<compile_context>
chip_gen: v5e
topology: v5e:2x2
jax: 0.10.0
libtpu: 0.0.40
codegen_flags: <defaults>
</compile_context>

<pallas_src>
import math

import jax
import jax.numpy as jnp
from jax.experimental import pallas as pl
from jax.experimental.pallas import tpu as pltpu


def make_seq2seq_decoder_kernel(embed_scale: float, T: int):
    """Builds the Pallas kernel with embed_scale and T baked in as constants."""

    def kernel(tf_ref,      # (T,)            int32 SMEM  teacher-forcing flag per step
               temb_ref,    # (T, Bblk, E)    f32   VMEM  pre-embedded (scaled) teacher tokens
               embg_ref,    # (E, E)          bf16  VMEM  greedy lookup table (rows 0..E-1)
               wah_ref,     # (H, H)          bf16  attn.attn weight^T, hidden block
               wae_ref,     # (2Eenc, H)      bf16  attn.attn weight^T, encoder block
               ba_ref,      # (1, H)          f32   attn.attn bias
               val_ref,     # (H, 1)          bf16  attn.val weight^T
               wih_e_ref,   # (E, 3H)         bf16  GRU weight_ih^T, embedded rows
               wih_w_ref,   # (2Eenc, 3H)     bf16  GRU weight_ih^T, weighted rows
               whh_ref,     # (H, 3H)         bf16  GRU weight_hh^T
               bih_ref,     # (1, 3H)         f32
               bhh_ref,     # (1, 3H)         f32
               wfc_h_ref,   # (H, E)          bf16  fc_out^T, "output" rows
               wfc_w_ref,   # (2Eenc, E)      bf16  fc_out^T, "weighted" rows
               wfc_e_ref,   # (E, E)          bf16  fc_out^T, "embedded" rows
               bfc_ref,     # (1, E)          f32
               enc_ref,     # (Bblk, S, 2Eenc) bf16  encoder outputs (batch block)
               h0_ref,      # (Bblk, H)       f32   initial decoder hidden (batch block)
               out_ref,     # (Bblk, T*E)     f32   lane-dense per-step predictions
               nxt_ref):    # (Bblk, E)       f32   VMEM scratch: next-step embedding
        _, B, E = temb_ref.shape
        H = wah_ref.shape[0]
        S = enc_ref.shape[1]
        E2 = enc_ref.shape[2]

        enc_bf = enc_ref[...]                                    # (B, S, E2) bf16
        wah = wah_ref[...]
        val = val_ref[...]                                       # (H, 1) bf16
        wih_e = wih_e_ref[...]
        wih_w = wih_w_ref[...]
        whh = whh_ref[...]
        bih = bih_ref[...]
        bhh = bhh_ref[...]
        wfc_h = wfc_h_ref[...]
        wfc_w = wfc_w_ref[...]
        wfc_e = wfc_e_ref[...]
        bfc = bfc_ref[...]

        # Step-invariant encoder projection, with the attention bias folded in
        # once (hoisted out of the unrolled time loop).
        enc_energy = (jnp.dot(enc_bf.reshape(B * S, E2), wae_ref[...],
                              preferred_element_type=jnp.float32)
                      .reshape(B, S, H) + ba_ref[...])           # (B, S, H) f32

        pred_iota = jax.lax.broadcasted_iota(jnp.int32, (B, E), 1)

        h = h0_ref[...]                                          # (B, H) f32
        h_bf = h.astype(jnp.bfloat16)                            # cast once per step
        embedded = temb_ref[0]                                   # (B, E) f32

        # T is a small static constant -> fully unroll the serial time loop.
        # TODO(synk): at realistic (H, S, d_model) switch to lax.fori_loop with
        # (h, embedded) carried via VMEM scratch to bound code size / vreg live ranges.
        preds = []
        for idx in range(T):
            emb_bf = embedded.astype(jnp.bfloat16)

            # ---- additive (Bahdanau) attention; reductions on the MXU -------
            hproj = jnp.dot(h_bf, wah, preferred_element_type=jnp.float32)   # (B, H)
            energy = jnp.tanh(enc_energy + hproj[:, None, :])                # (B, S, H)
            logits = jnp.sum(
                jnp.dot(energy.reshape(B * S, H).astype(jnp.bfloat16), val,
                        preferred_element_type=jnp.float32).reshape(B, S, 1),
                axis=-1)                                                     # (B, S)
            m = jnp.max(logits, axis=-1, keepdims=True)
            e = jnp.exp(logits - m)
            attn = e * pl.reciprocal(jnp.sum(e, axis=-1, keepdims=True),
                                     approx=True)                            # (B, S)
            weighted = jnp.sum(
                jnp.einsum('bqs,bse->bqe', attn[:, None, :].astype(jnp.bfloat16),
                           enc_bf, preferred_element_type=jnp.float32),
                axis=1)                                                      # (B, E2)
            w_bf = weighted.astype(jnp.bfloat16)

            # ---- single-step GRU cell, split weights (no concatenates) ------
            gx = (jnp.dot(emb_bf, wih_e, preferred_element_type=jnp.float32)
                  + jnp.dot(w_bf, wih_w, preferred_element_type=jnp.float32)
                  + bih)                                                     # (B, 3H)
            gh = jnp.dot(h_bf, whh, preferred_element_type=jnp.float32) + bhh
            r = jax.nn.sigmoid(gx[:, 0:H] + gh[:, 0:H])
            z = jax.nn.sigmoid(gx[:, H:2 * H] + gh[:, H:2 * H])
            n = jnp.tanh(gx[:, 2 * H:3 * H] + r * gh[:, 2 * H:3 * H])
            h = (1.0 - z) * n + z * h                                        # (B, H)
            h_bf = h.astype(jnp.bfloat16)

            # ---- fc_out(cat(output, weighted, embedded)) as 3 partial matmuls
            pred = (jnp.dot(h_bf, wfc_h, preferred_element_type=jnp.float32)
                    + jnp.dot(w_bf, wfc_w, preferred_element_type=jnp.float32)
                    + jnp.dot(emb_bf, wfc_e, preferred_element_type=jnp.float32)
                    + bfc)                                                   # (B, E)
            preds.append(pred)

            # ---- next-step input: teacher forcing vs greedy argmax ----------
            if idx + 1 < T:
                tf = tf_ref[idx]                                             # scalar (SMEM)

                @pl.when(tf != 0)
                def _():
                    nxt_ref[...] = temb_ref[idx + 1]                         # teacher embedding

                @pl.when(tf == 0)
                def _():
                    # greedy argmax over the d_model-wide prediction (as in the
                    # reference: output.argmax(1)); index range is [0, E), so only
                    # the first E rows of the embedding table are ever needed.
                    pmax = jnp.max(pred, axis=1, keepdims=True)
                    top1 = jnp.min(jnp.where(pred == pmax, pred_iota, E),
                                   axis=1, keepdims=True)                    # (B, 1) int32
                    onehot = jnp.where(pred_iota == top1, 1.0,
                                       0.0).astype(jnp.bfloat16)             # (B, E)
                    nxt_ref[...] = jnp.dot(
                        onehot, embg_ref[...],
                        preferred_element_type=jnp.float32) * embed_scale

                embedded = nxt_ref[...]

        # Single lane-dense store of all T predictions.
        out_ref[...] = jnp.concatenate(preds, axis=1)                        # (B, T*E)

    return kernel


def seq2seq_decoder_forward(input_ids, attention_mask, enc_hidden, enc_outputs,
                            params, tf_flags, embed_scale, block_b=8):
    """Wrapper: parameter/layout glue around a batch-tiled pallas_call."""
    if attention_mask is not None:
        input_ids = input_ids * attention_mask       # matches `input_ids *= attention_mask`
    input_ids = input_ids.astype(jnp.int32)
    B, T = input_ids.shape
    V, E = params["embed"].shape
    H = params["wah"].shape[0]
    E2 = params["wae"].shape[0]
    S = enc_outputs.shape[1]

    # bf16 weights feed the MXU; accumulation & elementwise math stay f32.
    to_bf16 = lambda w: w.astype(jnp.bfloat16)
    emb_bf = to_bf16(params["embed"])

    # The greedy path argmaxes over d_model and reuses that index as a token id,
    # so it only ever reads rows [0, d_model) of the table -> the full vocab
    # embedding never has to live in VMEM.
    # TODO(synk): if d_model > vocab_size PyTorch's nn.Embedding would raise;
    # here out-of-table rows embed to zero (silent), as documented previously.
    if V >= E:
        emb_greedy = emb_bf[:E]
    else:
        emb_greedy = jnp.concatenate(
            [emb_bf, jnp.zeros((E - V, E), jnp.bfloat16)], axis=0)

    # Teacher tokens are known up front: pre-embed (and pre-scale) them outside
    # the kernel, using the same (bf16-rounded) table as the greedy path.
    temb = (jnp.take(emb_bf.astype(jnp.float32), input_ids, axis=0)
            * float(embed_scale))                    # (B, T, E)
    temb = jnp.transpose(temb, (1, 0, 2))            # (T, B, E)

    # Pad batch to a sublane-multiple block so the grid tiles it evenly.
    Bblk = block_b
    Bp = ((B + Bblk - 1) // Bblk) * Bblk
    pad = Bp - B
    if pad:
        temb = jnp.pad(temb, ((0, 0), (0, pad), (0, 0)))
        enc_outputs = jnp.pad(enc_outputs, ((0, pad), (0, 0), (0, 0)))
        enc_hidden = jnp.pad(enc_hidden, ((0, pad), (0, 0)))

    enc_bf16 = enc_outputs.astype(jnp.bfloat16)      # halve DMA of the largest input
    h0 = enc_hidden.astype(jnp.float32)

    wih = params["wih"]
    wfc = params["wfc"]
    weights = [
        emb_greedy,                         # (E, E)     bf16
        to_bf16(params["wah"]),             # (H, H)
        to_bf16(params["wae"]),             # (2Eenc, H)
        params["ba"],                       # (1, H)     f32
        to_bf16(params["val"]),             # (H, 1)
        to_bf16(wih[:E]),                   # GRU weight_ih^T, embedded rows
        to_bf16(wih[E:]),                   # GRU weight_ih^T, weighted rows
        to_bf16(params["whh"]),             # (H, 3H)
        params["bih"],                      # (1, 3H)    f32
        params["bhh"],                      # (1, 3H)    f32
        to_bf16(wfc[:H]),                   # fc_out^T, output rows
        to_bf16(wfc[H:H + E2]),             # fc_out^T, weighted rows
        to_bf16(wfc[H + E2:]),              # fc_out^T, embedded rows
        params["bfc"],                      # (1, E)     f32
    ]

    def wspec(a):                           # weight: full-array block, constant index
        zeros = (0,) * a.ndim
        return pl.BlockSpec(a.shape, lambda i, _z=zeros: _z)

    smem_spec = pl.BlockSpec(memory_space=pltpu.MemorySpace.SMEM)
    in_specs = ([smem_spec,
                 pl.BlockSpec((T, Bblk, E), lambda i: (0, i, 0))]
                + [wspec(w) for w in weights]
                + [pl.BlockSpec((Bblk, S, E2), lambda i: (i, 0, 0)),
                   pl.BlockSpec((Bblk, H), lambda i: (i, 0))])
    out_specs = pl.BlockSpec((Bblk, T * E), lambda i: (i, 0))

    # Explicit scoped-VMEM limit sized from the resident buffers (+ headroom).
    resident = sum(int(w.size) * w.dtype.itemsize for w in weights)
    per_block = (T * Bblk * E * 4          # temb block (f32)
                 + Bblk * S * E2 * 2       # enc block (bf16)
                 + Bblk * H * 4            # h0 block (f32)
                 + Bblk * T * E * 4        # out block (f32)
                 + Bblk * E * 4)           # next-embedding scratch
    vmem_limit = int(min(64 << 20, max(16 << 20, 4 * (resident + 2 * per_block))))

    kernel = make_seq2seq_decoder_kernel(float(embed_scale), T)

    out_flat = pl.pallas_call(
        kernel,
        out_shape=jax.ShapeDtypeStruct((Bp, T * E), jnp.float32),
        grid=(Bp // Bblk,),
        in_specs=in_specs,
        out_specs=out_specs,
        scratch_shapes=[pltpu.VMEM((Bblk, E), jnp.float32)],
        compiler_params=pltpu.CompilerParams(
            dimension_semantics=("parallel",),       # v7x: split batch over 2 TCs
            vmem_limit_bytes=vmem_limit),
    )(tf_flags.astype(jnp.int32), temb, *weights, enc_bf16, h0)

    return out_flat[:B].reshape(B, T, E)             # (B, T, d_model) like PyTorch


def init_params(key, vocab, d_model, enc_hid, dec_hid, pad_id):
    ks = jax.random.split(key, 11)

    def rnd(k, shape, s=0.1):
        return (s * jax.random.normal(k, shape)).astype(jnp.float32)

    embed = rnd(ks[0], (vocab, d_model), 0.5).at[pad_id].set(0.0)  # nn.Embedding w/ padding_idx
    return dict(
        embed=embed,
        # Attention: attn = Linear(2*enc_hid + dec_hid -> dec_hid), split & transposed;
        # cat order in the reference is (dec_hidden, encoder_outputs).
        wah=rnd(ks[1], (dec_hid, dec_hid)),
        wae=rnd(ks[2], (2 * enc_hid, dec_hid)),
        ba=rnd(ks[3], (1, dec_hid)),
        val=rnd(ks[4], (dec_hid, 1)),                              # Linear(dec_hid -> 1, no bias)
        # GRU(in = d_model + 2*enc_hid, hidden = dec_hid), gate order [r|z|n], transposed.
        wih=rnd(ks[5], (d_model + 2 * enc_hid, 3 * dec_hid)),
        whh=rnd(ks[6], (dec_hid, 3 * dec_hid)),
        bih=rnd(ks[7], (1, 3 * dec_hid)),
        bhh=rnd(ks[8], (1, 3 * dec_hid)),
        # fc_out: Linear(dec_hid + 2*enc_hid + d_model -> d_model), rows ordered
        # to match cat(output, weighted, embedded).
        wfc=rnd(ks[9], (dec_hid + 2 * enc_hid + d_model, d_model)),
        bfc=rnd(ks[10], (1, d_model)),
    )


if __name__ == "__main__":
    # Small, module-consistent shapes.
    B, T, S = 2, 8, 8                       # batch, target_len, src_len
    vocab, d_model = 64, 32                 # config.vocab_size, config.d_model
    enc_hid, dec_hid = 32, 32               # enc_hid_dim, dec_hid_dim
    pad_id = 1                              # config.pad_token_id
    embed_scale = math.sqrt(d_model)        # config.scale_embedding = True

    key = jax.random.PRNGKey(0)
    kp, ki, kh, ke, kt = jax.random.split(key, 5)

    params = init_params(kp, vocab, d_model, enc_hid, dec_hid, pad_id)
    input_ids = jax.random.randint(ki, (B, T), 0, vocab, dtype=jnp.int32)
    attention_mask = jnp.ones((B, T), dtype=jnp.int32)
    enc_hidden = jax.random.normal(kh, (B, dec_hid), dtype=jnp.float32)
    enc_outputs = jax.random.normal(ke, (B, S, 2 * enc_hid), dtype=jnp.float32)

    # TODO(synk): reference draws teacher_force with Python random.random() each step;
    # replaced by a deterministic Bernoulli(0.5) draw from PRNGKey(0).
    tf_flags = (jax.random.uniform(kt, (T,)) < 0.5).astype(jnp.int32)

    out = seq2seq_decoder_forward(input_ids, attention_mask, enc_hidden,
                                  enc_outputs, params, tf_flags, embed_scale)
    out = jax.block_until_ready(out)

    assert out.shape == (B, T, d_model), out.shape
    assert out.dtype == jnp.float32
    assert bool(jnp.isfinite(out).all())
    print("KERNEL_OK")
</pallas_src>

<mosaic_0001>
module attributes {stable_mosaic.version = 11 : i64} {
  func.func @kernel(%arg0: i32, %arg1: memref<8xi32, #tpu.memory_space<smem>>, %arg2: memref<8x8x32xf32, #tpu.memory_space<vmem>>, %arg3: memref<32x32xbf16, #tpu.memory_space<vmem>>, %arg4: memref<32x32xbf16, #tpu.memory_space<vmem>>, %arg5: memref<64x32xbf16, #tpu.memory_space<vmem>>, %arg6: memref<1x32xf32, #tpu.memory_space<vmem>>, %arg7: memref<32x1xbf16, #tpu.memory_space<vmem>>, %arg8: memref<32x96xbf16, #tpu.memory_space<vmem>>, %arg9: memref<64x96xbf16, #tpu.memory_space<vmem>>, %arg10: memref<32x96xbf16, #tpu.memory_space<vmem>>, %arg11: memref<1x96xf32, #tpu.memory_space<vmem>>, %arg12: memref<1x96xf32, #tpu.memory_space<vmem>>, %arg13: memref<32x32xbf16, #tpu.memory_space<vmem>>, %arg14: memref<64x32xbf16, #tpu.memory_space<vmem>>, %arg15: memref<32x32xbf16, #tpu.memory_space<vmem>>, %arg16: memref<1x32xf32, #tpu.memory_space<vmem>>, %arg17: memref<8x8x64xbf16, #tpu.memory_space<vmem>>, %arg18: memref<8x32xf32, #tpu.memory_space<vmem>>, %arg19: memref<8x256xf32, #tpu.memory_space<vmem>>, %arg20: memref<8x32xf32, #tpu.memory_space<vmem>>) attributes {dimension_semantics = [#tpu.dimension_semantics<parallel>], iteration_bounds = array<i64: 1>, scalar_prefetch = 0 : i64, scratch_operands = 1 : i64, tpu.core_type = #tpu.core_type<tc>, window_params = [{transform_indices = @transform_0, window_bounds = array<i64: 8>}, {transform_indices = @transform_1, window_bounds = array<i64: 8, 8, 32>}, {pipeline_mode = #tpu.pipeline_mode<synchronous>, transform_indices = @transform_2, window_bounds = array<i64: 32, 32>}, {pipeline_mode = #tpu.pipeline_mode<synchronous>, transform_indices = @transform_3, window_bounds = array<i64: 32, 32>}, {pipeline_mode = #tpu.pipeline_mode<synchronous>, transform_indices = @transform_4, window_bounds = array<i64: 64, 32>}, {pipeline_mode = #tpu.pipeline_mode<synchronous>, transform_indices = @transform_5, window_bounds = array<i64: 1, 32>}, {pipeline_mode = #tpu.pipeline_mode<synchronous>, transform_indices = @transform_6, window_bounds = array<i64: 32, 1>}, {pipeline_mode = #tpu.pipeline_mode<synchronous>, transform_indices = @transform_7, window_bounds = array<i64: 32, 96>}, {pipeline_mode = #tpu.pipeline_mode<synchronous>, transform_indices = @transform_8, window_bounds = array<i64: 64, 96>}, {pipeline_mode = #tpu.pipeline_mode<synchronous>, transform_indices = @transform_9, window_bounds = array<i64: 32, 96>}, {pipeline_mode = #tpu.pipeline_mode<synchronous>, transform_indices = @transform_10, window_bounds = array<i64: 1, 96>}, {pipeline_mode = #tpu.pipeline_mode<synchronous>, transform_indices = @transform_11, window_bounds = array<i64: 1, 96>}, {pipeline_mode = #tpu.pipeline_mode<synchronous>, transform_indices = @transform_12, window_bounds = array<i64: 32, 32>}, {pipeline_mode = #tpu.pipeline_mode<synchronous>, transform_indices = @transform_13, window_bounds = array<i64: 64, 32>}, {pipeline_mode = #tpu.pipeline_mode<synchronous>, transform_indices = @transform_14, window_bounds = array<i64: 32, 32>}, {pipeline_mode = #tpu.pipeline_mode<synchronous>, transform_indices = @transform_15, window_bounds = array<i64: 1, 32>}, {transform_indices = @transform_16, window_bounds = array<i64: 8, 8, 64>}, {transform_indices = @transform_17, window_bounds = array<i64: 8, 32>}, {transform_indices = @transform_18, window_bounds = array<i64: 8, 256>}]} {
    %c0 = arith.constant 0 : index
    %c0_0 = arith.constant 0 : index
    %c0_1 = arith.constant 0 : index
    %0 = vector.load %arg17[%c0, %c0_0, %c0_1] : memref<8x8x64xbf16, #tpu.memory_space<vmem>>, vector<8x8x64xbf16>
    %c0_2 = arith.constant 0 : index
    %c0_3 = arith.constant 0 : index
    %1 = vector.load %arg4[%c0_2, %c0_3] : memref<32x32xbf16, #tpu.memory_space<vmem>>, vector<32x32xbf16>
    %c0_4 = arith.constant 0 : index
    %c0_5 = arith.constant 0 : index
    %2 = vector.load %arg7[%c0_4, %c0_5] : memref<32x1xbf16, #tpu.memory_space<vmem>>, vector<32x1xbf16>
    %c0_6 = arith.constant 0 : index
    %c0_7 = arith.constant 0 : index
    %3 = vector.load %arg8[%c0_6, %c0_7] : memref<32x96xbf16, #tpu.memory_space<vmem>>, vector<32x96xbf16>
    %c0_8 = arith.constant 0 : index
    %c0_9 = arith.constant 0 : index
    %4 = vector.load %arg9[%c0_8, %c0_9] : memref<64x96xbf16, #tpu.memory_space<vmem>>, vector<64x96xbf16>
    %c0_10 = arith.constant 0 : index
    %c0_11 = arith.constant 0 : index
    %5 = vector.load %arg10[%c0_10, %c0_11] : memref<32x96xbf16, #tpu.memory_space<vmem>>, vector<32x96xbf16>
    %c0_12 = arith.constant 0 : index
    %c0_13 = arith.constant 0 : index
    %6 = vector.load %arg11[%c0_12, %c0_13] : memref<1x96xf32, #tpu.memory_space<vmem>>, vector<1x96xf32>
    %c0_14 = arith.constant 0 : index
    %c0_15 = arith.constant 0 : index
    %7 = vector.load %arg12[%c0_14, %c0_15] : memref<1x96xf32, #tpu.memory_space<vmem>>, vector<1x96xf32>
    %c0_16 = arith.constant 0 : index
    %c0_17 = arith.constant 0 : index
    %8 = vector.load %arg13[%c0_16, %c0_17] : memref<32x32xbf16, #tpu.memory_space<vmem>>, vector<32x32xbf16>
    %c0_18 = arith.constant 0 : index
    %c0_19 = arith.constant 0 : index
    %9 = vector.load %arg14[%c0_18, %c0_19] : memref<64x32xbf16, #tpu.memory_space<vmem>>, vector<64x32xbf16>
    %c0_20 = arith.constant 0 : index
    %c0_21 = arith.constant 0 : index
    %10 = vector.load %arg15[%c0_20, %c0_21] : memref<32x32xbf16, #tpu.memory_space<vmem>>, vector<32x32xbf16>
    %c0_22 = arith.constant 0 : index
    %c0_23 = arith.constant 0 : index
    %11 = vector.load %arg16[%c0_22, %c0_23] : memref<1x32xf32, #tpu.memory_space<vmem>>, vector<1x32xf32>
    %12 = vector.shape_cast %0 : vector<8x8x64xbf16> to vector<64x64xbf16>
    %c0_24 = arith.constant 0 : index
    %c0_25 = arith.constant 0 : index
    %13 = vector.load %arg5[%c0_24, %c0_25] : memref<64x32xbf16, #tpu.memory_space<vmem>>, vector<64x32xbf16>
    %cst = arith.constant dense<0.000000e+00> : vector<64x32xf32>
    %14 = tpu.matmul %12, %13, %cst {dimension_numbers = #tpu.dot_dimension_numbers<[1], [0], [0], [1], [0, 0, 1, 1], [], []>} : vector<64x64xbf16>, vector<64x32xbf16>, vector<64x32xf32> -> vector<64x32xf32>
    %15 = vector.shape_cast %14 : vector<64x32xf32> to vector<8x8x32xf32>
    %c0_26 = arith.constant 0 : index
    %c0_27 = arith.constant 0 : index
    %16 = vector.load %arg6[%c0_26, %c0_27] : memref<1x32xf32, #tpu.memory_space<vmem>>, vector<1x32xf32>
    %17 = vector.shape_cast %16 : vector<1x32xf32> to vector<1x1x32xf32>
    %18 = vector.broadcast %17 : vector<1x1x32xf32> to vector<8x8x32xf32>
    %19 = arith.addf %15, %18 : vector<8x8x32xf32>
    %20 = tpu.iota {dimensions = array<i32: 1>} : vector<8x32xi32>
    %c0_28 = arith.constant 0 : index
    %c0_29 = arith.constant 0 : index
    %21 = vector.load %arg18[%c0_28, %c0_29] : memref<8x32xf32, #tpu.memory_space<vmem>>, vector<8x32xf32>
    %22 = arith.truncf %21 : vector<8x32xf32> to vector<8x32xbf16>
    %c0_30 = arith.constant 0 : index
    %c0_31 = arith.constant 0 : index
    %c0_32 = arith.constant 0 : index
    %23 = vector.load %arg2[%c0_30, %c0_31, %c0_32] : memref<8x8x32xf32, #tpu.memory_space<vmem>>, vector<1x8x32xf32>
    %24 = vector.shape_cast %23 : vector<1x8x32xf32> to vector<8x32xf32>
    %25 = arith.truncf %24 : vector<8x32xf32> to vector<8x32xbf16>
    %cst_33 = arith.constant dense<0.000000e+00> : vector<8x32xf32>
    %26 = tpu.matmul %22, %1, %cst_33 {dimension_numbers = #tpu.dot_dimension_numbers<[1], [0], [0], [1], [0, 0, 1, 1], [], []>} : vector<8x32xbf16>, vector<32x32xbf16>, vector<8x32xf32> -> vector<8x32xf32>
    %27 = vector.shape_cast %26 : vector<8x32xf32> to vector<8x1x32xf32>
    %28 = vector.broadcast %27 : vector<8x1x32xf32> to vector<8x8x32xf32>
    %29 = arith.addf %19, %28 : vector<8x8x32xf32>
    %30 = math.tanh %29 : vector<8x8x32xf32>
    %31 = vector.shape_cast %30 : vector<8x8x32xf32> to vector<64x32xf32>
    %32 = arith.truncf %31 : vector<64x32xf32> to vector<64x32xbf16>
    %cst_34 = arith.constant dense<0.000000e+00> : vector<64x1xf32>
    %33 = tpu.matmul %32, %2, %cst_34 {dimension_numbers = #tpu.dot_dimension_numbers<[1], [0], [0], [1], [0, 0, 1, 1], [], []>} : vector<64x32xbf16>, vector<32x1xbf16>, vector<64x1xf32> -> vector<64x1xf32>
    %34 = vector.shape_cast %33 : vector<64x1xf32> to vector<8x8x1xf32>
    %cst_35 = arith.constant dense<0.000000e+00> : vector<8x8xf32>
    %35 = vector.multi_reduction <add>, %34, %cst_35 [2] : vector<8x8x1xf32> to vector<8x8xf32>
    %cst_36 = arith.constant dense<0xFF800000> : vector<8xf32>
    %36 = vector.multi_reduction <maximumf>, %35, %cst_36 [1] : vector<8x8xf32> to vector<8xf32>
    %37 = vector.shape_cast %36 : vector<8xf32> to vector<8x1xf32>
    %38 = vector.broadcast %37 : vector<8x1xf32> to vector<8x8xf32>
    %39 = arith.subf %35, %38 : vector<8x8xf32>
    %40 = math.exp %39 : vector<8x8xf32>
    %cst_37 = arith.constant dense<0.000000e+00> : vector<8xf32>
    %41 = vector.multi_reduction <add>, %40, %cst_37 [1] : vector<8x8xf32> to vector<8xf32>
    %42 = vector.shape_cast %41 : vector<8xf32> to vector<8x1xf32>
    %43 = tpu.reciprocal %42 {approx = true} : vector<8x1xf32> -> vector<8x1xf32>
    %44 = vector.broadcast %43 : vector<8x1xf32> to vector<8x8xf32>
    %45 = arith.mulf %40, %44 : vector<8x8xf32>
    %46 = vector.shape_cast %45 : vector<8x8xf32> to vector<8x1x8xf32>
    %47 = arith.truncf %46 : vector<8x1x8xf32> to vector<8x1x8xbf16>
    "tpu.trace_start"() <{level = 10 : i32, message = "bqs,bse->bqe"}> : () -> ()
    %cst_38 = arith.constant dense<0.000000e+00> : vector<8x1x64xf32>
    %48 = tpu.matmul %47, %0, %cst_38 {dimension_numbers = #tpu.dot_dimension_numbers<[2], [1], [1], [2], [0, 0, 0, 1, 1, 2], [0], [0]>} : vector<8x1x8xbf16>, vector<8x8x64xbf16>, vector<8x1x64xf32> -> vector<8x1x64xf32>
    "tpu.trace_stop"() : () -> ()
    %cst_39 = arith.constant dense<0.000000e+00> : vector<8x64xf32>
    %49 = vector.multi_reduction <add>, %48, %cst_39 [1] : vector<8x1x64xf32> to vector<8x64xf32>
    %50 = arith.truncf %49 : vector<8x64xf32> to vector<8x64xbf16>
    %cst_40 = arith.constant dense<0.000000e+00> : vector<8x96xf32>
    %51 = tpu.matmul %25, %3, %cst_40 {dimension_numbers = #tpu.dot_dimension_numbers<[1], [0], [0], [1], [0, 0, 1, 1], [], []>} : vector<8x32xbf16>, vector<32x96xbf16>, vector<8x96xf32> -> vector<8x96xf32>
    %cst_41 = arith.constant dense<0.000000e+00> : vector<8x96xf32>
    %52 = tpu.matmul %50, %4, %cst_41 {dimension_numbers = #tpu.dot_dimension_numbers<[1], [0], [0], [1], [0, 0, 1, 1], [], []>} : vector<8x64xbf16>, vector<64x96xbf16>, vector<8x96xf32> -> vector<8x96xf32>
    %53 = arith.addf %51, %52 : vector<8x96xf32>
    %54 = vector.broadcast %6 : vector<1x96xf32> to vector<8x96xf32>
    %55 = arith.addf %53, %54 : vector<8x96xf32>
    %cst_42 = arith.constant dense<0.000000e+00> : vector<8x96xf32>
    %56 = tpu.matmul %22, %5, %cst_42 {dimension_numbers = #tpu.dot_dimension_numbers<[1], [0], [0], [1], [0, 0, 1, 1], [], []>} : vector<8x32xbf16>, vector<32x96xbf16>, vector<8x96xf32> -> vector<8x96xf32>
    %57 = vector.broadcast %7 : vector<1x96xf32> to vector<8x96xf32>
    %58 = arith.addf %56, %57 : vector<8x96xf32>
    %59 = vector.extract_strided_slice %55 {offsets = [0, 0], sizes = [8, 32], strides = [1, 1]} : vector<8x96xf32> to vector<8x32xf32>
    %60 = vector.extract_strided_slice %58 {offsets = [0, 0], sizes = [8, 32], strides = [1, 1]} : vector<8x96xf32> to vector<8x32xf32>
    %61 = arith.addf %59, %60 : vector<8x32xf32>
    %62 = arith.negf %61 : vector<8x32xf32>
    %63 = math.exp %62 : vector<8x32xf32>
    %cst_43 = arith.constant 1.000000e+00 : f32
    %64 = vector.broadcast %cst_43 : f32 to vector<8x32xf32>
    %65 = arith.addf %64, %63 : vector<8x32xf32>
    %66 = arith.divf %64, %65 : vector<8x32xf32>
    %67 = vector.extract_strided_slice %55 {offsets = [0, 32], sizes = [8, 32], strides = [1, 1]} : vector<8x96xf32> to vector<8x32xf32>
    %68 = vector.extract_strided_slice %58 {offsets = [0, 32], sizes = [8, 32], strides = [1, 1]} : vector<8x96xf32> to vector<8x32xf32>
    %69 = arith.addf %67, %68 : vector<8x32xf32>
    %70 = arith.negf %69 : vector<8x32xf32>
    %71 = math.exp %70 : vector<8x32xf32>
    %cst_44 = arith.constant 1.000000e+00 : f32
    %72 = vector.broadcast %cst_44 : f32 to vector<8x32xf32>
    %73 = arith.addf %72, %71 : vector<8x32xf32>
    %74 = arith.divf %72, %73 : vector<8x32xf32>
    %75 = vector.extract_strided_slice %55 {offsets = [0, 64], sizes = [8, 32], strides = [1, 1]} : vector<8x96xf32> to vector<8x32xf32>
    %76 = vector.extract_strided_slice %58 {offsets = [0, 64], sizes = [8, 32], strides = [1, 1]} : vector<8x96xf32> to vector<8x32xf32>
    %77 = arith.mulf %66, %76 : vector<8x32xf32>
    %78 = arith.addf %75, %77 : vector<8x32xf32>
    %79 = math.tanh %78 : vector<8x32xf32>
    %cst_45 = arith.constant 1.000000e+00 : f32
    %80 = vector.broadcast %cst_45 : f32 to vector<8x32xf32>
    %81 = arith.subf %80, %74 : vector<8x32xf32>
    %82 = arith.mulf %81, %79 : vector<8x32xf32>
    %83 = arith.mulf %74, %21 : vector<8x32xf32>
    %84 = arith.addf %82, %83 : vector<8x32xf32>
    %85 = arith.truncf %84 : vector<8x32xf32> to vector<8x32xbf16>
    %cst_46 = arith.constant dense<0.000000e+00> : vector<8x32xf32>
    %86 = tpu.matmul %85, %8, %cst_46 {dimension_numbers = #tpu.dot_dimension_numbers<[1], [0], [0], [1], [0, 0, 1, 1], [], []>} : vector<8x32xbf16>, vector<32x32xbf16>, vector<8x32xf32> -> vector<8x32xf32>
    %cst_47 = arith.constant dense<0.000000e+00> : vector<8x32xf32>
    %87 = tpu.matmul %50, %9, %cst_47 {dimension_numbers = #tpu.dot_dimension_numbers<[1], [0], [0], [1], [0, 0, 1, 1], [], []>} : vector<8x64xbf16>, vector<64x32xbf16>, vector<8x32xf32> -> vector<8x32xf32>
    %88 = arith.addf %86, %87 : vector<8x32xf32>
    %cst_48 = arith.constant dense<0.000000e+00> : vector<8x32xf32>
    %89 = tpu.matmul %25, %10, %cst_48 {dimension_numbers = #tpu.dot_dimension_numbers<[1], [0], [0], [1], [0, 0, 1, 1], [], []>} : vector<8x32xbf16>, vector<32x32xbf16>, vector<8x32xf32> -> vector<8x32xf32>
    %90 = arith.addf %88, %89 : vector<8x32xf32>
    %91 = vector.broadcast %11 : vector<1x32xf32> to vector<8x32xf32>
    %92 = arith.addf %90, %91 : vector<8x32xf32>
    %c0_49 = arith.constant 0 : index
    %93 = memref.load %arg1[%c0_49] : memref<8xi32, #tpu.memory_space<smem>>
    %c0_i32 = arith.constant 0 : i32
    %94 = arith.cmpi ne, %93, %c0_i32 : i32
    %95 = arith.extui %94 : i1 to i32
    %c0_i32_50 = arith.constant 0 : i32
    %96 = arith.cmpi ne, %95, %c0_i32_50 : i32
    scf.if %96 {
      %c1_205 = arith.constant 1 : index
      %c0_206 = arith.constant 0 : index
      %c0_207 = arith.constant 0 : index
      %627 = vector.load %arg2[%c1_205, %c0_206, %c0_207] : memref<8x8x32xf32, #tpu.memory_space<vmem>>, vector<1x8x32xf32>
      %628 = vector.shape_cast %627 : vector<1x8x32xf32> to vector<8x32xf32>
      %c0_208 = arith.constant 0 : index
      %c0_209 = arith.constant 0 : index
      %629 = vector.load %arg20[%c0_208, %c0_209] : memref<8x32xf32, #tpu.memory_space<vmem>>, vector<8x32xf32>
      tpu.vector_store %arg20[%c0_208, %c0_209], %628 {strides = array<i32>} : memref<8x32xf32, #tpu.memory_space<vmem>>, vector<8x32xf32>,
    } else {
    }
    %c0_i32_51 = arith.constant 0 : i32
    %97 = arith.cmpi eq, %93, %c0_i32_51 : i32
    %98 = arith.extui %97 : i1 to i32
    %c0_i32_52 = arith.constant 0 : i32
    %99 = arith.cmpi ne, %98, %c0_i32_52 : i32
    scf.if %99 {
      %cst_205 = arith.constant dense<0xFF800000> : vector<8xf32>
      %627 = vector.multi_reduction <maximumf>, %92, %cst_205 [1] : vector<8x32xf32> to vector<8xf32>
      %628 = vector.shape_cast %627 : vector<8xf32> to vector<8x1xf32>
      %629 = vector.broadcast %628 : vector<8x1xf32> to vector<8x32xf32>
      %630 = arith.cmpf oeq, %92, %629 : vector<8x32xf32>
      %c32_i32 = arith.constant 32 : i32
      %631 = vector.broadcast %c32_i32 : i32 to vector<8x32xi32>
      %632 = arith.select %630, %20, %631 : vector<8x32xi1>, vector<8x32xi32>
      %cst_206 = arith.constant dense<2147483647> : vector<8xi32>
      %633 = vector.multi_reduction <minsi>, %632, %cst_206 [1] : vector<8x32xi32> to vector<8xi32>
      %634 = vector.shape_cast %633 : vector<8xi32> to vector<8x1xi32>
      %635 = vector.broadcast %634 : vector<8x1xi32> to vector<8x32xi32>
      %636 = arith.cmpi eq, %20, %635 : vector<8x32xi32>
      %cst_207 = arith.constant 1.000000e+00 : f32
      %cst_208 = arith.constant 0.000000e+00 : f32
      %637 = vector.broadcast %cst_207 : f32 to vector<8x32xf32>
      %638 = vector.broadcast %cst_208 : f32 to vector<8x32xf32>
      %639 = arith.select %636, %637, %638 : vector<8x32xi1>, vector<8x32xf32>
      %640 = arith.truncf %639 : vector<8x32xf32> to vector<8x32xbf16>
      %c0_209 = arith.constant 0 : index
      %c0_210 = arith.constant 0 : index
      %641 = vector.load %arg3[%c0_209, %c0_210] : memref<32x32xbf16, #tpu.memory_space<vmem>>, vector<32x32xbf16>
      %cst_211 = arith.constant dense<0.000000e+00> : vector<8x32xf32>
      %642 = tpu.matmul %640, %641, %cst_211 {dimension_numbers = #tpu.dot_dimension_numbers<[1], [0], [0], [1], [0, 0, 1, 1], [], []>} : vector<8x32xbf16>, vector<32x32xbf16>, vector<8x32xf32> -> vector<8x32xf32>
      %cst_212 = arith.constant 5.65685415 : f32
      %643 = vector.broadcast %cst_212 : f32 to vector<8x32xf32>
      %644 = arith.mulf %642, %643 : vector<8x32xf32>
      %c0_213 = arith.constant 0 : index
      %c0_214 = arith.constant 0 : index
      %645 = vector.load %arg20[%c0_213, %c0_214] : memref<8x32xf32, #tpu.memory_space<vmem>>, vector<8x32xf32>
      tpu.vector_store %arg20[%c0_213, %c0_214], %644 {strides = array<i32>} : memref<8x32xf32, #tpu.memory_space<vmem>>, vector<8x32xf32>,
    } else {
    }
    %c0_53 = arith.constant 0 : index
    %c0_54 = arith.constant 0 : index
    %100 = vector.load %arg20[%c0_53, %c0_54] : memref<8x32xf32, #tpu.memory_space<vmem>>, vector<8x32xf32>
    %101 = arith.truncf %100 : vector<8x32xf32> to vector<8x32xbf16>
    %cst_55 = arith.constant dense<0.000000e+00> : vector<8x32xf32>
    %102 = tpu.matmul %85, %1, %cst_55 {dimension_numbers = #tpu.dot_dimension_numbers<[1], [0], [0], [1], [0, 0, 1, 1], [], []>} : vector<8x32xbf16>, vector<32x32xbf16>, vector<8x32xf32> -> vector<8x32xf32>
    %103 = vector.shape_cast %102 : vector<8x32xf32> to vector<8x1x32xf32>
    %104 = vector.broadcast %103 : vector<8x1x32xf32> to vector<8x8x32xf32>
    %105 = arith.addf %19, %104 : vector<8x8x32xf32>
    %106 = math.tanh %105 : vector<8x8x32xf32>
    %107 = vector.shape_cast %106 : vector<8x8x32xf32> to vector<64x32xf32>
    %108 = arith.truncf %107 : vector<64x32xf32> to vector<64x32xbf16>
    %cst_56 = arith.constant dense<0.000000e+00> : vector<64x1xf32>
    %109 = tpu.matmul %108, %2, %cst_56 {dimension_numbers = #tpu.dot_dimension_numbers<[1], [0], [0], [1], [0, 0, 1, 1], [], []>} : vector<64x32xbf16>, vector<32x1xbf16>, vector<64x1xf32> -> vector<64x1xf32>
    %110 = vector.shape_cast %109 : vector<64x1xf32> to vector<8x8x1xf32>
    %cst_57 = arith.constant dense<0.000000e+00> : vector<8x8xf32>
    %111 = vector.multi_reduction <add>, %110, %cst_57 [2] : vector<8x8x1xf32> to vector<8x8xf32>
    %cst_58 = arith.constant dense<0xFF800000> : vector<8xf32>
    %112 = vector.multi_reduction <maximumf>, %111, %cst_58 [1] : vector<8x8xf32> to vector<8xf32>
    %113 = vector.shape_cast %112 : vector<8xf32> to vector<8x1xf32>
    %114 = vector.broadcast %113 : vector<8x1xf32> to vector<8x8xf32>
    %115 = arith.subf %111, %114 : vector<8x8xf32>
    %116 = math.exp %115 : vector<8x8xf32>
    %cst_59 = arith.constant dense<0.000000e+00> : vector<8xf32>
    %117 = vector.multi_reduction <add>, %116, %cst_59 [1] : vector<8x8xf32> to vector<8xf32>
    %118 = vector.shape_cast %117 : vector<8xf32> to vector<8x1xf32>
    %119 = tpu.reciprocal %118 {approx = true} : vector<8x1xf32> -> vector<8x1xf32>
    %120 = vector.broadcast %119 : vector<8x1xf32> to vector<8x8xf32>
    %121 = arith.mulf %116, %120 : vector<8x8xf32>
    %122 = vector.shape_cast %121 : vector<8x8xf32> to vector<8x1x8xf32>
    %123 = arith.truncf %122 : vector<8x1x8xf32> to vector<8x1x8xbf16>
    "tpu.trace_start"() <{level = 10 : i32, message = "bqs,bse->bqe"}> : () -> ()
    %cst_60 = arith.constant dense<0.000000e+00> : vector<8x1x64xf32>
    %124 = tpu.matmul %123, %0, %cst_60 {dimension_numbers = #tpu.dot_dimension_numbers<[2], [1], [1], [2], [0, 0, 0, 1, 1, 2], [0], [0]>} : vector<8x1x8xbf16>, vector<8x8x64xbf16>, vector<8x1x64xf32> -> vector<8x1x64xf32>
    "tpu.trace_stop"() : () -> ()
    %cst_61 = arith.constant dense<0.000000e+00> : vector<8x64xf32>
    %125 = vector.multi_reduction <add>, %124, %cst_61 [1] : vector<8x1x64xf32> to vector<8x64xf32>
    %126 = arith.truncf %125 : vector<8x64xf32> to vector<8x64xbf16>
    %cst_62 = arith.constant dense<0.000000e+00> : vector<8x96xf32>
    %127 = tpu.matmul %101, %3, %cst_62 {dimension_numbers = #tpu.dot_dimension_numbers<[1], [0], [0], [1], [0, 0, 1, 1], [], []>} : vector<8x32xbf16>, vector<32x96xbf16>, vector<8x96xf32> -> vector<8x96xf32>
    %cst_63 = arith.constant dense<0.000000e+00> : vector<8x96xf32>
    %128 = tpu.matmul %126, %4, %cst_63 {dimension_numbers = #tpu.dot_dimension_numbers<[1], [0], [0], [1], [0, 0, 1, 1], [], []>} : vector<8x64xbf16>, vector<64x96xbf16>, vector<8x96xf32> -> vector<8x96xf32>
    %129 = arith.addf %127, %128 : vector<8x96xf32>
    %130 = vector.broadcast %6 : vector<1x96xf32> to vector<8x96xf32>
    %131 = arith.addf %129, %130 : vector<8x96xf32>
    %cst_64 = arith.constant dense<0.000000e+00> : vector<8x96xf32>
    %132 = tpu.matmul %85, %5, %cst_64 {dimension_numbers = #tpu.dot_dimension_numbers<[1], [0], [0], [1], [0, 0, 1, 1], [], []>} : vector<8x32xbf16>, vector<32x96xbf16>, vector<8x96xf32> -> vector<8x96xf32>
    %133 = vector.broadcast %7 : vector<1x96xf32> to vector<8x96xf32>
    %134 = arith.addf %132, %133 : vector<8x96xf32>
    %135 = vector.extract_strided_slice %131 {offsets = [0, 0], sizes = [8, 32], strides = [1, 1]} : vector<8x96xf32> to vector<8x32xf32>
    %136 = vector.extract_strided_slice %134 {offsets = [0, 0], sizes = [8, 32], strides = [1, 1]} : vector<8x96xf32> to vector<8x32xf32>
    %137 = arith.addf %135, %136 : vector<8x32xf32>
    %138 = arith.negf %137 : vector<8x32xf32>
    %139 = math.exp %138 : vector<8x32xf32>
    %cst_65 = arith.constant 1.000000e+00 : f32
    %140 = vector.broadcast %cst_65 : f32 to vector<8x32xf32>
    %141 = arith.addf %140, %139 : vector<8x32xf32>
    %142 = arith.divf %140, %141 : vector<8x32xf32>
    %143 = vector.extract_strided_slice %131 {offsets = [0, 32], sizes = [8, 32], strides = [1, 1]} : vector<8x96xf32> to vector<8x32xf32>
    %144 = vector.extract_strided_slice %134 {offsets = [0, 32], sizes = [8, 32], strides = [1, 1]} : vector<8x96xf32> to vector<8x32xf32>
    %145 = arith.addf %143, %144 : vector<8x32xf32>
    %146 = arith.negf %145 : vector<8x32xf32>
    %147 = math.exp %146 : vector<8x32xf32>
    %cst_66 = arith.constant 1.000000e+00 : f32
    %148 = vector.broadcast %cst_66 : f32 to vector<8x32xf32>
    %149 = arith.addf %148, %147 : vector<8x32xf32>
    %150 = arith.divf %148, %149 : vector<8x32xf32>
    %151 = vector.extract_strided_slice %131 {offsets = [0, 64], sizes = [8, 32], strides = [1, 1]} : vector<8x96xf32> to vector<8x32xf32>
    %152 = vector.extract_strided_slice %134 {offsets = [0, 64], sizes = [8, 32], strides = [1, 1]} : vector<8x96xf32> to vector<8x32xf32>
    %153 = arith.mulf %142, %152 : vector<8x32xf32>
    %154 = arith.addf %151, %153 : vector<8x32xf32>
    %155 = math.tanh %154 : vector<8x32xf32>
    %cst_67 = arith.constant 1.000000e+00 : f32
    %156 = vector.broadcast %cst_67 : f32 to vector<8x32xf32>
    %157 = arith.subf %156, %150 : vector<8x32xf32>
    %158 = arith.mulf %157, %155 : vector<8x32xf32>
    %159 = arith.mulf %150, %84 : vector<8x32xf32>
    %160 = arith.addf %158, %159 : vector<8x32xf32>
    %161 = arith.truncf %160 : vector<8x32xf32> to vector<8x32xbf16>
    %cst_68 = arith.constant dense<0.000000e+00> : vector<8x32xf32>
    %162 = tpu.matmul %161, %8, %cst_68 {dimension_numbers = #tpu.dot_dimension_numbers<[1], [0], [0], [1], [0, 0, 1, 1], [], []>} : vector<8x32xbf16>, vector<32x32xbf16>, vector<8x32xf32> -> vector<8x32xf32>
    %cst_69 = arith.constant dense<0.000000e+00> : vector<8x32xf32>
    %163 = tpu.matmul %126, %9, %cst_69 {dimension_numbers = #tpu.dot_dimension_numbers<[1], [0], [0], [1], [0, 0, 1, 1], [], []>} : vector<8x64xbf16>, vector<64x32xbf16>, vector<8x32xf32> -> vector<8x32xf32>
    %164 = arith.addf %162, %163 : vector<8x32xf32>
    %cst_70 = arith.constant dense<0.000000e+00> : vector<8x32xf32>
    %165 = tpu.matmul %101, %10, %cst_70 {dimension_numbers = #tpu.dot_dimension_numbers<[1], [0], [0], [1], [0, 0, 1, 1], [], []>} : vector<8x32xbf16>, vector<32x32xbf16>, vector<8x32xf32> -> vector<8x32xf32>
    %166 = arith.addf %164, %165 : vector<8x32xf32>
    %167 = vector.broadcast %11 : vector<1x32xf32> to vector<8x32xf32>
    %168 = arith.addf %166, %167 : vector<8x32xf32>
    %c1 = arith.constant 1 : index
    %169 = memref.load %arg1[%c1] : memref<8xi32, #tpu.memory_space<smem>>
    %c0_i32_71 = arith.constant 0 : i32
    %170 = arith.cmpi ne, %169, %c0_i32_71 : i32
    %171 = arith.extui %170 : i1 to i32
    %c0_i32_72 = arith.constant 0 : i32
    %172 = arith.cmpi ne, %171, %c0_i32_72 : i32
    scf.if %172 {
      %c2_205 = arith.constant 2 : index
      %c0_206 = arith.constant 0 : index
      %c0_207 = arith.constant 0 : index
      %627 = vector.load %arg2[%c2_205, %c0_206, %c0_207] : memref<8x8x32xf32, #tpu.memory_space<vmem>>, vector<1x8x32xf32>
      %628 = vector.shape_cast %627 : vector<1x8x32xf32> to vector<8x32xf32>
      %c0_208 = arith.constant 0 : index
      %c0_209 = arith.constant 0 : index
      %629 = vector.load %arg20[%c0_208, %c0_209] : memref<8x32xf32, #tpu.memory_space<vmem>>, vector<8x32xf32>
      tpu.vector_store %arg20[%c0_208, %c0_209], %628 {strides = array<i32>} : memref<8x32xf32, #tpu.memory_space<vmem>>, vector<8x32xf32>,
    } else {
    }
    %c0_i32_73 = arith.constant 0 : i32
    %173 = arith.cmpi eq, %169, %c0_i32_73 : i32
    %174 = arith.extui %173 : i1 to i32
    %c0_i32_74 = arith.constant 0 : i32
    %175 = arith.cmpi ne, %174, %c0_i32_74 : i32
    scf.if %175 {
      %cst_205 = arith.constant dense<0xFF800000> : vector<8xf32>
      %627 = vector.multi_reduction <maximumf>, %168, %cst_205 [1] : vector<8x32xf32> to vector<8xf32>
      %628 = vector.shape_cast %627 : vector<8xf32> to vector<8x1xf32>
      %629 = vector.broadcast %628 : vector<8x1xf32> to vector<8x32xf32>
      %630 = arith.cmpf oeq, %168, %629 : vector<8x32xf32>
      %c32_i32 = arith.constant 32 : i32
      %631 = vector.broadcast %c32_i32 : i32 to vector<8x32xi32>
      %632 = arith.select %630, %20, %631 : vector<8x32xi1>, vector<8x32xi32>
      %cst_206 = arith.constant dense<2147483647> : vector<8xi32>
      %633 = vector.multi_reduction <minsi>, %632, %cst_206 [1] : vector<8x32xi32> to vector<8xi32>
      %634 = vector.shape_cast %633 : vector<8xi32> to vector<8x1xi32>
      %635 = vector.broadcast %634 : vector<8x1xi32> to vector<8x32xi32>
      %636 = arith.cmpi eq, %20, %635 : vector<8x32xi32>
      %cst_207 = arith.constant 1.000000e+00 : f32
      %cst_208 = arith.constant 0.000000e+00 : f32
      %637 = vector.broadcast %cst_207 : f32 to vector<8x32xf32>
      %638 = vector.broadcast %cst_208 : f32 to vector<8x32xf32>
      %639 = arith.select %636, %637, %638 : vector<8x32xi1>, vector<8x32xf32>
      %640 = arith.truncf %639 : vector<8x32xf32> to vector<8x32xbf16>
      %c0_209 = arith.constant 0 : index
      %c0_210 = arith.constant 0 : index
      %641 = vector.load %arg3[%c0_209, %c0_210] : memref<32x32xbf16, #tpu.memory_space<vmem>>, vector<32x32xbf16>
      %cst_211 = arith.constant dense<0.000000e+00> : vector<8x32xf32>
      %642 = tpu.matmul %640, %641, %cst_211 {dimension_numbers = #tpu.dot_dimension_numbers<[1], [0], [0], [1], [0, 0, 1, 1], [], []>} : vector<8x32xbf16>, vector<32x32xbf16>, vector<8x32xf32> -> vector<8x32xf32>
      %cst_212 = arith.constant 5.65685415 : f32
      %643 = vector.broadcast %cst_212 : f32 to vector<8x32xf32>
      %644 = arith.mulf %642, %643 : vector<8x32xf32>
      %c0_213 = arith.constant 0 : index
      %c0_214 = arith.constant 0 : index
      %645 = vector.load %arg20[%c0_213, %c0_214] : memref<8x32xf32, #tpu.memory_space<vmem>>, vector<8x32xf32>
      tpu.vector_store %arg20[%c0_213, %c0_214], %644 {strides = array<i32>} : memref<8x32xf32, #tpu.memory_space<vmem>>, vector<8x32xf32>,
    } else {
    }
    %c0_75 = arith.constant 0 : index
    %c0_76 = arith.constant 0 : index
    %176 = vector.load %arg20[%c0_75, %c0_76] : memref<8x32xf32, #tpu.memory_space<vmem>>, vector<8x32xf32>
    %177 = arith.truncf %176 : vector<8x32xf32> to vector<8x32xbf16>
    %cst_77 = arith.constant dense<0.000000e+00> : vector<8x32xf32>
    %178 = tpu.matmul %161, %1, %cst_77 {dimension_numbers = #tpu.dot_dimension_numbers<[1], [0], [0], [1], [0, 0, 1, 1], [], []>} : vector<8x32xbf16>, vector<32x32xbf16>, vector<8x32xf32> -> vector<8x32xf32>
    %179 = vector.shape_cast %178 : vector<8x32xf32> to vector<8x1x32xf32>
    %180 = vector.broadcast %179 : vector<8x1x32xf32> to vector<8x8x32xf32>
    %181 = arith.addf %19, %180 : vector<8x8x32xf32>
    %182 = math.tanh %181 : vector<8x8x32xf32>
    %183 = vector.shape_cast %182 : vector<8x8x32xf32> to vector<64x32xf32>
    %184 = arith.truncf %183 : vector<64x32xf32> to vector<64x32xbf16>
    %cst_78 = arith.constant dense<0.000000e+00> : vector<64x1xf32>
    %185 = tpu.matmul %184, %2, %cst_78 {dimension_numbers = #tpu.dot_dimension_numbers<[1], [0], [0], [1], [0, 0, 1, 1], [], []>} : vector<64x32xbf16>, vector<32x1xbf16>, vector<64x1xf32> -> vector<64x1xf32>
    %186 = vector.shape_cast %185 : vector<64x1xf32> to vector<8x8x1xf32>
    %cst_79 = arith.constant dense<0.000000e+00> : vector<8x8xf32>
    %187 = vector.multi_reduction <add>, %186, %cst_79 [2] : vector<8x8x1xf32> to vector<8x8xf32>
    %cst_80 = arith.constant dense<0xFF800000> : vector<8xf32>
    %188 = vector.multi_reduction <maximumf>, %187, %cst_80 [1] : vector<8x8xf32> to vector<8xf32>
    %189 = vector.shape_cast %188 : vector<8xf32> to vector<8x1xf32>
    %190 = vector.broadcast %189 : vector<8x1xf32> to vector<8x8xf32>
    %191 = arith.subf %187, %190 : vector<8x8xf32>
    %192 = math.exp %191 : vector<8x8xf32>
    %cst_81 = arith.constant dense<0.000000e+00> : vector<8xf32>
    %193 = vector.multi_reduction <add>, %192, %cst_81 [1] : vector<8x8xf32> to vector<8xf32>
    %194 = vector.shape_cast %193 : vector<8xf32> to vector<8x1xf32>
    %195 = tpu.reciprocal %194 {approx = true} : vector<8x1xf32> -> vector<8x1xf32>
    %196 = vector.broadcast %195 : vector<8x1xf32> to vector<8x8xf32>
    %197 = arith.mulf %192, %196 : vector<8x8xf32>
    %198 = vector.shape_cast %197 : vector<8x8xf32> to vector<8x1x8xf32>
    %199 = arith.truncf %198 : vector<8x1x8xf32> to vector<8x1x8xbf16>
    "tpu.trace_start"() <{level = 10 : i32, message = "bqs,bse->bqe"}> : () -> ()
    %cst_82 = arith.constant dense<0.000000e+00> : vector<8x1x64xf32>
    %200 = tpu.matmul %199, %0, %cst_82 {dimension_numbers = #tpu.dot_dimension_numbers<[2], [1], [1], [2], [0, 0, 0, 1, 1, 2], [0], [0]>} : vector<8x1x8xbf16>, vector<8x8x64xbf16>, vector<8x1x64xf32> -> vector<8x1x64xf32>
    "tpu.trace_stop"() : () -> ()
    %cst_83 = arith.constant dense<0.000000e+00> : vector<8x64xf32>
    %201 = vector.multi_reduction <add>, %200, %cst_83 [1] : vector<8x1x64xf32> to vector<8x64xf32>
    %202 = arith.truncf %201 : vector<8x64xf32> to vector<8x64xbf16>
    %cst_84 = arith.constant dense<0.000000e+00> : vector<8x96xf32>
    %203 = tpu.matmul %177, %3, %cst_84 {dimension_numbers = #tpu.dot_dimension_numbers<[1], [0], [0], [1], [0, 0, 1, 1], [], []>} : vector<8x32xbf16>, vector<32x96xbf16>, vector<8x96xf32> -> vector<8x96xf32>
    %cst_85 = arith.constant dense<0.000000e+00> : vector<8x96xf32>
    %204 = tpu.matmul %202, %4, %cst_85 {dimension_numbers = #tpu.dot_dimension_numbers<[1], [0], [0], [1], [0, 0, 1, 1], [], []>} : vector<8x64xbf16>, vector<64x96xbf16>, vector<8x96xf32> -> vector<8x96xf32>
    %205 = arith.addf %203, %204 : vector<8x96xf32>
    %206 = vector.broadcast %6 : vector<1x96xf32> to vector<8x96xf32>
    %207 = arith.addf %205, %206 : vector<8x96xf32>
    %cst_86 = arith.constant dense<0.000000e+00> : vector<8x96xf32>
    %208 = tpu.matmul %161, %5, %cst_86 {dimension_numbers = #tpu.dot_dimension_numbers<[1], [0], [0], [1], [0, 0, 1, 1], [], []>} : vector<8x32xbf16>, vector<32x96xbf16>, vector<8x96xf32> -> vector<8x96xf32>
    %209 = vector.broadcast %7 : vector<1x96xf32> to vector<8x96xf32>
    %210 = arith.addf %208, %209 : vector<8x96xf32>
    %211 = vector.extract_strided_slice %207 {offsets = [0, 0], sizes = [8, 32], strides = [1, 1]} : vector<8x96xf32> to vector<8x32xf32>
    %212 = vector.extract_strided_slice %210 {offsets = [0, 0], sizes = [8, 32], strides = [1, 1]} : vector<8x96xf32> to vector<8x32xf32>
    %213 = arith.addf %211, %212 : vector<8x32xf32>
    %214 = arith.negf %213 : vector<8x32xf32>
    %215 = math.exp %214 : vector<8x32xf32>
    %cst_87 = arith.constant 1.000000e+00 : f32
    %216 = vector.broadcast %cst_87 : f32 to vector<8x32xf32>
    %217 = arith.addf %216, %215 : vector<8x32xf32>
    %218 = arith.divf %216, %217 : vector<8x32xf32>
    %219 = vector.extract_strided_slice %207 {offsets = [0, 32], sizes = [8, 32], strides = [1, 1]} : vector<8x96xf32> to vector<8x32xf32>
    %220 = vector.extract_strided_slice %210 {offsets = [0, 32], sizes = [8, 32], strides = [1, 1]} : vector<8x96xf32> to vector<8x32xf32>
    %221 = arith.addf %219, %220 : vector<8x32xf32>
    %222 = arith.negf %221 : vector<8x32xf32>
    %223 = math.exp %222 : vector<8x32xf32>
    %cst_88 = arith.constant 1.000000e+00 : f32
    %224 = vector.broadcast %cst_88 : f32 to vector<8x32xf32>
    %225 = arith.addf %224, %223 : vector<8x32xf32>
    %226 = arith.divf %224, %225 : vector<8x32xf32>
    %227 = vector.extract_strided_slice %207 {offsets = [0, 64], sizes = [8, 32], strides = [1, 1]} : vector<8x96xf32> to vector<8x32xf32>
    %228 = vector.extract_strided_slice %210 {offsets = [0, 64], sizes = [8, 32], strides = [1, 1]} : vector<8x96xf32> to vector<8x32xf32>
    %229 = arith.mulf %218, %228 : vector<8x32xf32>
    %230 = arith.addf %227, %229 : vector<8x32xf32>
    %231 = math.tanh %230 : vector<8x32xf32>
    %cst_89 = arith.constant 1.000000e+00 : f32
    %232 = vector.broadcast %cst_89 : f32 to vector<8x32xf32>
    %233 = arith.subf %232, %226 : vector<8x32xf32>
    %234 = arith.mulf %233, %231 : vector<8x32xf32>
    %235 = arith.mulf %226, %160 : vector<8x32xf32>
    %236 = arith.addf %234, %235 : vector<8x32xf32>
    %237 = arith.truncf %236 : vector<8x32xf32> to vector<8x32xbf16>
    %cst_90 = arith.constant dense<0.000000e+00> : vector<8x32xf32>
    %238 = tpu.matmul %237, %8, %cst_90 {dimension_numbers = #tpu.dot_dimension_numbers<[1], [0], [0], [1], [0, 0, 1, 1], [], []>} : vector<8x32xbf16>, vector<32x32xbf16>, vector<8x32xf32> -> vector<8x32xf32>
    %cst_91 = arith.constant dense<0.000000e+00> : vector<8x32xf32>
    %239 = tpu.matmul %202, %9, %cst_91 {dimension_numbers = #tpu.dot_dimension_numbers<[1], [0], [0], [1], [0, 0, 1, 1], [], []>} : vector<8x64xbf16>, vector<64x32xbf16>, vector<8x32xf32> -> vector<8x32xf32>
    %240 = arith.addf %238, %239 : vector<8x32xf32>
    %cst_92 = arith.constant dense<0.000000e+00> : vector<8x32xf32>
    %241 = tpu.matmul %177, %10, %cst_92 {dimension_numbers = #tpu.dot_dimension_numbers<[1], [0], [0], [1], [0, 0, 1, 1], [], []>} : vector<8x32xbf16>, vector<32x32xbf16>, vector<8x32xf32> -> vector<8x32xf32>
    %242 = arith.addf %240, %241 : vector<8x32xf32>
    %243 = vector.broadcast %11 : vector<1x32xf32> to vector<8x32xf32>
    %244 = arith.addf %242, %243 : vector<8x32xf32>
    %c2 = arith.constant 2 : index
    %245 = memref.load %arg1[%c2] : memref<8xi32, #tpu.memory_space<smem>>
    %c0_i32_93 = arith.constant 0 : i32
    %246 = arith.cmpi ne, %245, %c0_i32_93 : i32
    %247 = arith.extui %246 : i1 to i32
    %c0_i32_94 = arith.constant 0 : i32
    %248 = arith.cmpi ne, %247, %c0_i32_94 : i32
    scf.if %248 {
      %c3_205 = arith.constant 3 : index
      %c0_206 = arith.constant 0 : index
      %c0_207 = arith.constant 0 : index
      %627 = vector.load %arg2[%c3_205, %c0_206, %c0_207] : memref<8x8x32xf32, #tpu.memory_space<vmem>>, vector<1x8x32xf32>
      %628 = vector.shape_cast %627 : vector<1x8x32xf32> to vector<8x32xf32>
      %c0_208 = arith.constant 0 : index
      %c0_209 = arith.constant 0 : index
      %629 = vector.load %arg20[%c0_208, %c0_209] : memref<8x32xf32, #tpu.memory_space<vmem>>, vector<8x32xf32>
      tpu.vector_store %arg20[%c0_208, %c0_209], %628 {strides = array<i32>} : memref<8x32xf32, #tpu.memory_space<vmem>>, vector<8x32xf32>,
    } else {
    }
    %c0_i32_95 = arith.constant 0 : i32
    %249 = arith.cmpi eq, %245, %c0_i32_95 : i32
    %250 = arith.extui %249 : i1 to i32
    %c0_i32_96 = arith.constant 0 : i32
    %251 = arith.cmpi ne, %250, %c0_i32_96 : i32
    scf.if %251 {
      %cst_205 = arith.constant dense<0xFF800000> : vector<8xf32>
      %627 = vector.multi_reduction <maximumf>, %244, %cst_205 [1] : vector<8x32xf32> to vector<8xf32>
      %628 = vector.shape_cast %627 : vector<8xf32> to vector<8x1xf32>
      %629 = vector.broadcast %628 : vector<8x1xf32> to vector<8x32xf32>
      %630 = arith.cmpf oeq, %244, %629 : vector<8x32xf32>
      %c32_i32 = arith.constant 32 : i32
      %631 = vector.broadcast %c32_i32 : i32 to vector<8x32xi32>
      %632 = arith.select %630, %20, %631 : vector<8x32xi1>, vector<8x32xi32>
      %cst_206 = arith.constant dense<2147483647> : vector<8xi32>
      %633 = vector.multi_reduction <minsi>, %632, %cst_206 [1] : vector<8x32xi32> to vector<8xi32>
      %634 = vector.shape_cast %633 : vector<8xi32> to vector<8x1xi32>
      %635 = vector.broadcast %634 : vector<8x1xi32> to vector<8x32xi32>
      %636 = arith.cmpi eq, %20, %635 : vector<8x32xi32>
      %cst_207 = arith.constant 1.000000e+00 : f32
      %cst_208 = arith.constant 0.000000e+00 : f32
      %637 = vector.broadcast %cst_207 : f32 to vector<8x32xf32>
      %638 = vector.broadcast %cst_208 : f32 to vector<8x32xf32>
      %639 = arith.select %636, %637, %638 : vector<8x32xi1>, vector<8x32xf32>
      %640 = arith.truncf %639 : vector<8x32xf32> to vector<8x32xbf16>
      %c0_209 = arith.constant 0 : index
      %c0_210 = arith.constant 0 : index
      %641 = vector.load %arg3[%c0_209, %c0_210] : memref<32x32xbf16, #tpu.memory_space<vmem>>, vector<32x32xbf16>
      %cst_211 = arith.constant dense<0.000000e+00> : vector<8x32xf32>
      %642 = tpu.matmul %640, %641, %cst_211 {dimension_numbers = #tpu.dot_dimension_numbers<[1], [0], [0], [1], [0, 0, 1, 1], [], []>} : vector<8x32xbf16>, vector<32x32xbf16>, vector<8x32xf32> -> vector<8x32xf32>
      %cst_212 = arith.constant 5.65685415 : f32
      %643 = vector.broadcast %cst_212 : f32 to vector<8x32xf32>
      %644 = arith.mulf %642, %643 : vector<8x32xf32>
      %c0_213 = arith.constant 0 : index
      %c0_214 = arith.constant 0 : index
      %645 = vector.load %arg20[%c0_213, %c0_214] : memref<8x32xf32, #tpu.memory_space<vmem>>, vector<8x32xf32>
      tpu.vector_store %arg20[%c0_213, %c0_214], %644 {strides = array<i32>} : memref<8x32xf32, #tpu.memory_space<vmem>>, vector<8x32xf32>,
    } else {
    }
    %c0_97 = arith.constant 0 : index
    %c0_98 = arith.constant 0 : index
    %252 = vector.load %arg20[%c0_97, %c0_98] : memref<8x32xf32, #tpu.memory_space<vmem>>, vector<8x32xf32>
    %253 = arith.truncf %252 : vector<8x32xf32> to vector<8x32xbf16>
    %cst_99 = arith.constant dense<0.000000e+00> : vector<8x32xf32>
    %254 = tpu.matmul %237, %1, %cst_99 {dimension_numbers = #tpu.dot_dimension_numbers<[1], [0], [0], [1], [0, 0, 1, 1], [], []>} : vector<8x32xbf16>, vector<32x32xbf16>, vector<8x32xf32> -> vector<8x32xf32>
    %255 = vector.shape_cast %254 : vector<8x32xf32> to vector<8x1x32xf32>
    %256 = vector.broadcast %255 : vector<8x1x32xf32> to vector<8x8x32xf32>
    %257 = arith.addf %19, %256 : vector<8x8x32xf32>
    %258 = math.tanh %257 : vector<8x8x32xf32>
    %259 = vector.shape_cast %258 : vector<8x8x32xf32> to vector<64x32xf32>
    %260 = arith.truncf %259 : vector<64x32xf32> to vector<64x32xbf16>
    %cst_100 = arith.constant dense<0.000000e+00> : vector<64x1xf32>
    %261 = tpu.matmul %260, %2, %cst_100 {dimension_numbers = #tpu.dot_dimension_numbers<[1], [0], [0], [1], [0, 0, 1, 1], [], []>} : vector<64x32xbf16>, vector<32x1xbf16>, vector<64x1xf32> -> vector<64x1xf32>
    %262 = vector.shape_cast %261 : vector<64x1xf32> to vector<8x8x1xf32>
    %cst_101 = arith.constant dense<0.000000e+00> : vector<8x8xf32>
    %263 = vector.multi_reduction <add>, %262, %cst_101 [2] : vector<8x8x1xf32> to vector<8x8xf32>
    %cst_102 = arith.constant dense<0xFF800000> : vector<8xf32>
    %264 = vector.multi_reduction <maximumf>, %263, %cst_102 [1] : vector<8x8xf32> to vector<8xf32>
    %265 = vector.shape_cast %264 : vector<8xf32> to vector<8x1xf32>
    %266 = vector.broadcast %265 : vector<8x1xf32> to vector<8x8xf32>
    %267 = arith.subf %263, %266 : vector<8x8xf32>
    %268 = math.exp %267 : vector<8x8xf32>
    %cst_103 = arith.constant dense<0.000000e+00> : vector<8xf32>
    %269 = vector.multi_reduction <add>, %268, %cst_103 [1] : vector<8x8xf32> to vector<8xf32>
    %270 = vector.shape_cast %269 : vector<8xf32> to vector<8x1xf32>
    %271 = tpu.reciprocal %270 {approx = true} : vector<8x1xf32> -> vector<8x1xf32>
    %272 = vector.broadcast %271 : vector<8x1xf32> to vector<8x8xf32>
    %273 = arith.mulf %268, %272 : vector<8x8xf32>
    %274 = vector.shape_cast %273 : vector<8x8xf32> to vector<8x1x8xf32>
    %275 = arith.truncf %274 : vector<8x1x8xf32> to vector<8x1x8xbf16>
    "tpu.trace_start"() <{level = 10 : i32, message = "bqs,bse->bqe"}> : () -> ()
    %cst_104 = arith.constant dense<0.000000e+00> : vector<8x1x64xf32>
    %276 = tpu.matmul %275, %0, %cst_104 {dimension_numbers = #tpu.dot_dimension_numbers<[2], [1], [1], [2], [0, 0, 0, 1, 1, 2], [0], [0]>} : vector<8x1x8xbf16>, vector<8x8x64xbf16>, vector<8x1x64xf32> -> vector<8x1x64xf32>
    "tpu.trace_stop"() : () -> ()
    %cst_105 = arith.constant dense<0.000000e+00> : vector<8x64xf32>
    %277 = vector.multi_reduction <add>, %276, %cst_105 [1] : vector<8x1x64xf32> to vector<8x64xf32>
    %278 = arith.truncf %277 : vector<8x64xf32> to vector<8x64xbf16>
    %cst_106 = arith.constant dense<0.000000e+00> : vector<8x96xf32>
    %279 = tpu.matmul %253, %3, %cst_106 {dimension_numbers = #tpu.dot_dimension_numbers<[1], [0], [0], [1], [0, 0, 1, 1], [], []>} : vector<8x32xbf16>, vector<32x96xbf16>, vector<8x96xf32> -> vector<8x96xf32>
    %cst_107 = arith.constant dense<0.000000e+00> : vector<8x96xf32>
    %280 = tpu.matmul %278, %4, %cst_107 {dimension_numbers = #tpu.dot_dimension_numbers<[1], [0], [0], [1], [0, 0, 1, 1], [], []>} : vector<8x64xbf16>, vector<64x96xbf16>, vector<8x96xf32> -> vector<8x96xf32>
    %281 = arith.addf %279, %280 : vector<8x96xf32>
    %282 = vector.broadcast %6 : vector<1x96xf32> to vector<8x96xf32>
    %283 = arith.addf %281, %282 : vector<8x96xf32>
    %cst_108 = arith.constant dense<0.000000e+00> : vector<8x96xf32>
    %284 = tpu.matmul %237, %5, %cst_108 {dimension_numbers = #tpu.dot_dimension_numbers<[1], [0], [0], [1], [0, 0, 1, 1], [], []>} : vector<8x32xbf16>, vector<32x96xbf16>, vector<8x96xf32> -> vector<8x96xf32>
    %285 = vector.broadcast %7 : vector<1x96xf32> to vector<8x96xf32>
    %286 = arith.addf %284, %285 : vector<8x96xf32>
    %287 = vector.extract_strided_slice %283 {offsets = [0, 0], sizes = [8, 32], strides = [1, 1]} : vector<8x96xf32> to vector<8x32xf32>
    %288 = vector.extract_strided_slice %286 {offsets = [0, 0], sizes = [8, 32], strides = [1, 1]} : vector<8x96xf32> to vector<8x32xf32>
    %289 = arith.addf %287, %288 : vector<8x32xf32>
    %290 = arith.negf %289 : vector<8x32xf32>
    %291 = math.exp %290 : vector<8x32xf32>
    %cst_109 = arith.constant 1.000000e+00 : f32
    %292 = vector.broadcast %cst_109 : f32 to vector<8x32xf32>
    %293 = arith.addf %292, %291 : vector<8x32xf32>
    %294 = arith.divf %292, %293 : vector<8x32xf32>
    %295 = vector.extract_strided_slice %283 {offsets = [0, 32], sizes = [8, 32], strides = [1, 1]} : vector<8x96xf32> to vector<8x32xf32>
    %296 = vector.extract_strided_slice %286 {offsets = [0, 32], sizes = [8, 32], strides = [1, 1]} : vector<8x96xf32> to vector<8x32xf32>
    %297 = arith.addf %295, %296 : vector<8x32xf32>
    %298 = arith.negf %297 : vector<8x32xf32>
    %299 = math.exp %298 : vector<8x32xf32>
    %cst_110 = arith.constant 1.000000e+00 : f32
    %300 = vector.broadcast %cst_110 : f32 to vector<8x32xf32>
    %301 = arith.addf %300, %299 : vector<8x32xf32>
    %302 = arith.divf %300, %301 : vector<8x32xf32>
    %303 = vector.extract_strided_slice %283 {offsets = [0, 64], sizes = [8, 32], strides = [1, 1]} : vector<8x96xf32> to vector<8x32xf32>
    %304 = vector.extract_strided_slice %286 {offsets = [0, 64], sizes = [8, 32], strides = [1, 1]} : vector<8x96xf32> to vector<8x32xf32>
    %305 = arith.mulf %294, %304 : vector<8x32xf32>
    %306 = arith.addf %303, %305 : vector<8x32xf32>
    %307 = math.tanh %306 : vector<8x32xf32>
    %cst_111 = arith.constant 1.000000e+00 : f32
    %308 = vector.broadcast %cst_111 : f32 to vector<8x32xf32>
    %309 = arith.subf %308, %302 : vector<8x32xf32>
    %310 = arith.mulf %309, %307 : vector<8x32xf32>
    %311 = arith.mulf %302, %236 : vector<8x32xf32>
    %312 = arith.addf %310, %311 : vector<8x32xf32>
    %313 = arith.truncf %312 : vector<8x32xf32> to vector<8x32xbf16>
    %cst_112 = arith.constant dense<0.000000e+00> : vector<8x32xf32>
    %314 = tpu.matmul %313, %8, %cst_112 {dimension_numbers = #tpu.dot_dimension_numbers<[1], [0], [0], [1], [0, 0, 1, 1], [], []>} : vector<8x32xbf16>, vector<32x32xbf16>, vector<8x32xf32> -> vector<8x32xf32>
    %cst_113 = arith.constant dense<0.000000e+00> : vector<8x32xf32>
    %315 = tpu.matmul %278, %9, %cst_113 {dimension_numbers = #tpu.dot_dimension_numbers<[1], [0], [0], [1], [0, 0, 1, 1], [], []>} : vector<8x64xbf16>, vector<64x32xbf16>, vector<8x32xf32> -> vector<8x32xf32>
    %316 = arith.addf %314, %315 : vector<8x32xf32>
    %cst_114 = arith.constant dense<0.000000e+00> : vector<8x32xf32>
    %317 = tpu.matmul %253, %10, %cst_114 {dimension_numbers = #tpu.dot_dimension_numbers<[1], [0], [0], [1], [0, 0, 1, 1], [], []>} : vector<8x32xbf16>, vector<32x32xbf16>, vector<8x32xf32> -> vector<8x32xf32>
    %318 = arith.addf %316, %317 : vector<8x32xf32>
    %319 = vector.broadcast %11 : vector<1x32xf32> to vector<8x32xf32>
    %320 = arith.addf %318, %319 : vector<8x32xf32>
    %c3 = arith.constant 3 : index
    %321 = memref.load %arg1[%c3] : memref<8xi32, #tpu.memory_space<smem>>
    %c0_i32_115 = arith.constant 0 : i32
    %322 = arith.cmpi ne, %321, %c0_i32_115 : i32
    %323 = arith.extui %322 : i1 to i32
    %c0_i32_116 = arith.constant 0 : i32
    %324 = arith.cmpi ne, %323, %c0_i32_116 : i32
    scf.if %324 {
      %c4_205 = arith.constant 4 : index
      %c0_206 = arith.constant 0 : index
      %c0_207 = arith.constant 0 : index
      %627 = vector.load %arg2[%c4_205, %c0_206, %c0_207] : memref<8x8x32xf32, #tpu.memory_space<vmem>>, vector<1x8x32xf32>
      %628 = vector.shape_cast %627 : vector<1x8x32xf32> to vector<8x32xf32>
      %c0_208 = arith.constant 0 : index
      %c0_209 = arith.constant 0 : index
      %629 = vector.load %arg20[%c0_208, %c0_209] : memref<8x32xf32, #tpu.memory_space<vmem>>, vector<8x32xf32>
      tpu.vector_store %arg20[%c0_208, %c0_209], %628 {strides = array<i32>} : memref<8x32xf32, #tpu.memory_space<vmem>>, vector<8x32xf32>,
    } else {
    }
    %c0_i32_117 = arith.constant 0 : i32
    %325 = arith.cmpi eq, %321, %c0_i32_117 : i32
    %326 = arith.extui %325 : i1 to i32
    %c0_i32_118 = arith.constant 0 : i32
    %327 = arith.cmpi ne, %326, %c0_i32_118 : i32
    scf.if %327 {
      %cst_205 = arith.constant dense<0xFF800000> : vector<8xf32>
      %627 = vector.multi_reduction <maximumf>, %320, %cst_205 [1] : vector<8x32xf32> to vector<8xf32>
      %628 = vector.shape_cast %627 : vector<8xf32> to vector<8x1xf32>
      %629 = vector.broadcast %628 : vector<8x1xf32> to vector<8x32xf32>
      %630 = arith.cmpf oeq, %320, %629 : vector<8x32xf32>
      %c32_i32 = arith.constant 32 : i32
      %631 = vector.broadcast %c32_i32 : i32 to vector<8x32xi32>
      %632 = arith.select %630, %20, %631 : vector<8x32xi1>, vector<8x32xi32>
      %cst_206 = arith.constant dense<2147483647> : vector<8xi32>
      %633 = vector.multi_reduction <minsi>, %632, %cst_206 [1] : vector<8x32xi32> to vector<8xi32>
      %634 = vector.shape_cast %633 : vector<8xi32> to vector<8x1xi32>
      %635 = vector.broadcast %634 : vector<8x1xi32> to vector<8x32xi32>
      %636 = arith.cmpi eq, %20, %635 : vector<8x32xi32>
      %cst_207 = arith.constant 1.000000e+00 : f32
      %cst_208 = arith.constant 0.000000e+00 : f32
      %637 = vector.broadcast %cst_207 : f32 to vector<8x32xf32>
      %638 = vector.broadcast %cst_208 : f32 to vector<8x32xf32>
      %639 = arith.select %636, %637, %638 : vector<8x32xi1>, vector<8x32xf32>
      %640 = arith.truncf %639 : vector<8x32xf32> to vector<8x32xbf16>
      %c0_209 = arith.constant 0 : index
      %c0_210 = arith.constant 0 : index
      %641 = vector.load %arg3[%c0_209, %c0_210] : memref<32x32xbf16, #tpu.memory_space<vmem>>, vector<32x32xbf16>
      %cst_211 = arith.constant dense<0.000000e+00> : vector<8x32xf32>
      %642 = tpu.matmul %640, %641, %cst_211 {dimension_numbers = #tpu.dot_dimension_numbers<[1], [0], [0], [1], [0, 0, 1, 1], [], []>} : vector<8x32xbf16>, vector<32x32xbf16>, vector<8x32xf32> -> vector<8x32xf32>
      %cst_212 = arith.constant 5.65685415 : f32
      %643 = vector.broadcast %cst_212 : f32 to vector<8x32xf32>
      %644 = arith.mulf %642, %643 : vector<8x32xf32>
      %c0_213 = arith.constant 0 : index
      %c0_214 = arith.constant 0 : index
      %645 = vector.load %arg20[%c0_213, %c0_214] : memref<8x32xf32, #tpu.memory_space<vmem>>, vector<8x32xf32>
      tpu.vector_store %arg20[%c0_213, %c0_214], %644 {strides = array<i32>} : memref<8x32xf32, #tpu.memory_space<vmem>>, vector<8x32xf32>,
    } else {
    }
    %c0_119 = arith.constant 0 : index
    %c0_120 = arith.constant 0 : index
    %328 = vector.load %arg20[%c0_119, %c0_120] : memref<8x32xf32, #tpu.memory_space<vmem>>, vector<8x32xf32>
    %329 = arith.truncf %328 : vector<8x32xf32> to vector<8x32xbf16>
    %cst_121 = arith.constant dense<0.000000e+00> : vector<8x32xf32>
    %330 = tpu.matmul %313, %1, %cst_121 {dimension_numbers = #tpu.dot_dimension_numbers<[1], [0], [0], [1], [0, 0, 1, 1], [], []>} : vector<8x32xbf16>, vector<32x32xbf16>, vector<8x32xf32> -> vector<8x32xf32>
    %331 = vector.shape_cast %330 : vector<8x32xf32> to vector<8x1x32xf32>
    %332 = vector.broadcast %331 : vector<8x1x32xf32> to vector<8x8x32xf32>
    %333 = arith.addf %19, %332 : vector<8x8x32xf32>
    %334 = math.tanh %333 : vector<8x8x32xf32>
    %335 = vector.shape_cast %334 : vector<8x8x32xf32> to vector<64x32xf32>
    %336 = arith.truncf %335 : vector<64x32xf32> to vector<64x32xbf16>
    %cst_122 = arith.constant dense<0.000000e+00> : vector<64x1xf32>
    %337 = tpu.matmul %336, %2, %cst_122 {dimension_numbers = #tpu.dot_dimension_numbers<[1], [0], [0], [1], [0, 0, 1, 1], [], []>} : vector<64x32xbf16>, vector<32x1xbf16>, vector<64x1xf32> -> vector<64x1xf32>
    %338 = vector.shape_cast %337 : vector<64x1xf32> to vector<8x8x1xf32>
    %cst_123 = arith.constant dense<0.000000e+00> : vector<8x8xf32>
    %339 = vector.multi_reduction <add>, %338, %cst_123 [2] : vector<8x8x1xf32> to vector<8x8xf32>
    %cst_124 = arith.constant dense<0xFF800000> : vector<8xf32>
    %340 = vector.multi_reduction <maximumf>, %339, %cst_124 [1] : vector<8x8xf32> to vector<8xf32>
    %341 = vector.shape_cast %340 : vector<8xf32> to vector<8x1xf32>
    %342 = vector.broadcast %341 : vector<8x1xf32> to vector<8x8xf32>
    %343 = arith.subf %339, %342 : vector<8x8xf32>
    %344 = math.exp %343 : vector<8x8xf32>
    %cst_125 = arith.constant dense<0.000000e+00> : vector<8xf32>
    %345 = vector.multi_reduction <add>, %344, %cst_125 [1] : vector<8x8xf32> to vector<8xf32>
    %346 = vector.shape_cast %345 : vector<8xf32> to vector<8x1xf32>
    %347 = tpu.reciprocal %346 {approx = true} : vector<8x1xf32> -> vector<8x1xf32>
    %348 = vector.broadcast %347 : vector<8x1xf32> to vector<8x8xf32>
    %349 = arith.mulf %344, %348 : vector<8x8xf32>
    %350 = vector.shape_cast %349 : vector<8x8xf32> to vector<8x1x8xf32>
    %351 = arith.truncf %350 : vector<8x1x8xf32> to vector<8x1x8xbf16>
    "tpu.trace_start"() <{level = 10 : i32, message = "bqs,bse->bqe"}> : () -> ()
    %cst_126 = arith.constant dense<0.000000e+00> : vector<8x1x64xf32>
    %352 = tpu.matmul %351, %0, %cst_126 {dimension_numbers = #tpu.dot_dimension_numbers<[2], [1], [1], [2], [0, 0, 0, 1, 1, 2], [0], [0]>} : vector<8x1x8xbf16>, vector<8x8x64xbf16>, vector<8x1x64xf32> -> vector<8x1x64xf32>
    "tpu.trace_stop"() : () -> ()
    %cst_127 = arith.constant dense<0.000000e+00> : vector<8x64xf32>
    %353 = vector.multi_reduction <add>, %352, %cst_127 [1] : vector<8x1x64xf32> to vector<8x64xf32>
    %354 = arith.truncf %353 : vector<8x64xf32> to vector<8x64xbf16>
    %cst_128 = arith.constant dense<0.000000e+00> : vector<8x96xf32>
    %355 = tpu.matmul %329, %3, %cst_128 {dimension_numbers = #tpu.dot_dimension_numbers<[1], [0], [0], [1], [0, 0, 1, 1], [], []>} : vector<8x32xbf16>, vector<32x96xbf16>, vector<8x96xf32> -> vector<8x96xf32>
    %cst_129 = arith.constant dense<0.000000e+00> : vector<8x96xf32>
    %356 = tpu.matmul %354, %4, %cst_129 {dimension_numbers = #tpu.dot_dimension_numbers<[1], [0], [0], [1], [0, 0, 1, 1], [], []>} : vector<8x64xbf16>, vector<64x96xbf16>, vector<8x96xf32> -> vector<8x96xf32>
    %357 = arith.addf %355, %356 : vector<8x96xf32>
    %358 = vector.broadcast %6 : vector<1x96xf32> to vector<8x96xf32>
    %359 = arith.addf %357, %358 : vector<8x96xf32>
    %cst_130 = arith.constant dense<0.000000e+00> : vector<8x96xf32>
    %360 = tpu.matmul %313, %5, %cst_130 {dimension_numbers = #tpu.dot_dimension_numbers<[1], [0], [0], [1], [0, 0, 1, 1], [], []>} : vector<8x32xbf16>, vector<32x96xbf16>, vector<8x96xf32> -> vector<8x96xf32>
    %361 = vector.broadcast %7 : vector<1x96xf32> to vector<8x96xf32>
    %362 = arith.addf %360, %361 : vector<8x96xf32>
    %363 = vector.extract_strided_slice %359 {offsets = [0, 0], sizes = [8, 32], strides = [1, 1]} : vector<8x96xf32> to vector<8x32xf32>
    %364 = vector.extract_strided_slice %362 {offsets = [0, 0], sizes = [8, 32], strides = [1, 1]} : vector<8x96xf32> to vector<8x32xf32>
    %365 = arith.addf %363, %364 : vector<8x32xf32>
    %366 = arith.negf %365 : vector<8x32xf32>
    %367 = math.exp %366 : vector<8x32xf32>
    %cst_131 = arith.constant 1.000000e+00 : f32
    %368 = vector.broadcast %cst_131 : f32 to vector<8x32xf32>
    %369 = arith.addf %368, %367 : vector<8x32xf32>
    %370 = arith.divf %368, %369 : vector<8x32xf32>
    %371 = vector.extract_strided_slice %359 {offsets = [0, 32], sizes = [8, 32], strides = [1, 1]} : vector<8x96xf32> to vector<8x32xf32>
    %372 = vector.extract_strided_slice %362 {offsets = [0, 32], sizes = [8, 32], strides = [1, 1]} : vector<8x96xf32> to vector<8x32xf32>
    %373 = arith.addf %371, %372 : vector<8x32xf32>
    %374 = arith.negf %373 : vector<8x32xf32>
    %375 = math.exp %374 : vector<8x32xf32>
    %cst_132 = arith.constant 1.000000e+00 : f32
    %376 = vector.broadcast %cst_132 : f32 to vector<8x32xf32>
    %377 = arith.addf %376, %375 : vector<8x32xf32>
    %378 = arith.divf %376, %377 : vector<8x32xf32>
    %379 = vector.extract_strided_slice %359 {offsets = [0, 64], sizes = [8, 32], strides = [1, 1]} : vector<8x96xf32> to vector<8x32xf32>
    %380 = vector.extract_strided_slice %362 {offsets = [0, 64], sizes = [8, 32], strides = [1, 1]} : vector<8x96xf32> to vector<8x32xf32>
    %381 = arith.mulf %370, %380 : vector<8x32xf32>
    %382 = arith.addf %379, %381 : vector<8x32xf32>
    %383 = math.tanh %382 : vector<8x32xf32>
    %cst_133 = arith.constant 1.000000e+00 : f32
    %384 = vector.broadcast %cst_133 : f32 to vector<8x32xf32>
    %385 = arith.subf %384, %378 : vector<8x32xf32>
    %386 = arith.mulf %385, %383 : vector<8x32xf32>
    %387 = arith.mulf %378, %312 : vector<8x32xf32>
    %388 = arith.addf %386, %387 : vector<8x32xf32>
    %389 = arith.truncf %388 : vector<8x32xf32> to vector<8x32xbf16>
    %cst_134 = arith.constant dense<0.000000e+00> : vector<8x32xf32>
    %390 = tpu.matmul %389, %8, %cst_134 {dimension_numbers = #tpu.dot_dimension_numbers<[1], [0], [0], [1], [0, 0, 1, 1], [], []>} : vector<8x32xbf16>, vector<32x32xbf16>, vector<8x32xf32> -> vector<8x32xf32>
    %cst_135 = arith.constant dense<0.000000e+00> : vector<8x32xf32>
    %391 = tpu.matmul %354, %9, %cst_135 {dimension_numbers = #tpu.dot_dimension_numbers<[1], [0], [0], [1], [0, 0, 1, 1], [], []>} : vector<8x64xbf16>, vector<64x32xbf16>, vector<8x32xf32> -> vector<8x32xf32>
    %392 = arith.addf %390, %391 : vector<8x32xf32>
    %cst_136 = arith.constant dense<0.000000e+00> : vector<8x32xf32>
    %393 = tpu.matmul %329, %10, %cst_136 {dimension_numbers = #tpu.dot_dimension_numbers<[1], [0], [0], [1], [0, 0, 1, 1], [], []>} : vector<8x32xbf16>, vector<32x32xbf16>, vector<8x32xf32> -> vector<8x32xf32>
    %394 = arith.addf %392, %393 : vector<8x32xf32>
    %395 = vector.broadcast %11 : vector<1x32xf32> to vector<8x32xf32>
    %396 = arith.addf %394, %395 : vector<8x32xf32>
    %c4 = arith.constant 4 : index
    %397 = memref.load %arg1[%c4] : memref<8xi32, #tpu.memory_space<smem>>
    %c0_i32_137 = arith.constant 0 : i32
    %398 = arith.cmpi ne, %397, %c0_i32_137 : i32
    %399 = arith.extui %398 : i1 to i32
    %c0_i32_138 = arith.constant 0 : i32
    %400 = arith.cmpi ne, %399, %c0_i32_138 : i32
    scf.if %400 {
      %c5_205 = arith.constant 5 : index
      %c0_206 = arith.constant 0 : index
      %c0_207 = arith.constant 0 : index
      %627 = vector.load %arg2[%c5_205, %c0_206, %c0_207] : memref<8x8x32xf32, #tpu.memory_space<vmem>>, vector<1x8x32xf32>
      %628 = vector.shape_cast %627 : vector<1x8x32xf32> to vector<8x32xf32>
      %c0_208 = arith.constant 0 : index
      %c0_209 = arith.constant 0 : index
      %629 = vector.load %arg20[%c0_208, %c0_209] : memref<8x32xf32, #tpu.memory_space<vmem>>, vector<8x32xf32>
      tpu.vector_store %arg20[%c0_208, %c0_209], %628 {strides = array<i32>} : memref<8x32xf32, #tpu.memory_space<vmem>>, vector<8x32xf32>,
    } else {
    }
    %c0_i32_139 = arith.constant 0 : i32
    %401 = arith.cmpi eq, %397, %c0_i32_139 : i32
    %402 = arith.extui %401 : i1 to i32
    %c0_i32_140 = arith.constant 0 : i32
    %403 = arith.cmpi ne, %402, %c0_i32_140 : i32
    scf.if %403 {
      %cst_205 = arith.constant dense<0xFF800000> : vector<8xf32>
      %627 = vector.multi_reduction <maximumf>, %396, %cst_205 [1] : vector<8x32xf32> to vector<8xf32>
      %628 = vector.shape_cast %627 : vector<8xf32> to vector<8x1xf32>
      %629 = vector.broadcast %628 : vector<8x1xf32> to vector<8x32xf32>
      %630 = arith.cmpf oeq, %396, %629 : vector<8x32xf32>
      %c32_i32 = arith.constant 32 : i32
      %631 = vector.broadcast %c32_i32 : i32 to vector<8x32xi32>
      %632 = arith.select %630, %20, %631 : vector<8x32xi1>, vector<8x32xi32>
      %cst_206 = arith.constant dense<2147483647> : vector<8xi32>
      %633 = vector.multi_reduction <minsi>, %632, %cst_206 [1] : vector<8x32xi32> to vector<8xi32>
      %634 = vector.shape_cast %633 : vector<8xi32> to vector<8x1xi32>
      %635 = vector.broadcast %634 : vector<8x1xi32> to vector<8x32xi32>
      %636 = arith.cmpi eq, %20, %635 : vector<8x32xi32>
      %cst_207 = arith.constant 1.000000e+00 : f32
      %cst_208 = arith.constant 0.000000e+00 : f32
      %637 = vector.broadcast %cst_207 : f32 to vector<8x32xf32>
      %638 = vector.broadcast %cst_208 : f32 to vector<8x32xf32>
      %639 = arith.select %636, %637, %638 : vector<8x32xi1>, vector<8x32xf32>
      %640 = arith.truncf %639 : vector<8x32xf32> to vector<8x32xbf16>
      %c0_209 = arith.constant 0 : index
      %c0_210 = arith.constant 0 : index
      %641 = vector.load %arg3[%c0_209, %c0_210] : memref<32x32xbf16, #tpu.memory_space<vmem>>, vector<32x32xbf16>
      %cst_211 = arith.constant dense<0.000000e+00> : vector<8x32xf32>
      %642 = tpu.matmul %640, %641, %cst_211 {dimension_numbers = #tpu.dot_dimension_numbers<[1], [0], [0], [1], [0, 0, 1, 1], [], []>} : vector<8x32xbf16>, vector<32x32xbf16>, vector<8x32xf32> -> vector<8x32xf32>
      %cst_212 = arith.constant 5.65685415 : f32
      %643 = vector.broadcast %cst_212 : f32 to vector<8x32xf32>
      %644 = arith.mulf %642, %643 : vector<8x32xf32>
      %c0_213 = arith.constant 0 : index
      %c0_214 = arith.constant 0 : index
      %645 = vector.load %arg20[%c0_213, %c0_214] : memref<8x32xf32, #tpu.memory_space<vmem>>, vector<8x32xf32>
      tpu.vector_store %arg20[%c0_213, %c0_214], %644 {strides = array<i32>} : memref<8x32xf32, #tpu.memory_space<vmem>>, vector<8x32xf32>,
    } else {
    }
    %c0_141 = arith.constant 0 : index
    %c0_142 = arith.constant 0 : index
    %404 = vector.load %arg20[%c0_141, %c0_142] : memref<8x32xf32, #tpu.memory_space<vmem>>, vector<8x32xf32>
    %405 = arith.truncf %404 : vector<8x32xf32> to vector<8x32xbf16>
    %cst_143 = arith.constant dense<0.000000e+00> : vector<8x32xf32>
    %406 = tpu.matmul %389, %1, %cst_143 {dimension_numbers = #tpu.dot_dimension_numbers<[1], [0], [0], [1], [0, 0, 1, 1], [], []>} : vector<8x32xbf16>, vector<32x32xbf16>, vector<8x32xf32> -> vector<8x32xf32>
    %407 = vector.shape_cast %406 : vector<8x32xf32> to vector<8x1x32xf32>
    %408 = vector.broadcast %407 : vector<8x1x32xf32> to vector<8x8x32xf32>
    %409 = arith.addf %19, %408 : vector<8x8x32xf32>
    %410 = math.tanh %409 : vector<8x8x32xf32>
    %411 = vector.shape_cast %410 : vector<8x8x32xf32> to vector<64x32xf32>
    %412 = arith.truncf %411 : vector<64x32xf32> to vector<64x32xbf16>
    %cst_144 = arith.constant dense<0.000000e+00> : vector<64x1xf32>
    %413 = tpu.matmul %412, %2, %cst_144 {dimension_numbers = #tpu.dot_dimension_numbers<[1], [0], [0], [1], [0, 0, 1, 1], [], []>} : vector<64x32xbf16>, vector<32x1xbf16>, vector<64x1xf32> -> vector<64x1xf32>
    %414 = vector.shape_cast %413 : vector<64x1xf32> to vector<8x8x1xf32>
    %cst_145 = arith.constant dense<0.000000e+00> : vector<8x8xf32>
    %415 = vector.multi_reduction <add>, %414, %cst_145 [2] : vector<8x8x1xf32> to vector<8x8xf32>
    %cst_146 = arith.constant dense<0xFF800000> : vector<8xf32>
    %416 = vector.multi_reduction <maximumf>, %415, %cst_146 [1] : vector<8x8xf32> to vector<8xf32>
    %417 = vector.shape_cast %416 : vector<8xf32> to vector<8x1xf32>
    %418 = vector.broadcast %417 : vector<8x1xf32> to vector<8x8xf32>
    %419 = arith.subf %415, %418 : vector<8x8xf32>
    %420 = math.exp %419 : vector<8x8xf32>
    %cst_147 = arith.constant dense<0.000000e+00> : vector<8xf32>
    %421 = vector.multi_reduction <add>, %420, %cst_147 [1] : vector<8x8xf32> to vector<8xf32>
    %422 = vector.shape_cast %421 : vector<8xf32> to vector<8x1xf32>
    %423 = tpu.reciprocal %422 {approx = true} : vector<8x1xf32> -> vector<8x1xf32>
    %424 = vector.broadcast %423 : vector<8x1xf32> to vector<8x8xf32>
    %425 = arith.mulf %420, %424 : vector<8x8xf32>
    %426 = vector.shape_cast %425 : vector<8x8xf32> to vector<8x1x8xf32>
    %427 = arith.truncf %426 : vector<8x1x8xf32> to vector<8x1x8xbf16>
    "tpu.trace_start"() <{level = 10 : i32, message = "bqs,bse->bqe"}> : () -> ()
    %cst_148 = arith.constant dense<0.000000e+00> : vector<8x1x64xf32>
    %428 = tpu.matmul %427, %0, %cst_148 {dimension_numbers = #tpu.dot_dimension_numbers<[2], [1], [1], [2], [0, 0, 0, 1, 1, 2], [0], [0]>} : vector<8x1x8xbf16>, vector<8x8x64xbf16>, vector<8x1x64xf32> -> vector<8x1x64xf32>
    "tpu.trace_stop"() : () -> ()
    %cst_149 = arith.constant dense<0.000000e+00> : vector<8x64xf32>
    %429 = vector.multi_reduction <add>, %428, %cst_149 [1] : vector<8x1x64xf32> to vector<8x64xf32>
    %430 = arith.truncf %429 : vector<8x64xf32> to vector<8x64xbf16>
    %cst_150 = arith.constant dense<0.000000e+00> : vector<8x96xf32>
    %431 = tpu.matmul %405, %3, %cst_150 {dimension_numbers = #tpu.dot_dimension_numbers<[1], [0], [0], [1], [0, 0, 1, 1], [], []>} : vector<8x32xbf16>, vector<32x96xbf16>, vector<8x96xf32> -> vector<8x96xf32>
    %cst_151 = arith.constant dense<0.000000e+00> : vector<8x96xf32>
    %432 = tpu.matmul %430, %4, %cst_151 {dimension_numbers = #tpu.dot_dimension_numbers<[1], [0], [0], [1], [0, 0, 1, 1], [], []>} : vector<8x64xbf16>, vector<64x96xbf16>, vector<8x96xf32> -> vector<8x96xf32>
    %433 = arith.addf %431, %432 : vector<8x96xf32>
    %434 = vector.broadcast %6 : vector<1x96xf32> to vector<8x96xf32>
    %435 = arith.addf %433, %434 : vector<8x96xf32>
    %cst_152 = arith.constant dense<0.000000e+00> : vector<8x96xf32>
    %436 = tpu.matmul %389, %5, %cst_152 {dimension_numbers = #tpu.dot_dimension_numbers<[1], [0], [0], [1], [0, 0, 1, 1], [], []>} : vector<8x32xbf16>, vector<32x96xbf16>, vector<8x96xf32> -> vector<8x96xf32>
    %437 = vector.broadcast %7 : vector<1x96xf32> to vector<8x96xf32>
    %438 = arith.addf %436, %437 : vector<8x96xf32>
    %439 = vector.extract_strided_slice %435 {offsets = [0, 0], sizes = [8, 32], strides = [1, 1]} : vector<8x96xf32> to vector<8x32xf32>
    %440 = vector.extract_strided_slice %438 {offsets = [0, 0], sizes = [8, 32], strides = [1, 1]} : vector<8x96xf32> to vector<8x32xf32>
    %441 = arith.addf %439, %440 : vector<8x32xf32>
    %442 = arith.negf %441 : vector<8x32xf32>
    %443 = math.exp %442 : vector<8x32xf32>
    %cst_153 = arith.constant 1.000000e+00 : f32
    %444 = vector.broadcast %cst_153 : f32 to vector<8x32xf32>
    %445 = arith.addf %444, %443 : vector<8x32xf32>
    %446 = arith.divf %444, %445 : vector<8x32xf32>
    %447 = vector.extract_strided_slice %435 {offsets = [0, 32], sizes = [8, 32], strides = [1, 1]} : vector<8x96xf32> to vector<8x32xf32>
    %448 = vector.extract_strided_slice %438 {offsets = [0, 32], sizes = [8, 32], strides = [1, 1]} : vector<8x96xf32> to vector<8x32xf32>
    %449 = arith.addf %447, %448 : vector<8x32xf32>
    %450 = arith.negf %449 : vector<8x32xf32>
    %451 = math.exp %450 : vector<8x32xf32>
    %cst_154 = arith.constant 1.000000e+00 : f32
    %452 = vector.broadcast %cst_154 : f32 to vector<8x32xf32>
    %453 = arith.addf %452, %451 : vector<8x32xf32>
    %454 = arith.divf %452, %453 : vector<8x32xf32>
    %455 = vector.extract_strided_slice %435 {offsets = [0, 64], sizes = [8, 32], strides = [1, 1]} : vector<8x96xf32> to vector<8x32xf32>
    %456 = vector.extract_strided_slice %438 {offsets = [0, 64], sizes = [8, 32], strides = [1, 1]} : vector<8x96xf32> to vector<8x32xf32>
    %457 = arith.mulf %446, %456 : vector<8x32xf32>
    %458 = arith.addf %455, %457 : vector<8x32xf32>
    %459 = math.tanh %458 : vector<8x32xf32>
    %cst_155 = arith.constant 1.000000e+00 : f32
    %460 = vector.broadcast %cst_155 : f32 to vector<8x32xf32>
    %461 = arith.subf %460, %454 : vector<8x32xf32>
    %462 = arith.mulf %461, %459 : vector<8x32xf32>
    %463 = arith.mulf %454, %388 : vector<8x32xf32>
    %464 = arith.addf %462, %463 : vector<8x32xf32>
    %465 = arith.truncf %464 : vector<8x32xf32> to vector<8x32xbf16>
    %cst_156 = arith.constant dense<0.000000e+00> : vector<8x32xf32>
    %466 = tpu.matmul %465, %8, %cst_156 {dimension_numbers = #tpu.dot_dimension_numbers<[1], [0], [0], [1], [0, 0, 1, 1], [], []>} : vector<8x32xbf16>, vector<32x32xbf16>, vector<8x32xf32> -> vector<8x32xf32>
    %cst_157 = arith.constant dense<0.000000e+00> : vector<8x32xf32>
    %467 = tpu.matmul %430, %9, %cst_157 {dimension_numbers = #tpu.dot_dimension_numbers<[1], [0], [0], [1], [0, 0, 1, 1], [], []>} : vector<8x64xbf16>, vector<64x32xbf16>, vector<8x32xf32> -> vector<8x32xf32>
    %468 = arith.addf %466, %467 : vector<8x32xf32>
    %cst_158 = arith.constant dense<0.000000e+00> : vector<8x32xf32>
    %469 = tpu.matmul %405, %10, %cst_158 {dimension_numbers = #tpu.dot_dimension_numbers<[1], [0], [0], [1], [0, 0, 1, 1], [], []>} : vector<8x32xbf16>, vector<32x32xbf16>, vector<8x32xf32> -> vector<8x32xf32>
    %470 = arith.addf %468, %469 : vector<8x32xf32>
    %471 = vector.broadcast %11 : vector<1x32xf32> to vector<8x32xf32>
    %472 = arith.addf %470, %471 : vector<8x32xf32>
    %c5 = arith.constant 5 : index
    %473 = memref.load %arg1[%c5] : memref<8xi32, #tpu.memory_space<smem>>
    %c0_i32_159 = arith.constant 0 : i32
    %474 = arith.cmpi ne, %473, %c0_i32_159 : i32
    %475 = arith.extui %474 : i1 to i32
    %c0_i32_160 = arith.constant 0 : i32
    %476 = arith.cmpi ne, %475, %c0_i32_160 : i32
    scf.if %476 {
      %c6_205 = arith.constant 6 : index
      %c0_206 = arith.constant 0 : index
      %c0_207 = arith.constant 0 : index
      %627 = vector.load %arg2[%c6_205, %c0_206, %c0_207] : memref<8x8x32xf32, #tpu.memory_space<vmem>>, vector<1x8x32xf32>
      %628 = vector.shape_cast %627 : vector<1x8x32xf32> to vector<8x32xf32>
      %c0_208 = arith.constant 0 : index
      %c0_209 = arith.constant 0 : index
      %629 = vector.load %arg20[%c0_208, %c0_209] : memref<8x32xf32, #tpu.memory_space<vmem>>, vector<8x32xf32>
      tpu.vector_store %arg20[%c0_208, %c0_209], %628 {strides = array<i32>} : memref<8x32xf32, #tpu.memory_space<vmem>>, vector<8x32xf32>,
    } else {
    }
    %c0_i32_161 = arith.constant 0 : i32
    %477 = arith.cmpi eq, %473, %c0_i32_161 : i32
    %478 = arith.extui %477 : i1 to i32
    %c0_i32_162 = arith.constant 0 : i32
    %479 = arith.cmpi ne, %478, %c0_i32_162 : i32
    scf.if %479 {
      %cst_205 = arith.constant dense<0xFF800000> : vector<8xf32>
      %627 = vector.multi_reduction <maximumf>, %472, %cst_205 [1] : vector<8x32xf32> to vector<8xf32>
      %628 = vector.shape_cast %627 : vector<8xf32> to vector<8x1xf32>
      %629 = vector.broadcast %628 : vector<8x1xf32> to vector<8x32xf32>
      %630 = arith.cmpf oeq, %472, %629 : vector<8x32xf32>
      %c32_i32 = arith.constant 32 : i32
      %631 = vector.broadcast %c32_i32 : i32 to vector<8x32xi32>
      %632 = arith.select %630, %20, %631 : vector<8x32xi1>, vector<8x32xi32>
      %cst_206 = arith.constant dense<2147483647> : vector<8xi32>
      %633 = vector.multi_reduction <minsi>, %632, %cst_206 [1] : vector<8x32xi32> to vector<8xi32>
      %634 = vector.shape_cast %633 : vector<8xi32> to vector<8x1xi32>
      %635 = vector.broadcast %634 : vector<8x1xi32> to vector<8x32xi32>
      %636 = arith.cmpi eq, %20, %635 : vector<8x32xi32>
      %cst_207 = arith.constant 1.000000e+00 : f32
      %cst_208 = arith.constant 0.000000e+00 : f32
      %637 = vector.broadcast %cst_207 : f32 to vector<8x32xf32>
      %638 = vector.broadcast %cst_208 : f32 to vector<8x32xf32>
      %639 = arith.select %636, %637, %638 : vector<8x32xi1>, vector<8x32xf32>
      %640 = arith.truncf %639 : vector<8x32xf32> to vector<8x32xbf16>
      %c0_209 = arith.constant 0 : index
      %c0_210 = arith.constant 0 : index
      %641 = vector.load %arg3[%c0_209, %c0_210] : memref<32x32xbf16, #tpu.memory_space<vmem>>, vector<32x32xbf16>
      %cst_211 = arith.constant dense<0.000000e+00> : vector<8x32xf32>
      %642 = tpu.matmul %640, %641, %cst_211 {dimension_numbers = #tpu.dot_dimension_numbers<[1], [0], [0], [1], [0, 0, 1, 1], [], []>} : vector<8x32xbf16>, vector<32x32xbf16>, vector<8x32xf32> -> vector<8x32xf32>
      %cst_212 = arith.constant 5.65685415 : f32
      %643 = vector.broadcast %cst_212 : f32 to vector<8x32xf32>
      %644 = arith.mulf %642, %643 : vector<8x32xf32>
      %c0_213 = arith.constant 0 : index
      %c0_214 = arith.constant 0 : index
      %645 = vector.load %arg20[%c0_213, %c0_214] : memref<8x32xf32, #tpu.memory_space<vmem>>, vector<8x32xf32>
      tpu.vector_store %arg20[%c0_213, %c0_214], %644 {strides = array<i32>} : memref<8x32xf32, #tpu.memory_space<vmem>>, vector<8x32xf32>,
    } else {
    }
    %c0_163 = arith.constant 0 : index
    %c0_164 = arith.constant 0 : index
    %480 = vector.load %arg20[%c0_163, %c0_164] : memref<8x32xf32, #tpu.memory_space<vmem>>, vector<8x32xf32>
    %481 = arith.truncf %480 : vector<8x32xf32> to vector<8x32xbf16>
    %cst_165 = arith.constant dense<0.000000e+00> : vector<8x32xf32>
    %482 = tpu.matmul %465, %1, %cst_165 {dimension_numbers = #tpu.dot_dimension_numbers<[1], [0], [0], [1], [0, 0, 1, 1], [], []>} : vector<8x32xbf16>, vector<32x32xbf16>, vector<8x32xf32> -> vector<8x32xf32>
    %483 = vector.shape_cast %482 : vector<8x32xf32> to vector<8x1x32xf32>
    %484 = vector.broadcast %483 : vector<8x1x32xf32> to vector<8x8x32xf32>
    %485 = arith.addf %19, %484 : vector<8x8x32xf32>
    %486 = math.tanh %485 : vector<8x8x32xf32>
    %487 = vector.shape_cast %486 : vector<8x8x32xf32> to vector<64x32xf32>
    %488 = arith.truncf %487 : vector<64x32xf32> to vector<64x32xbf16>
    %cst_166 = arith.constant dense<0.000000e+00> : vector<64x1xf32>
    %489 = tpu.matmul %488, %2, %cst_166 {dimension_numbers = #tpu.dot_dimension_numbers<[1], [0], [0], [1], [0, 0, 1, 1], [], []>} : vector<64x32xbf16>, vector<32x1xbf16>, vector<64x1xf32> -> vector<64x1xf32>
    %490 = vector.shape_cast %489 : vector<64x1xf32> to vector<8x8x1xf32>
    %cst_167 = arith.constant dense<0.000000e+00> : vector<8x8xf32>
    %491 = vector.multi_reduction <add>, %490, %cst_167 [2] : vector<8x8x1xf32> to vector<8x8xf32>
    %cst_168 = arith.constant dense<0xFF800000> : vector<8xf32>
    %492 = vector.multi_reduction <maximumf>, %491, %cst_168 [1] : vector<8x8xf32> to vector<8xf32>
    %493 = vector.shape_cast %492 : vector<8xf32> to vector<8x1xf32>
    %494 = vector.broadcast %493 : vector<8x1xf32> to vector<8x8xf32>
    %495 = arith.subf %491, %494 : vector<8x8xf32>
    %496 = math.exp %495 : vector<8x8xf32>
    %cst_169 = arith.constant dense<0.000000e+00> : vector<8xf32>
    %497 = vector.multi_reduction <add>, %496, %cst_169 [1] : vector<8x8xf32> to vector<8xf32>
    %498 = vector.shape_cast %497 : vector<8xf32> to vector<8x1xf32>
    %499 = tpu.reciprocal %498 {approx = true} : vector<8x1xf32> -> vector<8x1xf32>
    %500 = vector.broadcast %499 : vector<8x1xf32> to vector<8x8xf32>
    %501 = arith.mulf %496, %500 : vector<8x8xf32>
    %502 = vector.shape_cast %501 : vector<8x8xf32> to vector<8x1x8xf32>
    %503 = arith.truncf %502 : vector<8x1x8xf32> to vector<8x1x8xbf16>
    "tpu.trace_start"() <{level = 10 : i32, message = "bqs,bse->bqe"}> : () -> ()
    %cst_170 = arith.constant dense<0.000000e+00> : vector<8x1x64xf32>
    %504 = tpu.matmul %503, %0, %cst_170 {dimension_numbers = #tpu.dot_dimension_numbers<[2], [1], [1], [2], [0, 0, 0, 1, 1, 2], [0], [0]>} : vector<8x1x8xbf16>, vector<8x8x64xbf16>, vector<8x1x64xf32> -> vector<8x1x64xf32>
    "tpu.trace_stop"() : () -> ()
    %cst_171 = arith.constant dense<0.000000e+00> : vector<8x64xf32>
    %505 = vector.multi_reduction <add>, %504, %cst_171 [1] : vector<8x1x64xf32> to vector<8x64xf32>
    %506 = arith.truncf %505 : vector<8x64xf32> to vector<8x64xbf16>
    %cst_172 = arith.constant dense<0.000000e+00> : vector<8x96xf32>
    %507 = tpu.matmul %481, %3, %cst_172 {dimension_numbers = #tpu.dot_dimension_numbers<[1], [0], [0], [1], [0, 0, 1, 1], [], []>} : vector<8x32xbf16>, vector<32x96xbf16>, vector<8x96xf32> -> vector<8x96xf32>
    %cst_173 = arith.constant dense<0.000000e+00> : vector<8x96xf32>
    %508 = tpu.matmul %506, %4, %cst_173 {dimension_numbers = #tpu.dot_dimension_numbers<[1], [0], [0], [1], [0, 0, 1, 1], [], []>} : vector<8x64xbf16>, vector<64x96xbf16>, vector<8x96xf32> -> vector<8x96xf32>
    %509 = arith.addf %507, %508 : vector<8x96xf32>
    %510 = vector.broadcast %6 : vector<1x96xf32> to vector<8x96xf32>
    %511 = arith.addf %509, %510 : vector<8x96xf32>
    %cst_174 = arith.constant dense<0.000000e+00> : vector<8x96xf32>
    %512 = tpu.matmul %465, %5, %cst_174 {dimension_numbers = #tpu.dot_dimension_numbers<[1], [0], [0], [1], [0, 0, 1, 1], [], []>} : vector<8x32xbf16>, vector<32x96xbf16>, vector<8x96xf32> -> vector<8x96xf32>
    %513 = vector.broadcast %7 : vector<1x96xf32> to vector<8x96xf32>
    %514 = arith.addf %512, %513 : vector<8x96xf32>
    %515 = vector.extract_strided_slice %511 {offsets = [0, 0], sizes = [8, 32], strides = [1, 1]} : vector<8x96xf32> to vector<8x32xf32>
    %516 = vector.extract_strided_slice %514 {offsets = [0, 0], sizes = [8, 32], strides = [1, 1]} : vector<8x96xf32> to vector<8x32xf32>
    %517 = arith.addf %515, %516 : vector<8x32xf32>
    %518 = arith.negf %517 : vector<8x32xf32>
    %519 = math.exp %518 : vector<8x32xf32>
    %cst_175 = arith.constant 1.000000e+00 : f32
    %520 = vector.broadcast %cst_175 : f32 to vector<8x32xf32>
    %521 = arith.addf %520, %519 : vector<8x32xf32>
    %522 = arith.divf %520, %521 : vector<8x32xf32>
    %523 = vector.extract_strided_slice %511 {offsets = [0, 32], sizes = [8, 32], strides = [1, 1]} : vector<8x96xf32> to vector<8x32xf32>
    %524 = vector.extract_strided_slice %514 {offsets = [0, 32], sizes = [8, 32], strides = [1, 1]} : vector<8x96xf32> to vector<8x32xf32>
    %525 = arith.addf %523, %524 : vector<8x32xf32>
    %526 = arith.negf %525 : vector<8x32xf32>
    %527 = math.exp %526 : vector<8x32xf32>
    %cst_176 = arith.constant 1.000000e+00 : f32
    %528 = vector.broadcast %cst_176 : f32 to vector<8x32xf32>
    %529 = arith.addf %528, %527 : vector<8x32xf32>
    %530 = arith.divf %528, %529 : vector<8x32xf32>
    %531 = vector.extract_strided_slice %511 {offsets = [0, 64], sizes = [8, 32], strides = [1, 1]} : vector<8x96xf32> to vector<8x32xf32>
    %532 = vector.extract_strided_slice %514 {offsets = [0, 64], sizes = [8, 32], strides = [1, 1]} : vector<8x96xf32> to vector<8x32xf32>
    %533 = arith.mulf %522, %532 : vector<8x32xf32>
    %534 = arith.addf %531, %533 : vector<8x32xf32>
    %535 = math.tanh %534 : vector<8x32xf32>
    %cst_177 = arith.constant 1.000000e+00 : f32
    %536 = vector.broadcast %cst_177 : f32 to vector<8x32xf32>
    %537 = arith.subf %536, %530 : vector<8x32xf32>
    %538 = arith.mulf %537, %535 : vector<8x32xf32>
    %539 = arith.mulf %530, %464 : vector<8x32xf32>
    %540 = arith.addf %538, %539 : vector<8x32xf32>
    %541 = arith.truncf %540 : vector<8x32xf32> to vector<8x32xbf16>
    %cst_178 = arith.constant dense<0.000000e+00> : vector<8x32xf32>
    %542 = tpu.matmul %541, %8, %cst_178 {dimension_numbers = #tpu.dot_dimension_numbers<[1], [0], [0], [1], [0, 0, 1, 1], [], []>} : vector<8x32xbf16>, vector<32x32xbf16>, vector<8x32xf32> -> vector<8x32xf32>
    %cst_179 = arith.constant dense<0.000000e+00> : vector<8x32xf32>
    %543 = tpu.matmul %506, %9, %cst_179 {dimension_numbers = #tpu.dot_dimension_numbers<[1], [0], [0], [1], [0, 0, 1, 1], [], []>} : vector<8x64xbf16>, vector<64x32xbf16>, vector<8x32xf32> -> vector<8x32xf32>
    %544 = arith.addf %542, %543 : vector<8x32xf32>
    %cst_180 = arith.constant dense<0.000000e+00> : vector<8x32xf32>
    %545 = tpu.matmul %481, %10, %cst_180 {dimension_numbers = #tpu.dot_dimension_numbers<[1], [0], [0], [1], [0, 0, 1, 1], [], []>} : vector<8x32xbf16>, vector<32x32xbf16>, vector<8x32xf32> -> vector<8x32xf32>
    %546 = arith.addf %544, %545 : vector<8x32xf32>
    %547 = vector.broadcast %11 : vector<1x32xf32> to vector<8x32xf32>
    %548 = arith.addf %546, %547 : vector<8x32xf32>
    %c6 = arith.constant 6 : index
    %549 = memref.load %arg1[%c6] : memref<8xi32, #tpu.memory_space<smem>>
    %c0_i32_181 = arith.constant 0 : i32
    %550 = arith.cmpi ne, %549, %c0_i32_181 : i32
    %551 = arith.extui %550 : i1 to i32
    %c0_i32_182 = arith.constant 0 : i32
    %552 = arith.cmpi ne, %551, %c0_i32_182 : i32
    scf.if %552 {
      %c7 = arith.constant 7 : index
      %c0_205 = arith.constant 0 : index
      %c0_206 = arith.constant 0 : index
      %627 = vector.load %arg2[%c7, %c0_205, %c0_206] : memref<8x8x32xf32, #tpu.memory_space<vmem>>, vector<1x8x32xf32>
      %628 = vector.shape_cast %627 : vector<1x8x32xf32> to vector<8x32xf32>
      %c0_207 = arith.constant 0 : index
      %c0_208 = arith.constant 0 : index
      %629 = vector.load %arg20[%c0_207, %c0_208] : memref<8x32xf32, #tpu.memory_space<vmem>>, vector<8x32xf32>
      tpu.vector_store %arg20[%c0_207, %c0_208], %628 {strides = array<i32>} : memref<8x32xf32, #tpu.memory_space<vmem>>, vector<8x32xf32>,
    } else {
    }
    %c0_i32_183 = arith.constant 0 : i32
    %553 = arith.cmpi eq, %549, %c0_i32_183 : i32
    %554 = arith.extui %553 : i1 to i32
    %c0_i32_184 = arith.constant 0 : i32
    %555 = arith.cmpi ne, %554, %c0_i32_184 : i32
    scf.if %555 {
      %cst_205 = arith.constant dense<0xFF800000> : vector<8xf32>
      %627 = vector.multi_reduction <maximumf>, %548, %cst_205 [1] : vector<8x32xf32> to vector<8xf32>
      %628 = vector.shape_cast %627 : vector<8xf32> to vector<8x1xf32>
      %629 = vector.broadcast %628 : vector<8x1xf32> to vector<8x32xf32>
      %630 = arith.cmpf oeq, %548, %629 : vector<8x32xf32>
      %c32_i32 = arith.constant 32 : i32
      %631 = vector.broadcast %c32_i32 : i32 to vector<8x32xi32>
      %632 = arith.select %630, %20, %631 : vector<8x32xi1>, vector<8x32xi32>
      %cst_206 = arith.constant dense<2147483647> : vector<8xi32>
      %633 = vector.multi_reduction <minsi>, %632, %cst_206 [1] : vector<8x32xi32> to vector<8xi32>
      %634 = vector.shape_cast %633 : vector<8xi32> to vector<8x1xi32>
      %635 = vector.broadcast %634 : vector<8x1xi32> to vector<8x32xi32>
      %636 = arith.cmpi eq, %20, %635 : vector<8x32xi32>
      %cst_207 = arith.constant 1.000000e+00 : f32
      %cst_208 = arith.constant 0.000000e+00 : f32
      %637 = vector.broadcast %cst_207 : f32 to vector<8x32xf32>
      %638 = vector.broadcast %cst_208 : f32 to vector<8x32xf32>
      %639 = arith.select %636, %637, %638 : vector<8x32xi1>, vector<8x32xf32>
      %640 = arith.truncf %639 : vector<8x32xf32> to vector<8x32xbf16>
      %c0_209 = arith.constant 0 : index
      %c0_210 = arith.constant 0 : index
      %641 = vector.load %arg3[%c0_209, %c0_210] : memref<32x32xbf16, #tpu.memory_space<vmem>>, vector<32x32xbf16>
      %cst_211 = arith.constant dense<0.000000e+00> : vector<8x32xf32>
      %642 = tpu.matmul %640, %641, %cst_211 {dimension_numbers = #tpu.dot_dimension_numbers<[1], [0], [0], [1], [0, 0, 1, 1], [], []>} : vector<8x32xbf16>, vector<32x32xbf16>, vector<8x32xf32> -> vector<8x32xf32>
      %cst_212 = arith.constant 5.65685415 : f32
      %643 = vector.broadcast %cst_212 : f32 to vector<8x32xf32>
      %644 = arith.mulf %642, %643 : vector<8x32xf32>
      %c0_213 = arith.constant 0 : index
      %c0_214 = arith.constant 0 : index
      %645 = vector.load %arg20[%c0_213, %c0_214] : memref<8x32xf32, #tpu.memory_space<vmem>>, vector<8x32xf32>
      tpu.vector_store %arg20[%c0_213, %c0_214], %644 {strides = array<i32>} : memref<8x32xf32, #tpu.memory_space<vmem>>, vector<8x32xf32>,
    } else {
    }
    %c0_185 = arith.constant 0 : index
    %c0_186 = arith.constant 0 : index
    %556 = vector.load %arg20[%c0_185, %c0_186] : memref<8x32xf32, #tpu.memory_space<vmem>>, vector<8x32xf32>
    %557 = arith.truncf %556 : vector<8x32xf32> to vector<8x32xbf16>
    %cst_187 = arith.constant dense<0.000000e+00> : vector<8x32xf32>
    %558 = tpu.matmul %541, %1, %cst_187 {dimension_numbers = #tpu.dot_dimension_numbers<[1], [0], [0], [1], [0, 0, 1, 1], [], []>} : vector<8x32xbf16>, vector<32x32xbf16>, vector<8x32xf32> -> vector<8x32xf32>
    %559 = vector.shape_cast %558 : vector<8x32xf32> to vector<8x1x32xf32>
    %560 = vector.broadcast %559 : vector<8x1x32xf32> to vector<8x8x32xf32>
    %561 = arith.addf %19, %560 : vector<8x8x32xf32>
    %562 = math.tanh %561 : vector<8x8x32xf32>
    %563 = vector.shape_cast %562 : vector<8x8x32xf32> to vector<64x32xf32>
    %564 = arith.truncf %563 : vector<64x32xf32> to vector<64x32xbf16>
    %cst_188 = arith.constant dense<0.000000e+00> : vector<64x1xf32>
    %565 = tpu.matmul %564, %2, %cst_188 {dimension_numbers = #tpu.dot_dimension_numbers<[1], [0], [0], [1], [0, 0, 1, 1], [], []>} : vector<64x32xbf16>, vector<32x1xbf16>, vector<64x1xf32> -> vector<64x1xf32>
    %566 = vector.shape_cast %565 : vector<64x1xf32> to vector<8x8x1xf32>
    %cst_189 = arith.constant dense<0.000000e+00> : vector<8x8xf32>
    %567 = vector.multi_reduction <add>, %566, %cst_189 [2] : vector<8x8x1xf32> to vector<8x8xf32>
    %cst_190 = arith.constant dense<0xFF800000> : vector<8xf32>
    %568 = vector.multi_reduction <maximumf>, %567, %cst_190 [1] : vector<8x8xf32> to vector<8xf32>
    %569 = vector.shape_cast %568 : vector<8xf32> to vector<8x1xf32>
    %570 = vector.broadcast %569 : vector<8x1xf32> to vector<8x8xf32>
    %571 = arith.subf %567, %570 : vector<8x8xf32>
    %572 = math.exp %571 : vector<8x8xf32>
    %cst_191 = arith.constant dense<0.000000e+00> : vector<8xf32>
    %573 = vector.multi_reduction <add>, %572, %cst_191 [1] : vector<8x8xf32> to vector<8xf32>
    %574 = vector.shape_cast %573 : vector<8xf32> to vector<8x1xf32>
    %575 = tpu.reciprocal %574 {approx = true} : vector<8x1xf32> -> vector<8x1xf32>
    %576 = vector.broadcast %575 : vector<8x1xf32> to vector<8x8xf32>
    %577 = arith.mulf %572, %576 : vector<8x8xf32>
    %578 = vector.shape_cast %577 : vector<8x8xf32> to vector<8x1x8xf32>
    %579 = arith.truncf %578 : vector<8x1x8xf32> to vector<8x1x8xbf16>
    "tpu.trace_start"() <{level = 10 : i32, message = "bqs,bse->bqe"}> : () -> ()
    %cst_192 = arith.constant dense<0.000000e+00> : vector<8x1x64xf32>
    %580 = tpu.matmul %579, %0, %cst_192 {dimension_numbers = #tpu.dot_dimension_numbers<[2], [1], [1], [2], [0, 0, 0, 1, 1, 2], [0], [0]>} : vector<8x1x8xbf16>, vector<8x8x64xbf16>, vector<8x1x64xf32> -> vector<8x1x64xf32>
    "tpu.trace_stop"() : () -> ()
    %cst_193 = arith.constant dense<0.000000e+00> : vector<8x64xf32>
    %581 = vector.multi_reduction <add>, %580, %cst_193 [1] : vector<8x1x64xf32> to vector<8x64xf32>
    %582 = arith.truncf %581 : vector<8x64xf32> to vector<8x64xbf16>
    %cst_194 = arith.constant dense<0.000000e+00> : vector<8x96xf32>
    %583 = tpu.matmul %557, %3, %cst_194 {dimension_numbers = #tpu.dot_dimension_numbers<[1], [0], [0], [1], [0, 0, 1, 1], [], []>} : vector<8x32xbf16>, vector<32x96xbf16>, vector<8x96xf32> -> vector<8x96xf32>
    %cst_195 = arith.constant dense<0.000000e+00> : vector<8x96xf32>
    %584 = tpu.matmul %582, %4, %cst_195 {dimension_numbers = #tpu.dot_dimension_numbers<[1], [0], [0], [1], [0, 0, 1, 1], [], []>} : vector<8x64xbf16>, vector<64x96xbf16>, vector<8x96xf32> -> vector<8x96xf32>
    %585 = arith.addf %583, %584 : vector<8x96xf32>
    %586 = vector.broadcast %6 : vector<1x96xf32> to vector<8x96xf32>
    %587 = arith.addf %585, %586 : vector<8x96xf32>
    %cst_196 = arith.constant dense<0.000000e+00> : vector<8x96xf32>
    %588 = tpu.matmul %541, %5, %cst_196 {dimension_numbers = #tpu.dot_dimension_numbers<[1], [0], [0], [1], [0, 0, 1, 1], [], []>} : vector<8x32xbf16>, vector<32x96xbf16>, vector<8x96xf32> -> vector<8x96xf32>
    %589 = vector.broadcast %7 : vector<1x96xf32> to vector<8x96xf32>
    %590 = arith.addf %588, %589 : vector<8x96xf32>
    %591 = vector.extract_strided_slice %587 {offsets = [0, 0], sizes = [8, 32], strides = [1, 1]} : vector<8x96xf32> to vector<8x32xf32>
    %592 = vector.extract_strided_slice %590 {offsets = [0, 0], sizes = [8, 32], strides = [1, 1]} : vector<8x96xf32> to vector<8x32xf32>
    %593 = arith.addf %591, %592 : vector<8x32xf32>
    %594 = arith.negf %593 : vector<8x32xf32>
    %595 = math.exp %594 : vector<8x32xf32>
    %cst_197 = arith.constant 1.000000e+00 : f32
    %596 = vector.broadcast %cst_197 : f32 to vector<8x32xf32>
    %597 = arith.addf %596, %595 : vector<8x32xf32>
    %598 = arith.divf %596, %597 : vector<8x32xf32>
    %599 = vector.extract_strided_slice %587 {offsets = [0, 32], sizes = [8, 32], strides = [1, 1]} : vector<8x96xf32> to vector<8x32xf32>
    %600 = vector.extract_strided_slice %590 {offsets = [0, 32], sizes = [8, 32], strides = [1, 1]} : vector<8x96xf32> to vector<8x32xf32>
    %601 = arith.addf %599, %600 : vector<8x32xf32>
    %602 = arith.negf %601 : vector<8x32xf32>
    %603 = math.exp %602 : vector<8x32xf32>
    %cst_198 = arith.constant 1.000000e+00 : f32
    %604 = vector.broadcast %cst_198 : f32 to vector<8x32xf32>
    %605 = arith.addf %604, %603 : vector<8x32xf32>
    %606 = arith.divf %604, %605 : vector<8x32xf32>
    %607 = vector.extract_strided_slice %587 {offsets = [0, 64], sizes = [8, 32], strides = [1, 1]} : vector<8x96xf32> to vector<8x32xf32>
    %608 = vector.extract_strided_slice %590 {offsets = [0, 64], sizes = [8, 32], strides = [1, 1]} : vector<8x96xf32> to vector<8x32xf32>
    %609 = arith.mulf %598, %608 : vector<8x32xf32>
    %610 = arith.addf %607, %609 : vector<8x32xf32>
    %611 = math.tanh %610 : vector<8x32xf32>
    %cst_199 = arith.constant 1.000000e+00 : f32
    %612 = vector.broadcast %cst_199 : f32 to vector<8x32xf32>
    %613 = arith.subf %612, %606 : vector<8x32xf32>
    %614 = arith.mulf %613, %611 : vector<8x32xf32>
    %615 = arith.mulf %606, %540 : vector<8x32xf32>
    %616 = arith.addf %614, %615 : vector<8x32xf32>
    %617 = arith.truncf %616 : vector<8x32xf32> to vector<8x32xbf16>
    %cst_200 = arith.constant dense<0.000000e+00> : vector<8x32xf32>
    %618 = tpu.matmul %617, %8, %cst_200 {dimension_numbers = #tpu.dot_dimension_numbers<[1], [0], [0], [1], [0, 0, 1, 1], [], []>} : vector<8x32xbf16>, vector<32x32xbf16>, vector<8x32xf32> -> vector<8x32xf32>
    %cst_201 = arith.constant dense<0.000000e+00> : vector<8x32xf32>
    %619 = tpu.matmul %582, %9, %cst_201 {dimension_numbers = #tpu.dot_dimension_numbers<[1], [0], [0], [1], [0, 0, 1, 1], [], []>} : vector<8x64xbf16>, vector<64x32xbf16>, vector<8x32xf32> -> vector<8x32xf32>
    %620 = arith.addf %618, %619 : vector<8x32xf32>
    %cst_202 = arith.constant dense<0.000000e+00> : vector<8x32xf32>
    %621 = tpu.matmul %557, %10, %cst_202 {dimension_numbers = #tpu.dot_dimension_numbers<[1], [0], [0], [1], [0, 0, 1, 1], [], []>} : vector<8x32xbf16>, vector<32x32xbf16>, vector<8x32xf32> -> vector<8x32xf32>
    %622 = arith.addf %620, %621 : vector<8x32xf32>
    %623 = vector.broadcast %11 : vector<1x32xf32> to vector<8x32xf32>
    %624 = arith.addf %622, %623 : vector<8x32xf32>
    %625 = tpu.concatenate %92, %168, %244, %320, %396, %472, %548, %624 in 1 : vector<8x32xf32>, vector<8x32xf32>, vector<8x32xf32>, vector<8x32xf32>, vector<8x32xf32>, vector<8x32xf32>, vector<8x32xf32>, vector<8x32xf32> -> vector<8x256xf32>
    %c0_203 = arith.constant 0 : index
    %c0_204 = arith.constant 0 : index
    %626 = vector.load %arg19[%c0_203, %c0_204] : memref<8x256xf32, #tpu.memory_space<vmem>>, vector<8x256xf32>
    tpu.vector_store %arg19[%c0_203, %c0_204], %625 {strides = array<i32>} : memref<8x256xf32, #tpu.memory_space<vmem>>, vector<8x256xf32>,
    return
  }
  func.func @transform_0(%arg0: i32) -> i32 {
    %c0_i32 = arith.constant 0 : i32
    %c0_i32_0 = arith.constant 0 : i32
    return %c0_i32 : i32
  }
  func.func @transform_1(%arg0: i32) -> (i32, i32, i32) {
    %c0_i32 = arith.constant 0 : i32
    %c0_i32_0 = arith.constant 0 : i32
    %c0_i32_1 = arith.constant 0 : i32
    return %c0_i32, %arg0, %c0_i32_0 : i32, i32, i32
  }
  func.func @transform_2(%arg0: i32) -> (i32, i32) {
    %c0_i32 = arith.constant 0 : i32
    %c0_i32_0 = arith.constant 0 : i32
    %c0_i32_1 = arith.constant 0 : i32
    return %c0_i32, %c0_i32_0 : i32, i32
  }
  func.func @transform_3(%arg0: i32) -> (i32, i32) {
    %c0_i32 = arith.constant 0 : i32
    %c0_i32_0 = arith.constant 0 : i32
    %c0_i32_1 = arith.constant 0 : i32
    return %c0_i32, %c0_i32_0 : i32, i32
  }
  func.func @transform_4(%arg0: i32) -> (i32, i32) {
    %c0_i32 = arith.constant 0 : i32
    %c0_i32_0 = arith.constant 0 : i32
    %c0_i32_1 = arith.constant 0 : i32
    return %c0_i32, %c0_i32_0 : i32, i32
  }
  func.func @transform_5(%arg0: i32) -> (i32, i32) {
    %c0_i32 = arith.constant 0 : i32
    %c0_i32_0 = arith.constant 0 : i32
    %c0_i32_1 = arith.constant 0 : i32
    return %c0_i32, %c0_i32_0 : i32, i32
  }
  func.func @transform_6(%arg0: i32) -> (i32, i32) {
    %c0_i32 = arith.constant 0 : i32
    %c0_i32_0 = arith.constant 0 : i32
    %c0_i32_1 = arith.constant 0 : i32
    return %c0_i32, %c0_i32_0 : i32, i32
  }
  func.func @transform_7(%arg0: i32) -> (i32, i32) {
    %c0_i32 = arith.constant 0 : i32
    %c0_i32_0 = arith.constant 0 : i32
    %c0_i32_1 = arith.constant 0 : i32
    return %c0_i32, %c0_i32_0 : i32, i32
  }
  func.func @transform_8(%arg0: i32) -> (i32, i32) {
    %c0_i32 = arith.constant 0 : i32
    %c0_i32_0 = arith.constant 0 : i32
    %c0_i32_1 = arith.constant 0 : i32
    return %c0_i32, %c0_i32_0 : i32, i32
  }
  func.func @transform_9(%arg0: i32) -> (i32, i32) {
    %c0_i32 = arith.constant 0 : i32
    %c0_i32_0 = arith.constant 0 : i32
    %c0_i32_1 = arith.constant 0 : i32
    return %c0_i32, %c0_i32_0 : i32, i32
  }
  func.func @transform_10(%arg0: i32) -> (i32, i32) {
    %c0_i32 = arith.constant 0 : i32
    %c0_i32_0 = arith.constant 0 : i32
    %c0_i32_1 = arith.constant 0 : i32
    return %c0_i32, %c0_i32_0 : i32, i32
  }
  func.func @transform_11(%arg0: i32) -> (i32, i32) {
    %c0_i32 = arith.constant 0 : i32
    %c0_i32_0 = arith.constant 0 : i32
    %c0_i32_1 = arith.constant 0 : i32
    return %c0_i32, %c0_i32_0 : i32, i32
  }
  func.func @transform_12(%arg0: i32) -> (i32, i32) {
    %c0_i32 = arith.constant 0 : i32
    %c0_i32_0 = arith.constant 0 : i32
    %c0_i32_1 = arith.constant 0 : i32
    return %c0_i32, %c0_i32_0 : i32, i32
  }
  func.func @transform_13(%arg0: i32) -> (i32, i32) {
    %c0_i32 = arith.constant 0 : i32
    %c0_i32_0 = arith.constant 0 : i32
    %c0_i32_1 = arith.constant 0 : i32
    return %c0_i32, %c0_i32_0 : i32, i32
  }
  func.func @transform_14(%arg0: i32) -> (i32, i32) {
    %c0_i32 = arith.constant 0 : i32
    %c0_i32_0 = arith.constant 0 : i32
    %c0_i32_1 = arith.constant 0 : i32
    return %c0_i32, %c0_i32_0 : i32, i32
  }
  func.func @transform_15(%arg0: i32) -> (i32, i32) {
    %c0_i32 = arith.constant 0 : i32
    %c0_i32_0 = arith.constant 0 : i32
    %c0_i32_1 = arith.constant 0 : i32
    return %c0_i32, %c0_i32_0 : i32, i32
  }
  func.func @transform_16(%arg0: i32) -> (i32, i32, i32) {
    %c0_i32 = arith.constant 0 : i32
    %c0_i32_0 = arith.constant 0 : i32
    %c0_i32_1 = arith.constant 0 : i32
    return %arg0, %c0_i32, %c0_i32_0 : i32, i32, i32
  }
  func.func @transform_17(%arg0: i32) -> (i32, i32) {
    %c0_i32 = arith.constant 0 : i32
    %c0_i32_0 = arith.constant 0 : i32
    return %arg0, %c0_i32 : i32, i32
  }
  func.func @transform_18(%arg0: i32) -> (i32, i32) {
    %c0_i32 = arith.constant 0 : i32
    %c0_i32_0 = arith.constant 0 : i32
    return %arg0, %c0_i32 : i32, i32
  }
}

</mosaic_0001>

<bundles_post_ra>
// kernel: tpu_custom_call.1
= control target key start
LH: loop header
LB: loop body
LE: loop exit
PB: predicated region body
PF: predicated region fallthrough
CT: control target
= control target key end

     0   :  { %s9200_s0 = inlined_call_operand.vmem [shape: s32[8], index: 0, kind: input, shape index: {}]   ;;  %s9201_s1 = inlined_call_operand.vmem [shape: f32[8,8,32], index: 1, kind: input, shape index: {}]   ;;  %s9202_s2 = inlined_call_operand.vmem [shape: bf16[32,32], index: 2, kind: input, shape index: {}]   ;;  %s9203_s3 = inlined_call_operand.hbm [shape: bf16[32,32], index: 3, kind: input, shape index: {}]   ;;  %s9204_s4 = inlined_call_operand.vmem [shape: bf16[64,32], index: 4, kind: input, shape index: {}]   ;;  %s9205_s5 = inlined_call_operand.hbm [shape: f32[1,32], index: 5, kind: input, shape index: {}]   ;;  %s9206_s6 = inlined_call_operand.vmem [shape: bf16[32,1], index: 6, kind: input, shape index: {}]   ;;  %s9207_s7 = inlined_call_operand.hbm [shape: bf16[32,96], index: 7, kind: input, shape index: {}]   ;;  %s9208_s8 = inlined_call_operand.hbm [shape: bf16[64,96], index: 8, kind: input, shape index: {}]   ;;  %s9209_s9 = inlined_call_operand.hbm [shape: bf16[32,96], index: 9, kind: input, shape index: {}]   ;;  %s9210_s10 = inlined_call_operand.hbm [shape: f32[1,96], index: 10, kind: input, shape index: {}]   ;;  %s9211_s11 = inlined_call_operand.hbm [shape: f32[1,96], index: 11, kind: input, shape index: {}]   ;;  %s9212_s12 = inlined_call_operand.hbm [shape: bf16[32,32], index: 12, kind: input, shape index: {}]   ;;  %s9213_s13 = inlined_call_operand.vmem [shape: bf16[64,32], index: 13, kind: input, shape index: {}]   ;;  %s9214_s14 = inlined_call_operand.hbm [shape: bf16[32,32], index: 14, kind: input, shape index: {}]   ;;  %s9215_s15 = inlined_call_operand.vmem [shape: f32[1,32], index: 15, kind: input, shape index: {}]   ;;  %s9216_s16 = inlined_call_operand.hbm [shape: bf16[8,8,64], index: 16, kind: input, shape index: {}]   ;;  %s9217_s17 = inlined_call_operand.vmem [shape: f32[8,32], index: 17, kind: input, shape index: {}]   ;;  %s9218_s18 = inlined_call_operand.hbm [shape: f32[8,256], index: 18, kind: output, shape index: {}]  }
   0x1   :  { %9247 = sst [smem:[#allocation45_spill]] %s9200_s0 }
   0x2   :  { %9248 = sst [smem:[#allocation46_spill]] %s9201_s1 }
   0x3   :  { %9249 = sst [smem:[#allocation47_spill]] %s9202_s2 }
   0x4   :  { %23 = vsyncpa [#allocation6], 0 }
   0x5   :  { %24 = vsyncpa [#allocation4], 0 }
   0x6   :  { %25 = vsyncpa [#allocation9], 0 }
   0x7   :  { %26 = vsyncpa [#allocation12], 0 }
   0x8   :  { %27 = vsyncpa [#allocation15], 0 }
   0x9   :  { %28 = vsyncpa [#allocation18], 0 }
   0xa   :  { %29 = vsyncpa [#allocation21], 0  ;;  %s64_s29 = sshll.u32 %s9205_s5, 4  ;;  %s65_s29 = int_to_ptr.hbm [resolvable:$true] %s64_s29 }
   0xb   :  { %30 = vsyncpa [#allocation5], 0  ;;  %s7550_s30 = smov [#allocation8]   ;;  %s89_s20 = sshll.u32 %s9208_s8, 4  ;;  %s90_s20 = int_to_ptr.hbm [resolvable:$true] %s89_s20 }
   0xc   :  { %s66_s0 = sshll.u32 %s7550_s30, 4  ;;  %s7551_s21 = smov [#allocation11]   ;;  %s67_s0 = int_to_ptr.vmem [resolvable:$true] %s66_s0 }
   0xd   :  { %69 = dma.hbm_to_vmem [thread:$0]  %s65_s29, 16, %s67_s0, [#allocation9]  }
   0xe   :  { %s91_s22 = sshll.u32 %s7551_s21, 4  ;;  %s116_s24 = sshll.u32 %s9210_s10, 4  ;;  %s92_s22 = int_to_ptr.vmem [resolvable:$true] %s91_s22  ;;  %s117_s24 = int_to_ptr.hbm [resolvable:$true] %s116_s24 }
   0xf   :  { %s7552_s5 = smov 64   ;;  %s7553_s25 = smov 4  }
  0x10   :  { %97 = dma.hbm_to_vmem [thread:$0]  %s90_s20, 512, %s92_s22, [#allocation12], %s7552_s5, %s7552_s5, %s7553_s25  }
  0x11   :  { %s137_s28 = sshll.u32 %s9212_s12, 4  ;;  %s7554_s8 = smov [#allocation14]   ;;  %s138_s28 = int_to_ptr.hbm [resolvable:$true] %s137_s28 }
  0x12   :  { %s118_s29 = sshll.u32 %s7554_s8, 4  ;;  %s7555_s30 = smov [#allocation17]   ;;  %s119_s29 = int_to_ptr.vmem [resolvable:$true] %s118_s29 }
  0x13   :  { %121 = dma.hbm_to_vmem [thread:$0]  %s117_s24, 16, %s119_s29, [#allocation15]  }
  0x14   :  { %s139_s0 = sshll.u32 %s7555_s30, 4  ;;  %s9250_s1 = sld [smem:[#allocation45_spill]]  ;;  %s140_s0 = int_to_ptr.vmem [resolvable:$true] %s139_s0 }
  0x15   :  { %145 = dma.hbm_to_vmem [thread:$0]  %s138_s28, 256, %s140_s0, [#allocation18], %s7552_s5, %s7552_s5, %s7553_s25  }
  0x16   :  { %s48_s12 = sshll.u32 %s9203_s3, 4  ;;  %s7556_s2 = smov [#allocation3]   ;;  %s49_s12 = int_to_ptr.hbm [resolvable:$true] %s48_s12 }
  0x17   :  { %s7557_s23 = smov [#allocation7]   ;;  %s76_s8 = sshll.u32 %s9207_s7, 4  ;;  %s77_s8 = int_to_ptr.hbm [resolvable:$true] %s76_s8 }
  0x18   :  { %s50_s24 = sshll.u32 %s7557_s23, 4  ;;  %s102_s30 = sshll.u32 %s9209_s9, 4  ;;  %s51_s24 = int_to_ptr.vmem [resolvable:$true] %s50_s24  ;;  %s103_s30 = int_to_ptr.hbm [resolvable:$true] %s102_s30 }
  0x19   :  { %56 = dma.hbm_to_vmem [thread:$0]  %s49_s12, 256, %s51_s24, [#allocation4], %s7552_s5, %s7552_s5, %s7553_s25  }
  0x1a   :  { %s36_s21 = sshll.u32 %s9250_s1, 4  ;;  %s7558_s3 = smov [#allocation10]   ;;  %s37_s21 = int_to_ptr.vmem [resolvable:$true] %s36_s21 }
  0x1b   :  { %39 = dma.vmem_to_smem %s37_s21, 16, %s7556_s2, [#allocation6]  }
  0x1c   :  { %s78_s0 = sshll.u32 %s7558_s3, 4  ;;  %s7559_s10 = smov [#allocation13]   ;;  %s79_s0 = int_to_ptr.vmem [resolvable:$true] %s78_s0 }
  0x1d   :  { %84 = dma.hbm_to_vmem [thread:$0]  %s77_s8, 256, %s79_s0, [#allocation9], %s7552_s5, %s7552_s5, %s7553_s25  }
  0x1e   :  { %s104_s7 = sshll.u32 %s7559_s10, 4  ;;  %s127_s21 = sshll.u32 %s9211_s11, 4  ;;  %s105_s7 = int_to_ptr.vmem [resolvable:$true] %s104_s7  ;;  %s128_s21 = int_to_ptr.hbm [resolvable:$true] %s127_s21 }
  0x1f   :  { %110 = dma.hbm_to_vmem [thread:$0]  %s103_s30, 256, %s105_s7, [#allocation12], %s7552_s5, %s7552_s5, %s7553_s25  }
  0x20   :  { %s152_s22 = sshll.u32 %s9214_s14, 4  ;;  %s7560_s12 = smov [#allocation16]   ;;  %s153_s22 = int_to_ptr.hbm [resolvable:$true] %s152_s22 }
  0x21   :  { %s129_s2 = sshll.u32 %s7560_s12, 4  ;;  %s7561_s23 = smov [#allocation19]   ;;  %s130_s2 = int_to_ptr.vmem [resolvable:$true] %s129_s2 }
  0x22   :  { %132 = dma.hbm_to_vmem [thread:$0]  %s128_s21, 16, %s130_s2, [#allocation15]  }
  0x23   :  { %s154_s24 = sshll.u32 %s7561_s23, 4  ;;  %s167_s11 = sshll.u32 %s9216_s16, 4  ;;  %s155_s24 = int_to_ptr.vmem [resolvable:$true] %s154_s24  ;;  %s168_s11 = int_to_ptr.hbm [resolvable:$true] %s167_s11 }
  0x24   :  { %160 = dma.hbm_to_vmem [thread:$0]  %s153_s22, 256, %s155_s24, [#allocation18], %s7552_s5, %s7552_s5, %s7553_s25  }
  0x25   :  { %s7562_s8 = smov [#allocation20]  }
  0x26   :  { %s169_s28 = sshll.u32 %s7562_s8, 4  ;;  %s170_s28 = int_to_ptr.vmem [resolvable:$true] %s169_s28 }
  0x27   :  { %175 = dma.hbm_to_vmem [thread:$0]  %s168_s11, 512, %s170_s28, [#allocation21], %s7552_s5, %s7552_s5, %s7553_s25  }
  0x28   :  { %7534 = dma.done.wait [#allocation6], 16  }
  0x29   :  { %7535 = vsyncadd [#allocation6], 4294967280 }
  0x2a   :  { %7536 = dma.done.wait [#allocation4], 256  }
  0x2b   :  { %7537 = vsyncadd [#allocation4], 4294967040 }
  0x2c   :  { %7538 = dma.done.wait [#allocation9], 272  }
  0x2d   :  { %7539 = vsyncadd [#allocation9], 4294967024 }
  0x2e   :  { %7540 = dma.done.wait [#allocation12], 768  }
  0x2f   :  { %7541 = vsyncadd [#allocation12], 4294966528 }
  0x30   :  { %7542 = dma.done.wait [#allocation15], 32  }
  0x31   :  { %7543 = vsyncadd [#allocation15], 4294967264 }
  0x32   :  { %7544 = dma.done.wait [#allocation18], 512  }
  0x33   :  { %7545 = vsyncadd [#allocation18], 4294966784 }
  0x34   :  { %7546 = dma.done.wait [#allocation21], 512  }
  0x35   :  { %7547 = vsyncadd [#allocation21], 4294966784 }
  0x36   :  { %222 = sfence }
  0x37   :  { %v6871_v0 = vld [vmem:[%s9204_s4 + $0x18] sm:$0xff]  ;;  %v7726_v1 = vld [vmem:[#allocation7 + $0x8] sm:$0xff]  ;;  %v7732_v3 = vld [vmem:[#allocation7] sm:$0xff]  ;;  %vm399_vm0 = vcmask 261120   ;;  %vm327_vm1 = vcmask 523264   ;;  %v9226_v47 = vmov 0  }
  0x38   :  { %344 = vmatpush.bf16.msra.mxu0 %v6871_v0  ;;  %v6870_v2 = vld [vmem:[%s9204_s4 + $0x10] sm:$0xff]  ;;  %409 = vmatpush.bf16.msra.mxu1 %v7726_v1  ;;  %v7737_v4 = vld [vmem:[%s9217_s17] sm:$0xff]  ;;  %v6869_v6 = vld [vmem:[%s9204_s4 + $0x8] sm:$0xff]  ;;  %vm561_vm2 = vcmask 1041409   ;;  %vm563_vm3 = vcmask 1042434   ;;  %vm565_vm4 = vcmask 1043459  }
  0x39   :  { %v7741_v5 = vpack.c.bf16 %v7737_v4, %v7737_v4  ;;  %v6868_v7 = vld [vmem:[%s9204_s4] sm:$0xff]  ;;  %v6846_v10 = vld [vmem:[#allocation20 + $0x10] sm:$0xff]  ;;  %v6847_v11 = vld [vmem:[#allocation20 + $0x18] sm:$0xff]  ;;  %6910 = vset.pattern.permute.xlu0 %v9226_v47  ;;  %6911 = vset.pattern.permute.xlu1 %v9226_v47  ;;  %vm567_vm5 = vcmask 1044484   ;;  %vm569_vm6 = vcmask 1045509   ;;  %vm571_vm7 = vcmask 1046534  }
  0x3a   :  { %v6844_v8 = vld [vmem:[#allocation20] sm:$0xff]  ;;  %v6845_v9 = vld [vmem:[#allocation20 + $0x8] sm:$0xff]  ;;  %v6913_v16 = vld [vmem:[#allocation8] ss:$0 sm:$0xff]  ;;  %6912 = vset.pattern.permute.xlu2 %v9226_v47  ;;  %vm573_vm8 = vcmask 1047559   ;;  %vm576_vm9 = vcmask 64512  }
  0x3b   :  { %v7759_v12 = vld [vmem:[%s9206_s6 + $0x8] sm:$0xff]  ;;  %v7765_v13 = vld [vmem:[%s9206_s6] sm:$0xff]  ;;  %vm718_vm10 = vcmask 1043456   ;;  %s9259_s12 = sld [smem:[#allocation46_spill]]  ;;  %s7565_s8 = smov 96  }
  0x3c   :  { %345 = vmatpush.bf16.msra.mxu0 %v6870_v2  ;;  %410 = vmatpush.bf16.msra.mxu1 %v7732_v3  ;;  %s1220_s28 = sld [smem:[#allocation3]] }
  0x3d   :  { %490 = vmatpush.bf16.msra.mxu2 %v7759_v12 }
  0x3f   :  { %6458 = vmatmul.msk.bf16.vlgmr.msra.gmra.mxu1 %vm399_vm0, %v7741_v5 }
  0x40   :  { %346 = vmatpush.bf16.msra.mxu0 %v6869_v6 }
  0x41   :  { %491 = vmatpush.bf16.msra.mxu2 %v7765_v13 }
  0x42   :  { %p6558_p0 = scmp.eq.s32.totalorder %s1220_s28, 0 }
  0x43   :  { %s9261_s30 = sld [smem:[#allocation46_spill]] (!%p6558_p0) }
  0x44   :  { %347 = vmatpush.bf16.msra.mxu0 %v6868_v7 }
  0x47   :  { %6446 = vmatmul.msk.bf16.vlgmr.msra.gmra.mxu0 %vm327_vm1, %v6844_v8 }
  0x57   :  { %6447 = vmatmul.msk.bf16.gmra.mxu0 %vm327_vm1, %v6845_v9 }
  0x67   :  { %6448 = vmatmul.msk.bf16.gmra.mxu0 %vm327_vm1, %v6846_v10 }
  0x77   :  { %6449 = vmatmul.msk.bf16.gmra.mxu0 %vm327_vm1, %v6847_v11 }
  0xbc   :  { %v412_v14 = vpop.f32.mrf.mxu1 }
  0xbd   :  { %v417_v18 = vrot.slane %v412_v14, 1  ;;  %v424_v20 = vperm.slane %v412_v14, 0  ;;  %v418_v28 = vrot.slane %v412_v14, 2  ;;  %v419_v32 = vrot.slane %v412_v14, 3 }
  0xbe   :  { %v420_v41 = vrot.slane %v412_v14, 4  ;;  %v421_v45 = vrot.slane %v412_v14, 5  ;;  %v422_v55 = vrot.slane %v412_v14, 6  ;;  %v423_v59 = vrot.slane %v412_v14, 7 }
  0xbf   :  { %v425_v21 = vperm.slane %v417_v18, 0  ;;  %v426_v33 = vperm.slane %v418_v28, 0  ;;  %v427_v37 = vperm.slane %v419_v32, 0 }
  0xc0   :  { %v428_v46 = vperm.slane %v420_v41, 0  ;;  %v429_v51 = vperm.slane %v421_v45, 0  ;;  %v430_v60 = vperm.slane %v422_v55, 0  ;;  %v431_v0 = vperm.slane %v423_v59, 0 }
  0xc4   :  { %v349_v15 = vpop.f32.mrf.mxu0  ;;  %v414_v17 = vpop.f32.mrf.mxu1 }
  0xc5   :  { %v7768_v19 = vadd.f32 %v6913_v16, %v349_v15 }
  0xc7   :  { %9251 = vst [vmem:[#allocation31_spill] sm:$0xff] %v7768_v19  ;;  %v440_v22 = vadd.f32 %v424_v20, %v7768_v19 }
  0xc9   :  { %6917 = vtanh.f32 %v440_v22  ;;  %v381_v22 = vlaneseq }
  0xcc   :  { %v351_v23 = vpop.f32.mrf.mxu0 }
  0xcd   :  { %v7771_v24 = vadd.f32 %v6913_v16, %v351_v23 }
  0xcf   :  { %9252 = vst [vmem:[#allocation32_spill] sm:$0xff] %v7771_v24  ;;  %v441_v25 = vadd.f32 %v425_v21, %v7771_v24  ;;  %v6918_v27 = vpop.eup %6917 }
  0xd1   :  { %6919 = vtanh.f32 %v441_v25 }
  0xd4   :  { %v354_v26 = vpop.f32.mrf.mxu0 }
  0xd5   :  { %v7774_v30 = vadd.f32 %v6913_v16, %v354_v26  ;;  %v7811_v26 = vand.u32 127, %v381_v22 }
  0xd7   :  { %v6920_v29 = vpop.eup %6919  ;;  %9253 = vst [vmem:[#allocation33_spill] sm:$0xff] %v7774_v30  ;;  %v442_v34 = vadd.f32 %v426_v33, %v7774_v30 }
  0xd8   :  { %v456_v31 = vpack.c.bf16 %v6920_v29, %v6918_v27 }
  0xd9   :  { %6921 = vtanh.f32 %v442_v34 }
  0xda   :  { %6467 = vmatmul.msk.bf16.vlgmr.msra.gmra.mxu2 %vm399_vm0, %v456_v31 }
  0xdc   :  { %v356_v35 = vpop.f32.mrf.mxu0 }
  0xdd   :  { %v7778_v36 = vadd.f32 %v6913_v16, %v356_v35 }
  0xdf   :  { %9254 = vst [vmem:[#allocation34_spill] sm:$0xff] %v7778_v36  ;;  %v443_v38 = vadd.f32 %v427_v37, %v7778_v36  ;;  %v6922_v40 = vpop.eup %6921 }
  0xe1   :  { %6923 = vtanh.f32 %v443_v38 }
  0xe4   :  { %v359_v39 = vpop.f32.mrf.mxu0 }
  0xe5   :  { %v7781_v43 = vadd.f32 %v6913_v16, %v359_v39 }
  0xe7   :  { %v6924_v42 = vpop.eup %6923  ;;  %9255 = vst [vmem:[#allocation35_spill] sm:$0xff] %v7781_v43  ;;  %v444_v48 = vadd.f32 %v428_v46, %v7781_v43 }
  0xe8   :  { %v457_v44 = vpack.c.bf16 %v6924_v42, %v6922_v40 }
  0xe9   :  { %6925 = vtanh.f32 %v444_v48 }
  0xea   :  { %6468 = vmatmul.msk.bf16.gmra.mxu2 %vm399_vm0, %v457_v44 }
  0xec   :  { %v361_v49 = vpop.f32.mrf.mxu0 }
  0xed   :  { %v7788_v50 = vadd.f32 %v6913_v16, %v361_v49 }
  0xef   :  { %9256 = vst [vmem:[#allocation36_spill] sm:$0xff] %v7788_v50  ;;  %v445_v52 = vadd.f32 %v429_v51, %v7788_v50  ;;  %v6926_v54 = vpop.eup %6925 }
  0xf1   :  { %6927 = vtanh.f32 %v445_v52 }
  0xf4   :  { %v364_v53 = vpop.f32.mrf.mxu0 }
  0xf5   :  { %v7791_v57 = vadd.f32 %v6913_v16, %v364_v53 }
  0xf7   :  { %v6928_v56 = vpop.eup %6927  ;;  %9257 = vst [vmem:[#allocation37_spill] sm:$0xff] %v7791_v57  ;;  %v446_v61 = vadd.f32 %v430_v60, %v7791_v57 }
  0xf8   :  { %v458_v58 = vpack.c.bf16 %v6928_v56, %v6926_v54 }
  0xf9   :  { %6929 = vtanh.f32 %v446_v61 }
  0xfa   :  { %6469 = vmatmul.msk.bf16.gmra.mxu2 %vm399_vm0, %v458_v58 }
  0xfc   :  { %v366_v62 = vpop.f32.mrf.mxu0 }
  0xfd   :  { %v7795_v63 = vadd.f32 %v6913_v16, %v366_v62 }
  0xff   :  { %9258 = vst [vmem:[#allocation38_spill] sm:$0xff] %v7795_v63  ;;  %v447_v2 = vadd.f32 %v431_v0, %v7795_v63  ;;  %v6930_v6 = vpop.eup %6929 }
 0x101   :  { %6931 = vtanh.f32 %v447_v2 }
 0x107   :  { %v6932_v7 = vpop.eup %6931 }
 0x108   :  { %v459_v8 = vpack.c.bf16 %v6932_v7, %v6930_v6 }
 0x10a   :  { %6470 = vmatmul.msk.bf16.gmra.mxu2 %vm399_vm0, %v459_v8 }
 0x15d   :  { %v493_v9 = vpop.f32.mrf.mxu2 }
 0x15e   :  { %530 = vperm.xlu0 %6910, %v493_v9  }
 0x165   :  { %v495_v10 = vpop.f32.mrf.mxu2 }
 0x166   :  { %533 = vperm.xlu0 %6910, %v495_v10  }
 0x16d   :  { %v498_v11 = vpop.f32.mrf.mxu2 }
 0x16e   :  { %536 = vperm.xlu1 %6911, %v498_v11  }
 0x175   :  { %v500_v14 = vpop.f32.mrf.mxu2 }
 0x176   :  { %539 = vperm.xlu1 %6911, %v500_v14  }
 0x17d   :  { %v7799_v15 = vpop.f32.mrf.mxu2 }
 0x17e   :  { %542 = vperm.xlu2 %6912, %v7799_v15  }
 0x185   :  { %v7802_v16 = vpop.f32.mrf.mxu2 }
 0x186   :  { %545 = vperm.xlu2 %6912, %v7802_v16  }
 0x18d   :  { %v7805_v17 = vpop.f32.mrf.mxu2 }
 0x18e   :  { %548 = vperm.xlu0 %6910, %v7805_v17  }
 0x195   :  { %v7808_v18 = vpop.f32.mrf.mxu2 }
 0x196   :  { %551 = vperm.xlu1 %6911, %v7808_v18  }
 0x1d0   :  { %v531_v20 = vpop.permute.xlu0 %530 }
 0x1d1   :  { %v553_v31 = vperm.slane %v531_v20, %v7811_v26 }
 0x1d8   :  { %v534_v23 = vpop.permute.xlu0 %533  ;;  %v543_v25 = vpop.permute.xlu2 %542 }
 0x1d9   :  { %v554_v28 = vperm.slane %v534_v23, %v7811_v26  ;;  %v557_v38 = vperm.slane %v543_v25, %v7811_v26 }
 0x1db   :  { %v562_v33 = vsel %vm561_vm2, %v554_v28, %v553_v31 }
 0x1e0   :  { %v537_v21 = vpop.permute.xlu1 %536  ;;  %v546_v39 = vpop.permute.xlu2 %545 }
 0x1e1   :  { %v555_v29 = vperm.slane %v537_v21, %v7811_v26  ;;  %v558_v42 = vperm.slane %v546_v39, %v7811_v26 }
 0x1e3   :  { %v564_v34 = vsel %vm563_vm3, %v555_v29, %v562_v33 }
 0x1e8   :  { %v540_v27 = vpop.permute.xlu1 %539 }
 0x1e9   :  { %v556_v32 = vperm.slane %v540_v27, %v7811_v26 }
 0x1eb   :  { %v566_v35 = vsel %vm565_vm4, %v556_v32, %v564_v34 }
 0x1ec   :  { %v568_v40 = vsel %vm567_vm5, %v557_v38, %v566_v35 }
 0x1ed   :  { %v570_v46 = vsel %vm569_vm6, %v558_v42, %v568_v40 }
 0x200   :  { %v549_v37 = vpop.permute.xlu0 %548 }
 0x201   :  { %v559_v41 = vperm.slane %v549_v37, %v7811_v26 }
 0x203   :  { %v572_v48 = vsel %vm571_vm7, %v559_v41, %v570_v46 }
 0x208   :  { %v552_v44 = vpop.permute.xlu1 %551 }
 0x209   :  { %v560_v45 = vperm.slane %v552_v44, %v7811_v26 }
 0x20b   :  { %v574_v49 = vsel %vm573_vm8, %v560_v45, %v572_v48 }
 0x20c   :  { %v577_v51 = vsel %vm576_vm9, %v574_v49, -inf }
 0x20d   :  { %578 = vmax.xlane.f32.xlu2 %v577_v51 }
 0x280   :  { %v579_v52 = vpop.xlane.xlu2 %578 }
 0x281   :  { %v582_v53 = vperm.slane %v579_v52, 1  ;;  %v581_v54 = vperm.slane %v579_v52, 0  ;;  %v584_v58 = vperm.slane %v579_v52, 3  ;;  %v583_v59 = vperm.slane %v579_v52, 2 }
 0x282   :  { %v586_v6 = vperm.slane %v579_v52, 5  ;;  %v585_v8 = vperm.slane %v579_v52, 4  ;;  %v587_v23 = vperm.slane %v579_v52, 6 }
 0x283   :  { %v598_v55 = vsub.f32 %v495_v10, %v582_v53  ;;  %v597_v56 = vsub.f32 %v493_v9, %v581_v54  ;;  %v600_v62 = vsub.f32 %v500_v14, %v584_v58  ;;  %v599_v0 = vsub.f32 %v498_v11, %v583_v59 }
 0x284   :  { %v602_v9 = vsub.f32 %v7802_v16, %v586_v6  ;;  %v601_v10 = vsub.f32 %v7799_v15, %v585_v8  ;;  %v588_v11 = vperm.slane %v579_v52, 7  ;;  %v603_v29 = vsub.f32 %v7805_v17, %v587_v23 }
 0x285   :  { %v607_v60 = vmul.f32 1.442695, %v598_v55  ;;  %v605_v61 = vmul.f32 1.442695, %v597_v56  ;;  %v611_v2 = vmul.f32 1.442695, %v600_v62 }
 0x286   :  { %v609_v7 = vmul.f32 1.442695, %v599_v0  ;;  %v615_v14 = vmul.f32 1.442695, %v602_v9  ;;  %v613_v22 = vmul.f32 1.442695, %v601_v10  ;;  %v604_v28 = vsub.f32 %v7808_v18, %v588_v11 }
 0x287   :  { %6933 = vpow2.f32 %v607_v60  ;;  %v617_v31 = vmul.f32 1.442695, %v603_v29 }
 0x288   :  { %6935 = vpow2.f32 %v605_v61  ;;  %v619_v16 = vmul.f32 1.442695, %v604_v28 }
 0x289   :  { %6937 = vpow2.f32 %v611_v2 }
 0x28a   :  { %6939 = vpow2.f32 %v609_v7 }
 0x28b   :  { %6941 = vpow2.f32 %v615_v14 }
 0x28c   :  { %6943 = vpow2.f32 %v613_v22 }
 0x28d   :  { %v7829_v20 = vpop.eup %6933  ;;  %6945 = vpow2.f32 %v619_v16 }
 0x28e   :  { %v7831_v21 = vpop.eup %6935  ;;  %633 = vperm.xlu1 %6911, %v7829_v20   ;;  %6947 = vpow2.f32 %v617_v31 }
 0x28f   :  { %630 = vperm.xlu0 %6910, %v7831_v21   ;;  %v6938_v25 = vpop.eup %6937 }
 0x290   :  { %v7837_v27 = vpop.eup %6939 }
 0x291   :  { %v7842_v32 = vpop.eup %6941 }
 0x292   :  { %v6944_v15 = vpop.eup %6943 }
 0x293   :  { %v7845_v33 = vpop.eup %6945 }
 0x294   :  { %v6948_v34 = vpop.eup %6947 }
 0x296   :  { %639 = vperm.xlu1 %6911, %v6938_v25  }
 0x297   :  { %636 = vperm.xlu0 %6910, %v7837_v27  }
 0x29e   :  { %645 = vperm.xlu1 %6911, %v7842_v32  }
 0x29f   :  { %642 = vperm.xlu0 %6910, %v6944_v15  }
 0x2a6   :  { %651 = vperm.xlu1 %6911, %v7845_v33  }
 0x2a7   :  { %648 = vperm.xlu0 %6910, %v6948_v34  }
 0x300   :  { %v634_v18 = vpop.permute.xlu1 %633 }
 0x301   :  { %v631_v35 = vpop.permute.xlu0 %630  ;;  %v654_v38 = vperm.slane %v634_v18, %v7811_v26 }
 0x302   :  { %v653_v39 = vperm.slane %v631_v35, %v7811_v26 }
 0x304   :  { %v661_v44 = vsel %vm561_vm2, %v654_v38, %v653_v39 }
 0x308   :  { %v640_v37 = vpop.permute.xlu1 %639 }
 0x309   :  { %v637_v17 = vpop.permute.xlu0 %636  ;;  %v656_v45 = vperm.slane %v640_v37, %v7811_v26 }
 0x30a   :  { %v655_v40 = vperm.slane %v637_v17, %v7811_v26 }
 0x30c   :  { %v662_v46 = vsel %vm563_vm3, %v655_v40, %v661_v44 }
 0x30d   :  { %v663_v51 = vsel %vm565_vm4, %v656_v45, %v662_v46 }
 0x310   :  { %v646_v41 = vpop.permute.xlu1 %645 }
 0x311   :  { %v643_v42 = vpop.permute.xlu0 %642  ;;  %v658_v49 = vperm.slane %v646_v41, %v7811_v26 }
 0x312   :  { %v657_v48 = vperm.slane %v643_v42, %v7811_v26 }
 0x314   :  { %v664_v52 = vsel %vm567_vm5, %v657_v48, %v663_v51 }
 0x315   :  { %v665_v58 = vsel %vm569_vm6, %v658_v49, %v664_v52 }
 0x318   :  { %v652_v53 = vpop.permute.xlu1 %651 }
 0x319   :  { %v660_v54 = vperm.slane %v652_v53, %v7811_v26  ;;  %v649_v55 = vpop.permute.xlu0 %648 }
 0x31a   :  { %v659_v56 = vperm.slane %v649_v55, %v7811_v26 }
 0x31c   :  { %v666_v59 = vsel %vm571_vm7, %v659_v56, %v665_v58  ;;  %v224_v58 = vld [vmem:[#allocation20] sm:$0xf] }
 0x31d   :  { %v667_v60 = vsel %vm573_vm8, %v660_v54, %v666_v59  ;;  %v7870_v59 = vsel %vm718_vm10, %v224_v58, 0 }
 0x31e   :  { %v669_v61 = vsel %vm576_vm9, %v667_v60, 0.0  ;;  %729 = vmatpush.bf16.msra.mxu3 %v7870_v59 }
 0x31f   :  { %670 = vadd.xlane.f32.xlu0 %v669_v61 }
 0x392   :  { %v671_v62 = vpop.xlane.xlu0 %670 }
 0x393   :  { %6949 = vrcp.f32 %v671_v62 }
 0x399   :  { %v6950_v0 = vpop.eup %6949 }
 0x39a   :  { %v675_v2 = vperm.slane %v6950_v0, 1  ;;  %v674_v6 = vperm.slane %v6950_v0, 0  ;;  %v678_v7 = vperm.slane %v6950_v0, 4  ;;  %v677_v8 = vperm.slane %v6950_v0, 3 }
 0x39b   :  { %v680_v16 = vperm.slane %v6950_v0, 6  ;;  %v676_v31 = vperm.slane %v6950_v0, 2  ;;  %v681_v52 = vperm.slane %v6950_v0, 7 }
 0x39c   :  { %v691_v9 = vmul.f32 %v7829_v20, %v675_v2  ;;  %v690_v10 = vmul.f32 %v7831_v21, %v674_v6  ;;  %v694_v22 = vmul.f32 %v6944_v15, %v678_v7  ;;  %v693_v23 = vmul.f32 %v6938_v25, %v677_v8  ;;  %v228_v8 = vld [vmem:[#allocation20 + $0x10] sm:$0xf] }
 0x39d   :  { %v696_v40 = vmul.f32 %v6948_v34, %v680_v16  ;;  %v692_v20 = vmul.f32 %v7837_v27, %v676_v31  ;;  %v679_v21 = vperm.slane %v6950_v0, 5  ;;  %v697_v27 = vmul.f32 %v7845_v33, %v681_v52  ;;  %v226_v33 = vld [vmem:[#allocation20 + $0x8] sm:$0xf]  ;;  %v227_v0 = vld [vmem:[#allocation20 + $0xc] sm:$0xf] }
 0x39e   :  { %v699_v14 = vpack.c.bf16 %v691_v9, %v691_v9  ;;  %v698_v11 = vpack.c.bf16 %v690_v10, %v690_v10  ;;  %v702_v37 = vpack.c.bf16 %v694_v22, %v694_v22  ;;  %v701_v17 = vpack.c.bf16 %v693_v23, %v693_v23  ;;  %v229_v23 = vld [vmem:[#allocation20 + $0x14] sm:$0xf] }
 0x39f   :  { %v704_v15 = vpack.c.bf16 %v696_v40, %v696_v40  ;;  %v700_v25 = vpack.c.bf16 %v692_v20, %v692_v20  ;;  %v695_v46 = vmul.f32 %v7842_v32, %v679_v21  ;;  %v705_v54 = vpack.c.bf16 %v697_v27, %v697_v27  ;;  %v225_v32 = vld [vmem:[#allocation20 + $0x4] sm:$0xf]  ;;  %v231_v40 = vld [vmem:[#allocation20 + $0x1c] sm:$0xf] }
 0x3a0   :  { %v736_v28 = vunpack.c.l.b16 %v699_v14  ;;  %v707_v29 = vunpack.c.l.b16 %v698_v11  ;;  %v820_v38 = vunpack.c.l.b16 %v702_v37  ;;  %v792_v39 = vunpack.c.l.b16 %v701_v17  ;;  %v7901_v37 = vld [vmem:[#allocation13 + $0x8] sm:$0xff]  ;;  %v7928_v27 = vld [vmem:[#allocation10] sm:$0xff] }
 0x3a1   :  { %v876_v44 = vunpack.c.l.b16 %v704_v15  ;;  %v764_v45 = vunpack.c.l.b16 %v700_v25  ;;  %v703_v51 = vpack.c.bf16 %v695_v46, %v695_v46  ;;  %v904_v55 = vunpack.c.l.b16 %v705_v54  ;;  %1071 = vmatpush.bf16.msrb.mxu0 %v7901_v37 }
 0x3a2   :  { %v6473_v18 = vunpack.i.l.s16 %v736_v28  ;;  %v6471_v35 = vunpack.i.l.s16 %v707_v29  ;;  %v6479_v41 = vunpack.i.l.s16 %v820_v38  ;;  %v6477_v42 = vunpack.i.l.s16 %v792_v39  ;;  %v230_v28 = vld [vmem:[#allocation20 + $0x18] sm:$0xf] }
 0x3a3   :  { %v6483_v48 = vunpack.i.l.s16 %v876_v44  ;;  %v6475_v49 = vunpack.i.l.s16 %v764_v45  ;;  %v848_v34 = vunpack.c.l.b16 %v703_v51  ;;  %v6485_v56 = vunpack.i.l.s16 %v904_v55 }
 0x3a4   :  { %740 = vperm.xlu2 %6912, %v6473_v18   ;;  %711 = vperm.xlu1 %6911, %v6471_v35   ;;  %v7874_v60 = vsel %vm718_vm10, %v225_v32, 0  ;;  %v7878_v61 = vsel %vm718_vm10, %v226_v33, 0  ;;  %v7883_v7 = vsel %vm718_vm10, %v227_v0, 0  ;;  %v7886_v9 = vsel %vm718_vm10, %v228_v8, 0  ;;  %v7931_v32 = vld [vmem:[#allocation11 + $0x18] sm:$0xff]  ;;  %v7936_v33 = vld [vmem:[%s9213_s13 + $0x18] sm:$0xff] }
 0x3a5   :  { %v6481_v53 = vunpack.i.l.s16 %v848_v34  ;;  %757 = vmatpush.bf16.msrb.mxu3 %v7874_v60  ;;  %785 = vmatpush.bf16.msrb.mxu1 %v7878_v61  ;;  %v7894_v18 = vsel %vm718_vm10, %v229_v23, 0  ;;  %v7897_v35 = vsel %vm718_vm10, %v230_v28, 0  ;;  %v7925_v34 = vld [vmem:[#allocation10 + $0x8] sm:$0xff]  ;;  %v7950_v8 = vld [vmem:[%s9213_s13 + $0x10] sm:$0xff] }
 0x3a6   :  { %1039 = vmatpush.bf16.msrb.mxu2 %v7925_v34  ;;  %v7965_v28 = vld [vmem:[#allocation11] sm:$0xff] }
 0x3a9   :  { %841 = vmatpush.bf16.msra.mxu1 %v7886_v9 }
 0x3aa   :  { %1040 = vmatpush.bf16.msrb.mxu2 %v7928_v27 }
 0x3ac   :  { %824 = vperm.xlu2 %6912, %v6479_v41   ;;  %796 = vperm.xlu1 %6911, %v6477_v42   ;;  %v7909_v41 = vsel %vm718_vm10, %v231_v40, 0  ;;  %v7913_v42 = vld [vmem:[#allocation13] sm:$0xff] }
 0x3ad   :  { %1072 = vmatpush.bf16.msrb.mxu0 %v7913_v42 }
 0x3b0   :  { %6521 = vmatmul.msk.bf16.vlgmr.msrb.gmra.mxu0 %vm399_vm0, %v7741_v5 }
 0x3b4   :  { %880 = vperm.xlu2 %6912, %v6483_v48   ;;  %768 = vperm.xlu1 %6911, %v6475_v49  }
 0x3bc   :  { %852 = vperm.xlu1 %6911, %v6481_v53  }
 0x3c4   :  { %908 = vperm.xlu1 %6911, %v6485_v56  }
 0x3fe   :  { %v741_v14 = vpop.permute.xlu2 %740 }
 0x3ff   :  { %v742_v11 = vperm.slane %v741_v14, %v7811_v26 }
 0x401   :  { %v743_v16 = vpack.c.b16 %v742_v11, %v742_v11  ;;  %v7956_v11 = vld [vmem:[#allocation11 + $0x8] sm:$0xff] }
 0x406   :  { %v825_v17 = vpop.permute.xlu2 %824 }
 0x407   :  { %v826_v38 = vperm.slane %v825_v17, %v7811_v26 }
 0x409   :  { %v827_v20 = vpack.c.b16 %v826_v38, %v826_v38 }
 0x40e   :  { %v881_v15 = vpop.permute.xlu2 %880 }
 0x40f   :  { %v882_v44 = vperm.slane %v881_v15, %v7811_v26 }
 0x411   :  { %v883_v46 = vpack.c.b16 %v882_v44, %v882_v44 }
 0x416   :  { %v712_v62 = vpop.permute.xlu1 %711 }
 0x417   :  { %v713_v2 = vperm.slane %v712_v62, %v7811_v26  ;;  %v385_v62 = vld [vmem:[%s9259_s12] sm:$0xff] }
 0x418   :  { %v7941_v0 = vpack.c.bf16 %v385_v62, %v385_v62 }
 0x419   :  { %v714_v6 = vpack.c.b16 %v713_v2, %v713_v2 }
 0x41a   :  { %6512 = vmatmul.msk.bf16.vlgmr.msrb.gmra.mxu2 %vm399_vm0, %v7941_v0 }
 0x41b   :  { %6472 = vmatmul.msk.bf16.vlgmr.msra.gmra.mxu3 %vm576_vm9, %v714_v6  ;;  %v7945_v6 = vld [vmem:[#allocation11 + $0x10] sm:$0xff] }
 0x41c   :  { %813 = vmatpush.bf16.msra.mxu3 %v7883_v7 }
 0x41e   :  { %v797_v10 = vpop.permute.xlu1 %796 }
 0x41f   :  { %v798_v39 = vperm.slane %v797_v10, %v7811_v26 }
 0x421   :  { %v799_v21 = vpack.c.b16 %v798_v39, %v798_v39 }
 0x426   :  { %v769_v22 = vpop.permute.xlu1 %768 }
 0x427   :  { %v770_v29 = vperm.slane %v769_v22, %v7811_v26  ;;  %v7961_v22 = vld [vmem:[%s9213_s13 + $0x8] sm:$0xff] }
 0x429   :  { %v771_v31 = vpack.c.b16 %v770_v29, %v770_v29  ;;  %v7970_v29 = vld [vmem:[%s9213_s13] sm:$0xff]  ;;  %s7564_s13 = smov 32  }
 0x42b   :  { %6474 = vmatmul.msk.bf16.vlgmr.msrb.gmra.mxu3 %vm576_vm9, %v743_v16  ;;  %6476 = vmatmul.msk.bf16.vlgmr.msrb.gmra.mxu1 %vm576_vm9, %v771_v31  ;;  %v7972_v31 = vld [vmem:[#allocation16] ss:$0 sm:$0xff] }
 0x42c   :  { %869 = vmatpush.bf16.msrb.mxu3 %v7894_v18  ;;  %897 = vmatpush.bf16.msrb.mxu1 %v7897_v35 }
 0x42d   :  { %v1074_v17 = vpop.f32.mrf.mxu0 }
 0x42e   :  { %v853_v25 = vpop.permute.xlu1 %852  ;;  %v1075_v38 = vadd.f32 %v7972_v31, %v1074_v17 }
 0x42f   :  { %v854_v45 = vperm.slane %v853_v25, %v7811_v26 }
 0x430   :  { %1099 = vrot.lane.b32.xlu1 %v1075_v38, %s7552_s5 }
 0x431   :  { %v855_v48 = vpack.c.b16 %v854_v45, %v854_v45 }
 0x436   :  { %v909_v49 = vpop.permute.xlu1 %908 }
 0x437   :  { %v910_v51 = vperm.slane %v909_v49, %v7811_v26 }
 0x438   :  { %1116 = vrot.lane.b32.xlu1 %v7737_v4, %s7564_s13 }
 0x439   :  { %v911_v52 = vpack.c.b16 %v910_v51, %v910_v51 }
 0x43b   :  { %6478 = vmatmul.msk.bf16.vlgmr.msra.gmra.mxu3 %vm576_vm9, %v799_v21  ;;  %6480 = vmatmul.msk.bf16.vlgmr.msra.gmra.mxu1 %vm576_vm9, %v827_v20  ;;  %v1076_v21 = vpop.f32.mrf.mxu0 }
 0x43c   :  { %925 = vmatpush.bf16.msra.mxu3 %v7909_v41  ;;  %1009 = vmatpush.bf16.msra.mxu1 %v7931_v32 }
 0x440   :  { %1010 = vmatpush.bf16.msra.mxu1 %v7945_v6 }
 0x444   :  { %1011 = vmatpush.bf16.msra.mxu1 %v7956_v11 }
 0x448   :  { %1012 = vmatpush.bf16.msra.mxu1 %v7965_v28 }
 0x44b   :  { %6482 = vmatmul.msk.bf16.vlgmr.msrb.gmra.mxu3 %vm576_vm9, %v855_v48  ;;  %6484 = vmatmul.msk.bf16.vlgmr.msrb.gmra.mxu1 %vm576_vm9, %v883_v46 }
 0x44c   :  { %1150 = vmatpush.bf16.msrb.mxu3 %v7936_v33 }
 0x450   :  { %1151 = vmatpush.bf16.msrb.mxu3 %v7950_v8 }
 0x454   :  { %1152 = vmatpush.bf16.msrb.mxu3 %v7961_v22 }
 0x458   :  { %1153 = vmatpush.bf16.msrb.mxu3 %v7970_v29 }
 0x45b   :  { %6486 = vmatmul.msk.bf16.vlgmr.msra.gmra.mxu3 %vm576_vm9, %v911_v52 }
 0x49e   :  { %v731_v5 = vpop.f32.mrf.mxu3 }
 0x49f   :  { %v939_v45 = vpack.c.bf16 %v731_v5, %v731_v5 }
 0x4a6   :  { %v733_v53 = vpop.f32.mrf.mxu3 }
 0x4a8   :  { %v787_v54 = vpop.f32.mrf.mxu1 }
 0x4a9   :  { %v941_v44 = vpack.c.bf16 %v787_v54, %v787_v54 }
 0x4ab   :  { %v957_v51 = vunpack.c.l.b16 %v941_v44 }
 0x4ae   :  { %v759_v55 = vpop.f32.mrf.mxu3 }
 0x4af   :  { %v940_v39 = vpack.c.bf16 %v759_v55, %v759_v55 }
 0x4b0   :  { %v789_v56 = vpop.f32.mrf.mxu1 }
 0x4b1   :  { %v956_v15 = vunpack.c.l.b16 %v940_v39  ;;  %v955_v56 = vunpack.c.l.b16 %v939_v45 }
 0x4b3   :  { %v963_v46 = vrot.slane %v956_v15, 7 }
 0x4b5   :  { %v964_v55 = vsel %vm561_vm2, %v963_v46, %v955_v56 }
 0x4b6   :  { %v761_v58 = vpop.f32.mrf.mxu3 }
 0x4b8   :  { %v843_v2 = vpop.f32.mrf.mxu1 }
 0x4b9   :  { %v943_v52 = vpack.c.bf16 %v843_v2, %v843_v2 }
 0x4be   :  { %v815_v10 = vpop.f32.mrf.mxu3 }
 0x4bf   :  { %v942_v25 = vpack.c.bf16 %v815_v10, %v815_v10 }
 0x4c0   :  { %v845_v14 = vpop.f32.mrf.mxu1 }
 0x4c1   :  { %v958_v48 = vunpack.c.l.b16 %v942_v25  ;;  %v965_v14 = vrot.slane %v957_v51, 6 }
 0x4c3   :  { %v967_v58 = vrot.slane %v958_v48, 5  ;;  %v966_v5 = vsel %vm563_vm3, %v965_v14, %v964_v55 }
 0x4c5   :  { %v968_v54 = vsel %vm565_vm4, %v967_v58, %v966_v5 }
 0x4c6   :  { %v817_v23 = vpop.f32.mrf.mxu3 }
 0x4c7   :  { %v959_v23 = vunpack.c.l.b16 %v943_v52  ;;  %v7989_v52 = vld [vmem:[#allocation14] ss:$0 sm:$0xff] }
 0x4c8   :  { %v899_v16 = vpop.f32.mrf.mxu1 }
 0x4c9   :  { %v945_v10 = vpack.c.bf16 %v899_v16, %v899_v16  ;;  %v969_v4 = vrot.slane %v959_v23, 4 }
 0x4cb   :  { %v961_v39 = vunpack.c.l.b16 %v945_v10  ;;  %v970_v2 = vsel %vm567_vm5, %v969_v4, %v968_v54 }
 0x4cd   :  { %v973_v25 = vrot.slane %v961_v39, 2 }
 0x4ce   :  { %v871_v40 = vpop.f32.mrf.mxu3 }
 0x4cf   :  { %v944_v49 = vpack.c.bf16 %v871_v40, %v871_v40 }
 0x4d0   :  { %v901_v20 = vpop.f32.mrf.mxu1 }
 0x4d1   :  { %v960_v62 = vunpack.c.l.b16 %v944_v49  ;;  %v1042_v49 = vpop.f32.mrf.mxu2 }
 0x4d3   :  { %v971_v17 = vrot.slane %v960_v62, 3 }
 0x4d5   :  { %v972_v21 = vsel %vm569_vm6, %v971_v17, %v970_v2 }
 0x4d6   :  { %v873_v53 = vpop.f32.mrf.mxu3  ;;  %v974_v45 = vsel %vm571_vm7, %v973_v25, %v972_v21  ;;  %v1100_v25 = vpop.permute.xlu1 %1099 }
 0x4d9   :  { %v1044_v51 = vpop.f32.mrf.mxu2 }
 0x4da   :  { %v7996_v51 = vld [vmem:[#allocation17 + $0x8] sm:$0xff] }
 0x4db   :  { %1183 = vmatpush.bf16.msrb.mxu1 %v7996_v51 }
 0x4de   :  { %v927_v20 = vpop.f32.mrf.mxu3 }
 0x4df   :  { %v946_v40 = vpack.c.bf16 %v927_v20, %v927_v20 }
 0x4e1   :  { %v962_v15 = vunpack.c.l.b16 %v946_v40 }
 0x4e3   :  { %v975_v44 = vrot.slane %v962_v15, 1 }
 0x4e5   :  { %v976_v16 = vsel %vm573_vm8, %v975_v44, %v974_v45 }
 0x4e6   :  { %v977_v46 = vpack.c.b16 %v976_v16, %v976_v16  ;;  %v929_v48 = vpop.f32.mrf.mxu3 }
 0x4e8   :  { %6503 = vmatmul.msk.bf16.vlgmr.msra.gmra.mxu1 %vm327_vm1, %v977_v46  ;;  %6539 = vmatmul.msk.bf16.vlgmr.msrb.gmra.mxu3 %vm327_vm1, %v977_v46 }
 0x565   :  { %v1014_v53 = vpop.f32.mrf.mxu1 }
 0x566   :  { %v1043_v56 = vadd.f32 %v1042_v49, %v1014_v53  ;;  %v7994_v49 = vld [vmem:[#allocation19 + $0x8] sm:$0xff]  ;;  %v7999_v53 = vld [vmem:[#allocation19] sm:$0xff] }
 0x567   :  { %1208 = vmatpush.bf16.msra.mxu2 %v7994_v49 }
 0x568   :  { %v1049_v55 = vadd.f32 %v7989_v52, %v1043_v56  ;;  %v8002_v56 = vld [vmem:[#allocation17] sm:$0xff] }
 0x569   :  { %1184 = vmatpush.bf16.msrb.mxu1 %v8002_v56 }
 0x56a   :  { %v1078_v58 = vadd.f32 %v1075_v38, %v1049_v55 }
 0x56b   :  { %v1155_v62 = vpop.f32.mrf.mxu3  ;;  %1209 = vmatpush.bf16.msra.mxu2 %v7999_v53 }
 0x56c   :  { %v6522_v14 = vmul.f32 -1.442695, %v1078_v58 }
 0x56d   :  { %v1016_v23 = vpop.f32.mrf.mxu1 }
 0x56e   :  { %6951 = vpow2.f32 %v6522_v14  ;;  %6557 = vmatmul.msk.bf16.vlgmr.msra.gmra.mxu2 %vm399_vm0, %v7941_v0 }
 0x573   :  { %v1157_v10 = vpop.f32.mrf.mxu3 }
 0x574   :  { %v6952_v5 = vpop.eup %6951 }
 0x575   :  { %v1082_v54 = vadd.f32 1.0, %v6952_v5 }
 0x577   :  { %6953 = vrcp.f32 %v1082_v54  ;;  %v1094_v20 = vand.u32 2147483648, %v1082_v54  ;;  %v1092_v2 = vand.u32 2147483647, %v1082_v54  ;;  %vm1088_vm12 = vweird.f32 %v1082_v54 }
 0x579   :  { %v1095_v15 = vor.u32 1.1754944e-38, %v1094_v20  ;;  %vm1093_vm14 = vcmp.eq.f32.partialorder %v1092_v2, 8.507059e+37 }
 0x57d   :  { %v6954_v17 = vpop.eup %6953 }
 0x57e   :  { %v1084_v4 = vmul.f32 %v6954_v17, %v1082_v54  ;;  %vm1089_vm11 = vweird.f32 %v6954_v17 }
 0x57f   :  { %vm1090_vm13 = vmor %vm1088_vm12, %vm1089_vm11 }
 0x580   :  { %v1085_v39 = vsub.f32 1.0, %v1084_v4 }
 0x582   :  { %v1086_v40 = vmul.f32 %v6954_v17, %v1085_v39 }
 0x584   :  { %v1087_v21 = vadd.f32 %v6954_v17, %v1086_v40  ;;  %v8020_v40 = vld [vmem:[%s9215_s15] ss:$0 sm:$0xff] }
 0x586   :  { %v1091_v38 = vsel %vm1090_vm13, %v6954_v17, %v1087_v21 }
 0x587   :  { %v1096_v44 = vsel %vm1093_vm14, %v1095_v15, %v1091_v38 }
 0x588   :  { %v1102_v45 = vmul.f32 %v1100_v25, %v1096_v44  ;;  %v1109_v58 = vsub.f32 1.0, %v1096_v44 }
 0x58a   :  { %1104 = vrot.lane.b32.xlu2 %v1102_v45, %s7552_s5 }
 0x5e4   :  { %v1105_v16 = vpop.permute.xlu2 %1104 }
 0x5e5   :  { %v1107_v46 = vadd.f32 %v1105_v16, %v1049_v55  ;;  %v1117_v55 = vpop.permute.xlu1 %1116 }
 0x5e6   :  { %v1119_v23 = vmul.f32 %v1117_v55, %v1096_v44 }
 0x5e7   :  { %6955 = vtanh.f32 %v1107_v46 }
 0x5ed   :  { %v6956_v48 = vpop.eup %6955 }
 0x5ee   :  { %1111 = vrot.lane.b32.xlu0 %v6956_v48, %s7565_s8 }
 0x5f1   :  { %v1211_v4 = vpop.f32.mrf.mxu2 }
 0x5f9   :  { %v1213_v0 = vpop.f32.mrf.mxu2 }
 0x660   :  { %v1112_v14 = vpop.permute.xlu0 %1111 }
 0x661   :  { %v1114_v10 = vmul.f32 %v1112_v14, %v1109_v58 }
 0x663   :  { %v8008_v5 = vadd.f32 %v1119_v23, %v1114_v10 }
 0x665   :  { %v1121_v54 = vpack.c.bf16 %v8008_v5, %v8008_v5 }
 0x667   :  { %1160 = vrot.lane.b32.xlu2 %v1121_v54, %s7565_s8 }
 0x6c1   :  { %v8013_v17 = vpop.permute.xlu2 %1160 }
 0x6c2   :  { %6548 = vmatmul.msk.bf16.vlgmr.msrb.gmra.mxu1 %vm399_vm0, %v8013_v17 }
 0x73f   :  { %v1186_v39 = vpop.f32.mrf.mxu1 }
 0x740   :  { %v1187_v20 = vadd.f32 %v1186_v39, %v1155_v62 }
 0x742   :  { %v1215_v2 = vadd.f32 %v1211_v4, %v1187_v20 }
 0x743   :  { %1224 = sbr.rel (%p6558_p0) target bundleno = 1866 (0x74a), region = 121 }
 0x744   :  { %v8023_v21 = vadd.f32 %v8020_v40, %v1215_v2 }
 0x746   :  { %9260 = vst [vmem:[#allocation39_spill] sm:$0xff] %v8023_v21 }
 0x747   :  { %v1188_v15 = vpop.f32.mrf.mxu1 }
 0x748   :  { %v6559_v38 = vld [vmem:[%s9261_s30 + $0x8] sm:$0xff] }
 0x749   :  { %1227 = vst.msk [vmem:[#allocation2] sm:$0xff] %vm399_vm0, %v6559_v38 }
 0x74a PF:  { %p6560_p1 = scmp.ne.s32.totalorder %s1220_s28, 0 }
 0x74b   :  { %s9262_s0 = sld [smem:[#allocation47_spill]] (!%p6560_p1) }
 0x74c   :  { %1231 = sbr.rel (%p6560_p1) target bundleno = 2373 (0x945), region = 125 }
 0x751   :  { %v1232_v62 = vsel %vm399_vm0, %v8023_v21, -inf  ;;  %v6873_v23 = vld [vmem:[%s9262_s0 + $0x8] sm:$0xff]  ;;  %v6872_v10 = vld [vmem:[%s9262_s0] sm:$0xff]  ;;  %v7566_v2 = vmov 0.0  }
 0x752   :  { %1233 = vmax.xlane.f32.xlu0 %v1232_v62  ;;  %1280 = vmatpush.bf16.msra.mxu0 %v6873_v23 }
 0x756   :  { %1281 = vmatpush.bf16.msra.mxu0 %v6872_v10 }
 0x7c5   :  { %v1234_v25 = vpop.xlane.xlu0 %1233 }
 0x7c6   :  { %vm1235_vm15 = vcmp.eq.f32.partialorder %v8023_v21, %v1234_v25 }
 0x7c7   :  { %v1236_v44 = vsel %vm1235_vm15, %v7811_v26, 32 }
 0x7c8   :  { %v1237_v45 = vsel %vm399_vm0, %v1236_v44, 2147483647 }
 0x7c9   :  { %v1239_v16 = vshra.s32 %v1237_v45, 16  ;;  %v1238_v48 = vand.u32 65535, %v1237_v45 }
 0x7cb   :  { %v1241_v46 = vcvt.s32.f32 %v1239_v16  ;;  %v1240_v58 = vcvt.s32.f32 %v1238_v48 }
 0x7cd   :  { %1242 = vmin.xlane.f32.xlu0 %v1241_v46 }
 0x840   :  { %v1243_v55 = vpop.xlane.xlu0 %1242 }
 0x841   :  { %vm1244_vm10 = vcmp.eq.f32.partialorder %v1241_v46, %v1243_v55  ;;  %v1249_v54 = vcvt.f32.s32 %v1243_v55 }
 0x842   :  { %v1245_v14 = vsel %vm1244_vm10, %v1240_v58, inf }
 0x843   :  { %1246 = vmin.xlane.f32.xlu1 %v1245_v14  ;;  %v1250_v0 = vshll.u32 %v1249_v54, 16 }
 0x8b6   :  { %v1247_v4 = vpop.xlane.xlu1 %1246 }
 0x8b7   :  { %v1248_v39 = vcvt.f32.s32 %v1247_v4 }
 0x8b9   :  { %v1251_v20 = vadd.s32 %v1250_v0, %v1248_v39 }
 0x8bb   :  { %vm1252_vm11 = vcmp.eq.s32.totalorder %v7811_v26, %v1251_v20 }
 0x8bc   :  { %v1253_v15 = vsel %vm1252_vm11, 1.0, %v7566_v2 }
 0x8bd   :  { %v1254_v38 = vpack.c.bf16 %v1253_v15, %v1253_v15 }
 0x8bf   :  { %6569 = vmatmul.msk.bf16.vlgmr.msra.gmra.mxu0 %vm399_vm0, %v1254_v38 }
 0x93c   :  { %v1283_v62 = vpop.f32.mrf.mxu0 }
 0x93d   :  { %v1287_v25 = vmul.f32 5.656854, %v1283_v62 }
 0x93f   :  { %1288 = vst.msk [vmem:[#allocation2] sm:$0xff] %vm399_vm0, %v1287_v25 }
 0x944   :  { %v1285_v44 = vpop.f32.mrf.mxu0 }
 0x945 PF:  { %1297 = vmatpush.bf16.msra.mxu0 %v7726_v1  ;;  %1366 = vmatpush.bf16.msra.mxu1 %v7759_v12  ;;  %s6598_s19 = sld [smem:[#allocation3 + $0x1]] }
 0x946   :  { %6957 = vset.pattern.permute.xlu0 %v9226_v47  ;;  %6958 = vset.pattern.permute.xlu1 %v9226_v47 }
 0x947   :  { %6959 = vset.pattern.permute.xlu2 %v9226_v47  ;;  %1618 = vmatpush.bf16.msra.mxu3 %v7874_v60 }
 0x948   :  { %1593 = vmatpush.bf16.msra.mxu2 %v7870_v59 }
 0x949   :  { %1298 = vmatpush.bf16.msra.mxu0 %v7732_v3  ;;  %1367 = vmatpush.bf16.msra.mxu1 %v7765_v13 }
 0x94b   :  { %1668 = vmatpush.bf16.msrb.mxu3 %v7883_v7  ;;  %p6599_p2 = scmp.eq.s32.totalorder %s6598_s19, 0 }
 0x94c   :  { %1643 = vmatpush.bf16.msrb.mxu2 %v7878_v61  ;;  %6570 = vmatmul.msk.bf16.vlgmr.msra.gmra.mxu0 %vm399_vm0, %v8013_v17  ;;  %s9264_s4 = sld [smem:[#allocation46_spill]] (!%p6599_p2) }
 0x94d   :  { %1693 = vmatpush.bf16.msrb.mxu0 %v7886_v9 }
 0x951   :  { %1768 = vmatpush.bf16.msra.mxu0 %v7909_v41 }
 0x9c9   :  { %v1300_v45 = vpop.f32.mrf.mxu0 }
 0x9ca   :  { %v1305_v16 = vrot.slane %v1300_v45, 1  ;;  %v1312_v46 = vperm.slane %v1300_v45, 0  ;;  %v1306_v23 = vrot.slane %v1300_v45, 2  ;;  %v1307_v10 = vrot.slane %v1300_v45, 3 }
 0x9cb   :  { %v1308_v38 = vrot.slane %v1300_v45, 4  ;;  %v1309_v62 = vrot.slane %v1300_v45, 5 }
 0x9cc   :  { %v1313_v48 = vperm.slane %v1305_v16, 0  ;;  %v1328_v55 = vadd.f32 %v1312_v46, %v7768_v19  ;;  %v1314_v4 = vperm.slane %v1306_v23, 0  ;;  %v1315_v39 = vperm.slane %v1307_v10, 0 }
 0x9cd   :  { %v1316_v16 = vperm.slane %v1308_v38, 0  ;;  %v1317_v46 = vperm.slane %v1309_v62, 0  ;;  %v1311_v23 = vrot.slane %v1300_v45, 7 }
 0x9ce   :  { %v1329_v58 = vadd.f32 %v1313_v48, %v7771_v24  ;;  %6960 = vtanh.f32 %v1328_v55  ;;  %v1330_v2 = vadd.f32 %v1314_v4, %v7774_v30  ;;  %v1331_v15 = vadd.f32 %v1315_v39, %v7778_v36 }
 0x9cf   :  { %v1332_v55 = vadd.f32 %v1316_v16, %v7781_v43 }
 0x9d0   :  { %6962 = vtanh.f32 %v1329_v58  ;;  %v1333_v58 = vadd.f32 %v1317_v46, %v7788_v50 }
 0x9d1   :  { %v1302_v14 = vpop.f32.mrf.mxu0  ;;  %6964 = vtanh.f32 %v1330_v2 }
 0x9d2   :  { %6966 = vtanh.f32 %v1331_v15  ;;  %v1310_v14 = vrot.slane %v1300_v45, 6 }
 0x9d3   :  { %6968 = vtanh.f32 %v1332_v55 }
 0x9d4   :  { %v6961_v54 = vpop.eup %6960  ;;  %6970 = vtanh.f32 %v1333_v58  ;;  %v1318_v4 = vperm.slane %v1310_v14, 0 }
 0x9d6   :  { %v6963_v0 = vpop.eup %6962 }
 0x9d7   :  { %v1344_v20 = vpack.c.bf16 %v6963_v0, %v6961_v54  ;;  %v6965_v25 = vpop.eup %6964  ;;  %v1319_v0 = vperm.slane %v1311_v23, 0 }
 0x9d8   :  { %v6967_v44 = vpop.eup %6966 }
 0x9d9   :  { %6571 = vmatmul.msk.bf16.vlgmr.msra.gmra.mxu1 %vm399_vm0, %v1344_v20  ;;  %v1345_v48 = vpack.c.bf16 %v6967_v44, %v6965_v25  ;;  %v6969_v10 = vpop.eup %6968  ;;  %v1334_v20 = vadd.f32 %v1318_v4, %v7791_v57  ;;  %v1335_v2 = vadd.f32 %v1319_v0, %v7795_v63 }
 0x9da   :  { %v6971_v54 = vpop.eup %6970 }
 0x9db   :  { %v1346_v39 = vpack.c.bf16 %v6971_v54, %v6969_v10  ;;  %6972 = vtanh.f32 %v1334_v20 }
 0x9dc   :  { %6974 = vtanh.f32 %v1335_v2 }
 0x9e1   :  { %v6973_v15 = vpop.eup %6972 }
 0x9e2   :  { %v6975_v38 = vpop.eup %6974 }
 0x9e3   :  { %v1347_v62 = vpack.c.bf16 %v6975_v38, %v6973_v15 }
 0x9e9   :  { %6572 = vmatmul.msk.bf16.gmra.mxu1 %vm399_vm0, %v1345_v48 }
 0x9f9   :  { %6573 = vmatmul.msk.bf16.gmra.mxu1 %vm399_vm0, %v1346_v39 }
 0xa09   :  { %6574 = vmatmul.msk.bf16.gmra.mxu1 %vm399_vm0, %v1347_v62 }
 0xa56   :  { %v1369_v25 = vpop.f32.mrf.mxu1 }
 0xa57   :  { %1406 = vperm.xlu0 %6957, %v1369_v25  }
 0xa5e   :  { %v1371_v45 = vpop.f32.mrf.mxu1 }
 0xa5f   :  { %1409 = vperm.xlu0 %6957, %v1371_v45  }
 0xa66   :  { %v1374_v44 = vpop.f32.mrf.mxu1 }
 0xa67   :  { %1412 = vperm.xlu1 %6958, %v1374_v44  }
 0xa6e   :  { %v1376_v16 = vpop.f32.mrf.mxu1 }
 0xa6f   :  { %1415 = vperm.xlu1 %6958, %v1376_v16  }
 0xa76   :  { %v1379_v46 = vpop.f32.mrf.mxu1 }
 0xa77   :  { %1418 = vperm.xlu2 %6959, %v1379_v46  }
 0xa7e   :  { %v1381_v48 = vpop.f32.mrf.mxu1 }
 0xa7f   :  { %1421 = vperm.xlu2 %6959, %v1381_v48  }
 0xa86   :  { %v8070_v55 = vpop.f32.mrf.mxu1 }
 0xa87   :  { %1424 = vperm.xlu0 %6957, %v8070_v55  }
 0xa8e   :  { %v1386_v58 = vpop.f32.mrf.mxu1 }
 0xa8f   :  { %1427 = vperm.xlu1 %6958, %v1386_v58  }
 0xac9   :  { %v1407_v14 = vpop.permute.xlu0 %1406 }
 0xaca   :  { %v1429_v20 = vperm.slane %v1407_v14, %v7811_v26 }
 0xad1   :  { %v1410_v10 = vpop.permute.xlu0 %1409  ;;  %v1419_v54 = vpop.permute.xlu2 %1418 }
 0xad2   :  { %v1430_v0 = vperm.slane %v1410_v10, %v7811_v26  ;;  %v1433_v21 = vperm.slane %v1419_v54, %v7811_v26 }
 0xad4   :  { %v1437_v15 = vsel %vm561_vm2, %v1430_v0, %v1429_v20 }
 0xad9   :  { %v1413_v23 = vpop.permute.xlu1 %1412  ;;  %v1422_v63 = vpop.permute.xlu2 %1421 }
 0xada   :  { %v1431_v39 = vperm.slane %v1413_v23, %v7811_v26  ;;  %v1434_v23 = vperm.slane %v1422_v63, %v7811_v26 }
 0xadc   :  { %v1438_v38 = vsel %vm563_vm3, %v1431_v39, %v1437_v15 }
 0xae1   :  { %v1416_v4 = vpop.permute.xlu1 %1415 }
 0xae2   :  { %v1432_v2 = vperm.slane %v1416_v4, %v7811_v26 }
 0xae4   :  { %v1439_v62 = vsel %vm565_vm4, %v1432_v2, %v1438_v38 }
 0xae5   :  { %v1440_v57 = vsel %vm567_vm5, %v1433_v21, %v1439_v62 }
 0xae6   :  { %v1441_v4 = vsel %vm569_vm6, %v1434_v23, %v1440_v57 }
 0xaf9   :  { %v1425_v47 = vpop.permute.xlu0 %1424 }
 0xafa   :  { %v1435_v10 = vperm.slane %v1425_v47, %v7811_v26 }
 0xafc   :  { %v1442_v0 = vsel %vm571_vm7, %v1435_v10, %v1441_v4 }
 0xb01   :  { %v1428_v50 = vpop.permute.xlu1 %1427 }
 0xb02   :  { %v1436_v14 = vperm.slane %v1428_v50, %v7811_v26 }
 0xb04   :  { %v1443_v39 = vsel %vm573_vm8, %v1436_v14, %v1442_v0 }
 0xb05   :  { %v1445_v20 = vsel %vm576_vm9, %v1443_v39, -inf }
 0xb06   :  { %1446 = vmax.xlane.f32.xlu2 %v1445_v20 }
 0xb79   :  { %v1447_v54 = vpop.xlane.xlu2 %1446 }
 0xb7a   :  { %v1450_v2 = vperm.slane %v1447_v54, 1  ;;  %v1449_v15 = vperm.slane %v1447_v54, 0  ;;  %v1452_v47 = vperm.slane %v1447_v54, 3  ;;  %v1451_v62 = vperm.slane %v1447_v54, 2 }
 0xb7b   :  { %v1454_v10 = vperm.slane %v1447_v54, 5  ;;  %v1453_v14 = vperm.slane %v1447_v54, 4 }
 0xb7c   :  { %v1466_v21 = vsub.f32 %v1371_v45, %v1450_v2  ;;  %v1465_v38 = vsub.f32 %v1369_v25, %v1449_v15  ;;  %v1468_v50 = vsub.f32 %v1376_v16, %v1452_v47  ;;  %v1467_v57 = vsub.f32 %v1374_v44, %v1451_v62 }
 0xb7d   :  { %v1470_v25 = vsub.f32 %v1381_v48, %v1454_v10  ;;  %v1469_v45 = vsub.f32 %v1379_v46, %v1453_v14  ;;  %v1456_v16 = vperm.slane %v1447_v54, 7  ;;  %v1455_v44 = vperm.slane %v1447_v54, 6 }
 0xb7e   :  { %v1475_v63 = vmul.f32 1.442695, %v1466_v21  ;;  %v1473_v43 = vmul.f32 1.442695, %v1465_v38  ;;  %v1479_v23 = vmul.f32 1.442695, %v1468_v50 }
 0xb7f   :  { %v1477_v4 = vmul.f32 1.442695, %v1467_v57  ;;  %v1483_v20 = vmul.f32 1.442695, %v1470_v25  ;;  %v1472_v21 = vsub.f32 %v1386_v58, %v1456_v16  ;;  %v1471_v38 = vsub.f32 %v8070_v55, %v1455_v44 }
 0xb80   :  { %6976 = vpow2.f32 %v1475_v63 }
 0xb81   :  { %6978 = vpow2.f32 %v1473_v43  ;;  %v1481_v43 = vmul.f32 1.442695, %v1469_v45  ;;  %v1487_v47 = vmul.f32 1.442695, %v1472_v21  ;;  %v1485_v62 = vmul.f32 1.442695, %v1471_v38 }
 0xb82   :  { %6980 = vpow2.f32 %v1479_v23 }
 0xb83   :  { %6982 = vpow2.f32 %v1477_v4 }
 0xb84   :  { %6984 = vpow2.f32 %v1483_v20 }
 0xb85   :  { %6986 = vpow2.f32 %v1481_v43 }
 0xb86   :  { %v8089_v0 = vpop.eup %6976  ;;  %6988 = vpow2.f32 %v1487_v47 }
 0xb87   :  { %v8091_v39 = vpop.eup %6978  ;;  %1501 = vperm.xlu1 %6958, %v8089_v0   ;;  %6990 = vpow2.f32 %v1485_v62 }
 0xb88   :  { %1498 = vperm.xlu0 %6957, %v8091_v39   ;;  %v8095_v2 = vpop.eup %6980 }
 0xb89   :  { %v6983_v15 = vpop.eup %6982 }
 0xb8a   :  { %v6985_v48 = vpop.eup %6984 }
 0xb8b   :  { %v8099_v63 = vpop.eup %6986 }
 0xb8c   :  { %v6989_v46 = vpop.eup %6988 }
 0xb8d   :  { %v8102_v54 = vpop.eup %6990 }
 0xb8f   :  { %1507 = vperm.xlu1 %6958, %v8095_v2  }
 0xb90   :  { %1504 = vperm.xlu0 %6957, %v6983_v15  }
 0xb97   :  { %1513 = vperm.xlu1 %6958, %v6985_v48  }
 0xb98   :  { %1510 = vperm.xlu0 %6957, %v8099_v63  }
 0xb9f   :  { %1519 = vperm.xlu1 %6958, %v6989_v46  }
 0xba0   :  { %1516 = vperm.xlu0 %6957, %v8102_v54  }
 0xbf9   :  { %v1502_v58 = vpop.permute.xlu1 %1501 }
 0xbfa   :  { %v1499_v50 = vpop.permute.xlu0 %1498  ;;  %v1522_v23 = vperm.slane %v1502_v58, %v7811_v26 }
 0xbfb   :  { %v1521_v10 = vperm.slane %v1499_v50, %v7811_v26 }
 0xbfd   :  { %v1529_v45 = vsel %vm561_vm2, %v1522_v23, %v1521_v10 }
 0xc01   :  { %v1508_v57 = vpop.permute.xlu1 %1507 }
 0xc02   :  { %v1505_v55 = vpop.permute.xlu0 %1504  ;;  %v1524_v20 = vperm.slane %v1508_v57, %v7811_v26 }
 0xc03   :  { %v1523_v4 = vperm.slane %v1505_v55, %v7811_v26 }
 0xc05   :  { %v1530_v16 = vsel %vm563_vm3, %v1523_v4, %v1529_v45 }
 0xc06   :  { %v1531_v21 = vsel %vm565_vm4, %v1524_v20, %v1530_v16 }
 0xc09   :  { %v1514_v14 = vpop.permute.xlu1 %1513 }
 0xc0a   :  { %v1511_v25 = vpop.permute.xlu0 %1510  ;;  %v1526_v44 = vperm.slane %v1514_v14, %v7811_v26 }
 0xc0b   :  { %v1525_v43 = vperm.slane %v1511_v25, %v7811_v26 }
 0xc0d   :  { %v1532_v38 = vsel %vm567_vm5, %v1525_v43, %v1531_v21 }
 0xc0e   :  { %v1533_v55 = vsel %vm569_vm6, %v1526_v44, %v1532_v38 }
 0xc11   :  { %v1520_v47 = vpop.permute.xlu1 %1519 }
 0xc12   :  { %v1528_v62 = vperm.slane %v1520_v47, %v7811_v26  ;;  %v1517_v58 = vpop.permute.xlu0 %1516 }
 0xc13   :  { %v1527_v50 = vperm.slane %v1517_v58, %v7811_v26 }
 0xc15   :  { %v1534_v57 = vsel %vm571_vm7, %v1527_v50, %v1533_v55 }
 0xc16   :  { %v1535_v23 = vsel %vm573_vm8, %v1528_v62, %v1534_v57 }
 0xc17   :  { %v1537_v10 = vsel %vm576_vm9, %v1535_v23, 0.0 }
 0xc18   :  { %1538 = vadd.xlane.f32.xlu0 %v1537_v10 }
 0xc8b   :  { %v1539_v4 = vpop.xlane.xlu0 %1538 }
 0xc8c   :  { %6992 = vrcp.f32 %v1539_v4 }
 0xc92   :  { %v6993_v14 = vpop.eup %6992 }
 0xc93   :  { %v1543_v25 = vperm.slane %v6993_v14, 1  ;;  %v1542_v45 = vperm.slane %v6993_v14, 0  ;;  %v1547_v20 = vperm.slane %v6993_v14, 5  ;;  %v1544_v16 = vperm.slane %v6993_v14, 2 }
 0xc94   :  { %v1549_v55 = vperm.slane %v6993_v14, 7  ;;  %v1545_v57 = vperm.slane %v6993_v14, 3 }
 0xc95   :  { %v1559_v43 = vmul.f32 %v8089_v0, %v1543_v25  ;;  %v1558_v21 = vmul.f32 %v8091_v39, %v1542_v45  ;;  %v1563_v38 = vmul.f32 %v6985_v48, %v1547_v20  ;;  %v1560_v58 = vmul.f32 %v6983_v15, %v1544_v16 }
 0xc96   :  { %v1565_v19 = vmul.f32 %v6989_v46, %v1549_v55  ;;  %v1561_v0 = vmul.f32 %v8095_v2, %v1545_v57  ;;  %v1546_v39 = vperm.slane %v6993_v14, 4 }
 0xc97   :  { %v1567_v47 = vpack.c.bf16 %v1559_v43, %v1559_v43  ;;  %v1566_v44 = vpack.c.bf16 %v1558_v21, %v1558_v21  ;;  %v1571_v4 = vpack.c.bf16 %v1563_v38, %v1563_v38  ;;  %v1568_v36 = vpack.c.bf16 %v1560_v58, %v1560_v58 }
 0xc98   :  { %v1573_v48 = vpack.c.bf16 %v1565_v19, %v1565_v19  ;;  %v1569_v15 = vpack.c.bf16 %v1561_v0, %v1561_v0  ;;  %v1562_v43 = vmul.f32 %v8099_v63, %v1546_v39  ;;  %v1548_v38 = vperm.slane %v6993_v14, 6 }
 0xc99   :  { %v1600_v50 = vunpack.c.l.b16 %v1567_v47  ;;  %v1575_v62 = vunpack.c.l.b16 %v1566_v44  ;;  %v1700_v30 = vunpack.c.l.b16 %v1571_v4  ;;  %v1625_v24 = vunpack.c.l.b16 %v1568_v36 }
 0xc9a   :  { %v1750_v20 = vunpack.c.l.b16 %v1573_v48  ;;  %v1650_v16 = vunpack.c.l.b16 %v1569_v15  ;;  %v1570_v44 = vpack.c.bf16 %v1562_v43, %v1562_v43  ;;  %v1564_v2 = vmul.f32 %v8102_v54, %v1548_v38 }
 0xc9b   :  { %v6577_v23 = vunpack.i.l.s16 %v1600_v50  ;;  %v6575_v10 = vunpack.i.l.s16 %v1575_v62  ;;  %v6585_v25 = vunpack.i.l.s16 %v1700_v30  ;;  %v6579_v45 = vunpack.i.l.s16 %v1625_v24 }
 0xc9c   :  { %v6589_v21 = vunpack.i.l.s16 %v1750_v20  ;;  %v6581_v47 = vunpack.i.l.s16 %v1650_v16  ;;  %v1675_v36 = vunpack.c.l.b16 %v1570_v44  ;;  %v1572_v30 = vpack.c.bf16 %v1564_v2, %v1564_v2 }
 0xc9d   :  { %1604 = vperm.xlu2 %6959, %v6577_v23   ;;  %1579 = vperm.xlu1 %6958, %v6575_v10  }
 0xc9e   :  { %v6583_v46 = vunpack.i.l.s16 %v1675_v36  ;;  %v1725_v19 = vunpack.c.l.b16 %v1572_v30  ;;  %v1289_v30 = vld [vmem:[#allocation2] sm:$0xff] }
 0xca0   :  { %v6587_v24 = vunpack.i.l.s16 %v1725_v19 }
 0xca5   :  { %1704 = vperm.xlu2 %6959, %v6585_v25   ;;  %1629 = vperm.xlu1 %6958, %v6579_v45  }
 0xcad   :  { %1754 = vperm.xlu2 %6959, %v6589_v21   ;;  %1654 = vperm.xlu1 %6958, %v6581_v47  }
 0xcb5   :  { %1679 = vperm.xlu1 %6958, %v6583_v46  }
 0xcbd   :  { %1729 = vperm.xlu1 %6958, %v6587_v24   ;;  %v1290_v24 = vpack.c.bf16 %v1289_v30, %v1289_v30 }
 0xcf7   :  { %v1605_v58 = vpop.permute.xlu2 %1604 }
 0xcf8   :  { %v1606_v50 = vperm.slane %v1605_v58, %v7811_v26 }
 0xcfa   :  { %v1607_v62 = vpack.c.b16 %v1606_v50, %v1606_v50 }
 0xcfc   :  { %6578 = vmatmul.msk.bf16.vlgmr.msra.gmra.mxu3 %vm576_vm9, %v1607_v62 }
 0xcfd   :  { %1743 = vmatpush.bf16.msra.mxu3 %v7897_v35 }
 0xcff   :  { %v1705_v45 = vpop.permute.xlu2 %1704 }
 0xd00   :  { %v1706_v15 = vperm.slane %v1705_v45, %v7811_v26 }
 0xd02   :  { %v1707_v43 = vpack.c.b16 %v1706_v15, %v1706_v15 }
 0xd07   :  { %v1755_v47 = vpop.permute.xlu2 %1754 }
 0xd08   :  { %v1756_v44 = vperm.slane %v1755_v47, %v7811_v26 }
 0xd0a   :  { %v1757_v38 = vpack.c.b16 %v1756_v44, %v1756_v44 }
 0xd0f   :  { %v1580_v63 = vpop.permute.xlu1 %1579 }
 0xd10   :  { %v1581_v14 = vperm.slane %v1580_v63, %v7811_v26 }
 0xd12   :  { %v1582_v55 = vpack.c.b16 %v1581_v14, %v1581_v14 }
 0xd14   :  { %6576 = vmatmul.msk.bf16.vlgmr.msra.gmra.mxu2 %vm576_vm9, %v1582_v55 }
 0xd15   :  { %1718 = vmatpush.bf16.msra.mxu2 %v7894_v18 }
 0xd17   :  { %v1630_v54 = vpop.permute.xlu1 %1629 }
 0xd18   :  { %v1631_v57 = vperm.slane %v1630_v54, %v7811_v26 }
 0xd1a   :  { %v1632_v4 = vpack.c.b16 %v1631_v57, %v1631_v57 }
 0xd1f   :  { %v1655_v23 = vpop.permute.xlu1 %1654 }
 0xd20   :  { %v1656_v10 = vperm.slane %v1655_v23, %v7811_v26 }
 0xd22   :  { %v1657_v0 = vpack.c.b16 %v1656_v10, %v1656_v10 }
 0xd24   :  { %6580 = vmatmul.msk.bf16.vlgmr.msrb.gmra.mxu2 %vm576_vm9, %v1632_v4  ;;  %6582 = vmatmul.msk.bf16.vlgmr.msrb.gmra.mxu3 %vm576_vm9, %v1657_v0 }
 0xd25   :  { %1828 = vmatpush.bf16.msrb.mxu2 %v7931_v32  ;;  %1846 = vmatpush.bf16.msrb.mxu3 %v7925_v34 }
 0xd27   :  { %v1680_v39 = vpop.permute.xlu1 %1679 }
 0xd28   :  { %v1681_v25 = vperm.slane %v1680_v39, %v7811_v26 }
 0xd29   :  { %1829 = vmatpush.bf16.msrb.mxu2 %v7945_v6  ;;  %1847 = vmatpush.bf16.msrb.mxu3 %v7928_v27 }
 0xd2a   :  { %v1682_v48 = vpack.c.b16 %v1681_v25, %v1681_v25 }
 0xd2c   :  { %6584 = vmatmul.msk.bf16.vlgmr.msrb.gmra.mxu0 %vm576_vm9, %v1682_v48 }
 0xd2d   :  { %1860 = vmatpush.bf16.msrb.mxu0 %v7901_v37  ;;  %1830 = vmatpush.bf16.msrb.mxu2 %v7956_v11 }
 0xd2f   :  { %v1730_v20 = vpop.permute.xlu1 %1729 }
 0xd30   :  { %v1731_v16 = vperm.slane %v1730_v20, %v7811_v26 }
 0xd31   :  { %1861 = vmatpush.bf16.msrb.mxu0 %v7913_v42  ;;  %1831 = vmatpush.bf16.msrb.mxu2 %v7965_v28 }
 0xd32   :  { %v1732_v21 = vpack.c.b16 %v1731_v16, %v1731_v16 }
 0xd34   :  { %6586 = vmatmul.msk.bf16.vlgmr.msra.gmra.mxu2 %vm576_vm9, %v1707_v43  ;;  %6588 = vmatmul.msk.bf16.vlgmr.msra.gmra.mxu3 %vm576_vm9, %v1732_v21 }
 0xd35   :  { %1911 = vmatpush.bf16.msra.mxu2 %v7936_v33  ;;  %1932 = vmatpush.bf16.msra.mxu3 %v7996_v51 }
 0xd39   :  { %1912 = vmatpush.bf16.msra.mxu2 %v7950_v8  ;;  %1933 = vmatpush.bf16.msra.mxu3 %v8002_v56 }
 0xd3c   :  { %6590 = vmatmul.msk.bf16.vlgmr.msra.gmra.mxu0 %vm576_vm9, %v1757_v38 }
 0xd3d   :  { %1913 = vmatpush.bf16.msra.mxu2 %v7961_v22  ;;  %1945 = vmatpush.bf16.msra.mxu0 %v7994_v49 }
 0xd41   :  { %1914 = vmatpush.bf16.msra.mxu2 %v7970_v29  ;;  %1946 = vmatpush.bf16.msra.mxu0 %v7999_v53 }
 0xd44   :  { %6592 = vmatmul.msk.bf16.vlgmr.msrb.gmra.mxu3 %vm399_vm0, %v1290_v24 }
 0xd4c   :  { %6593 = vmatmul.msk.bf16.vlgmr.msrb.gmra.mxu0 %vm399_vm0, %v8013_v17 }
 0xd5c   :  { %6597 = vmatmul.msk.bf16.vlgmr.msra.gmra.mxu0 %vm399_vm0, %v1290_v24 }
 0xd7f   :  { %v1620_v36 = vpop.f32.mrf.mxu3 }
 0xd80   :  { %v1783_v14 = vpack.c.bf16 %v1620_v36, %v1620_v36 }
 0xd82   :  { %v1799_v10 = vunpack.c.l.b16 %v1783_v14 }
 0xd84   :  { %v1806_v48 = vrot.slane %v1799_v10, 7 }
 0xd87   :  { %v1622_v2 = vpop.f32.mrf.mxu3 }
 0xd97   :  { %v1595_v46 = vpop.f32.mrf.mxu2 }
 0xd98   :  { %v1782_v55 = vpack.c.bf16 %v1595_v46, %v1595_v46 }
 0xd9a   :  { %v1798_v39 = vunpack.c.l.b16 %v1782_v55 }
 0xd9c   :  { %v1807_v20 = vsel %vm561_vm2, %v1806_v48, %v1798_v39 }
 0xd9f   :  { %v1597_v19 = vpop.f32.mrf.mxu2 }
 0xda7   :  { %v1645_v58 = vpop.f32.mrf.mxu2  ;;  %v1670_v50 = vpop.f32.mrf.mxu3 }
 0xda8   :  { %v1784_v63 = vpack.c.bf16 %v1645_v58, %v1645_v58  ;;  %v1785_v54 = vpack.c.bf16 %v1670_v50, %v1670_v50 }
 0xda9   :  { %v1695_v62 = vpop.f32.mrf.mxu0 }
 0xdaa   :  { %v1800_v57 = vunpack.c.l.b16 %v1784_v63  ;;  %v1786_v4 = vpack.c.bf16 %v1695_v62, %v1695_v62  ;;  %v1801_v25 = vunpack.c.l.b16 %v1785_v54 }
 0xdac   :  { %v1808_v45 = vrot.slane %v1800_v57, 6  ;;  %v1802_v15 = vunpack.c.l.b16 %v1786_v4  ;;  %v1810_v16 = vrot.slane %v1801_v25, 5 }
 0xdae   :  { %v1809_v43 = vsel %vm563_vm3, %v1808_v45, %v1807_v20  ;;  %v1812_v36 = vrot.slane %v1802_v15, 4 }
 0xdaf   :  { %v1647_v23 = vpop.f32.mrf.mxu2  ;;  %v1672_v17 = vpop.f32.mrf.mxu3  ;;  %v1811_v46 = vsel %vm565_vm4, %v1810_v16, %v1809_v43 }
 0xdb0   :  { %v1813_v63 = vsel %vm567_vm5, %v1812_v36, %v1811_v46 }
 0xdb1   :  { %v1697_v0 = vpop.f32.mrf.mxu0 }
 0xdb7   :  { %v1720_v21 = vpop.f32.mrf.mxu2  ;;  %v1745_v47 = vpop.f32.mrf.mxu3 }
 0xdb8   :  { %v1787_v44 = vpack.c.bf16 %v1720_v21, %v1720_v21  ;;  %v1788_v38 = vpack.c.bf16 %v1745_v47, %v1745_v47 }
 0xdb9   :  { %v1770_v2 = vpop.f32.mrf.mxu0 }
 0xdba   :  { %v1803_v30 = vunpack.c.l.b16 %v1787_v44  ;;  %v1804_v19 = vunpack.c.l.b16 %v1788_v38  ;;  %v1789_v24 = vpack.c.bf16 %v1770_v2, %v1770_v2 }
 0xdbc   :  { %v1814_v58 = vrot.slane %v1803_v30, 3  ;;  %v1816_v50 = vrot.slane %v1804_v19, 2  ;;  %v1805_v62 = vunpack.c.l.b16 %v1789_v24 }
 0xdbe   :  { %v1815_v14 = vsel %vm569_vm6, %v1814_v58, %v1813_v63  ;;  %v1818_v55 = vrot.slane %v1805_v62, 1 }
 0xdbf   :  { %v1817_v54 = vsel %vm571_vm7, %v1816_v50, %v1815_v14  ;;  %v1722_v57 = vpop.f32.mrf.mxu2  ;;  %v1747_v23 = vpop.f32.mrf.mxu3 }
 0xdc0   :  { %v1819_v17 = vsel %vm573_vm8, %v1818_v55, %v1817_v54 }
 0xdc1   :  { %v1820_v10 = vpack.c.b16 %v1819_v17, %v1819_v17  ;;  %v1772_v4 = vpop.f32.mrf.mxu0 }
 0xdc3   :  { %6591 = vmatmul.msk.bf16.vlgmr.msrb.gmra.mxu2 %vm327_vm1, %v1820_v10 }
 0xdc7   :  { %v1849_v45 = vpop.f32.mrf.mxu3 }
 0xdc9   :  { %v1863_v0 = vpop.f32.mrf.mxu0 }
 0xdca   :  { %v1864_v39 = vadd.f32 %v7972_v31, %v1863_v0 }
 0xdcc   :  { %1888 = vrot.lane.b32.xlu1 %v1864_v39, %s7552_s5 }
 0xdcf   :  { %v1851_v48 = vpop.f32.mrf.mxu3 }
 0xdd1   :  { %v1865_v25 = vpop.f32.mrf.mxu0 }
 0xdd3   :  { %6595 = vmatmul.msk.bf16.vlgmr.msra.gmra.mxu2 %vm327_vm1, %v1820_v10 }
 0xe3e   :  { %v1889_v63 = vpop.permute.xlu1 %1888 }
 0xe46   :  { %v1833_v15 = vpop.f32.mrf.mxu2 }
 0xe47   :  { %v1850_v20 = vadd.f32 %v1849_v45, %v1833_v15  ;;  %v1948_v15 = vpop.f32.mrf.mxu0 }
 0xe49   :  { %v1853_v16 = vadd.f32 %v7989_v52, %v1850_v20 }
 0xe4b   :  { %v1867_v43 = vadd.f32 %v1864_v39, %v1853_v16 }
 0xe4d   :  { %v6594_v21 = vmul.f32 -1.442695, %v1867_v43 }
 0xe4e   :  { %v1835_v47 = vpop.f32.mrf.mxu2 }
 0xe4f   :  { %6994 = vpow2.f32 %v6594_v21  ;;  %v1950_v20 = vpop.f32.mrf.mxu0 }
 0xe55   :  { %v6995_v44 = vpop.eup %6994 }
 0xe56   :  { %v1871_v38 = vadd.f32 1.0, %v6995_v44  ;;  %v1916_v36 = vpop.f32.mrf.mxu2 }
 0xe58   :  { %6996 = vrcp.f32 %v1871_v38  ;;  %v1883_v24 = vand.u32 2147483648, %v1871_v38  ;;  %v1881_v50 = vand.u32 2147483647, %v1871_v38  ;;  %vm1877_vm13 = vweird.f32 %v1871_v38 }
 0xe5a   :  { %v1884_v14 = vor.u32 1.1754944e-38, %v1883_v24  ;;  %vm1882_vm15 = vcmp.eq.f32.partialorder %v1881_v50, 8.507059e+37 }
 0xe5e   :  { %v6997_v2 = vpop.eup %6996  ;;  %v1918_v46 = vpop.f32.mrf.mxu2 }
 0xe5f   :  { %v1873_v30 = vmul.f32 %v6997_v2, %v1871_v38  ;;  %vm1878_vm12 = vweird.f32 %v6997_v2 }
 0xe60   :  { %vm1879_vm14 = vmor %vm1877_vm13, %vm1878_vm12 }
 0xe61   :  { %v1874_v19 = vsub.f32 1.0, %v1873_v30 }
 0xe63   :  { %v1875_v58 = vmul.f32 %v6997_v2, %v1874_v19 }
 0xe65   :  { %v1876_v62 = vadd.f32 %v6997_v2, %v1875_v58 }
 0xe67   :  { %v1880_v55 = vsel %vm1879_vm14, %v6997_v2, %v1876_v62 }
 0xe68   :  { %v1885_v54 = vsel %vm1882_vm15, %v1884_v14, %v1880_v55 }
 0xe69   :  { %v1891_v57 = vmul.f32 %v1889_v63, %v1885_v54  ;;  %v1898_v4 = vsub.f32 1.0, %v1885_v54  ;;  %v1904_v25 = vmul.f32 %v1885_v54, %v8008_v5 }
 0xe6b   :  { %1893 = vrot.lane.b32.xlu2 %v1891_v57, %s7552_s5 }
 0xec5   :  { %v1894_v23 = vpop.permute.xlu2 %1893 }
 0xec6   :  { %v1896_v17 = vadd.f32 %v1894_v23, %v1853_v16 }
 0xec8   :  { %6998 = vtanh.f32 %v1896_v17 }
 0xece   :  { %v6999_v10 = vpop.eup %6998 }
 0xecf   :  { %1900 = vrot.lane.b32.xlu0 %v6999_v10, %s7565_s8 }
 0xf41   :  { %v1901_v0 = vpop.permute.xlu0 %1900 }
 0xf42   :  { %v1903_v39 = vmul.f32 %v1901_v0, %v1898_v4 }
 0xf44   :  { %v8179_v45 = vadd.f32 %v1904_v25, %v1903_v39 }
 0xf46   :  { %v1906_v48 = vpack.c.bf16 %v8179_v45, %v8179_v45 }
 0xf48   :  { %1921 = vrot.lane.b32.xlu1 %v1906_v48, %s7565_s8 }
 0xfba   :  { %v8184_v43 = vpop.permute.xlu1 %1921 }
 0xfbb   :  { %6596 = vmatmul.msk.bf16.vlgmr.msra.gmra.mxu3 %vm399_vm0, %v8184_v43 }
0x103e   :  { %v1935_v16 = vpop.f32.mrf.mxu3 }
0x103f   :  { %v1936_v21 = vadd.f32 %v1935_v16, %v1916_v36 }
0x1041   :  { %v1952_v47 = vadd.f32 %v1948_v15, %v1936_v21 }
0x1042   :  { %1958 = sbr.rel (%p6599_p2) target bundleno = 4169 (0x1049), region = 129 }
0x1043   :  { %v8189_v5 = vadd.f32 %v8020_v40, %v1952_v47 }
0x1045   :  { %9263 = vst [vmem:[#allocation40_spill] sm:$0xff] %v8189_v5 }
0x1046   :  { %v1937_v44 = vpop.f32.mrf.mxu3 }
0x1047   :  { %v6600_v38 = vld [vmem:[%s9264_s4 + $0x10] sm:$0xff] }
0x1048   :  { %1961 = vst.msk [vmem:[#allocation2] sm:$0xff] %vm399_vm0, %v6600_v38 }
0x1049 PF:  { %p6601_p3 = scmp.ne.s32.totalorder %s6598_s19, 0 }
0x104a   :  { %s9265_s9 = sld [smem:[#allocation47_spill]] (!%p6601_p3) }
0x104b   :  { %1965 = sbr.rel (%p6601_p3) target bundleno = 4676 (0x1244), region = 133 }
0x1050   :  { %v1966_v2 = vsel %vm399_vm0, %v8189_v5, -inf  ;;  %v6875_v14 = vld [vmem:[%s9265_s9 + $0x8] sm:$0xff]  ;;  %v6874_v55 = vld [vmem:[%s9265_s9] sm:$0xff]  ;;  %v7567_v4 = vmov 0.0  }
0x1051   :  { %1967 = vmax.xlane.f32.xlu0 %v1966_v2  ;;  %2014 = vmatpush.bf16.msra.mxu0 %v6875_v14 }
0x1055   :  { %2015 = vmatpush.bf16.msra.mxu0 %v6874_v55 }
0x10c4   :  { %v1968_v36 = vpop.xlane.xlu0 %1967 }
0x10c5   :  { %vm1969_vm10 = vcmp.eq.f32.partialorder %v8189_v5, %v1968_v36 }
0x10c6   :  { %v1970_v46 = vsel %vm1969_vm10, %v7811_v26, 32 }
0x10c7   :  { %v1971_v30 = vsel %vm399_vm0, %v1970_v46, 2147483647 }
0x10c8   :  { %v1973_v19 = vshra.s32 %v1971_v30, 16  ;;  %v1972_v58 = vand.u32 65535, %v1971_v30 }
0x10ca   :  { %v1975_v24 = vcvt.s32.f32 %v1973_v19  ;;  %v1974_v62 = vcvt.s32.f32 %v1972_v58 }
0x10cc   :  { %1976 = vmin.xlane.f32.xlu0 %v1975_v24 }
0x113f   :  { %v1977_v50 = vpop.xlane.xlu0 %1976 }
0x1140   :  { %vm1978_vm11 = vcmp.eq.f32.partialorder %v1975_v24, %v1977_v50  ;;  %v1983_v54 = vcvt.f32.s32 %v1977_v50 }
0x1141   :  { %v1979_v63 = vsel %vm1978_vm11, %v1974_v62, inf }
0x1142   :  { %1980 = vmin.xlane.f32.xlu1 %v1979_v63  ;;  %v1984_v23 = vshll.u32 %v1983_v54, 16 }
0x11b5   :  { %v1981_v57 = vpop.xlane.xlu1 %1980 }
0x11b6   :  { %v1982_v17 = vcvt.f32.s32 %v1981_v57 }
0x11b8   :  { %v1985_v10 = vadd.s32 %v1984_v23, %v1982_v17 }
0x11ba   :  { %vm1986_vm12 = vcmp.eq.s32.totalorder %v7811_v26, %v1985_v10 }
0x11bb   :  { %v1987_v0 = vsel %vm1986_vm12, 1.0, %v7567_v4 }
0x11bc   :  { %v1988_v39 = vpack.c.bf16 %v1987_v0, %v1987_v0 }
0x11be   :  { %6610 = vmatmul.msk.bf16.vlgmr.msra.gmra.mxu0 %vm399_vm0, %v1988_v39 }
0x123b   :  { %v2017_v25 = vpop.f32.mrf.mxu0 }
0x123c   :  { %v2021_v48 = vmul.f32 5.656854, %v2017_v25 }
0x123e   :  { %2022 = vst.msk [vmem:[#allocation2] sm:$0xff] %vm399_vm0, %v2021_v48 }
0x1243   :  { %v2019_v15 = vpop.f32.mrf.mxu0 }
0x1244 PF:  { %2031 = vmatpush.bf16.msra.mxu0 %v7726_v1  ;;  %2100 = vmatpush.bf16.msra.mxu1 %v7759_v12  ;;  %v9266_v20 = vmov 0   ;;  %v9267_v38 = vld [vmem:[#allocation31_spill] sm:$0xff]  ;;  %v9268_v36 = vld [vmem:[#allocation32_spill] sm:$0xff]  ;;  %v9269_v55 = vld [vmem:[#allocation33_spill] sm:$0xff]  ;;  %s6639_s12 = sld [smem:[#allocation3 + $0x2]] }
0x1245   :  { %7000 = vset.pattern.permute.xlu0 %v9266_v20  ;;  %7001 = vset.pattern.permute.xlu1 %v9266_v20  ;;  %v9270_v57 = vld [vmem:[#allocation34_spill] sm:$0xff]  ;;  %v9271_v15 = vld [vmem:[#allocation35_spill] sm:$0xff] }
0x1246   :  { %7002 = vset.pattern.permute.xlu2 %v9266_v20  ;;  %2352 = vmatpush.bf16.msra.mxu3 %v7874_v60 }
0x1247   :  { %2327 = vmatpush.bf16.msra.mxu2 %v7870_v59 }
0x1248   :  { %2032 = vmatpush.bf16.msra.mxu0 %v7732_v3  ;;  %2101 = vmatpush.bf16.msra.mxu1 %v7765_v13 }
0x124a   :  { %2402 = vmatpush.bf16.msrb.mxu3 %v7883_v7  ;;  %p6640_p4 = scmp.eq.s32.totalorder %s6639_s12, 0 }
0x124b   :  { %2377 = vmatpush.bf16.msrb.mxu2 %v7878_v61  ;;  %6611 = vmatmul.msk.bf16.vlgmr.msra.gmra.mxu0 %vm399_vm0, %v8184_v43  ;;  %s9276_s24 = sld [smem:[#allocation46_spill]] (!%p6640_p4) }
0x124c   :  { %2427 = vmatpush.bf16.msrb.mxu0 %v7886_v9 }
0x1250   :  { %2502 = vmatpush.bf16.msra.mxu0 %v7909_v41 }
0x12c8   :  { %v2034_v16 = vpop.f32.mrf.mxu0 }
0x12c9   :  { %v2039_v21 = vrot.slane %v2034_v16, 1  ;;  %v2046_v47 = vperm.slane %v2034_v16, 0  ;;  %v2040_v19 = vrot.slane %v2034_v16, 2  ;;  %v2041_v24 = vrot.slane %v2034_v16, 3 }
0x12ca   :  { %v2042_v17 = vrot.slane %v2034_v16, 4  ;;  %v2043_v10 = vrot.slane %v2034_v16, 5 }
0x12cb   :  { %v2047_v44 = vperm.slane %v2039_v21, 0  ;;  %v2062_v2 = vadd.f32 %v2046_v47, %v9267_v38  ;;  %v2048_v50 = vperm.slane %v2040_v19, 0  ;;  %v2049_v63 = vperm.slane %v2041_v24, 0  ;;  %v9272_v21 = vld [vmem:[#allocation36_spill] sm:$0xff]  ;;  %v9273_v24 = vld [vmem:[#allocation37_spill] sm:$0xff] }
0x12cc   :  { %v2050_v39 = vperm.slane %v2042_v17, 0  ;;  %v2051_v25 = vperm.slane %v2043_v10, 0  ;;  %v2045_v38 = vrot.slane %v2034_v16, 7 }
0x12cd   :  { %v2063_v46 = vadd.f32 %v2047_v44, %v9268_v36  ;;  %7003 = vtanh.f32 %v2062_v2  ;;  %v2064_v54 = vadd.f32 %v2048_v50, %v9269_v55  ;;  %v2065_v23 = vadd.f32 %v2049_v63, %v9270_v57  ;;  %v9274_v50 = vld [vmem:[#allocation38_spill] sm:$0xff] }
0x12ce   :  { %v2066_v20 = vadd.f32 %v2050_v39, %v9271_v15  ;;  %v2067_v47 = vadd.f32 %v2051_v25, %v9272_v21  ;;  %v2044_v44 = vrot.slane %v2034_v16, 6 }
0x12cf   :  { %7005 = vtanh.f32 %v2063_v46 }
0x12d0   :  { %v2036_v30 = vpop.f32.mrf.mxu0  ;;  %7007 = vtanh.f32 %v2064_v54  ;;  %v2052_v46 = vperm.slane %v2044_v44, 0 }
0x12d1   :  { %7009 = vtanh.f32 %v2065_v23  ;;  %v2053_v30 = vperm.slane %v2045_v38, 0 }
0x12d2   :  { %7011 = vtanh.f32 %v2066_v20 }
0x12d3   :  { %v7004_v58 = vpop.eup %7003  ;;  %7013 = vtanh.f32 %v2067_v47 }
0x12d5   :  { %v7006_v62 = vpop.eup %7005 }
0x12d6   :  { %v2078_v14 = vpack.c.bf16 %v7006_v62, %v7004_v58  ;;  %v7008_v4 = vpop.eup %7007  ;;  %v2068_v58 = vadd.f32 %v2052_v46, %v9273_v24  ;;  %v2069_v62 = vadd.f32 %v2053_v30, %v9274_v50 }
0x12d7   :  { %v7010_v0 = vpop.eup %7009 }
0x12d8   :  { %6612 = vmatmul.msk.bf16.vlgmr.msra.gmra.mxu1 %vm399_vm0, %v2078_v14  ;;  %v2079_v48 = vpack.c.bf16 %v7010_v0, %v7008_v4  ;;  %v7012_v2 = vpop.eup %7011  ;;  %7015 = vtanh.f32 %v2068_v58 }
0x12d9   :  { %v7014_v36 = vpop.eup %7013  ;;  %7017 = vtanh.f32 %v2069_v62 }
0x12da   :  { %v2080_v19 = vpack.c.bf16 %v7014_v36, %v7012_v2 }
0x12de   :  { %v7016_v63 = vpop.eup %7015 }
0x12df   :  { %v7018_v14 = vpop.eup %7017 }
0x12e0   :  { %v2081_v55 = vpack.c.bf16 %v7018_v14, %v7016_v63 }
0x12e8   :  { %6613 = vmatmul.msk.bf16.gmra.mxu1 %vm399_vm0, %v2079_v48 }
0x12f8   :  { %6614 = vmatmul.msk.bf16.gmra.mxu1 %vm399_vm0, %v2080_v19 }
0x1308   :  { %6615 = vmatmul.msk.bf16.gmra.mxu1 %vm399_vm0, %v2081_v55 }
0x1355   :  { %v2103_v54 = vpop.f32.mrf.mxu1 }
0x1356   :  { %2140 = vperm.xlu0 %7000, %v2103_v54  }
0x135d   :  { %v2105_v16 = vpop.f32.mrf.mxu1 }
0x135e   :  { %2143 = vperm.xlu0 %7000, %v2105_v16  }
0x1365   :  { %v2108_v57 = vpop.f32.mrf.mxu1 }
0x1366   :  { %2146 = vperm.xlu1 %7001, %v2108_v57  }
0x136d   :  { %v2110_v23 = vpop.f32.mrf.mxu1 }
0x136e   :  { %2149 = vperm.xlu1 %7001, %v2110_v23  }
0x1375   :  { %v2113_v17 = vpop.f32.mrf.mxu1 }
0x1376   :  { %2152 = vperm.xlu2 %7002, %v2113_v17  }
0x137d   :  { %v2115_v10 = vpop.f32.mrf.mxu1 }
0x137e   :  { %2155 = vperm.xlu2 %7002, %v2115_v10  }
0x1385   :  { %v8236_v4 = vpop.f32.mrf.mxu1 }
0x1386   :  { %2158 = vperm.xlu0 %7000, %v8236_v4  }
0x138d   :  { %v2120_v0 = vpop.f32.mrf.mxu1 }
0x138e   :  { %2161 = vperm.xlu1 %7001, %v2120_v0  }
0x13c8   :  { %v2141_v39 = vpop.permute.xlu0 %2140 }
0x13c9   :  { %v2163_v44 = vperm.slane %v2141_v39, %v7811_v26 }
0x13d0   :  { %v2144_v48 = vpop.permute.xlu0 %2143  ;;  %v2153_v15 = vpop.permute.xlu2 %2152 }
0x13d1   :  { %v2164_v21 = vperm.slane %v2144_v48, %v7811_v26  ;;  %v2167_v19 = vperm.slane %v2153_v15, %v7811_v26 }
0x13d3   :  { %v2171_v2 = vsel %vm561_vm2, %v2164_v21, %v2163_v44 }
0x13d8   :  { %v2147_v25 = vpop.permute.xlu1 %2146  ;;  %v2156_v24 = vpop.permute.xlu2 %2155 }
0x13d9   :  { %v2165_v47 = vperm.slane %v2147_v25, %v7811_v26  ;;  %v2168_v62 = vperm.slane %v2156_v24, %v7811_v26 }
0x13db   :  { %v2172_v36 = vsel %vm563_vm3, %v2165_v47, %v2171_v2 }
0x13e0   :  { %v2150_v20 = vpop.permute.xlu1 %2149 }
0x13e1   :  { %v2166_v38 = vperm.slane %v2150_v20, %v7811_v26 }
0x13e3   :  { %v2173_v46 = vsel %vm565_vm4, %v2166_v38, %v2172_v36 }
0x13e4   :  { %v2174_v58 = vsel %vm567_vm5, %v2167_v19, %v2173_v46 }
0x13e5   :  { %v2175_v55 = vsel %vm569_vm6, %v2168_v62, %v2174_v58 }
0x13f8   :  { %v2159_v30 = vpop.permute.xlu0 %2158 }
0x13f9   :  { %v2169_v50 = vperm.slane %v2159_v30, %v7811_v26 }
0x13fb   :  { %v2176_v39 = vsel %vm571_vm7, %v2169_v50, %v2175_v55 }
0x1400   :  { %v2162_v63 = vpop.permute.xlu1 %2161 }
0x1401   :  { %v2170_v14 = vperm.slane %v2162_v63, %v7811_v26 }
0x1403   :  { %v2177_v25 = vsel %vm573_vm8, %v2170_v14, %v2176_v39 }
0x1404   :  { %v2179_v48 = vsel %vm576_vm9, %v2177_v25, -inf }
0x1405   :  { %2180 = vmax.xlane.f32.xlu2 %v2179_v48 }
0x1478   :  { %v2181_v15 = vpop.xlane.xlu2 %2180 }
0x1479   :  { %v2184_v20 = vperm.slane %v2181_v15, 1  ;;  %v2183_v21 = vperm.slane %v2181_v15, 0  ;;  %v2186_v38 = vperm.slane %v2181_v15, 3  ;;  %v2185_v2 = vperm.slane %v2181_v15, 2 }
0x147a   :  { %v2188_v58 = vperm.slane %v2181_v15, 5  ;;  %v2187_v62 = vperm.slane %v2181_v15, 4 }
0x147b   :  { %v2200_v47 = vsub.f32 %v2105_v16, %v2184_v20  ;;  %v2199_v44 = vsub.f32 %v2103_v54, %v2183_v21  ;;  %v2202_v30 = vsub.f32 %v2110_v23, %v2186_v38  ;;  %v2201_v19 = vsub.f32 %v2108_v57, %v2185_v2 }
0x147c   :  { %v2204_v54 = vsub.f32 %v2115_v10, %v2188_v58  ;;  %v2203_v16 = vsub.f32 %v2113_v17, %v2187_v62  ;;  %v2190_v23 = vperm.slane %v2181_v15, 7  ;;  %v2189_v57 = vperm.slane %v2181_v15, 6 }
0x147d   :  { %v2209_v36 = vmul.f32 1.442695, %v2200_v47  ;;  %v2207_v46 = vmul.f32 1.442695, %v2199_v44  ;;  %v2213_v24 = vmul.f32 1.442695, %v2202_v30 }
0x147e   :  { %v2211_v50 = vmul.f32 1.442695, %v2201_v19  ;;  %v2217_v55 = vmul.f32 1.442695, %v2204_v54  ;;  %v2215_v39 = vmul.f32 1.442695, %v2203_v16  ;;  %v2206_v20 = vsub.f32 %v2120_v0, %v2190_v23 }
0x147f   :  { %7019 = vpow2.f32 %v2209_v36  ;;  %v2205_v21 = vsub.f32 %v8236_v4, %v2189_v57 }
0x1480   :  { %7021 = vpow2.f32 %v2207_v46  ;;  %v2221_v47 = vmul.f32 1.442695, %v2206_v20 }
0x1481   :  { %7023 = vpow2.f32 %v2213_v24  ;;  %v2219_v44 = vmul.f32 1.442695, %v2205_v21 }
0x1482   :  { %7025 = vpow2.f32 %v2211_v50 }
0x1483   :  { %7027 = vpow2.f32 %v2217_v55 }
0x1484   :  { %7029 = vpow2.f32 %v2215_v39 }
0x1485   :  { %v8255_v63 = vpop.eup %7019  ;;  %7031 = vpow2.f32 %v2221_v47 }
0x1486   :  { %v8257_v14 = vpop.eup %7021  ;;  %2235 = vperm.xlu1 %7001, %v8255_v63   ;;  %7033 = vpow2.f32 %v2219_v44 }
0x1487   :  { %2232 = vperm.xlu0 %7000, %v8257_v14   ;;  %v8261_v25 = vpop.eup %7023 }
0x1488   :  { %v7026_v48 = vpop.eup %7025 }
0x1489   :  { %v7028_v10 = vpop.eup %7027 }
0x148a   :  { %v8265_v38 = vpop.eup %7029 }
0x148b   :  { %v7032_v17 = vpop.eup %7031 }
0x148c   :  { %v8268_v15 = vpop.eup %7033 }
0x148e   :  { %2241 = vperm.xlu1 %7001, %v8261_v25  }
0x148f   :  { %2238 = vperm.xlu0 %7000, %v7026_v48  }
0x1496   :  { %2247 = vperm.xlu1 %7001, %v7028_v10  }
0x1497   :  { %2244 = vperm.xlu0 %7000, %v8265_v38  }
0x149e   :  { %2253 = vperm.xlu1 %7001, %v7032_v17  }
0x149f   :  { %2250 = vperm.xlu0 %7000, %v8268_v15  }
0x14f8   :  { %v2236_v0 = vpop.permute.xlu1 %2235 }
0x14f9   :  { %v2233_v2 = vpop.permute.xlu0 %2232  ;;  %v2256_v46 = vperm.slane %v2236_v0, %v7811_v26 }
0x14fa   :  { %v2255_v30 = vperm.slane %v2233_v2, %v7811_v26 }
0x14fc   :  { %v2263_v50 = vsel %vm561_vm2, %v2256_v46, %v2255_v30 }
0x1500   :  { %v2242_v36 = vpop.permute.xlu1 %2241 }
0x1501   :  { %v2239_v4 = vpop.permute.xlu0 %2238  ;;  %v2258_v62 = vperm.slane %v2242_v36, %v7811_v26 }
0x1502   :  { %v2257_v19 = vperm.slane %v2239_v4, %v7811_v26 }
0x1504   :  { %v2264_v54 = vsel %vm563_vm3, %v2257_v19, %v2263_v50 }
0x1505   :  { %v2265_v23 = vsel %vm565_vm4, %v2258_v62, %v2264_v54 }
0x1508   :  { %v2248_v24 = vpop.permute.xlu1 %2247 }
0x1509   :  { %v2245_v58 = vpop.permute.xlu0 %2244  ;;  %v2260_v55 = vperm.slane %v2248_v24, %v7811_v26 }
0x150a   :  { %v2259_v16 = vperm.slane %v2245_v58, %v7811_v26 }
0x150c   :  { %v2266_v39 = vsel %vm567_vm5, %v2259_v16, %v2265_v23 }
0x150d   :  { %v2267_v44 = vsel %vm569_vm6, %v2260_v55, %v2266_v39 }
0x1510   :  { %v2254_v57 = vpop.permute.xlu1 %2253 }
0x1511   :  { %v2262_v20 = vperm.slane %v2254_v57, %v7811_v26  ;;  %v2251_v21 = vpop.permute.xlu0 %2250 }
0x1512   :  { %v2261_v47 = vperm.slane %v2251_v21, %v7811_v26 }
0x1514   :  { %v2268_v0 = vsel %vm571_vm7, %v2261_v47, %v2267_v44 }
0x1515   :  { %v2269_v2 = vsel %vm573_vm8, %v2262_v20, %v2268_v0 }
0x1516   :  { %v2271_v36 = vsel %vm576_vm9, %v2269_v2, 0.0 }
0x1517   :  { %2272 = vadd.xlane.f32.xlu0 %v2271_v36 }
0x158a   :  { %v2273_v4 = vpop.xlane.xlu0 %2272 }
0x158b   :  { %7035 = vrcp.f32 %v2273_v4 }
0x1591   :  { %v7036_v46 = vpop.eup %7035 }
0x1592   :  { %v2277_v30 = vperm.slane %v7036_v46, 1  ;;  %v2276_v19 = vperm.slane %v7036_v46, 0  ;;  %v2281_v24 = vperm.slane %v7036_v46, 5  ;;  %v2278_v58 = vperm.slane %v7036_v46, 2 }
0x1593   :  { %v2283_v20 = vperm.slane %v7036_v46, 7  ;;  %v2279_v21 = vperm.slane %v7036_v46, 3 }
0x1594   :  { %v2293_v50 = vmul.f32 %v8255_v63, %v2277_v30  ;;  %v2292_v62 = vmul.f32 %v8257_v14, %v2276_v19  ;;  %v2297_v55 = vmul.f32 %v7028_v10, %v2281_v24  ;;  %v2294_v23 = vmul.f32 %v7026_v48, %v2278_v58 }
0x1595   :  { %v2299_v5 = vmul.f32 %v7032_v17, %v2283_v20  ;;  %v2295_v63 = vmul.f32 %v8261_v25, %v2279_v21  ;;  %v2280_v14 = vperm.slane %v7036_v46, 4 }
0x1596   :  { %v2301_v54 = vpack.c.bf16 %v2293_v50, %v2293_v50  ;;  %v2300_v16 = vpack.c.bf16 %v2292_v62, %v2292_v62  ;;  %v2305_v0 = vpack.c.bf16 %v2297_v55, %v2297_v55  ;;  %v2302_v2 = vpack.c.bf16 %v2294_v23, %v2294_v23 }
0x1597   :  { %v2307_v10 = vpack.c.bf16 %v2299_v5, %v2299_v5  ;;  %v2303_v48 = vpack.c.bf16 %v2295_v63, %v2295_v63  ;;  %v2296_v50 = vmul.f32 %v8265_v38, %v2280_v14  ;;  %v2282_v55 = vperm.slane %v7036_v46, 6 }
0x1598   :  { %v2334_v39 = vunpack.c.l.b16 %v2301_v54  ;;  %v2309_v57 = vunpack.c.l.b16 %v2300_v16  ;;  %v2434_v36 = vunpack.c.l.b16 %v2305_v0  ;;  %v2359_v4 = vunpack.c.l.b16 %v2302_v2 }
0x1599   :  { %v2484_v24 = vunpack.c.l.b16 %v2307_v10  ;;  %v2384_v58 = vunpack.c.l.b16 %v2303_v48  ;;  %v2304_v16 = vpack.c.bf16 %v2296_v50, %v2296_v50  ;;  %v2298_v25 = vmul.f32 %v8268_v15, %v2282_v55 }
0x159a   :  { %v6618_v47 = vunpack.i.l.s16 %v2334_v39  ;;  %v6616_v44 = vunpack.i.l.s16 %v2309_v57  ;;  %v6626_v30 = vunpack.i.l.s16 %v2434_v36  ;;  %v6620_v19 = vunpack.i.l.s16 %v2359_v4 }
0x159b   :  { %v6630_v62 = vunpack.i.l.s16 %v2484_v24  ;;  %v6622_v54 = vunpack.i.l.s16 %v2384_v58  ;;  %v2409_v17 = vunpack.c.l.b16 %v2304_v16  ;;  %v2306_v39 = vpack.c.bf16 %v2298_v25, %v2298_v25 }
0x159c   :  { %2338 = vperm.xlu2 %7002, %v6618_v47   ;;  %2313 = vperm.xlu1 %7001, %v6616_v44  }
0x159d   :  { %v6624_v23 = vunpack.i.l.s16 %v2409_v17  ;;  %v2459_v5 = vunpack.c.l.b16 %v2306_v39  ;;  %v2023_v39 = vld [vmem:[#allocation2] sm:$0xff] }
0x159f   :  { %v6628_v57 = vunpack.i.l.s16 %v2459_v5 }
0x15a4   :  { %2438 = vperm.xlu2 %7002, %v6626_v30   ;;  %2363 = vperm.xlu1 %7001, %v6620_v19  }
0x15ac   :  { %2488 = vperm.xlu2 %7002, %v6630_v62   ;;  %2388 = vperm.xlu1 %7001, %v6622_v54  }
0x15b4   :  { %2413 = vperm.xlu1 %7001, %v6624_v23  }
0x15bc   :  { %2463 = vperm.xlu1 %7001, %v6628_v57   ;;  %v2024_v57 = vpack.c.bf16 %v2023_v39, %v2023_v39 }
0x15f6   :  { %v2339_v20 = vpop.permute.xlu2 %2338 }
0x15f7   :  { %v2340_v21 = vperm.slane %v2339_v20, %v7811_v26 }
0x15f9   :  { %v2341_v47 = vpack.c.b16 %v2340_v21, %v2340_v21 }
0x15fb   :  { %6619 = vmatmul.msk.bf16.vlgmr.msra.gmra.mxu3 %vm576_vm9, %v2341_v47 }
0x15fc   :  { %2477 = vmatpush.bf16.msra.mxu3 %v7897_v35 }
0x15fe   :  { %v2439_v19 = vpop.permute.xlu2 %2438 }
0x15ff   :  { %v2440_v48 = vperm.slane %v2439_v19, %v7811_v26 }
0x1601   :  { %v2441_v50 = vpack.c.b16 %v2440_v48, %v2440_v48 }
0x1606   :  { %v2489_v54 = vpop.permute.xlu2 %2488 }
0x1607   :  { %v2490_v16 = vperm.slane %v2489_v54, %v7811_v26 }
0x1609   :  { %v2491_v55 = vpack.c.b16 %v2490_v16, %v2490_v16 }
0x160e   :  { %v2314_v38 = vpop.permute.xlu1 %2313 }
0x160f   :  { %v2315_v46 = vperm.slane %v2314_v38, %v7811_v26 }
0x1611   :  { %v2316_v44 = vpack.c.b16 %v2315_v46, %v2315_v46 }
0x1613   :  { %6617 = vmatmul.msk.bf16.vlgmr.msra.gmra.mxu2 %vm576_vm9, %v2316_v44 }
0x1614   :  { %2452 = vmatpush.bf16.msra.mxu2 %v7894_v18 }
0x1616   :  { %v2364_v15 = vpop.permute.xlu1 %2363 }
0x1617   :  { %v2365_v0 = vperm.slane %v2364_v15, %v7811_v26 }
0x1619   :  { %v2366_v4 = vpack.c.b16 %v2365_v0, %v2365_v0 }
0x161e   :  { %v2389_v2 = vpop.permute.xlu1 %2388 }
0x161f   :  { %v2390_v36 = vperm.slane %v2389_v2, %v7811_v26 }
0x1621   :  { %v2391_v63 = vpack.c.b16 %v2390_v36, %v2390_v36 }
0x1623   :  { %6621 = vmatmul.msk.bf16.vlgmr.msrb.gmra.mxu2 %vm576_vm9, %v2366_v4  ;;  %6623 = vmatmul.msk.bf16.vlgmr.msrb.gmra.mxu3 %vm576_vm9, %v2391_v63 }
0x1624   :  { %2562 = vmatpush.bf16.msrb.mxu2 %v7931_v32  ;;  %2580 = vmatpush.bf16.msrb.mxu3 %v7925_v34 }
0x1626   :  { %v2414_v14 = vpop.permute.xlu1 %2413 }
0x1627   :  { %v2415_v30 = vperm.slane %v2414_v14, %v7811_v26 }
0x1628   :  { %2563 = vmatpush.bf16.msrb.mxu2 %v7945_v6  ;;  %2581 = vmatpush.bf16.msrb.mxu3 %v7928_v27 }
0x1629   :  { %v2416_v10 = vpack.c.b16 %v2415_v30, %v2415_v30 }
0x162b   :  { %6625 = vmatmul.msk.bf16.vlgmr.msrb.gmra.mxu0 %vm576_vm9, %v2416_v10 }
0x162c   :  { %2594 = vmatpush.bf16.msrb.mxu0 %v7901_v37  ;;  %2564 = vmatpush.bf16.msrb.mxu2 %v7956_v11 }
0x162e   :  { %v2464_v24 = vpop.permute.xlu1 %2463 }
0x162f   :  { %v2465_v58 = vperm.slane %v2464_v24, %v7811_v26 }
0x1630   :  { %2595 = vmatpush.bf16.msrb.mxu0 %v7913_v42  ;;  %2565 = vmatpush.bf16.msrb.mxu2 %v7965_v28 }
0x1631   :  { %v2466_v62 = vpack.c.b16 %v2465_v58, %v2465_v58 }
0x1633   :  { %6627 = vmatmul.msk.bf16.vlgmr.msra.gmra.mxu2 %vm576_vm9, %v2441_v50  ;;  %6629 = vmatmul.msk.bf16.vlgmr.msra.gmra.mxu3 %vm576_vm9, %v2466_v62 }
0x1634   :  { %2645 = vmatpush.bf16.msra.mxu2 %v7936_v33  ;;  %2666 = vmatpush.bf16.msra.mxu3 %v7996_v51 }
0x1638   :  { %2646 = vmatpush.bf16.msra.mxu2 %v7950_v8  ;;  %2667 = vmatpush.bf16.msra.mxu3 %v8002_v56 }
0x163b   :  { %6631 = vmatmul.msk.bf16.vlgmr.msra.gmra.mxu0 %vm576_vm9, %v2491_v55 }
0x163c   :  { %2647 = vmatpush.bf16.msra.mxu2 %v7961_v22  ;;  %2679 = vmatpush.bf16.msra.mxu0 %v7994_v49 }
0x1640   :  { %2648 = vmatpush.bf16.msra.mxu2 %v7970_v29  ;;  %2680 = vmatpush.bf16.msra.mxu0 %v7999_v53 }
0x1643   :  { %6633 = vmatmul.msk.bf16.vlgmr.msrb.gmra.mxu3 %vm399_vm0, %v2024_v57 }
0x164b   :  { %6634 = vmatmul.msk.bf16.vlgmr.msrb.gmra.mxu0 %vm399_vm0, %v8184_v43 }
0x165b   :  { %6638 = vmatmul.msk.bf16.vlgmr.msra.gmra.mxu0 %vm399_vm0, %v2024_v57 }
0x167e   :  { %v2354_v17 = vpop.f32.mrf.mxu3 }
0x167f   :  { %v2517_v46 = vpack.c.bf16 %v2354_v17, %v2354_v17 }
0x1681   :  { %v2533_v36 = vunpack.c.l.b16 %v2517_v46 }
0x1683   :  { %v2540_v10 = vrot.slane %v2533_v36, 7 }
0x1686   :  { %v2356_v25 = vpop.f32.mrf.mxu3 }
0x1696   :  { %v2329_v23 = vpop.f32.mrf.mxu2 }
0x1697   :  { %v2516_v44 = vpack.c.bf16 %v2329_v23, %v2329_v23 }
0x1699   :  { %v2532_v14 = vunpack.c.l.b16 %v2516_v44 }
0x169b   :  { %v2541_v24 = vsel %vm561_vm2, %v2540_v10, %v2532_v14 }
0x169e   :  { %v2331_v5 = vpop.f32.mrf.mxu2 }
0x16a6   :  { %v2379_v20 = vpop.f32.mrf.mxu2  ;;  %v2404_v21 = vpop.f32.mrf.mxu3 }
0x16a7   :  { %v2518_v38 = vpack.c.bf16 %v2379_v20, %v2379_v20  ;;  %v2519_v15 = vpack.c.bf16 %v2404_v21, %v2404_v21 }
0x16a8   :  { %v2429_v47 = vpop.f32.mrf.mxu0 }
0x16a9   :  { %v2534_v0 = vunpack.c.l.b16 %v2518_v38  ;;  %v2520_v4 = vpack.c.bf16 %v2429_v47, %v2429_v47  ;;  %v2535_v30 = vunpack.c.l.b16 %v2519_v15 }
0x16ab   :  { %v2542_v19 = vrot.slane %v2534_v0, 6  ;;  %v2536_v48 = vunpack.c.l.b16 %v2520_v4  ;;  %v2544_v58 = vrot.slane %v2535_v30, 5 }
0x16ad   :  { %v2543_v50 = vsel %vm563_vm3, %v2542_v19, %v2541_v24  ;;  %v2546_v17 = vrot.slane %v2536_v48, 4 }
0x16ae   :  { %v2381_v2 = vpop.f32.mrf.mxu2  ;;  %v2406_v43 = vpop.f32.mrf.mxu3  ;;  %v2545_v23 = vsel %vm565_vm4, %v2544_v58, %v2543_v50 }
0x16af   :  { %v2547_v38 = vsel %vm567_vm5, %v2546_v17, %v2545_v23 }
0x16b0   :  { %v2431_v63 = vpop.f32.mrf.mxu0 }
0x16b6   :  { %v2454_v62 = vpop.f32.mrf.mxu2  ;;  %v2479_v54 = vpop.f32.mrf.mxu3 }
0x16b7   :  { %v2521_v16 = vpack.c.bf16 %v2454_v62, %v2454_v62  ;;  %v2522_v55 = vpack.c.bf16 %v2479_v54, %v2479_v54 }
0x16b8   :  { %v2504_v25 = vpop.f32.mrf.mxu0 }
0x16b9   :  { %v2537_v39 = vunpack.c.l.b16 %v2521_v16  ;;  %v2538_v5 = vunpack.c.l.b16 %v2522_v55  ;;  %v2523_v57 = vpack.c.bf16 %v2504_v25, %v2504_v25 }
0x16bb   :  { %v2548_v20 = vrot.slane %v2537_v39, 3  ;;  %v2550_v21 = vrot.slane %v2538_v5, 2  ;;  %v2539_v47 = vunpack.c.l.b16 %v2523_v57 }
0x16bd   :  { %v2549_v46 = vsel %vm569_vm6, %v2548_v20, %v2547_v38  ;;  %v2552_v44 = vrot.slane %v2539_v47, 1 }
0x16be   :  { %v2551_v15 = vsel %vm571_vm7, %v2550_v21, %v2549_v46  ;;  %v2456_v0 = vpop.f32.mrf.mxu2  ;;  %v2481_v2 = vpop.f32.mrf.mxu3 }
0x16bf   :  { %v2553_v43 = vsel %vm573_vm8, %v2552_v44, %v2551_v15 }
0x16c0   :  { %v2554_v36 = vpack.c.b16 %v2553_v43, %v2553_v43  ;;  %v2506_v4 = vpop.f32.mrf.mxu0 }
0x16c2   :  { %6632 = vmatmul.msk.bf16.vlgmr.msrb.gmra.mxu2 %vm327_vm1, %v2554_v36 }
0x16c6   :  { %v2583_v19 = vpop.f32.mrf.mxu3 }
0x16c8   :  { %v2597_v63 = vpop.f32.mrf.mxu0 }
0x16c9   :  { %v2598_v14 = vadd.f32 %v7972_v31, %v2597_v63 }
0x16cb   :  { %2622 = vrot.lane.b32.xlu1 %v2598_v14, %s7552_s5 }
0x16ce   :  { %v2585_v10 = vpop.f32.mrf.mxu3 }
0x16d0   :  { %v2599_v30 = vpop.f32.mrf.mxu0 }
0x16d2   :  { %6636 = vmatmul.msk.bf16.vlgmr.msra.gmra.mxu2 %vm327_vm1, %v2554_v36 }
0x173d   :  { %v2623_v38 = vpop.permute.xlu1 %2622 }
0x1745   :  { %v2567_v48 = vpop.f32.mrf.mxu2 }
0x1746   :  { %v2584_v24 = vadd.f32 %v2583_v19, %v2567_v48  ;;  %v2682_v48 = vpop.f32.mrf.mxu0 }
0x1748   :  { %v2587_v58 = vadd.f32 %v7989_v52, %v2584_v24 }
0x174a   :  { %v2601_v50 = vadd.f32 %v2598_v14, %v2587_v58 }
0x174c   :  { %v6635_v62 = vmul.f32 -1.442695, %v2601_v50 }
0x174d   :  { %v2569_v54 = vpop.f32.mrf.mxu2 }
0x174e   :  { %7037 = vpow2.f32 %v6635_v62  ;;  %v2684_v24 = vpop.f32.mrf.mxu0 }
0x1754   :  { %v7038_v16 = vpop.eup %7037 }
0x1755   :  { %v2605_v55 = vadd.f32 1.0, %v7038_v16  ;;  %v2650_v17 = vpop.f32.mrf.mxu2 }
0x1757   :  { %7039 = vrcp.f32 %v2605_v55  ;;  %v2617_v57 = vand.u32 2147483648, %v2605_v55  ;;  %v2615_v21 = vand.u32 2147483647, %v2605_v55  ;;  %vm2611_vm14 = vweird.f32 %v2605_v55 }
0x1759   :  { %v2618_v46 = vor.u32 1.1754944e-38, %v2617_v57  ;;  %vm2616_vm10 = vcmp.eq.f32.partialorder %v2615_v21, 8.507059e+37 }
0x175d   :  { %v7040_v25 = vpop.eup %7039  ;;  %v2652_v23 = vpop.f32.mrf.mxu2 }
0x175e   :  { %v2607_v39 = vmul.f32 %v7040_v25, %v2605_v55  ;;  %vm2612_vm13 = vweird.f32 %v7040_v25 }
0x175f   :  { %vm2613_vm15 = vmor %vm2611_vm14, %vm2612_vm13 }
0x1760   :  { %v2608_v5 = vsub.f32 1.0, %v2607_v39 }
0x1762   :  { %v2609_v20 = vmul.f32 %v7040_v25, %v2608_v5 }
0x1764   :  { %v2610_v47 = vadd.f32 %v7040_v25, %v2609_v20 }
0x1766   :  { %v2614_v44 = vsel %vm2613_vm15, %v7040_v25, %v2610_v47 }
0x1767   :  { %v2619_v15 = vsel %vm2616_vm10, %v2618_v46, %v2614_v44 }
0x1768   :  { %v2625_v0 = vmul.f32 %v2623_v38, %v2619_v15  ;;  %v2632_v4 = vsub.f32 1.0, %v2619_v15  ;;  %v2638_v30 = vmul.f32 %v2619_v15, %v8179_v45 }
0x176a   :  { %2627 = vrot.lane.b32.xlu2 %v2625_v0, %s7552_s5 }
0x17c4   :  { %v2628_v2 = vpop.permute.xlu2 %2627 }
0x17c5   :  { %v2630_v43 = vadd.f32 %v2628_v2, %v2587_v58 }
0x17c7   :  { %7041 = vtanh.f32 %v2630_v43 }
0x17cd   :  { %v7042_v36 = vpop.eup %7041 }
0x17ce   :  { %2634 = vrot.lane.b32.xlu0 %v7042_v36, %s7565_s8 }
0x1840   :  { %v2635_v63 = vpop.permute.xlu0 %2634 }
0x1841   :  { %v2637_v14 = vmul.f32 %v2635_v63, %v2632_v4 }
0x1843   :  { %v8345_v19 = vadd.f32 %v2638_v30, %v2637_v14 }
0x1845   :  { %v2640_v10 = vpack.c.bf16 %v8345_v19, %v8345_v19 }
0x1847   :  { %2655 = vrot.lane.b32.xlu1 %v2640_v10, %s7565_s8 }
0x18b9   :  { %v8350_v50 = vpop.permute.xlu1 %2655 }
0x18ba   :  { %6637 = vmatmul.msk.bf16.vlgmr.msra.gmra.mxu3 %vm399_vm0, %v8350_v50 }
0x193d   :  { %v2669_v58 = vpop.f32.mrf.mxu3 }
0x193e   :  { %v2670_v62 = vadd.f32 %v2669_v58, %v2650_v17 }
0x1940   :  { %v2686_v54 = vadd.f32 %v2682_v48, %v2670_v62 }
0x1941   :  { %2692 = sbr.rel (%p6640_p4) target bundleno = 6472 (0x1948), region = 137 }
0x1942   :  { %v8355_v45 = vadd.f32 %v8020_v40, %v2686_v54 }
0x1944   :  { %9275 = vst [vmem:[#allocation41_spill] sm:$0xff] %v8355_v45 }
0x1945   :  { %v2671_v16 = vpop.f32.mrf.mxu3 }
0x1946   :  { %v6641_v55 = vld [vmem:[%s9276_s24 + $0x18] sm:$0xff] }
0x1947   :  { %2695 = vst.msk [vmem:[#allocation2] sm:$0xff] %vm399_vm0, %v6641_v55 }
0x1948 PF:  { %p6642_p5 = scmp.ne.s32.totalorder %s6639_s12, 0 }
0x1949   :  { %s9277_s11 = sld [smem:[#allocation47_spill]] (!%p6642_p5) }
0x194a   :  { %2699 = sbr.rel (%p6642_p5) target bundleno = 6979 (0x1b43), region = 141 }
0x194f   :  { %v2700_v25 = vsel %vm399_vm0, %v8355_v45, -inf  ;;  %v6877_v46 = vld [vmem:[%s9277_s11 + $0x8] sm:$0xff]  ;;  %v6876_v44 = vld [vmem:[%s9277_s11] sm:$0xff]  ;;  %v7568_v4 = vmov 0.0  }
0x1950   :  { %2701 = vmax.xlane.f32.xlu0 %v2700_v25  ;;  %2748 = vmatpush.bf16.msra.mxu0 %v6877_v46 }
0x1954   :  { %2749 = vmatpush.bf16.msra.mxu0 %v6876_v44 }
0x19c3   :  { %v2702_v17 = vpop.xlane.xlu0 %2701 }
0x19c4   :  { %vm2703_vm11 = vcmp.eq.f32.partialorder %v8355_v45, %v2702_v17 }
0x19c5   :  { %v2704_v23 = vsel %vm2703_vm11, %v7811_v26, 32 }
0x19c6   :  { %v2705_v39 = vsel %vm399_vm0, %v2704_v23, 2147483647 }
0x19c7   :  { %v2707_v5 = vshra.s32 %v2705_v39, 16  ;;  %v2706_v20 = vand.u32 65535, %v2705_v39 }
0x19c9   :  { %v2709_v57 = vcvt.s32.f32 %v2707_v5  ;;  %v2708_v47 = vcvt.s32.f32 %v2706_v20 }
0x19cb   :  { %2710 = vmin.xlane.f32.xlu0 %v2709_v57 }
0x1a3e   :  { %v2711_v21 = vpop.xlane.xlu0 %2710 }
0x1a3f   :  { %vm2712_vm12 = vcmp.eq.f32.partialorder %v2709_v57, %v2711_v21  ;;  %v2717_v15 = vcvt.f32.s32 %v2711_v21 }
0x1a40   :  { %v2713_v38 = vsel %vm2712_vm12, %v2708_v47, inf }
0x1a41   :  { %2714 = vmin.xlane.f32.xlu1 %v2713_v38  ;;  %v2718_v2 = vshll.u32 %v2717_v15, 16 }
0x1ab4   :  { %v2715_v0 = vpop.xlane.xlu1 %2714 }
0x1ab5   :  { %v2716_v43 = vcvt.f32.s32 %v2715_v0 }
0x1ab7   :  { %v2719_v36 = vadd.s32 %v2718_v2, %v2716_v43 }
0x1ab9   :  { %vm2720_vm13 = vcmp.eq.s32.totalorder %v7811_v26, %v2719_v36 }
0x1aba   :  { %v2721_v63 = vsel %vm2720_vm13, 1.0, %v7568_v4 }
0x1abb   :  { %v2722_v14 = vpack.c.bf16 %v2721_v63, %v2721_v63 }
0x1abd   :  { %6651 = vmatmul.msk.bf16.vlgmr.msra.gmra.mxu0 %vm399_vm0, %v2722_v14 }
0x1b3a   :  { %v2751_v30 = vpop.f32.mrf.mxu0 }
0x1b3b   :  { %v2755_v10 = vmul.f32 5.656854, %v2751_v30 }
0x1b3d   :  { %2756 = vst.msk [vmem:[#allocation2] sm:$0xff] %vm399_vm0, %v2755_v10 }
0x1b42   :  { %v2753_v48 = vpop.f32.mrf.mxu0 }
0x1b43 PF:  { %2765 = vmatpush.bf16.msra.mxu0 %v7726_v1  ;;  %2834 = vmatpush.bf16.msra.mxu1 %v7759_v12  ;;  %v9278_v24 = vmov 0   ;;  %v9279_v55 = vld [vmem:[#allocation31_spill] sm:$0xff]  ;;  %v9280_v17 = vld [vmem:[#allocation32_spill] sm:$0xff]  ;;  %v9281_v44 = vld [vmem:[#allocation33_spill] sm:$0xff]  ;;  %s6680_s16 = sld [smem:[#allocation3 + $0x3]] }
0x1b44   :  { %7043 = vset.pattern.permute.xlu0 %v9278_v24  ;;  %7044 = vset.pattern.permute.xlu1 %v9278_v24  ;;  %v9282_v0 = vld [vmem:[#allocation34_spill] sm:$0xff]  ;;  %v9283_v48 = vld [vmem:[#allocation35_spill] sm:$0xff] }
0x1b45   :  { %7045 = vset.pattern.permute.xlu2 %v9278_v24  ;;  %3086 = vmatpush.bf16.msra.mxu3 %v7874_v60 }
0x1b46   :  { %3061 = vmatpush.bf16.msra.mxu2 %v7870_v59 }
0x1b47   :  { %2766 = vmatpush.bf16.msra.mxu0 %v7732_v3  ;;  %2835 = vmatpush.bf16.msra.mxu1 %v7765_v13 }
0x1b49   :  { %3136 = vmatpush.bf16.msrb.mxu3 %v7883_v7  ;;  %p6681_p6 = scmp.eq.s32.totalorder %s6680_s16, 0 }
0x1b4a   :  { %3111 = vmatpush.bf16.msrb.mxu2 %v7878_v61  ;;  %6652 = vmatmul.msk.bf16.vlgmr.msra.gmra.mxu0 %vm399_vm0, %v8350_v50  ;;  %s9288_s30 = sld [smem:[#allocation46_spill]] (!%p6681_p6) }
0x1b4b   :  { %3161 = vmatpush.bf16.msrb.mxu0 %v7886_v9 }
0x1b4f   :  { %3236 = vmatpush.bf16.msra.mxu0 %v7909_v41 }
0x1bc7   :  { %v2768_v58 = vpop.f32.mrf.mxu0 }
0x1bc8   :  { %v2773_v62 = vrot.slane %v2768_v58, 1  ;;  %v2780_v54 = vperm.slane %v2768_v58, 0  ;;  %v2774_v5 = vrot.slane %v2768_v58, 2  ;;  %v2775_v57 = vrot.slane %v2768_v58, 3 }
0x1bc9   :  { %v2776_v43 = vrot.slane %v2768_v58, 4  ;;  %v2777_v36 = vrot.slane %v2768_v58, 5 }
0x1bca   :  { %v2781_v16 = vperm.slane %v2773_v62, 0  ;;  %v2796_v25 = vadd.f32 %v2780_v54, %v9279_v55  ;;  %v2782_v21 = vperm.slane %v2774_v5, 0  ;;  %v2783_v38 = vperm.slane %v2775_v57, 0  ;;  %v9284_v62 = vld [vmem:[#allocation36_spill] sm:$0xff]  ;;  %v9285_v57 = vld [vmem:[#allocation37_spill] sm:$0xff] }
0x1bcb   :  { %v2784_v14 = vperm.slane %v2776_v43, 0  ;;  %v2785_v30 = vperm.slane %v2777_v36, 0  ;;  %v2779_v55 = vrot.slane %v2768_v58, 7 }
0x1bcc   :  { %v2797_v23 = vadd.f32 %v2781_v16, %v9280_v17  ;;  %7046 = vtanh.f32 %v2796_v25  ;;  %v2798_v15 = vadd.f32 %v2782_v21, %v9281_v44  ;;  %v2799_v2 = vadd.f32 %v2783_v38, %v9282_v0  ;;  %v9286_v21 = vld [vmem:[#allocation38_spill] sm:$0xff] }
0x1bcd   :  { %v2800_v24 = vadd.f32 %v2784_v14, %v9283_v48  ;;  %v2801_v54 = vadd.f32 %v2785_v30, %v9284_v62  ;;  %v2778_v16 = vrot.slane %v2768_v58, 6 }
0x1bce   :  { %7048 = vtanh.f32 %v2797_v23 }
0x1bcf   :  { %v2770_v39 = vpop.f32.mrf.mxu0  ;;  %7050 = vtanh.f32 %v2798_v15  ;;  %v2786_v23 = vperm.slane %v2778_v16, 0 }
0x1bd0   :  { %7052 = vtanh.f32 %v2799_v2  ;;  %v2787_v39 = vperm.slane %v2779_v55, 0 }
0x1bd1   :  { %7054 = vtanh.f32 %v2800_v24 }
0x1bd2   :  { %v7047_v20 = vpop.eup %7046  ;;  %7056 = vtanh.f32 %v2801_v54 }
0x1bd4   :  { %v7049_v47 = vpop.eup %7048 }
0x1bd5   :  { %v2812_v46 = vpack.c.bf16 %v7049_v47, %v7047_v20  ;;  %v7051_v4 = vpop.eup %7050  ;;  %v2802_v20 = vadd.f32 %v2786_v23, %v9285_v57  ;;  %v2803_v47 = vadd.f32 %v2787_v39, %v9286_v21 }
0x1bd6   :  { %v7053_v63 = vpop.eup %7052 }
0x1bd7   :  { %6653 = vmatmul.msk.bf16.vlgmr.msra.gmra.mxu1 %vm399_vm0, %v2812_v46  ;;  %v2813_v10 = vpack.c.bf16 %v7053_v63, %v7051_v4  ;;  %v7055_v25 = vpop.eup %7054  ;;  %7058 = vtanh.f32 %v2802_v20 }
0x1bd8   :  { %v7057_v17 = vpop.eup %7056  ;;  %7060 = vtanh.f32 %v2803_v47 }
0x1bd9   :  { %v2814_v5 = vpack.c.bf16 %v7057_v17, %v7055_v25 }
0x1bdd   :  { %v7059_v38 = vpop.eup %7058 }
0x1bde   :  { %v7061_v46 = vpop.eup %7060 }
0x1bdf   :  { %v2815_v44 = vpack.c.bf16 %v7061_v46, %v7059_v38 }
0x1be7   :  { %6654 = vmatmul.msk.bf16.gmra.mxu1 %vm399_vm0, %v2813_v10 }
0x1bf7   :  { %6655 = vmatmul.msk.bf16.gmra.mxu1 %vm399_vm0, %v2814_v5 }
0x1c07   :  { %6656 = vmatmul.msk.bf16.gmra.mxu1 %vm399_vm0, %v2815_v44 }
0x1c54   :  { %v2837_v15 = vpop.f32.mrf.mxu1 }
0x1c55   :  { %2874 = vperm.xlu0 %7043, %v2837_v15  }
0x1c5c   :  { %v2839_v58 = vpop.f32.mrf.mxu1 }
0x1c5d   :  { %2877 = vperm.xlu0 %7043, %v2839_v58  }
0x1c64   :  { %v2842_v0 = vpop.f32.mrf.mxu1 }
0x1c65   :  { %2880 = vperm.xlu1 %7044, %v2842_v0  }
0x1c6c   :  { %v2844_v2 = vpop.f32.mrf.mxu1 }
0x1c6d   :  { %2883 = vperm.xlu1 %7044, %v2844_v2  }
0x1c74   :  { %v2847_v43 = vpop.f32.mrf.mxu1 }
0x1c75   :  { %2886 = vperm.xlu2 %7045, %v2847_v43  }
0x1c7c   :  { %v2849_v36 = vpop.f32.mrf.mxu1 }
0x1c7d   :  { %2889 = vperm.xlu2 %7045, %v2849_v36  }
0x1c84   :  { %v8402_v4 = vpop.f32.mrf.mxu1 }
0x1c85   :  { %2892 = vperm.xlu0 %7043, %v8402_v4  }
0x1c8c   :  { %v2854_v63 = vpop.f32.mrf.mxu1 }
0x1c8d   :  { %2895 = vperm.xlu1 %7044, %v2854_v63  }
0x1cc7   :  { %v2875_v14 = vpop.permute.xlu0 %2874 }
0x1cc8   :  { %v2897_v16 = vperm.slane %v2875_v14, %v7811_v26 }
0x1ccf   :  { %v2878_v10 = vpop.permute.xlu0 %2877  ;;  %v2887_v48 = vpop.permute.xlu2 %2886 }
0x1cd0   :  { %v2898_v62 = vperm.slane %v2878_v10, %v7811_v26  ;;  %v2901_v5 = vperm.slane %v2887_v48, %v7811_v26 }
0x1cd2   :  { %v2905_v25 = vsel %vm561_vm2, %v2898_v62, %v2897_v16 }
0x1cd7   :  { %v2881_v30 = vpop.permute.xlu1 %2880  ;;  %v2890_v57 = vpop.permute.xlu2 %2889 }
0x1cd8   :  { %v2899_v54 = vperm.slane %v2881_v30, %v7811_v26  ;;  %v2902_v47 = vperm.slane %v2890_v57, %v7811_v26 }
0x1cda   :  { %v2906_v17 = vsel %vm563_vm3, %v2899_v54, %v2905_v25 }
0x1cdf   :  { %v2884_v24 = vpop.permute.xlu1 %2883 }
0x1ce0   :  { %v2900_v55 = vperm.slane %v2884_v24, %v7811_v26 }
0x1ce2   :  { %v2907_v23 = vsel %vm565_vm4, %v2900_v55, %v2906_v17 }
0x1ce3   :  { %v2908_v20 = vsel %vm567_vm5, %v2901_v5, %v2907_v23 }
0x1ce4   :  { %v2909_v44 = vsel %vm569_vm6, %v2902_v47, %v2908_v20 }
0x1cf7   :  { %v2893_v39 = vpop.permute.xlu0 %2892 }
0x1cf8   :  { %v2903_v21 = vperm.slane %v2893_v39, %v7811_v26 }
0x1cfa   :  { %v2910_v14 = vsel %vm571_vm7, %v2903_v21, %v2909_v44 }
0x1cff   :  { %v2896_v38 = vpop.permute.xlu1 %2895 }
0x1d00   :  { %v2904_v46 = vperm.slane %v2896_v38, %v7811_v26 }
0x1d02   :  { %v2911_v30 = vsel %vm573_vm8, %v2904_v46, %v2910_v14 }
0x1d03   :  { %v2913_v10 = vsel %vm576_vm9, %v2911_v30, -inf }
0x1d04   :  { %2914 = vmax.xlane.f32.xlu2 %v2913_v10 }
0x1d77   :  { %v2915_v48 = vpop.xlane.xlu2 %2914 }
0x1d78   :  { %v2918_v24 = vperm.slane %v2915_v48, 1  ;;  %v2917_v62 = vperm.slane %v2915_v48, 0  ;;  %v2920_v55 = vperm.slane %v2915_v48, 3  ;;  %v2919_v25 = vperm.slane %v2915_v48, 2 }
0x1d79   :  { %v2922_v20 = vperm.slane %v2915_v48, 5  ;;  %v2921_v47 = vperm.slane %v2915_v48, 4 }
0x1d7a   :  { %v2934_v54 = vsub.f32 %v2839_v58, %v2918_v24  ;;  %v2933_v16 = vsub.f32 %v2837_v15, %v2917_v62  ;;  %v2936_v39 = vsub.f32 %v2844_v2, %v2920_v55  ;;  %v2935_v5 = vsub.f32 %v2842_v0, %v2919_v25 }
0x1d7b   :  { %v2938_v15 = vsub.f32 %v2849_v36, %v2922_v20  ;;  %v2937_v58 = vsub.f32 %v2847_v43, %v2921_v47  ;;  %v2924_v2 = vperm.slane %v2915_v48, 7  ;;  %v2923_v0 = vperm.slane %v2915_v48, 6 }
0x1d7c   :  { %v2943_v17 = vmul.f32 1.442695, %v2934_v54  ;;  %v2941_v23 = vmul.f32 1.442695, %v2933_v16  ;;  %v2947_v57 = vmul.f32 1.442695, %v2936_v39 }
0x1d7d   :  { %v2945_v21 = vmul.f32 1.442695, %v2935_v5  ;;  %v2951_v44 = vmul.f32 1.442695, %v2938_v15  ;;  %v2949_v14 = vmul.f32 1.442695, %v2937_v58  ;;  %v2940_v24 = vsub.f32 %v2854_v63, %v2924_v2 }
0x1d7e   :  { %7062 = vpow2.f32 %v2943_v17  ;;  %v2939_v62 = vsub.f32 %v8402_v4, %v2923_v0 }
0x1d7f   :  { %7064 = vpow2.f32 %v2941_v23  ;;  %v2955_v54 = vmul.f32 1.442695, %v2940_v24 }
0x1d80   :  { %7066 = vpow2.f32 %v2947_v57  ;;  %v2953_v16 = vmul.f32 1.442695, %v2939_v62 }
0x1d81   :  { %7068 = vpow2.f32 %v2945_v21 }
0x1d82   :  { %7070 = vpow2.f32 %v2951_v44 }
0x1d83   :  { %7072 = vpow2.f32 %v2949_v14 }
0x1d84   :  { %v8421_v38 = vpop.eup %7062  ;;  %7074 = vpow2.f32 %v2955_v54 }
0x1d85   :  { %v8423_v46 = vpop.eup %7064  ;;  %2969 = vperm.xlu1 %7044, %v8421_v38   ;;  %7076 = vpow2.f32 %v2953_v16 }
0x1d86   :  { %2966 = vperm.xlu0 %7043, %v8423_v46   ;;  %v8427_v30 = vpop.eup %7066 }
0x1d87   :  { %v7069_v10 = vpop.eup %7068 }
0x1d88   :  { %v7071_v36 = vpop.eup %7070 }
0x1d89   :  { %v8431_v55 = vpop.eup %7072 }
0x1d8a   :  { %v7075_v43 = vpop.eup %7074 }
0x1d8b   :  { %v8434_v48 = vpop.eup %7076 }
0x1d8d   :  { %2975 = vperm.xlu1 %7044, %v8427_v30  }
0x1d8e   :  { %2972 = vperm.xlu0 %7043, %v7069_v10  }
0x1d95   :  { %2981 = vperm.xlu1 %7044, %v7071_v36  }
0x1d96   :  { %2978 = vperm.xlu0 %7043, %v8431_v55  }
0x1d9d   :  { %2987 = vperm.xlu1 %7044, %v7075_v43  }
0x1d9e   :  { %2984 = vperm.xlu0 %7043, %v8434_v48  }
0x1df7   :  { %v2970_v63 = vpop.permute.xlu1 %2969 }
0x1df8   :  { %v2967_v25 = vpop.permute.xlu0 %2966  ;;  %v2990_v23 = vperm.slane %v2970_v63, %v7811_v26 }
0x1df9   :  { %v2989_v39 = vperm.slane %v2967_v25, %v7811_v26 }
0x1dfb   :  { %v2997_v21 = vsel %vm561_vm2, %v2990_v23, %v2989_v39 }
0x1dff   :  { %v2976_v17 = vpop.permute.xlu1 %2975 }
0x1e00   :  { %v2973_v4 = vpop.permute.xlu0 %2972  ;;  %v2992_v47 = vperm.slane %v2976_v17, %v7811_v26 }
0x1e01   :  { %v2991_v5 = vperm.slane %v2973_v4, %v7811_v26 }
0x1e03   :  { %v2998_v15 = vsel %vm563_vm3, %v2991_v5, %v2997_v21 }
0x1e04   :  { %v2999_v2 = vsel %vm565_vm4, %v2992_v47, %v2998_v15 }
0x1e07   :  { %v2982_v57 = vpop.permute.xlu1 %2981 }
0x1e08   :  { %v2979_v20 = vpop.permute.xlu0 %2978  ;;  %v2994_v44 = vperm.slane %v2982_v57, %v7811_v26 }
0x1e09   :  { %v2993_v58 = vperm.slane %v2979_v20, %v7811_v26 }
0x1e0b   :  { %v3000_v14 = vsel %vm567_vm5, %v2993_v58, %v2999_v2 }
0x1e0c   :  { %v3001_v16 = vsel %vm569_vm6, %v2994_v44, %v3000_v14 }
0x1e0f   :  { %v2988_v0 = vpop.permute.xlu1 %2987 }
0x1e10   :  { %v2996_v24 = vperm.slane %v2988_v0, %v7811_v26  ;;  %v2985_v62 = vpop.permute.xlu0 %2984 }
0x1e11   :  { %v2995_v54 = vperm.slane %v2985_v62, %v7811_v26 }
0x1e13   :  { %v3002_v63 = vsel %vm571_vm7, %v2995_v54, %v3001_v16 }
0x1e14   :  { %v3003_v25 = vsel %vm573_vm8, %v2996_v24, %v3002_v63 }
0x1e15   :  { %v3005_v17 = vsel %vm576_vm9, %v3003_v25, 0.0 }
0x1e16   :  { %3006 = vadd.xlane.f32.xlu0 %v3005_v17 }
0x1e89   :  { %v3007_v4 = vpop.xlane.xlu0 %3006 }
0x1e8a   :  { %7078 = vrcp.f32 %v3007_v4 }
0x1e90   :  { %v7079_v23 = vpop.eup %7078 }
0x1e91   :  { %v3011_v39 = vperm.slane %v7079_v23, 1  ;;  %v3010_v5 = vperm.slane %v7079_v23, 0  ;;  %v3015_v57 = vperm.slane %v7079_v23, 5  ;;  %v3012_v20 = vperm.slane %v7079_v23, 2 }
0x1e92   :  { %v3017_v24 = vperm.slane %v7079_v23, 7  ;;  %v3013_v62 = vperm.slane %v7079_v23, 3 }
0x1e93   :  { %v3027_v21 = vmul.f32 %v8421_v38, %v3011_v39  ;;  %v3026_v47 = vmul.f32 %v8423_v46, %v3010_v5  ;;  %v3031_v44 = vmul.f32 %v7071_v36, %v3015_v57  ;;  %v3028_v2 = vmul.f32 %v7069_v10, %v3012_v20 }
0x1e94   :  { %v3033_v45 = vmul.f32 %v7075_v43, %v3017_v24  ;;  %v3029_v38 = vmul.f32 %v8427_v30, %v3013_v62  ;;  %v3014_v46 = vperm.slane %v7079_v23, 4 }
0x1e95   :  { %v3035_v15 = vpack.c.bf16 %v3027_v21, %v3027_v21  ;;  %v3034_v58 = vpack.c.bf16 %v3026_v47, %v3026_v47  ;;  %v3039_v63 = vpack.c.bf16 %v3031_v44, %v3031_v44  ;;  %v3036_v25 = vpack.c.bf16 %v3028_v2, %v3028_v2 }
0x1e96   :  { %v3041_v36 = vpack.c.bf16 %v3033_v45, %v3033_v45  ;;  %v3037_v10 = vpack.c.bf16 %v3029_v38, %v3029_v38  ;;  %v3030_v21 = vmul.f32 %v8431_v55, %v3014_v46  ;;  %v3016_v44 = vperm.slane %v7079_v23, 6 }
0x1e97   :  { %v3068_v14 = vunpack.c.l.b16 %v3035_v15  ;;  %v3043_v0 = vunpack.c.l.b16 %v3034_v58  ;;  %v3168_v17 = vunpack.c.l.b16 %v3039_v63  ;;  %v3093_v4 = vunpack.c.l.b16 %v3036_v25 }
0x1e98   :  { %v3218_v57 = vunpack.c.l.b16 %v3041_v36  ;;  %v3118_v20 = vunpack.c.l.b16 %v3037_v10  ;;  %v3038_v58 = vpack.c.bf16 %v3030_v21, %v3030_v21  ;;  %v3032_v30 = vmul.f32 %v8434_v48, %v3016_v44 }
0x1e99   :  { %v6659_v54 = vunpack.i.l.s16 %v3068_v14  ;;  %v6657_v16 = vunpack.i.l.s16 %v3043_v0  ;;  %v6667_v39 = vunpack.i.l.s16 %v3168_v17  ;;  %v6661_v5 = vunpack.i.l.s16 %v3093_v4 }
0x1e9a   :  { %v6671_v47 = vunpack.i.l.s16 %v3218_v57  ;;  %v6663_v15 = vunpack.i.l.s16 %v3118_v20  ;;  %v3143_v43 = vunpack.c.l.b16 %v3038_v58  ;;  %v3040_v14 = vpack.c.bf16 %v3032_v30, %v3032_v30 }
0x1e9b   :  { %3072 = vperm.xlu2 %7045, %v6659_v54   ;;  %3047 = vperm.xlu1 %7044, %v6657_v16  }
0x1e9c   :  { %v6665_v2 = vunpack.i.l.s16 %v3143_v43  ;;  %v3193_v45 = vunpack.c.l.b16 %v3040_v14  ;;  %v2757_v14 = vld [vmem:[#allocation2] sm:$0xff] }
0x1e9e   :  { %v6669_v0 = vunpack.i.l.s16 %v3193_v45 }
0x1ea3   :  { %3172 = vperm.xlu2 %7045, %v6667_v39   ;;  %3097 = vperm.xlu1 %7044, %v6661_v5  }
0x1eab   :  { %3222 = vperm.xlu2 %7045, %v6671_v47   ;;  %3122 = vperm.xlu1 %7044, %v6663_v15  }
0x1eb3   :  { %3147 = vperm.xlu1 %7044, %v6665_v2  }
0x1ebb   :  { %3197 = vperm.xlu1 %7044, %v6669_v0   ;;  %v2758_v0 = vpack.c.bf16 %v2757_v14, %v2757_v14 }
0x1ef5   :  { %v3073_v24 = vpop.permute.xlu2 %3072 }
0x1ef6   :  { %v3074_v62 = vperm.slane %v3073_v24, %v7811_v26 }
0x1ef8   :  { %v3075_v54 = vpack.c.b16 %v3074_v62, %v3074_v62 }
0x1efa   :  { %6660 = vmatmul.msk.bf16.vlgmr.msra.gmra.mxu3 %vm576_vm9, %v3075_v54 }
0x1efb   :  { %3211 = vmatpush.bf16.msra.mxu3 %v7897_v35 }
0x1efd   :  { %v3173_v5 = vpop.permute.xlu2 %3172 }
0x1efe   :  { %v3174_v10 = vperm.slane %v3173_v5, %v7811_v26 }
0x1f00   :  { %v3175_v21 = vpack.c.b16 %v3174_v10, %v3174_v10 }
0x1f05   :  { %v3223_v15 = vpop.permute.xlu2 %3222 }
0x1f06   :  { %v3224_v58 = vperm.slane %v3223_v15, %v7811_v26 }
0x1f08   :  { %v3225_v44 = vpack.c.b16 %v3224_v58, %v3224_v58 }
0x1f0d   :  { %v3048_v55 = vpop.permute.xlu1 %3047 }
0x1f0e   :  { %v3049_v23 = vperm.slane %v3048_v55, %v7811_v26 }
0x1f10   :  { %v3050_v16 = vpack.c.b16 %v3049_v23, %v3049_v23 }
0x1f12   :  { %6658 = vmatmul.msk.bf16.vlgmr.msra.gmra.mxu2 %vm576_vm9, %v3050_v16 }
0x1f13   :  { %3186 = vmatpush.bf16.msra.mxu2 %v7894_v18 }
0x1f15   :  { %v3098_v48 = vpop.permute.xlu1 %3097 }
0x1f16   :  { %v3099_v63 = vperm.slane %v3098_v48, %v7811_v26 }
0x1f18   :  { %v3100_v4 = vpack.c.b16 %v3099_v63, %v3099_v63 }
0x1f1d   :  { %v3123_v25 = vpop.permute.xlu1 %3122 }
0x1f1e   :  { %v3124_v17 = vperm.slane %v3123_v25, %v7811_v26 }
0x1f20   :  { %v3125_v38 = vpack.c.b16 %v3124_v17, %v3124_v17 }
0x1f22   :  { %6662 = vmatmul.msk.bf16.vlgmr.msrb.gmra.mxu2 %vm576_vm9, %v3100_v4  ;;  %6664 = vmatmul.msk.bf16.vlgmr.msrb.gmra.mxu3 %vm576_vm9, %v3125_v38 }
0x1f23   :  { %3296 = vmatpush.bf16.msrb.mxu2 %v7931_v32  ;;  %3314 = vmatpush.bf16.msrb.mxu3 %v7925_v34 }
0x1f25   :  { %v3148_v46 = vpop.permute.xlu1 %3147 }
0x1f26   :  { %v3149_v39 = vperm.slane %v3148_v46, %v7811_v26 }
0x1f27   :  { %3297 = vmatpush.bf16.msrb.mxu2 %v7945_v6  ;;  %3315 = vmatpush.bf16.msrb.mxu3 %v7928_v27 }
0x1f28   :  { %v3150_v36 = vpack.c.b16 %v3149_v39, %v3149_v39 }
0x1f2a   :  { %6666 = vmatmul.msk.bf16.vlgmr.msrb.gmra.mxu0 %vm576_vm9, %v3150_v36 }
0x1f2b   :  { %3328 = vmatpush.bf16.msrb.mxu0 %v7901_v37  ;;  %3298 = vmatpush.bf16.msrb.mxu2 %v7956_v11 }
0x1f2d   :  { %v3198_v57 = vpop.permute.xlu1 %3197 }
0x1f2e   :  { %v3199_v20 = vperm.slane %v3198_v57, %v7811_v26 }
0x1f2f   :  { %3329 = vmatpush.bf16.msrb.mxu0 %v7913_v42  ;;  %3299 = vmatpush.bf16.msrb.mxu2 %v7965_v28 }
0x1f30   :  { %v3200_v47 = vpack.c.b16 %v3199_v20, %v3199_v20 }
0x1f32   :  { %6668 = vmatmul.msk.bf16.vlgmr.msra.gmra.mxu2 %vm576_vm9, %v3175_v21  ;;  %6670 = vmatmul.msk.bf16.vlgmr.msra.gmra.mxu3 %vm576_vm9, %v3200_v47 }
0x1f33   :  { %3379 = vmatpush.bf16.msra.mxu2 %v7936_v33  ;;  %3400 = vmatpush.bf16.msra.mxu3 %v7996_v51 }
0x1f37   :  { %3380 = vmatpush.bf16.msra.mxu2 %v7950_v8  ;;  %3401 = vmatpush.bf16.msra.mxu3 %v8002_v56 }
0x1f3a   :  { %6672 = vmatmul.msk.bf16.vlgmr.msra.gmra.mxu0 %vm576_vm9, %v3225_v44 }
0x1f3b   :  { %3381 = vmatpush.bf16.msra.mxu2 %v7961_v22  ;;  %3413 = vmatpush.bf16.msra.mxu0 %v7994_v49 }
0x1f3f   :  { %3382 = vmatpush.bf16.msra.mxu2 %v7970_v29  ;;  %3414 = vmatpush.bf16.msra.mxu0 %v7999_v53 }
0x1f42   :  { %6674 = vmatmul.msk.bf16.vlgmr.msrb.gmra.mxu3 %vm399_vm0, %v2758_v0 }
0x1f4a   :  { %6675 = vmatmul.msk.bf16.vlgmr.msrb.gmra.mxu0 %vm399_vm0, %v8350_v50 }
0x1f5a   :  { %6679 = vmatmul.msk.bf16.vlgmr.msra.gmra.mxu0 %vm399_vm0, %v2758_v0 }
0x1f7d   :  { %v3088_v43 = vpop.f32.mrf.mxu3 }
0x1f7e   :  { %v3251_v23 = vpack.c.bf16 %v3088_v43, %v3088_v43 }
0x1f80   :  { %v3267_v17 = vunpack.c.l.b16 %v3251_v23 }
0x1f82   :  { %v3274_v36 = vrot.slane %v3267_v17, 7 }
0x1f85   :  { %v3090_v30 = vpop.f32.mrf.mxu3 }
0x1f95   :  { %v3063_v2 = vpop.f32.mrf.mxu2 }
0x1f96   :  { %v3250_v16 = vpack.c.bf16 %v3063_v2, %v3063_v2 }
0x1f98   :  { %v3266_v46 = vunpack.c.l.b16 %v3250_v16 }
0x1f9a   :  { %v3275_v57 = vsel %vm561_vm2, %v3274_v36, %v3266_v46 }
0x1f9d   :  { %v3065_v45 = vpop.f32.mrf.mxu2 }
0x1fa5   :  { %v3113_v24 = vpop.f32.mrf.mxu2  ;;  %v3138_v62 = vpop.f32.mrf.mxu3 }
0x1fa6   :  { %v3252_v55 = vpack.c.bf16 %v3113_v24, %v3113_v24  ;;  %v3253_v48 = vpack.c.bf16 %v3138_v62, %v3138_v62 }
0x1fa7   :  { %v3163_v54 = vpop.f32.mrf.mxu0 }
0x1fa8   :  { %v3268_v63 = vunpack.c.l.b16 %v3252_v55  ;;  %v3254_v4 = vpack.c.bf16 %v3163_v54, %v3163_v54  ;;  %v3269_v39 = vunpack.c.l.b16 %v3253_v48 }
0x1faa   :  { %v3276_v5 = vrot.slane %v3268_v63, 6  ;;  %v3270_v10 = vunpack.c.l.b16 %v3254_v4  ;;  %v3278_v20 = vrot.slane %v3269_v39, 5 }
0x1fac   :  { %v3277_v21 = vsel %vm563_vm3, %v3276_v5, %v3275_v57  ;;  %v3280_v43 = vrot.slane %v3270_v10, 4 }
0x1fad   :  { %v3115_v25 = vpop.f32.mrf.mxu2  ;;  %v3140_v50 = vpop.f32.mrf.mxu3  ;;  %v3279_v2 = vsel %vm565_vm4, %v3278_v20, %v3277_v21 }
0x1fae   :  { %v3281_v55 = vsel %vm567_vm5, %v3280_v43, %v3279_v2 }
0x1faf   :  { %v3165_v38 = vpop.f32.mrf.mxu0 }
0x1fb5   :  { %v3188_v47 = vpop.f32.mrf.mxu2  ;;  %v3213_v15 = vpop.f32.mrf.mxu3 }
0x1fb6   :  { %v3255_v58 = vpack.c.bf16 %v3188_v47, %v3188_v47  ;;  %v3256_v44 = vpack.c.bf16 %v3213_v15, %v3213_v15 }
0x1fb7   :  { %v3238_v30 = vpop.f32.mrf.mxu0 }
0x1fb8   :  { %v3271_v14 = vunpack.c.l.b16 %v3255_v58  ;;  %v3272_v45 = vunpack.c.l.b16 %v3256_v44  ;;  %v3257_v0 = vpack.c.bf16 %v3238_v30, %v3238_v30 }
0x1fba   :  { %v3282_v24 = vrot.slane %v3271_v14, 3  ;;  %v3284_v62 = vrot.slane %v3272_v45, 2  ;;  %v3273_v54 = vunpack.c.l.b16 %v3257_v0 }
0x1fbc   :  { %v3283_v23 = vsel %vm569_vm6, %v3282_v24, %v3281_v55  ;;  %v3286_v16 = vrot.slane %v3273_v54, 1 }
0x1fbd   :  { %v3285_v48 = vsel %vm571_vm7, %v3284_v62, %v3283_v23  ;;  %v3190_v63 = vpop.f32.mrf.mxu2  ;;  %v3215_v25 = vpop.f32.mrf.mxu3 }
0x1fbe   :  { %v3287_v50 = vsel %vm573_vm8, %v3286_v16, %v3285_v48 }
0x1fbf   :  { %v3288_v17 = vpack.c.b16 %v3287_v50, %v3287_v50  ;;  %v3240_v4 = vpop.f32.mrf.mxu0 }
0x1fc1   :  { %6673 = vmatmul.msk.bf16.vlgmr.msrb.gmra.mxu2 %vm327_vm1, %v3288_v17 }
0x1fc5   :  { %v3317_v5 = vpop.f32.mrf.mxu3 }
0x1fc7   :  { %v3331_v38 = vpop.f32.mrf.mxu0 }
0x1fc8   :  { %v3332_v46 = vadd.f32 %v7972_v31, %v3331_v38 }
0x1fca   :  { %3356 = vrot.lane.b32.xlu1 %v3332_v46, %s7552_s5 }
0x1fcd   :  { %v3319_v36 = vpop.f32.mrf.mxu3 }
0x1fcf   :  { %v3333_v39 = vpop.f32.mrf.mxu0 }
0x1fd1   :  { %6677 = vmatmul.msk.bf16.vlgmr.msra.gmra.mxu2 %vm327_vm1, %v3288_v17 }
0x203c   :  { %v3357_v55 = vpop.permute.xlu1 %3356 }
0x2044   :  { %v3301_v10 = vpop.f32.mrf.mxu2 }
0x2045   :  { %v3318_v57 = vadd.f32 %v3317_v5, %v3301_v10  ;;  %v3416_v10 = vpop.f32.mrf.mxu0 }
0x2047   :  { %v3321_v20 = vadd.f32 %v7989_v52, %v3318_v57 }
0x2049   :  { %v3335_v21 = vadd.f32 %v3332_v46, %v3321_v20 }
0x204b   :  { %v6676_v47 = vmul.f32 -1.442695, %v3335_v21 }
0x204c   :  { %v3303_v15 = vpop.f32.mrf.mxu2 }
0x204d   :  { %7080 = vpow2.f32 %v6676_v47  ;;  %v3418_v57 = vpop.f32.mrf.mxu0 }
0x2053   :  { %v7081_v58 = vpop.eup %7080 }
0x2054   :  { %v3339_v44 = vadd.f32 1.0, %v7081_v58  ;;  %v3384_v43 = vpop.f32.mrf.mxu2 }
0x2056   :  { %7082 = vrcp.f32 %v3339_v44  ;;  %v3351_v0 = vand.u32 2147483648, %v3339_v44  ;;  %v3349_v62 = vand.u32 2147483647, %v3339_v44  ;;  %vm3345_vm15 = vweird.f32 %v3339_v44 }
0x2058   :  { %v3352_v23 = vor.u32 1.1754944e-38, %v3351_v0  ;;  %vm3350_vm11 = vcmp.eq.f32.partialorder %v3349_v62, 8.507059e+37 }
0x205c   :  { %v7083_v30 = vpop.eup %7082  ;;  %v3386_v2 = vpop.f32.mrf.mxu2 }
0x205d   :  { %v3341_v14 = vmul.f32 %v7083_v30, %v3339_v44  ;;  %vm3346_vm14 = vweird.f32 %v7083_v30 }
0x205e   :  { %vm3347_vm10 = vmor %vm3345_vm15, %vm3346_vm14 }
0x205f   :  { %v3342_v45 = vsub.f32 1.0, %v3341_v14 }
0x2061   :  { %v3343_v24 = vmul.f32 %v7083_v30, %v3342_v45 }
0x2063   :  { %v3344_v54 = vadd.f32 %v7083_v30, %v3343_v24 }
0x2065   :  { %v3348_v16 = vsel %vm3347_vm10, %v7083_v30, %v3344_v54 }
0x2066   :  { %v3353_v48 = vsel %vm3350_vm11, %v3352_v23, %v3348_v16 }
0x2067   :  { %v3359_v63 = vmul.f32 %v3357_v55, %v3353_v48  ;;  %v3366_v4 = vsub.f32 1.0, %v3353_v48  ;;  %v3372_v39 = vmul.f32 %v3353_v48, %v8345_v19 }
0x2069   :  { %3361 = vrot.lane.b32.xlu2 %v3359_v63, %s7552_s5 }
0x20c3   :  { %v3362_v25 = vpop.permute.xlu2 %3361 }
0x20c4   :  { %v3364_v50 = vadd.f32 %v3362_v25, %v3321_v20 }
0x20c6   :  { %7084 = vtanh.f32 %v3364_v50 }
0x20cc   :  { %v7085_v17 = vpop.eup %7084 }
0x20cd   :  { %3368 = vrot.lane.b32.xlu0 %v7085_v17, %s7565_s8 }
0x213f   :  { %v3369_v38 = vpop.permute.xlu0 %3368 }
0x2140   :  { %v3371_v46 = vmul.f32 %v3369_v38, %v3366_v4 }
0x2142   :  { %v8511_v5 = vadd.f32 %v3372_v39, %v3371_v46 }
0x2144   :  { %v3374_v36 = vpack.c.bf16 %v8511_v5, %v8511_v5 }
0x2146   :  { %3389 = vrot.lane.b32.xlu1 %v3374_v36, %s7565_s8 }
0x21b8   :  { %v8516_v21 = vpop.permute.xlu1 %3389 }
0x21b9   :  { %6678 = vmatmul.msk.bf16.vlgmr.msra.gmra.mxu3 %vm399_vm0, %v8516_v21 }
0x223c   :  { %v3403_v20 = vpop.f32.mrf.mxu3 }
0x223d   :  { %v3404_v47 = vadd.f32 %v3403_v20, %v3384_v43 }
0x223f   :  { %v3420_v15 = vadd.f32 %v3416_v10, %v3404_v47 }
0x2240   :  { %3426 = sbr.rel (%p6681_p6) target bundleno = 8775 (0x2247), region = 145 }
0x2241   :  { %v8521_v19 = vadd.f32 %v8020_v40, %v3420_v15 }
0x2243   :  { %9287 = vst [vmem:[#allocation42_spill] sm:$0xff] %v8521_v19 }
0x2244   :  { %v3405_v58 = vpop.f32.mrf.mxu3 }
0x2245   :  { %v6682_v44 = vld [vmem:[%s9288_s30 + $0x20] sm:$0xff] }
0x2246   :  { %3429 = vst.msk [vmem:[#allocation2] sm:$0xff] %vm399_vm0, %v6682_v44 }
0x2247 PF:  { %p6683_p7 = scmp.ne.s32.totalorder %s6680_s16, 0 }
0x2248   :  { %s9289_s0 = sld [smem:[#allocation47_spill]] (!%p6683_p7) }
0x2249   :  { %3433 = sbr.rel (%p6683_p7) target bundleno = 9282 (0x2442), region = 149 }
0x224e   :  { %v3434_v30 = vsel %vm399_vm0, %v8521_v19, -inf  ;;  %v6879_v23 = vld [vmem:[%s9289_s0 + $0x8] sm:$0xff]  ;;  %v6878_v16 = vld [vmem:[%s9289_s0] sm:$0xff]  ;;  %v7569_v4 = vmov 0.0  }
0x224f   :  { %3435 = vmax.xlane.f32.xlu0 %v3434_v30  ;;  %3482 = vmatpush.bf16.msra.mxu0 %v6879_v23 }
0x2253   :  { %3483 = vmatpush.bf16.msra.mxu0 %v6878_v16 }
0x22c2   :  { %v3436_v43 = vpop.xlane.xlu0 %3435 }
0x22c3   :  { %vm3437_vm12 = vcmp.eq.f32.partialorder %v8521_v19, %v3436_v43 }
0x22c4   :  { %v3438_v2 = vsel %vm3437_vm12, %v7811_v26, 32 }
0x22c5   :  { %v3439_v14 = vsel %vm399_vm0, %v3438_v2, 2147483647 }
0x22c6   :  { %v3441_v45 = vshra.s32 %v3439_v14, 16  ;;  %v3440_v24 = vand.u32 65535, %v3439_v14 }
0x22c8   :  { %v3443_v0 = vcvt.s32.f32 %v3441_v45  ;;  %v3442_v54 = vcvt.s32.f32 %v3440_v24 }
0x22ca   :  { %3444 = vmin.xlane.f32.xlu0 %v3443_v0 }
0x233d   :  { %v3445_v62 = vpop.xlane.xlu0 %3444 }
0x233e   :  { %vm3446_vm13 = vcmp.eq.f32.partialorder %v3443_v0, %v3445_v62  ;;  %v3451_v48 = vcvt.f32.s32 %v3445_v62 }
0x233f   :  { %v3447_v55 = vsel %vm3446_vm13, %v3442_v54, inf }
0x2340   :  { %3448 = vmin.xlane.f32.xlu1 %v3447_v55  ;;  %v3452_v25 = vshll.u32 %v3451_v48, 16 }
0x23b3   :  { %v3449_v63 = vpop.xlane.xlu1 %3448 }
0x23b4   :  { %v3450_v50 = vcvt.f32.s32 %v3449_v63 }
0x23b6   :  { %v3453_v17 = vadd.s32 %v3452_v25, %v3450_v50 }
0x23b8   :  { %vm3454_vm14 = vcmp.eq.s32.totalorder %v7811_v26, %v3453_v17 }
0x23b9   :  { %v3455_v38 = vsel %vm3454_vm14, 1.0, %v7569_v4 }
0x23ba   :  { %v3456_v46 = vpack.c.bf16 %v3455_v38, %v3455_v38 }
0x23bc   :  { %6692 = vmatmul.msk.bf16.vlgmr.msra.gmra.mxu0 %vm399_vm0, %v3456_v46 }
0x2439   :  { %v3485_v39 = vpop.f32.mrf.mxu0 }
0x243a   :  { %v3489_v36 = vmul.f32 5.656854, %v3485_v39 }
0x243c   :  { %3490 = vst.msk [vmem:[#allocation2] sm:$0xff] %vm399_vm0, %v3489_v36 }
0x2441   :  { %v3487_v10 = vpop.f32.mrf.mxu0 }
0x2442 PF:  { %3499 = vmatpush.bf16.msra.mxu0 %v7726_v1  ;;  %3568 = vmatpush.bf16.msra.mxu1 %v7759_v12  ;;  %v9290_v57 = vmov 0   ;;  %v9291_v44 = vld [vmem:[#allocation31_spill] sm:$0xff]  ;;  %v9292_v43 = vld [vmem:[#allocation32_spill] sm:$0xff]  ;;  %v9293_v16 = vld [vmem:[#allocation33_spill] sm:$0xff]  ;;  %s6721_s19 = sld [smem:[#allocation3 + $0x4]] }
0x2443   :  { %7086 = vset.pattern.permute.xlu0 %v9290_v57  ;;  %7087 = vset.pattern.permute.xlu1 %v9290_v57  ;;  %v9294_v63 = vld [vmem:[#allocation34_spill] sm:$0xff]  ;;  %v9295_v10 = vld [vmem:[#allocation35_spill] sm:$0xff] }
0x2444   :  { %7088 = vset.pattern.permute.xlu2 %v9290_v57  ;;  %3820 = vmatpush.bf16.msra.mxu3 %v7874_v60 }
0x2445   :  { %3795 = vmatpush.bf16.msra.mxu2 %v7870_v59 }
0x2446   :  { %3500 = vmatpush.bf16.msra.mxu0 %v7732_v3  ;;  %3569 = vmatpush.bf16.msra.mxu1 %v7765_v13 }
0x2448   :  { %3870 = vmatpush.bf16.msrb.mxu3 %v7883_v7  ;;  %p6722_p8 = scmp.eq.s32.totalorder %s6721_s19, 0 }
0x2449   :  { %3845 = vmatpush.bf16.msrb.mxu2 %v7878_v61  ;;  %6693 = vmatmul.msk.bf16.vlgmr.msra.gmra.mxu0 %vm399_vm0, %v8516_v21  ;;  %s9300_s4 = sld [smem:[#allocation46_spill]] (!%p6722_p8) }
0x244a   :  { %3895 = vmatpush.bf16.msrb.mxu0 %v7886_v9 }
0x244e   :  { %3970 = vmatpush.bf16.msra.mxu0 %v7909_v41 }
0x24c6   :  { %v3502_v20 = vpop.f32.mrf.mxu0 }
0x24c7   :  { %v3507_v47 = vrot.slane %v3502_v20, 1  ;;  %v3514_v15 = vperm.slane %v3502_v20, 0  ;;  %v3508_v45 = vrot.slane %v3502_v20, 2  ;;  %v3509_v0 = vrot.slane %v3502_v20, 3 }
0x24c8   :  { %v3510_v50 = vrot.slane %v3502_v20, 4  ;;  %v3511_v17 = vrot.slane %v3502_v20, 5 }
0x24c9   :  { %v3515_v58 = vperm.slane %v3507_v47, 0  ;;  %v3530_v30 = vadd.f32 %v3514_v15, %v9291_v44  ;;  %v3516_v62 = vperm.slane %v3508_v45, 0  ;;  %v3517_v55 = vperm.slane %v3509_v0, 0  ;;  %v9296_v47 = vld [vmem:[#allocation36_spill] sm:$0xff]  ;;  %v9297_v0 = vld [vmem:[#allocation37_spill] sm:$0xff] }
0x24ca   :  { %v3518_v46 = vperm.slane %v3510_v50, 0  ;;  %v3519_v39 = vperm.slane %v3511_v17, 0  ;;  %v3513_v44 = vrot.slane %v3502_v20, 7 }
0x24cb   :  { %v3531_v2 = vadd.f32 %v3515_v58, %v9292_v43  ;;  %7089 = vtanh.f32 %v3530_v30  ;;  %v3532_v48 = vadd.f32 %v3516_v62, %v9293_v16  ;;  %v3533_v25 = vadd.f32 %v3517_v55, %v9294_v63  ;;  %v9298_v62 = vld [vmem:[#allocation38_spill] sm:$0xff] }
0x24cc   :  { %v3534_v57 = vadd.f32 %v3518_v46, %v9295_v10  ;;  %v3535_v15 = vadd.f32 %v3519_v39, %v9296_v47  ;;  %v3512_v58 = vrot.slane %v3502_v20, 6 }
0x24cd   :  { %7091 = vtanh.f32 %v3531_v2 }
0x24ce   :  { %v3504_v14 = vpop.f32.mrf.mxu0  ;;  %7093 = vtanh.f32 %v3532_v48  ;;  %v3520_v2 = vperm.slane %v3512_v58, 0 }
0x24cf   :  { %7095 = vtanh.f32 %v3533_v25  ;;  %v3521_v14 = vperm.slane %v3513_v44, 0 }
0x24d0   :  { %7097 = vtanh.f32 %v3534_v57 }
0x24d1   :  { %v7090_v24 = vpop.eup %7089  ;;  %7099 = vtanh.f32 %v3535_v15 }
0x24d3   :  { %v7092_v54 = vpop.eup %7091 }
0x24d4   :  { %v3546_v23 = vpack.c.bf16 %v7092_v54, %v7090_v24  ;;  %v7094_v4 = vpop.eup %7093  ;;  %v3536_v24 = vadd.f32 %v3520_v2, %v9297_v0  ;;  %v3537_v54 = vadd.f32 %v3521_v14, %v9298_v62 }
0x24d5   :  { %v7096_v38 = vpop.eup %7095 }
0x24d6   :  { %6694 = vmatmul.msk.bf16.vlgmr.msra.gmra.mxu1 %vm399_vm0, %v3546_v23  ;;  %v3547_v36 = vpack.c.bf16 %v7096_v38, %v7094_v4  ;;  %v7098_v30 = vpop.eup %7097  ;;  %7101 = vtanh.f32 %v3536_v24 }
0x24d7   :  { %v7100_v43 = vpop.eup %7099  ;;  %7103 = vtanh.f32 %v3537_v54 }
0x24d8   :  { %v3548_v45 = vpack.c.bf16 %v7100_v43, %v7098_v30 }
0x24dc   :  { %v7102_v55 = vpop.eup %7101 }
0x24dd   :  { %v7104_v23 = vpop.eup %7103 }
0x24de   :  { %v3549_v16 = vpack.c.bf16 %v7104_v23, %v7102_v55 }
0x24e6   :  { %6695 = vmatmul.msk.bf16.gmra.mxu1 %vm399_vm0, %v3547_v36 }
0x24f6   :  { %6696 = vmatmul.msk.bf16.gmra.mxu1 %vm399_vm0, %v3548_v45 }
0x2506   :  { %6697 = vmatmul.msk.bf16.gmra.mxu1 %vm399_vm0, %v3549_v16 }
0x2553   :  { %v3571_v48 = vpop.f32.mrf.mxu1 }
0x2554   :  { %3608 = vperm.xlu0 %7086, %v3571_v48  }
0x255b   :  { %v3573_v20 = vpop.f32.mrf.mxu1 }
0x255c   :  { %3611 = vperm.xlu0 %7086, %v3573_v20  }
0x2563   :  { %v3576_v63 = vpop.f32.mrf.mxu1 }
0x2564   :  { %3614 = vperm.xlu1 %7087, %v3576_v63  }
0x256b   :  { %v3578_v25 = vpop.f32.mrf.mxu1 }
0x256c   :  { %3617 = vperm.xlu1 %7087, %v3578_v25  }
0x2573   :  { %v3581_v50 = vpop.f32.mrf.mxu1 }
0x2574   :  { %3620 = vperm.xlu2 %7088, %v3581_v50  }
0x257b   :  { %v3583_v17 = vpop.f32.mrf.mxu1 }
0x257c   :  { %3623 = vperm.xlu2 %7088, %v3583_v17  }
0x2583   :  { %v8568_v4 = vpop.f32.mrf.mxu1 }
0x2584   :  { %3626 = vperm.xlu0 %7086, %v8568_v4  }
0x258b   :  { %v3588_v38 = vpop.f32.mrf.mxu1 }
0x258c   :  { %3629 = vperm.xlu1 %7087, %v3588_v38  }
0x25c6   :  { %v3609_v46 = vpop.permute.xlu0 %3608 }
0x25c7   :  { %v3631_v58 = vperm.slane %v3609_v46, %v7811_v26 }
0x25ce   :  { %v3612_v36 = vpop.permute.xlu0 %3611  ;;  %v3621_v10 = vpop.permute.xlu2 %3620 }
0x25cf   :  { %v3632_v47 = vperm.slane %v3612_v36, %v7811_v26  ;;  %v3635_v45 = vperm.slane %v3621_v10, %v7811_v26 }
0x25d1   :  { %v3639_v30 = vsel %vm561_vm2, %v3632_v47, %v3631_v58 }
0x25d6   :  { %v3615_v39 = vpop.permute.xlu1 %3614  ;;  %v3624_v0 = vpop.permute.xlu2 %3623 }
0x25d7   :  { %v3633_v15 = vperm.slane %v3615_v39, %v7811_v26  ;;  %v3636_v54 = vperm.slane %v3624_v0, %v7811_v26 }
0x25d9   :  { %v3640_v43 = vsel %vm563_vm3, %v3633_v15, %v3639_v30 }
0x25de   :  { %v3618_v57 = vpop.permute.xlu1 %3617 }
0x25df   :  { %v3634_v44 = vperm.slane %v3618_v57, %v7811_v26 }
0x25e1   :  { %v3641_v2 = vsel %vm565_vm4, %v3634_v44, %v3640_v43 }
0x25e2   :  { %v3642_v24 = vsel %vm567_vm5, %v3635_v45, %v3641_v2 }
0x25e3   :  { %v3643_v16 = vsel %vm569_vm6, %v3636_v54, %v3642_v24 }
0x25f6   :  { %v3627_v14 = vpop.permute.xlu0 %3626 }
0x25f7   :  { %v3637_v62 = vperm.slane %v3627_v14, %v7811_v26 }
0x25f9   :  { %v3644_v46 = vsel %vm571_vm7, %v3637_v62, %v3643_v16 }
0x25fe   :  { %v3630_v55 = vpop.permute.xlu1 %3629 }
0x25ff   :  { %v3638_v23 = vperm.slane %v3630_v55, %v7811_v26 }
0x2601   :  { %v3645_v39 = vsel %vm573_vm8, %v3638_v23, %v3644_v46 }
0x2602   :  { %v3647_v36 = vsel %vm576_vm9, %v3645_v39, -inf }
0x2603   :  { %3648 = vmax.xlane.f32.xlu2 %v3647_v36 }
0x2676   :  { %v3649_v10 = vpop.xlane.xlu2 %3648 }
0x2677   :  { %v3652_v57 = vperm.slane %v3649_v10, 1  ;;  %v3651_v47 = vperm.slane %v3649_v10, 0  ;;  %v3654_v44 = vperm.slane %v3649_v10, 3  ;;  %v3653_v30 = vperm.slane %v3649_v10, 2 }
0x2678   :  { %v3656_v24 = vperm.slane %v3649_v10, 5  ;;  %v3655_v54 = vperm.slane %v3649_v10, 4 }
0x2679   :  { %v3668_v15 = vsub.f32 %v3573_v20, %v3652_v57  ;;  %v3667_v58 = vsub.f32 %v3571_v48, %v3651_v47  ;;  %v3670_v14 = vsub.f32 %v3578_v25, %v3654_v44  ;;  %v3669_v45 = vsub.f32 %v3576_v63, %v3653_v30 }
0x267a   :  { %v3672_v48 = vsub.f32 %v3583_v17, %v3656_v24  ;;  %v3671_v20 = vsub.f32 %v3581_v50, %v3655_v54  ;;  %v3658_v25 = vperm.slane %v3649_v10, 7  ;;  %v3657_v63 = vperm.slane %v3649_v10, 6 }
0x267b   :  { %v3677_v43 = vmul.f32 1.442695, %v3668_v15  ;;  %v3675_v2 = vmul.f32 1.442695, %v3667_v58  ;;  %v3681_v0 = vmul.f32 1.442695, %v3670_v14 }
0x267c   :  { %v3679_v62 = vmul.f32 1.442695, %v3669_v45  ;;  %v3685_v16 = vmul.f32 1.442695, %v3672_v48  ;;  %v3683_v46 = vmul.f32 1.442695, %v3671_v20  ;;  %v3674_v57 = vsub.f32 %v3588_v38, %v3658_v25 }
0x267d   :  { %7105 = vpow2.f32 %v3677_v43  ;;  %v3673_v47 = vsub.f32 %v8568_v4, %v3657_v63 }
0x267e   :  { %7107 = vpow2.f32 %v3675_v2  ;;  %v3689_v15 = vmul.f32 1.442695, %v3674_v57 }
0x267f   :  { %7109 = vpow2.f32 %v3681_v0  ;;  %v3687_v58 = vmul.f32 1.442695, %v3673_v47 }
0x2680   :  { %7111 = vpow2.f32 %v3679_v62 }
0x2681   :  { %7113 = vpow2.f32 %v3685_v16 }
0x2682   :  { %7115 = vpow2.f32 %v3683_v46 }
0x2683   :  { %v8587_v55 = vpop.eup %7105  ;;  %7117 = vpow2.f32 %v3689_v15 }
0x2684   :  { %v8589_v23 = vpop.eup %7107  ;;  %3703 = vperm.xlu1 %7087, %v8587_v55   ;;  %7119 = vpow2.f32 %v3687_v58 }
0x2685   :  { %3700 = vperm.xlu0 %7086, %v8589_v23   ;;  %v8593_v39 = vpop.eup %7109 }
0x2686   :  { %v7112_v36 = vpop.eup %7111 }
0x2687   :  { %v7114_v17 = vpop.eup %7113 }
0x2688   :  { %v8597_v44 = vpop.eup %7115 }
0x2689   :  { %v7118_v50 = vpop.eup %7117 }
0x268a   :  { %v8600_v10 = vpop.eup %7119 }
0x268c   :  { %3709 = vperm.xlu1 %7087, %v8593_v39  }
0x268d   :  { %3706 = vperm.xlu0 %7086, %v7112_v36  }
0x2694   :  { %3715 = vperm.xlu1 %7087, %v7114_v17  }
0x2695   :  { %3712 = vperm.xlu0 %7086, %v8597_v44  }
0x269c   :  { %3721 = vperm.xlu1 %7087, %v7118_v50  }
0x269d   :  { %3718 = vperm.xlu0 %7086, %v8600_v10  }
0x26f6   :  { %v3704_v38 = vpop.permute.xlu1 %3703 }
0x26f7   :  { %v3701_v30 = vpop.permute.xlu0 %3700  ;;  %v3724_v2 = vperm.slane %v3704_v38, %v7811_v26 }
0x26f8   :  { %v3723_v14 = vperm.slane %v3701_v30, %v7811_v26 }
0x26fa   :  { %v3731_v62 = vsel %vm561_vm2, %v3724_v2, %v3723_v14 }
0x26fe   :  { %v3710_v43 = vpop.permute.xlu1 %3709 }
0x26ff   :  { %v3707_v4 = vpop.permute.xlu0 %3706  ;;  %v3726_v54 = vperm.slane %v3710_v43, %v7811_v26 }
0x2700   :  { %v3725_v45 = vperm.slane %v3707_v4, %v7811_v26 }
0x2702   :  { %v3732_v48 = vsel %vm563_vm3, %v3725_v45, %v3731_v62 }
0x2703   :  { %v3733_v25 = vsel %vm565_vm4, %v3726_v54, %v3732_v48 }
0x2706   :  { %v3716_v0 = vpop.permute.xlu1 %3715 }
0x2707   :  { %v3713_v24 = vpop.permute.xlu0 %3712  ;;  %v3728_v16 = vperm.slane %v3716_v0, %v7811_v26 }
0x2708   :  { %v3727_v20 = vperm.slane %v3713_v24, %v7811_v26 }
0x270a   :  { %v3734_v46 = vsel %vm567_vm5, %v3727_v20, %v3733_v25 }
0x270b   :  { %v3735_v58 = vsel %vm569_vm6, %v3728_v16, %v3734_v46 }
0x270e   :  { %v3722_v63 = vpop.permute.xlu1 %3721 }
0x270f   :  { %v3730_v57 = vperm.slane %v3722_v63, %v7811_v26  ;;  %v3719_v47 = vpop.permute.xlu0 %3718 }
0x2710   :  { %v3729_v15 = vperm.slane %v3719_v47, %v7811_v26 }
0x2712   :  { %v3736_v38 = vsel %vm571_vm7, %v3729_v15, %v3735_v58 }
0x2713   :  { %v3737_v30 = vsel %vm573_vm8, %v3730_v57, %v3736_v38 }
0x2714   :  { %v3739_v43 = vsel %vm576_vm9, %v3737_v30, 0.0 }
0x2715   :  { %3740 = vadd.xlane.f32.xlu0 %v3739_v43 }
0x2788   :  { %v3741_v4 = vpop.xlane.xlu0 %3740 }
0x2789   :  { %7121 = vrcp.f32 %v3741_v4 }
0x278f   :  { %v7122_v2 = vpop.eup %7121 }
0x2790   :  { %v3745_v14 = vperm.slane %v7122_v2, 1  ;;  %v3744_v45 = vperm.slane %v7122_v2, 0  ;;  %v3749_v0 = vperm.slane %v7122_v2, 5  ;;  %v3746_v24 = vperm.slane %v7122_v2, 2 }
0x2791   :  { %v3751_v57 = vperm.slane %v7122_v2, 7  ;;  %v3747_v47 = vperm.slane %v7122_v2, 3 }
0x2792   :  { %v3761_v62 = vmul.f32 %v8587_v55, %v3745_v14  ;;  %v3760_v54 = vmul.f32 %v8589_v23, %v3744_v45  ;;  %v3765_v16 = vmul.f32 %v7114_v17, %v3749_v0  ;;  %v3762_v25 = vmul.f32 %v7112_v36, %v3746_v24 }
0x2793   :  { %v3767_v19 = vmul.f32 %v7118_v50, %v3751_v57  ;;  %v3763_v55 = vmul.f32 %v8593_v39, %v3747_v47  ;;  %v3748_v23 = vperm.slane %v7122_v2, 4 }
0x2794   :  { %v3769_v48 = vpack.c.bf16 %v3761_v62, %v3761_v62  ;;  %v3768_v20 = vpack.c.bf16 %v3760_v54, %v3760_v54  ;;  %v3773_v38 = vpack.c.bf16 %v3765_v16, %v3765_v16  ;;  %v3770_v30 = vpack.c.bf16 %v3762_v25, %v3762_v25 }
0x2795   :  { %v3775_v17 = vpack.c.bf16 %v3767_v19, %v3767_v19  ;;  %v3771_v36 = vpack.c.bf16 %v3763_v55, %v3763_v55  ;;  %v3764_v62 = vmul.f32 %v8597_v44, %v3748_v23  ;;  %v3750_v16 = vperm.slane %v7122_v2, 6 }
0x2796   :  { %v3802_v46 = vunpack.c.l.b16 %v3769_v48  ;;  %v3777_v63 = vunpack.c.l.b16 %v3768_v20  ;;  %v3902_v43 = vunpack.c.l.b16 %v3773_v38  ;;  %v3827_v4 = vunpack.c.l.b16 %v3770_v30 }
0x2797   :  { %v3952_v0 = vunpack.c.l.b16 %v3775_v17  ;;  %v3852_v24 = vunpack.c.l.b16 %v3771_v36  ;;  %v3772_v20 = vpack.c.bf16 %v3764_v62, %v3764_v62  ;;  %v3766_v39 = vmul.f32 %v8600_v10, %v3750_v16 }
0x2798   :  { %v6700_v15 = vunpack.i.l.s16 %v3802_v46  ;;  %v6698_v58 = vunpack.i.l.s16 %v3777_v63  ;;  %v6708_v14 = vunpack.i.l.s16 %v3902_v43  ;;  %v6702_v45 = vunpack.i.l.s16 %v3827_v4 }
0x2799   :  { %v6712_v54 = vunpack.i.l.s16 %v3952_v0  ;;  %v6704_v48 = vunpack.i.l.s16 %v3852_v24  ;;  %v3877_v50 = vunpack.c.l.b16 %v3772_v20  ;;  %v3774_v46 = vpack.c.bf16 %v3766_v39, %v3766_v39 }
0x279a   :  { %3806 = vperm.xlu2 %7088, %v6700_v15   ;;  %3781 = vperm.xlu1 %7087, %v6698_v58  }
0x279b   :  { %v6706_v25 = vunpack.i.l.s16 %v3877_v50  ;;  %v3927_v19 = vunpack.c.l.b16 %v3774_v46  ;;  %v3491_v46 = vld [vmem:[#allocation2] sm:$0xff] }
0x279d   :  { %v6710_v63 = vunpack.i.l.s16 %v3927_v19 }
0x27a2   :  { %3906 = vperm.xlu2 %7088, %v6708_v14   ;;  %3831 = vperm.xlu1 %7087, %v6702_v45  }
0x27aa   :  { %3956 = vperm.xlu2 %7088, %v6712_v54   ;;  %3856 = vperm.xlu1 %7087, %v6704_v48  }
0x27b2   :  { %3881 = vperm.xlu1 %7087, %v6706_v25  }
0x27ba   :  { %3931 = vperm.xlu1 %7087, %v6710_v63   ;;  %v3492_v63 = vpack.c.bf16 %v3491_v46, %v3491_v46 }
0x27f4   :  { %v3807_v57 = vpop.permute.xlu2 %3806 }
0x27f5   :  { %v3808_v47 = vperm.slane %v3807_v57, %v7811_v26 }
0x27f7   :  { %v3809_v15 = vpack.c.b16 %v3808_v47, %v3808_v47 }
0x27f9   :  { %6701 = vmatmul.msk.bf16.vlgmr.msra.gmra.mxu3 %vm576_vm9, %v3809_v15 }
0x27fa   :  { %3945 = vmatpush.bf16.msra.mxu3 %v7897_v35 }
0x27fc   :  { %v3907_v45 = vpop.permute.xlu2 %3906 }
0x27fd   :  { %v3908_v36 = vperm.slane %v3907_v45, %v7811_v26 }
0x27ff   :  { %v3909_v62 = vpack.c.b16 %v3908_v36, %v3908_v36 }
0x2804   :  { %v3957_v48 = vpop.permute.xlu2 %3956 }
0x2805   :  { %v3958_v20 = vperm.slane %v3957_v48, %v7811_v26 }
0x2807   :  { %v3959_v16 = vpack.c.b16 %v3958_v20, %v3958_v20 }
0x280c   :  { %v3782_v44 = vpop.permute.xlu1 %3781 }
0x280d   :  { %v3783_v2 = vperm.slane %v3782_v44, %v7811_v26 }
0x280f   :  { %v3784_v58 = vpack.c.b16 %v3783_v2, %v3783_v2 }
0x2811   :  { %6699 = vmatmul.msk.bf16.vlgmr.msra.gmra.mxu2 %vm576_vm9, %v3784_v58 }
0x2812   :  { %3920 = vmatpush.bf16.msra.mxu2 %v7894_v18 }
0x2814   :  { %v3832_v10 = vpop.permute.xlu1 %3831 }
0x2815   :  { %v3833_v38 = vperm.slane %v3832_v10, %v7811_v26 }
0x2817   :  { %v3834_v4 = vpack.c.b16 %v3833_v38, %v3833_v38 }
0x281c   :  { %v3857_v30 = vpop.permute.xlu1 %3856 }
0x281d   :  { %v3858_v43 = vperm.slane %v3857_v30, %v7811_v26 }
0x281f   :  { %v3859_v55 = vpack.c.b16 %v3858_v43, %v3858_v43 }
0x2821   :  { %6703 = vmatmul.msk.bf16.vlgmr.msrb.gmra.mxu2 %vm576_vm9, %v3834_v4  ;;  %6705 = vmatmul.msk.bf16.vlgmr.msrb.gmra.mxu3 %vm576_vm9, %v3859_v55 }
0x2822   :  { %4030 = vmatpush.bf16.msrb.mxu2 %v7931_v32  ;;  %4048 = vmatpush.bf16.msrb.mxu3 %v7925_v34 }
0x2824   :  { %v3882_v23 = vpop.permute.xlu1 %3881 }
0x2825   :  { %v3883_v14 = vperm.slane %v3882_v23, %v7811_v26 }
0x2826   :  { %4031 = vmatpush.bf16.msrb.mxu2 %v7945_v6  ;;  %4049 = vmatpush.bf16.msrb.mxu3 %v7928_v27 }
0x2827   :  { %v3884_v17 = vpack.c.b16 %v3883_v14, %v3883_v14 }
0x2829   :  { %6707 = vmatmul.msk.bf16.vlgmr.msrb.gmra.mxu0 %vm576_vm9, %v3884_v17 }
0x282a   :  { %4062 = vmatpush.bf16.msrb.mxu0 %v7901_v37  ;;  %4032 = vmatpush.bf16.msrb.mxu2 %v7956_v11 }
0x282c   :  { %v3932_v0 = vpop.permute.xlu1 %3931 }
0x282d   :  { %v3933_v24 = vperm.slane %v3932_v0, %v7811_v26 }
0x282e   :  { %4063 = vmatpush.bf16.msrb.mxu0 %v7913_v42  ;;  %4033 = vmatpush.bf16.msrb.mxu2 %v7965_v28 }
0x282f   :  { %v3934_v54 = vpack.c.b16 %v3933_v24, %v3933_v24 }
0x2831   :  { %6709 = vmatmul.msk.bf16.vlgmr.msra.gmra.mxu2 %vm576_vm9, %v3909_v62  ;;  %6711 = vmatmul.msk.bf16.vlgmr.msra.gmra.mxu3 %vm576_vm9, %v3934_v54 }
0x2832   :  { %4113 = vmatpush.bf16.msra.mxu2 %v7936_v33  ;;  %4134 = vmatpush.bf16.msra.mxu3 %v7996_v51 }
0x2836   :  { %4114 = vmatpush.bf16.msra.mxu2 %v7950_v8  ;;  %4135 = vmatpush.bf16.msra.mxu3 %v8002_v56 }
0x2839   :  { %6713 = vmatmul.msk.bf16.vlgmr.msra.gmra.mxu0 %vm576_vm9, %v3959_v16 }
0x283a   :  { %4115 = vmatpush.bf16.msra.mxu2 %v7961_v22  ;;  %4147 = vmatpush.bf16.msra.mxu0 %v7994_v49 }
0x283e   :  { %4116 = vmatpush.bf16.msra.mxu2 %v7970_v29  ;;  %4148 = vmatpush.bf16.msra.mxu0 %v7999_v53 }
0x2841   :  { %6715 = vmatmul.msk.bf16.vlgmr.msrb.gmra.mxu3 %vm399_vm0, %v3492_v63 }
0x2849   :  { %6716 = vmatmul.msk.bf16.vlgmr.msrb.gmra.mxu0 %vm399_vm0, %v8516_v21 }
0x2859   :  { %6720 = vmatmul.msk.bf16.vlgmr.msra.gmra.mxu0 %vm399_vm0, %v3492_v63 }
0x287c   :  { %v3822_v50 = vpop.f32.mrf.mxu3 }
0x287d   :  { %v3985_v2 = vpack.c.bf16 %v3822_v50, %v3822_v50 }
0x287f   :  { %v4001_v43 = vunpack.c.l.b16 %v3985_v2 }
0x2881   :  { %v4008_v17 = vrot.slane %v4001_v43, 7 }
0x2884   :  { %v3824_v39 = vpop.f32.mrf.mxu3 }
0x2894   :  { %v3797_v25 = vpop.f32.mrf.mxu2 }
0x2895   :  { %v3984_v58 = vpack.c.bf16 %v3797_v25, %v3797_v25 }
0x2897   :  { %v4000_v23 = vunpack.c.l.b16 %v3984_v58 }
0x2899   :  { %v4009_v0 = vsel %vm561_vm2, %v4008_v17, %v4000_v23 }
0x289c   :  { %v3799_v19 = vpop.f32.mrf.mxu2 }
0x28a4   :  { %v3847_v57 = vpop.f32.mrf.mxu2  ;;  %v3872_v47 = vpop.f32.mrf.mxu3 }
0x28a5   :  { %v3986_v44 = vpack.c.bf16 %v3847_v57, %v3847_v57  ;;  %v3987_v10 = vpack.c.bf16 %v3872_v47, %v3872_v47 }
0x28a6   :  { %v3897_v15 = vpop.f32.mrf.mxu0 }
0x28a7   :  { %v4002_v38 = vunpack.c.l.b16 %v3986_v44  ;;  %v3988_v4 = vpack.c.bf16 %v3897_v15, %v3897_v15  ;;  %v4003_v14 = vunpack.c.l.b16 %v3987_v10 }
0x28a9   :  { %v4010_v45 = vrot.slane %v4002_v38, 6  ;;  %v4004_v36 = vunpack.c.l.b16 %v3988_v4  ;;  %v4012_v24 = vrot.slane %v4003_v14, 5 }
0x28ab   :  { %v4011_v62 = vsel %vm563_vm3, %v4010_v45, %v4009_v0  ;;  %v4014_v50 = vrot.slane %v4004_v36, 4 }
0x28ac   :  { %v3849_v30 = vpop.f32.mrf.mxu2  ;;  %v3874_v21 = vpop.f32.mrf.mxu3  ;;  %v4013_v25 = vsel %vm565_vm4, %v4012_v24, %v4011_v62 }
0x28ad   :  { %v4015_v44 = vsel %vm567_vm5, %v4014_v50, %v4013_v25 }
0x28ae   :  { %v3899_v55 = vpop.f32.mrf.mxu0 }
0x28b4   :  { %v3922_v54 = vpop.f32.mrf.mxu2  ;;  %v3947_v48 = vpop.f32.mrf.mxu3 }
0x28b5   :  { %v3989_v20 = vpack.c.bf16 %v3922_v54, %v3922_v54  ;;  %v3990_v16 = vpack.c.bf16 %v3947_v48, %v3947_v48 }
0x28b6   :  { %v3972_v39 = vpop.f32.mrf.mxu0 }
0x28b7   :  { %v4005_v46 = vunpack.c.l.b16 %v3989_v20  ;;  %v4006_v19 = vunpack.c.l.b16 %v3990_v16  ;;  %v3991_v63 = vpack.c.bf16 %v3972_v39, %v3972_v39 }
0x28b9   :  { %v4016_v57 = vrot.slane %v4005_v46, 3  ;;  %v4018_v47 = vrot.slane %v4006_v19, 2  ;;  %v4007_v15 = vunpack.c.l.b16 %v3991_v63 }
0x28bb   :  { %v4017_v2 = vsel %vm569_vm6, %v4016_v57, %v4015_v44  ;;  %v4020_v58 = vrot.slane %v4007_v15, 1 }
0x28bc   :  { %v4019_v10 = vsel %vm571_vm7, %v4018_v47, %v4017_v2  ;;  %v3924_v38 = vpop.f32.mrf.mxu2  ;;  %v3949_v30 = vpop.f32.mrf.mxu3 }
0x28bd   :  { %v4021_v21 = vsel %vm573_vm8, %v4020_v58, %v4019_v10 }
0x28be   :  { %v4022_v43 = vpack.c.b16 %v4021_v21, %v4021_v21  ;;  %v3974_v4 = vpop.f32.mrf.mxu0 }
0x28c0   :  { %6714 = vmatmul.msk.bf16.vlgmr.msrb.gmra.mxu2 %vm327_vm1, %v4022_v43 }
0x28c4   :  { %v4051_v45 = vpop.f32.mrf.mxu3 }
0x28c6   :  { %v4065_v55 = vpop.f32.mrf.mxu0 }
0x28c7   :  { %v4066_v23 = vadd.f32 %v7972_v31, %v4065_v55 }
0x28c9   :  { %4090 = vrot.lane.b32.xlu1 %v4066_v23, %s7552_s5 }
0x28cc   :  { %v4053_v17 = vpop.f32.mrf.mxu3 }
0x28ce   :  { %v4067_v14 = vpop.f32.mrf.mxu0 }
0x28d0   :  { %6718 = vmatmul.msk.bf16.vlgmr.msra.gmra.mxu2 %vm327_vm1, %v4022_v43 }
0x293b   :  { %v4091_v44 = vpop.permute.xlu1 %4090 }
0x2943   :  { %v4035_v36 = vpop.f32.mrf.mxu2 }
0x2944   :  { %v4052_v0 = vadd.f32 %v4051_v45, %v4035_v36  ;;  %v4150_v36 = vpop.f32.mrf.mxu0 }
0x2946   :  { %v4055_v24 = vadd.f32 %v7989_v52, %v4052_v0 }
0x2948   :  { %v4069_v62 = vadd.f32 %v4066_v23, %v4055_v24 }
0x294a   :  { %v6717_v54 = vmul.f32 -1.442695, %v4069_v62 }
0x294b   :  { %v4037_v48 = vpop.f32.mrf.mxu2 }
0x294c   :  { %7123 = vpow2.f32 %v6717_v54  ;;  %v4152_v0 = vpop.f32.mrf.mxu0 }
0x2952   :  { %v7124_v20 = vpop.eup %7123 }
0x2953   :  { %v4073_v16 = vadd.f32 1.0, %v7124_v20  ;;  %v4118_v50 = vpop.f32.mrf.mxu2 }
0x2955   :  { %7125 = vrcp.f32 %v4073_v16  ;;  %v4085_v63 = vand.u32 2147483648, %v4073_v16  ;;  %v4083_v47 = vand.u32 2147483647, %v4073_v16  ;;  %vm4079_vm10 = vweird.f32 %v4073_v16 }
0x2957   :  { %v4086_v2 = vor.u32 1.1754944e-38, %v4085_v63  ;;  %vm4084_vm12 = vcmp.eq.f32.partialorder %v4083_v47, 8.507059e+37 }
0x295b   :  { %v7126_v39 = vpop.eup %7125  ;;  %v4120_v25 = vpop.f32.mrf.mxu2 }
0x295c   :  { %v4075_v46 = vmul.f32 %v7126_v39, %v4073_v16  ;;  %vm4080_vm15 = vweird.f32 %v7126_v39 }
0x295d   :  { %vm4081_vm11 = vmor %vm4079_vm10, %vm4080_vm15 }
0x295e   :  { %v4076_v19 = vsub.f32 1.0, %v4075_v46 }
0x2960   :  { %v4077_v57 = vmul.f32 %v7126_v39, %v4076_v19 }
0x2962   :  { %v4078_v15 = vadd.f32 %v7126_v39, %v4077_v57 }
0x2964   :  { %v4082_v58 = vsel %vm4081_vm11, %v7126_v39, %v4078_v15 }
0x2965   :  { %v4087_v10 = vsel %vm4084_vm12, %v4086_v2, %v4082_v58 }
0x2966   :  { %v4093_v38 = vmul.f32 %v4091_v44, %v4087_v10  ;;  %v4100_v4 = vsub.f32 1.0, %v4087_v10  ;;  %v4106_v14 = vmul.f32 %v4087_v10, %v8511_v5 }
0x2968   :  { %4095 = vrot.lane.b32.xlu2 %v4093_v38, %s7552_s5 }
0x29c2   :  { %v4096_v30 = vpop.permute.xlu2 %4095 }
0x29c3   :  { %v4098_v21 = vadd.f32 %v4096_v30, %v4055_v24 }
0x29c5   :  { %7127 = vtanh.f32 %v4098_v21 }
0x29cb   :  { %v7128_v43 = vpop.eup %7127 }
0x29cc   :  { %4102 = vrot.lane.b32.xlu0 %v7128_v43, %s7565_s8 }
0x2a3e   :  { %v4103_v55 = vpop.permute.xlu0 %4102 }
0x2a3f   :  { %v4105_v23 = vmul.f32 %v4103_v55, %v4100_v4 }
0x2a41   :  { %v8677_v45 = vadd.f32 %v4106_v14, %v4105_v23 }
0x2a43   :  { %v4108_v17 = vpack.c.bf16 %v8677_v45, %v8677_v45 }
0x2a45   :  { %4123 = vrot.lane.b32.xlu1 %v4108_v17, %s7565_s8 }
0x2ab7   :  { %v8682_v62 = vpop.permute.xlu1 %4123 }
0x2ab8   :  { %6719 = vmatmul.msk.bf16.vlgmr.msra.gmra.mxu3 %vm399_vm0, %v8682_v62 }
0x2b3b   :  { %v4137_v24 = vpop.f32.mrf.mxu3 }
0x2b3c   :  { %v4138_v54 = vadd.f32 %v4137_v24, %v4118_v50 }
0x2b3e   :  { %v4154_v48 = vadd.f32 %v4150_v36, %v4138_v54 }
0x2b3f   :  { %4160 = sbr.rel (%p6722_p8) target bundleno = 11078 (0x2b46), region = 153 }
0x2b40   :  { %v8687_v5 = vadd.f32 %v8020_v40, %v4154_v48 }
0x2b42   :  { %9299 = vst [vmem:[#allocation43_spill] sm:$0xff] %v8687_v5 }
0x2b43   :  { %v4139_v20 = vpop.f32.mrf.mxu3 }
0x2b44   :  { %v6723_v16 = vld [vmem:[%s9300_s4 + $0x28] sm:$0xff] }
0x2b45   :  { %4163 = vst.msk [vmem:[#allocation2] sm:$0xff] %vm399_vm0, %v6723_v16 }
0x2b46 PF:  { %p6724_p9 = scmp.ne.s32.totalorder %s6721_s19, 0 }
0x2b47   :  { %s9301_s9 = sld [smem:[#allocation47_spill]] (!%p6724_p9) }
0x2b48   :  { %4167 = sbr.rel (%p6724_p9) target bundleno = 11585 (0x2d41), region = 157 }
0x2b4d   :  { %v4168_v39 = vsel %vm399_vm0, %v8687_v5, -inf  ;;  %v6881_v2 = vld [vmem:[%s9301_s9 + $0x8] sm:$0xff]  ;;  %v6880_v58 = vld [vmem:[%s9301_s9] sm:$0xff]  ;;  %v7570_v4 = vmov 0.0  }
0x2b4e   :  { %4169 = vmax.xlane.f32.xlu0 %v4168_v39  ;;  %4216 = vmatpush.bf16.msra.mxu0 %v6881_v2 }
0x2b52   :  { %4217 = vmatpush.bf16.msra.mxu0 %v6880_v58 }
0x2bc1   :  { %v4170_v50 = vpop.xlane.xlu0 %4169 }
0x2bc2   :  { %vm4171_vm13 = vcmp.eq.f32.partialorder %v8687_v5, %v4170_v50 }
0x2bc3   :  { %v4172_v25 = vsel %vm4171_vm13, %v7811_v26, 32 }
0x2bc4   :  { %v4173_v46 = vsel %vm399_vm0, %v4172_v25, 2147483647 }
0x2bc5   :  { %v4175_v19 = vshra.s32 %v4173_v46, 16  ;;  %v4174_v57 = vand.u32 65535, %v4173_v46 }
0x2bc7   :  { %v4177_v63 = vcvt.s32.f32 %v4175_v19  ;;  %v4176_v15 = vcvt.s32.f32 %v4174_v57 }
0x2bc9   :  { %4178 = vmin.xlane.f32.xlu0 %v4177_v63 }
0x2c3c   :  { %v4179_v47 = vpop.xlane.xlu0 %4178 }
0x2c3d   :  { %vm4180_vm14 = vcmp.eq.f32.partialorder %v4177_v63, %v4179_v47  ;;  %v4185_v10 = vcvt.f32.s32 %v4179_v47 }
0x2c3e   :  { %v4181_v44 = vsel %vm4180_vm14, %v4176_v15, inf }
0x2c3f   :  { %4182 = vmin.xlane.f32.xlu1 %v4181_v44  ;;  %v4186_v30 = vshll.u32 %v4185_v10, 16 }
0x2cb2   :  { %v4183_v38 = vpop.xlane.xlu1 %4182 }
0x2cb3   :  { %v4184_v21 = vcvt.f32.s32 %v4183_v38 }
0x2cb5   :  { %v4187_v43 = vadd.s32 %v4186_v30, %v4184_v21 }
0x2cb7   :  { %vm4188_vm15 = vcmp.eq.s32.totalorder %v7811_v26, %v4187_v43 }
0x2cb8   :  { %v4189_v55 = vsel %vm4188_vm15, 1.0, %v7570_v4 }
0x2cb9   :  { %v4190_v23 = vpack.c.bf16 %v4189_v55, %v4189_v55 }
0x2cbb   :  { %6733 = vmatmul.msk.bf16.vlgmr.msra.gmra.mxu0 %vm399_vm0, %v4190_v23 }
0x2d38   :  { %v4219_v14 = vpop.f32.mrf.mxu0 }
0x2d39   :  { %v4223_v17 = vmul.f32 5.656854, %v4219_v14 }
0x2d3b   :  { %4224 = vst.msk [vmem:[#allocation2] sm:$0xff] %vm399_vm0, %v4223_v17 }
0x2d40   :  { %v4221_v36 = vpop.f32.mrf.mxu0 }
0x2d41 PF:  { %4233 = vmatpush.bf16.msra.mxu0 %v7726_v1  ;;  %4302 = vmatpush.bf16.msra.mxu1 %v7759_v12  ;;  %v9302_v0 = vmov 0   ;;  %v9303_v16 = vld [vmem:[#allocation31_spill] sm:$0xff]  ;;  %v9304_v50 = vld [vmem:[#allocation32_spill] sm:$0xff]  ;;  %v9305_v58 = vld [vmem:[#allocation33_spill] sm:$0xff]  ;;  %s6762_s12 = sld [smem:[#allocation3 + $0x5]] }
0x2d42   :  { %7129 = vset.pattern.permute.xlu0 %v9302_v0  ;;  %7130 = vset.pattern.permute.xlu1 %v9302_v0  ;;  %v9306_v38 = vld [vmem:[#allocation34_spill] sm:$0xff]  ;;  %v9307_v36 = vld [vmem:[#allocation35_spill] sm:$0xff] }
0x2d43   :  { %7131 = vset.pattern.permute.xlu2 %v9302_v0  ;;  %4554 = vmatpush.bf16.msra.mxu3 %v7874_v60 }
0x2d44   :  { %4529 = vmatpush.bf16.msra.mxu2 %v7870_v59 }
0x2d45   :  { %4234 = vmatpush.bf16.msra.mxu0 %v7732_v3  ;;  %4303 = vmatpush.bf16.msra.mxu1 %v7765_v13 }
0x2d47   :  { %4604 = vmatpush.bf16.msrb.mxu3 %v7883_v7  ;;  %p6763_p10 = scmp.eq.s32.totalorder %s6762_s12, 0 }
0x2d48   :  { %4579 = vmatpush.bf16.msrb.mxu2 %v7878_v61  ;;  %6734 = vmatmul.msk.bf16.vlgmr.msra.gmra.mxu0 %vm399_vm0, %v8682_v62  ;;  %s9312_s24 = sld [smem:[#allocation46_spill]] (!%p6763_p10) }
0x2d49   :  { %4629 = vmatpush.bf16.msrb.mxu0 %v7886_v9 }
0x2d4d   :  { %4704 = vmatpush.bf16.msra.mxu0 %v7909_v41 }
0x2dc5   :  { %v4236_v24 = vpop.f32.mrf.mxu0 }
0x2dc6   :  { %v4241_v54 = vrot.slane %v4236_v24, 1  ;;  %v4248_v48 = vperm.slane %v4236_v24, 0  ;;  %v4242_v19 = vrot.slane %v4236_v24, 2  ;;  %v4243_v63 = vrot.slane %v4236_v24, 3 }
0x2dc7   :  { %v4244_v21 = vrot.slane %v4236_v24, 4  ;;  %v4245_v43 = vrot.slane %v4236_v24, 5 }
0x2dc8   :  { %v4249_v20 = vperm.slane %v4241_v54, 0  ;;  %v4264_v39 = vadd.f32 %v4248_v48, %v9303_v16  ;;  %v4250_v47 = vperm.slane %v4242_v19, 0  ;;  %v4251_v44 = vperm.slane %v4243_v63, 0  ;;  %v9308_v54 = vld [vmem:[#allocation36_spill] sm:$0xff]  ;;  %v9309_v63 = vld [vmem:[#allocation37_spill] sm:$0xff] }
0x2dc9   :  { %v4252_v23 = vperm.slane %v4244_v21, 0  ;;  %v4253_v14 = vperm.slane %v4245_v43, 0  ;;  %v4247_v16 = vrot.slane %v4236_v24, 7 }
0x2dca   :  { %v4265_v25 = vadd.f32 %v4249_v20, %v9304_v50  ;;  %7132 = vtanh.f32 %v4264_v39  ;;  %v4266_v10 = vadd.f32 %v4250_v47, %v9305_v58  ;;  %v4267_v30 = vadd.f32 %v4251_v44, %v9306_v38  ;;  %v9310_v47 = vld [vmem:[#allocation38_spill] sm:$0xff] }
0x2dcb   :  { %v4268_v0 = vadd.f32 %v4252_v23, %v9307_v36  ;;  %v4269_v48 = vadd.f32 %v4253_v14, %v9308_v54  ;;  %v4246_v20 = vrot.slane %v4236_v24, 6 }
0x2dcc   :  { %7134 = vtanh.f32 %v4265_v25 }
0x2dcd   :  { %v4238_v46 = vpop.f32.mrf.mxu0  ;;  %7136 = vtanh.f32 %v4266_v10  ;;  %v4254_v25 = vperm.slane %v4246_v20, 0 }
0x2dce   :  { %7138 = vtanh.f32 %v4267_v30  ;;  %v4255_v46 = vperm.slane %v4247_v16, 0 }
0x2dcf   :  { %7140 = vtanh.f32 %v4268_v0 }
0x2dd0   :  { %v7133_v57 = vpop.eup %7132  ;;  %7142 = vtanh.f32 %v4269_v48 }
0x2dd2   :  { %v7135_v15 = vpop.eup %7134 }
0x2dd3   :  { %v4280_v2 = vpack.c.bf16 %v7135_v15, %v7133_v57  ;;  %v7137_v4 = vpop.eup %7136  ;;  %v4270_v57 = vadd.f32 %v4254_v25, %v9309_v63  ;;  %v4271_v15 = vadd.f32 %v4255_v46, %v9310_v47 }
0x2dd4   :  { %v7139_v55 = vpop.eup %7138 }
0x2dd5   :  { %6735 = vmatmul.msk.bf16.vlgmr.msra.gmra.mxu1 %vm399_vm0, %v4280_v2  ;;  %v4281_v17 = vpack.c.bf16 %v7139_v55, %v7137_v4  ;;  %v7141_v39 = vpop.eup %7140  ;;  %7144 = vtanh.f32 %v4270_v57 }
0x2dd6   :  { %v7143_v50 = vpop.eup %7142  ;;  %7146 = vtanh.f32 %v4271_v15 }
0x2dd7   :  { %v4282_v19 = vpack.c.bf16 %v7143_v50, %v7141_v39 }
0x2ddb   :  { %v7145_v44 = vpop.eup %7144 }
0x2ddc   :  { %v7147_v2 = vpop.eup %7146 }
0x2ddd   :  { %v4283_v58 = vpack.c.bf16 %v7147_v2, %v7145_v44 }
0x2de5   :  { %6736 = vmatmul.msk.bf16.gmra.mxu1 %vm399_vm0, %v4281_v17 }
0x2df5   :  { %6737 = vmatmul.msk.bf16.gmra.mxu1 %vm399_vm0, %v4282_v19 }
0x2e05   :  { %6738 = vmatmul.msk.bf16.gmra.mxu1 %vm399_vm0, %v4283_v58 }
0x2e52   :  { %v4305_v10 = vpop.f32.mrf.mxu1 }
0x2e53   :  { %4342 = vperm.xlu0 %7129, %v4305_v10  }
0x2e5a   :  { %v4307_v24 = vpop.f32.mrf.mxu1 }
0x2e5b   :  { %4345 = vperm.xlu0 %7129, %v4307_v24  }
0x2e62   :  { %v4310_v38 = vpop.f32.mrf.mxu1 }
0x2e63   :  { %4348 = vperm.xlu1 %7130, %v4310_v38  }
0x2e6a   :  { %v4312_v30 = vpop.f32.mrf.mxu1 }
0x2e6b   :  { %4351 = vperm.xlu1 %7130, %v4312_v30  }
0x2e72   :  { %v4315_v21 = vpop.f32.mrf.mxu1 }
0x2e73   :  { %4354 = vperm.xlu2 %7131, %v4315_v21  }
0x2e7a   :  { %v4317_v43 = vpop.f32.mrf.mxu1 }
0x2e7b   :  { %4357 = vperm.xlu2 %7131, %v4317_v43  }
0x2e82   :  { %v8734_v4 = vpop.f32.mrf.mxu1 }
0x2e83   :  { %4360 = vperm.xlu0 %7129, %v8734_v4  }
0x2e8a   :  { %v4322_v55 = vpop.f32.mrf.mxu1 }
0x2e8b   :  { %4363 = vperm.xlu1 %7130, %v4322_v55  }
0x2ec5   :  { %v4343_v23 = vpop.permute.xlu0 %4342 }
0x2ec6   :  { %v4365_v20 = vperm.slane %v4343_v23, %v7811_v26 }
0x2ecd   :  { %v4346_v17 = vpop.permute.xlu0 %4345  ;;  %v4355_v36 = vpop.permute.xlu2 %4354 }
0x2ece   :  { %v4366_v54 = vperm.slane %v4346_v17, %v7811_v26  ;;  %v4369_v19 = vperm.slane %v4355_v36, %v7811_v26 }
0x2ed0   :  { %v4373_v39 = vsel %vm561_vm2, %v4366_v54, %v4365_v20 }
0x2ed5   :  { %v4349_v14 = vpop.permute.xlu1 %4348  ;;  %v4358_v63 = vpop.permute.xlu2 %4357 }
0x2ed6   :  { %v4367_v48 = vperm.slane %v4349_v14, %v7811_v26  ;;  %v4370_v15 = vperm.slane %v4358_v63, %v7811_v26 }
0x2ed8   :  { %v4374_v50 = vsel %vm563_vm3, %v4367_v48, %v4373_v39 }
0x2edd   :  { %v4352_v0 = vpop.permute.xlu1 %4351 }
0x2ede   :  { %v4368_v16 = vperm.slane %v4352_v0, %v7811_v26 }
0x2ee0   :  { %v4375_v25 = vsel %vm565_vm4, %v4368_v16, %v4374_v50 }
0x2ee1   :  { %v4376_v57 = vsel %vm567_vm5, %v4369_v19, %v4375_v25 }
0x2ee2   :  { %v4377_v58 = vsel %vm569_vm6, %v4370_v15, %v4376_v57 }
0x2ef5   :  { %v4361_v46 = vpop.permute.xlu0 %4360 }
0x2ef6   :  { %v4371_v47 = vperm.slane %v4361_v46, %v7811_v26 }
0x2ef8   :  { %v4378_v23 = vsel %vm571_vm7, %v4371_v47, %v4377_v58 }
0x2efd   :  { %v4364_v44 = vpop.permute.xlu1 %4363 }
0x2efe   :  { %v4372_v2 = vperm.slane %v4364_v44, %v7811_v26 }
0x2f00   :  { %v4379_v14 = vsel %vm573_vm8, %v4372_v2, %v4378_v23 }
0x2f01   :  { %v4381_v17 = vsel %vm576_vm9, %v4379_v14, -inf }
0x2f02   :  { %4382 = vmax.xlane.f32.xlu2 %v4381_v17 }
0x2f75   :  { %v4383_v36 = vpop.xlane.xlu2 %4382 }
0x2f76   :  { %v4386_v0 = vperm.slane %v4383_v36, 1  ;;  %v4385_v54 = vperm.slane %v4383_v36, 0  ;;  %v4388_v16 = vperm.slane %v4383_v36, 3  ;;  %v4387_v39 = vperm.slane %v4383_v36, 2 }
0x2f77   :  { %v4390_v57 = vperm.slane %v4383_v36, 5  ;;  %v4389_v15 = vperm.slane %v4383_v36, 4 }
0x2f78   :  { %v4402_v48 = vsub.f32 %v4307_v24, %v4386_v0  ;;  %v4401_v20 = vsub.f32 %v4305_v10, %v4385_v54  ;;  %v4404_v46 = vsub.f32 %v4312_v30, %v4388_v16  ;;  %v4403_v19 = vsub.f32 %v4310_v38, %v4387_v39 }
0x2f79   :  { %v4406_v10 = vsub.f32 %v4317_v43, %v4390_v57  ;;  %v4405_v24 = vsub.f32 %v4315_v21, %v4389_v15  ;;  %v4392_v30 = vperm.slane %v4383_v36, 7  ;;  %v4391_v38 = vperm.slane %v4383_v36, 6 }
0x2f7a   :  { %v4411_v50 = vmul.f32 1.442695, %v4402_v48  ;;  %v4409_v25 = vmul.f32 1.442695, %v4401_v20  ;;  %v4415_v63 = vmul.f32 1.442695, %v4404_v46 }
0x2f7b   :  { %v4413_v47 = vmul.f32 1.442695, %v4403_v19  ;;  %v4419_v58 = vmul.f32 1.442695, %v4406_v10  ;;  %v4417_v23 = vmul.f32 1.442695, %v4405_v24  ;;  %v4408_v0 = vsub.f32 %v4322_v55, %v4392_v30 }
0x2f7c   :  { %7148 = vpow2.f32 %v4411_v50  ;;  %v4407_v54 = vsub.f32 %v8734_v4, %v4391_v38 }
0x2f7d   :  { %7150 = vpow2.f32 %v4409_v25  ;;  %v4423_v48 = vmul.f32 1.442695, %v4408_v0 }
0x2f7e   :  { %7152 = vpow2.f32 %v4415_v63  ;;  %v4421_v20 = vmul.f32 1.442695, %v4407_v54 }
0x2f7f   :  { %7154 = vpow2.f32 %v4413_v47 }
0x2f80   :  { %7156 = vpow2.f32 %v4419_v58 }
0x2f81   :  { %7158 = vpow2.f32 %v4417_v23 }
0x2f82   :  { %v8753_v44 = vpop.eup %7148  ;;  %7160 = vpow2.f32 %v4423_v48 }
0x2f83   :  { %v8755_v2 = vpop.eup %7150  ;;  %4437 = vperm.xlu1 %7130, %v8753_v44   ;;  %7162 = vpow2.f32 %v4421_v20 }
0x2f84   :  { %4434 = vperm.xlu0 %7129, %v8755_v2   ;;  %v8759_v14 = vpop.eup %7152 }
0x2f85   :  { %v7155_v17 = vpop.eup %7154 }
0x2f86   :  { %v7157_v43 = vpop.eup %7156 }
0x2f87   :  { %v8763_v16 = vpop.eup %7158 }
0x2f88   :  { %v7161_v21 = vpop.eup %7160 }
0x2f89   :  { %v8766_v36 = vpop.eup %7162 }
0x2f8b   :  { %4443 = vperm.xlu1 %7130, %v8759_v14  }
0x2f8c   :  { %4440 = vperm.xlu0 %7129, %v7155_v17  }
0x2f93   :  { %4449 = vperm.xlu1 %7130, %v7157_v43  }
0x2f94   :  { %4446 = vperm.xlu0 %7129, %v8763_v16  }
0x2f9b   :  { %4455 = vperm.xlu1 %7130, %v7161_v21  }
0x2f9c   :  { %4452 = vperm.xlu0 %7129, %v8766_v36  }
0x2ff5   :  { %v4438_v55 = vpop.permute.xlu1 %4437 }
0x2ff6   :  { %v4435_v39 = vpop.permute.xlu0 %4434  ;;  %v4458_v25 = vperm.slane %v4438_v55, %v7811_v26 }
0x2ff7   :  { %v4457_v46 = vperm.slane %v4435_v39, %v7811_v26 }
0x2ff9   :  { %v4465_v47 = vsel %vm561_vm2, %v4458_v25, %v4457_v46 }
0x2ffd   :  { %v4444_v50 = vpop.permute.xlu1 %4443 }
0x2ffe   :  { %v4441_v4 = vpop.permute.xlu0 %4440  ;;  %v4460_v15 = vperm.slane %v4444_v50, %v7811_v26 }
0x2fff   :  { %v4459_v19 = vperm.slane %v4441_v4, %v7811_v26 }
0x3001   :  { %v4466_v10 = vsel %vm563_vm3, %v4459_v19, %v4465_v47 }
0x3002   :  { %v4467_v30 = vsel %vm565_vm4, %v4460_v15, %v4466_v10 }
0x3005   :  { %v4450_v63 = vpop.permute.xlu1 %4449 }
0x3006   :  { %v4447_v57 = vpop.permute.xlu0 %4446  ;;  %v4462_v58 = vperm.slane %v4450_v63, %v7811_v26 }
0x3007   :  { %v4461_v24 = vperm.slane %v4447_v57, %v7811_v26 }
0x3009   :  { %v4468_v23 = vsel %vm567_vm5, %v4461_v24, %v4467_v30 }
0x300a   :  { %v4469_v20 = vsel %vm569_vm6, %v4462_v58, %v4468_v23 }
0x300d   :  { %v4456_v38 = vpop.permute.xlu1 %4455 }
0x300e   :  { %v4464_v0 = vperm.slane %v4456_v38, %v7811_v26  ;;  %v4453_v54 = vpop.permute.xlu0 %4452 }
0x300f   :  { %v4463_v48 = vperm.slane %v4453_v54, %v7811_v26 }
0x3011   :  { %v4470_v55 = vsel %vm571_vm7, %v4463_v48, %v4469_v20 }
0x3012   :  { %v4471_v39 = vsel %vm573_vm8, %v4464_v0, %v4470_v55 }
0x3013   :  { %v4473_v50 = vsel %vm576_vm9, %v4471_v39, 0.0 }
0x3014   :  { %4474 = vadd.xlane.f32.xlu0 %v4473_v50 }
0x3087   :  { %v4475_v4 = vpop.xlane.xlu0 %4474 }
0x3088   :  { %7164 = vrcp.f32 %v4475_v4 }
0x308e   :  { %v7165_v25 = vpop.eup %7164 }
0x308f   :  { %v4479_v46 = vperm.slane %v7165_v25, 1  ;;  %v4478_v19 = vperm.slane %v7165_v25, 0  ;;  %v4483_v63 = vperm.slane %v7165_v25, 5  ;;  %v4480_v57 = vperm.slane %v7165_v25, 2 }
0x3090   :  { %v4485_v0 = vperm.slane %v7165_v25, 7  ;;  %v4481_v54 = vperm.slane %v7165_v25, 3 }
0x3091   :  { %v4495_v47 = vmul.f32 %v8753_v44, %v4479_v46  ;;  %v4494_v15 = vmul.f32 %v8755_v2, %v4478_v19  ;;  %v4499_v58 = vmul.f32 %v7157_v43, %v4483_v63  ;;  %v4496_v30 = vmul.f32 %v7155_v17, %v4480_v57 }
0x3092   :  { %v4501_v5 = vmul.f32 %v7161_v21, %v4485_v0  ;;  %v4497_v44 = vmul.f32 %v8759_v14, %v4481_v54  ;;  %v4482_v2 = vperm.slane %v7165_v25, 4 }
0x3093   :  { %v4503_v10 = vpack.c.bf16 %v4495_v47, %v4495_v47  ;;  %v4502_v24 = vpack.c.bf16 %v4494_v15, %v4494_v15  ;;  %v4507_v55 = vpack.c.bf16 %v4499_v58, %v4499_v58  ;;  %v4504_v39 = vpack.c.bf16 %v4496_v30, %v4496_v30 }
0x3094   :  { %v4509_v43 = vpack.c.bf16 %v4501_v5, %v4501_v5  ;;  %v4505_v17 = vpack.c.bf16 %v4497_v44, %v4497_v44  ;;  %v4498_v47 = vmul.f32 %v8763_v16, %v4482_v2  ;;  %v4484_v58 = vperm.slane %v7165_v25, 6 }
0x3095   :  { %v4536_v23 = vunpack.c.l.b16 %v4503_v10  ;;  %v4511_v38 = vunpack.c.l.b16 %v4502_v24  ;;  %v4636_v50 = vunpack.c.l.b16 %v4507_v55  ;;  %v4561_v4 = vunpack.c.l.b16 %v4504_v39 }
0x3096   :  { %v4686_v63 = vunpack.c.l.b16 %v4509_v43  ;;  %v4586_v57 = vunpack.c.l.b16 %v4505_v17  ;;  %v4506_v24 = vpack.c.bf16 %v4498_v47, %v4498_v47  ;;  %v4500_v14 = vmul.f32 %v8766_v36, %v4484_v58 }
0x3097   :  { %v6741_v48 = vunpack.i.l.s16 %v4536_v23  ;;  %v6739_v20 = vunpack.i.l.s16 %v4511_v38  ;;  %v6749_v46 = vunpack.i.l.s16 %v4636_v50  ;;  %v6743_v19 = vunpack.i.l.s16 %v4561_v4 }
0x3098   :  { %v6753_v15 = vunpack.i.l.s16 %v4686_v63  ;;  %v6745_v10 = vunpack.i.l.s16 %v4586_v57  ;;  %v4611_v21 = vunpack.c.l.b16 %v4506_v24  ;;  %v4508_v23 = vpack.c.bf16 %v4500_v14, %v4500_v14 }
0x3099   :  { %4540 = vperm.xlu2 %7131, %v6741_v48   ;;  %4515 = vperm.xlu1 %7130, %v6739_v20  }
0x309a   :  { %v6747_v30 = vunpack.i.l.s16 %v4611_v21  ;;  %v4661_v5 = vunpack.c.l.b16 %v4508_v23  ;;  %v4225_v23 = vld [vmem:[#allocation2] sm:$0xff] }
0x309c   :  { %v6751_v38 = vunpack.i.l.s16 %v4661_v5 }
0x30a1   :  { %4640 = vperm.xlu2 %7131, %v6749_v46   ;;  %4565 = vperm.xlu1 %7130, %v6743_v19  }
0x30a9   :  { %4690 = vperm.xlu2 %7131, %v6753_v15   ;;  %4590 = vperm.xlu1 %7130, %v6745_v10  }
0x30b1   :  { %4615 = vperm.xlu1 %7130, %v6747_v30  }
0x30b9   :  { %4665 = vperm.xlu1 %7130, %v6751_v38   ;;  %v4226_v38 = vpack.c.bf16 %v4225_v23, %v4225_v23 }
0x30f3   :  { %v4541_v0 = vpop.permute.xlu2 %4540 }
0x30f4   :  { %v4542_v54 = vperm.slane %v4541_v0, %v7811_v26 }
0x30f6   :  { %v4543_v48 = vpack.c.b16 %v4542_v54, %v4542_v54 }
0x30f8   :  { %6742 = vmatmul.msk.bf16.vlgmr.msra.gmra.mxu3 %vm576_vm9, %v4543_v48 }
0x30f9   :  { %4679 = vmatpush.bf16.msra.mxu3 %v7897_v35 }
0x30fb   :  { %v4641_v19 = vpop.permute.xlu2 %4640 }
0x30fc   :  { %v4642_v17 = vperm.slane %v4641_v19, %v7811_v26 }
0x30fe   :  { %v4643_v47 = vpack.c.b16 %v4642_v17, %v4642_v17 }
0x3103   :  { %v4691_v10 = vpop.permute.xlu2 %4690 }
0x3104   :  { %v4692_v24 = vperm.slane %v4691_v10, %v7811_v26 }
0x3106   :  { %v4693_v58 = vpack.c.b16 %v4692_v24, %v4692_v24 }
0x310b   :  { %v4516_v16 = vpop.permute.xlu1 %4515 }
0x310c   :  { %v4517_v25 = vperm.slane %v4516_v16, %v7811_v26 }
0x310e   :  { %v4518_v20 = vpack.c.b16 %v4517_v25, %v4517_v25 }
0x3110   :  { %6740 = vmatmul.msk.bf16.vlgmr.msra.gmra.mxu2 %vm576_vm9, %v4518_v20 }
0x3111   :  { %4654 = vmatpush.bf16.msra.mxu2 %v7894_v18 }
0x3113   :  { %v4566_v36 = vpop.permute.xlu1 %4565 }
0x3114   :  { %v4567_v55 = vperm.slane %v4566_v36, %v7811_v26 }
0x3116   :  { %v4568_v4 = vpack.c.b16 %v4567_v55, %v4567_v55 }
0x311b   :  { %v4591_v39 = vpop.permute.xlu1 %4590 }
0x311c   :  { %v4592_v50 = vperm.slane %v4591_v39, %v7811_v26 }
0x311e   :  { %v4593_v44 = vpack.c.b16 %v4592_v50, %v4592_v50 }
0x3120   :  { %6744 = vmatmul.msk.bf16.vlgmr.msrb.gmra.mxu2 %vm576_vm9, %v4568_v4  ;;  %6746 = vmatmul.msk.bf16.vlgmr.msrb.gmra.mxu3 %vm576_vm9, %v4593_v44 }
0x3121   :  { %4764 = vmatpush.bf16.msrb.mxu2 %v7931_v32  ;;  %4782 = vmatpush.bf16.msrb.mxu3 %v7925_v34 }
0x3123   :  { %v4616_v2 = vpop.permute.xlu1 %4615 }
0x3124   :  { %v4617_v46 = vperm.slane %v4616_v2, %v7811_v26 }
0x3125   :  { %4765 = vmatpush.bf16.msrb.mxu2 %v7945_v6  ;;  %4783 = vmatpush.bf16.msrb.mxu3 %v7928_v27 }
0x3126   :  { %v4618_v43 = vpack.c.b16 %v4617_v46, %v4617_v46 }
0x3128   :  { %6748 = vmatmul.msk.bf16.vlgmr.msrb.gmra.mxu0 %vm576_vm9, %v4618_v43 }
0x3129   :  { %4796 = vmatpush.bf16.msrb.mxu0 %v7901_v37  ;;  %4766 = vmatpush.bf16.msrb.mxu2 %v7956_v11 }
0x312b   :  { %v4666_v63 = vpop.permute.xlu1 %4665 }
0x312c   :  { %v4667_v57 = vperm.slane %v4666_v63, %v7811_v26 }
0x312d   :  { %4797 = vmatpush.bf16.msrb.mxu0 %v7913_v42  ;;  %4767 = vmatpush.bf16.msrb.mxu2 %v7965_v28 }
0x312e   :  { %v4668_v15 = vpack.c.b16 %v4667_v57, %v4667_v57 }
0x3130   :  { %6750 = vmatmul.msk.bf16.vlgmr.msra.gmra.mxu2 %vm576_vm9, %v4643_v47  ;;  %6752 = vmatmul.msk.bf16.vlgmr.msra.gmra.mxu3 %vm576_vm9, %v4668_v15 }
0x3131   :  { %4847 = vmatpush.bf16.msra.mxu2 %v7936_v33  ;;  %4868 = vmatpush.bf16.msra.mxu3 %v7996_v51 }
0x3135   :  { %4848 = vmatpush.bf16.msra.mxu2 %v7950_v8  ;;  %4869 = vmatpush.bf16.msra.mxu3 %v8002_v56 }
0x3138   :  { %6754 = vmatmul.msk.bf16.vlgmr.msra.gmra.mxu0 %vm576_vm9, %v4693_v58 }
0x3139   :  { %4849 = vmatpush.bf16.msra.mxu2 %v7961_v22  ;;  %4881 = vmatpush.bf16.msra.mxu0 %v7994_v49 }
0x313d   :  { %4850 = vmatpush.bf16.msra.mxu2 %v7970_v29  ;;  %4882 = vmatpush.bf16.msra.mxu0 %v7999_v53 }
0x3140   :  { %6756 = vmatmul.msk.bf16.vlgmr.msrb.gmra.mxu3 %vm399_vm0, %v4226_v38 }
0x3148   :  { %6757 = vmatmul.msk.bf16.vlgmr.msrb.gmra.mxu0 %vm399_vm0, %v8682_v62 }
0x3158   :  { %6761 = vmatmul.msk.bf16.vlgmr.msra.gmra.mxu0 %vm399_vm0, %v4226_v38 }
0x317b   :  { %v4556_v21 = vpop.f32.mrf.mxu3 }
0x317c   :  { %v4719_v25 = vpack.c.bf16 %v4556_v21, %v4556_v21 }
0x317e   :  { %v4735_v50 = vunpack.c.l.b16 %v4719_v25 }
0x3180   :  { %v4742_v43 = vrot.slane %v4735_v50, 7 }
0x3183   :  { %v4558_v14 = vpop.f32.mrf.mxu3 }
0x3193   :  { %v4531_v30 = vpop.f32.mrf.mxu2 }
0x3194   :  { %v4718_v20 = vpack.c.bf16 %v4531_v30, %v4531_v30 }
0x3196   :  { %v4734_v2 = vunpack.c.l.b16 %v4718_v20 }
0x3198   :  { %v4743_v63 = vsel %vm561_vm2, %v4742_v43, %v4734_v2 }
0x319b   :  { %v4533_v5 = vpop.f32.mrf.mxu2 }
0x31a3   :  { %v4581_v0 = vpop.f32.mrf.mxu2  ;;  %v4606_v54 = vpop.f32.mrf.mxu3 }
0x31a4   :  { %v4720_v16 = vpack.c.bf16 %v4581_v0, %v4581_v0  ;;  %v4721_v36 = vpack.c.bf16 %v4606_v54, %v4606_v54 }
0x31a5   :  { %v4631_v48 = vpop.f32.mrf.mxu0 }
0x31a6   :  { %v4736_v55 = vunpack.c.l.b16 %v4720_v16  ;;  %v4722_v4 = vpack.c.bf16 %v4631_v48, %v4631_v48  ;;  %v4737_v46 = vunpack.c.l.b16 %v4721_v36 }
0x31a8   :  { %v4744_v19 = vrot.slane %v4736_v55, 6  ;;  %v4738_v17 = vunpack.c.l.b16 %v4722_v4  ;;  %v4746_v57 = vrot.slane %v4737_v46, 5 }
0x31aa   :  { %v4745_v47 = vsel %vm563_vm3, %v4744_v19, %v4743_v63  ;;  %v4748_v21 = vrot.slane %v4738_v17, 4 }
0x31ab   :  { %v4583_v39 = vpop.f32.mrf.mxu2  ;;  %v4608_v62 = vpop.f32.mrf.mxu3  ;;  %v4747_v30 = vsel %vm565_vm4, %v4746_v57, %v4745_v47 }
0x31ac   :  { %v4749_v16 = vsel %vm567_vm5, %v4748_v21, %v4747_v30 }
0x31ad   :  { %v4633_v44 = vpop.f32.mrf.mxu0 }
0x31b3   :  { %v4656_v15 = vpop.f32.mrf.mxu2  ;;  %v4681_v10 = vpop.f32.mrf.mxu3 }
0x31b4   :  { %v4723_v24 = vpack.c.bf16 %v4656_v15, %v4656_v15  ;;  %v4724_v58 = vpack.c.bf16 %v4681_v10, %v4681_v10 }
0x31b5   :  { %v4706_v14 = vpop.f32.mrf.mxu0 }
0x31b6   :  { %v4739_v23 = vunpack.c.l.b16 %v4723_v24  ;;  %v4740_v5 = vunpack.c.l.b16 %v4724_v58  ;;  %v4725_v38 = vpack.c.bf16 %v4706_v14, %v4706_v14 }
0x31b8   :  { %v4750_v0 = vrot.slane %v4739_v23, 3  ;;  %v4752_v54 = vrot.slane %v4740_v5, 2  ;;  %v4741_v48 = vunpack.c.l.b16 %v4725_v38 }
0x31ba   :  { %v4751_v25 = vsel %vm569_vm6, %v4750_v0, %v4749_v16  ;;  %v4754_v20 = vrot.slane %v4741_v48, 1 }
0x31bb   :  { %v4753_v36 = vsel %vm571_vm7, %v4752_v54, %v4751_v25  ;;  %v4658_v55 = vpop.f32.mrf.mxu2  ;;  %v4683_v39 = vpop.f32.mrf.mxu3 }
0x31bc   :  { %v4755_v62 = vsel %vm573_vm8, %v4754_v20, %v4753_v36 }
0x31bd   :  { %v4756_v50 = vpack.c.b16 %v4755_v62, %v4755_v62  ;;  %v4708_v4 = vpop.f32.mrf.mxu0 }
0x31bf   :  { %6755 = vmatmul.msk.bf16.vlgmr.msrb.gmra.mxu2 %vm327_vm1, %v4756_v50 }
0x31c3   :  { %v4785_v19 = vpop.f32.mrf.mxu3 }
0x31c5   :  { %v4799_v44 = vpop.f32.mrf.mxu0 }
0x31c6   :  { %v4800_v2 = vadd.f32 %v7972_v31, %v4799_v44 }
0x31c8   :  { %4824 = vrot.lane.b32.xlu1 %v4800_v2, %s7552_s5 }
0x31cb   :  { %v4787_v43 = vpop.f32.mrf.mxu3 }
0x31cd   :  { %v4801_v46 = vpop.f32.mrf.mxu0 }
0x31cf   :  { %6759 = vmatmul.msk.bf16.vlgmr.msra.gmra.mxu2 %vm327_vm1, %v4756_v50 }
0x323a   :  { %v4825_v16 = vpop.permute.xlu1 %4824 }
0x3242   :  { %v4769_v17 = vpop.f32.mrf.mxu2 }
0x3243   :  { %v4786_v63 = vadd.f32 %v4785_v19, %v4769_v17  ;;  %v4884_v17 = vpop.f32.mrf.mxu0 }
0x3245   :  { %v4789_v57 = vadd.f32 %v7989_v52, %v4786_v63 }
0x3247   :  { %v4803_v47 = vadd.f32 %v4800_v2, %v4789_v57 }
0x3249   :  { %v6758_v15 = vmul.f32 -1.442695, %v4803_v47 }
0x324a   :  { %v4771_v10 = vpop.f32.mrf.mxu2 }
0x324b   :  { %7166 = vpow2.f32 %v6758_v15  ;;  %v4886_v63 = vpop.f32.mrf.mxu0 }
0x3251   :  { %v7167_v24 = vpop.eup %7166 }
0x3252   :  { %v4807_v58 = vadd.f32 1.0, %v7167_v24  ;;  %v4852_v21 = vpop.f32.mrf.mxu2 }
0x3254   :  { %7168 = vrcp.f32 %v4807_v58  ;;  %v4819_v38 = vand.u32 2147483648, %v4807_v58  ;;  %v4817_v54 = vand.u32 2147483647, %v4807_v58  ;;  %vm4813_vm11 = vweird.f32 %v4807_v58 }
0x3256   :  { %v4820_v25 = vor.u32 1.1754944e-38, %v4819_v38  ;;  %vm4818_vm13 = vcmp.eq.f32.partialorder %v4817_v54, 8.507059e+37 }
0x325a   :  { %v7169_v14 = vpop.eup %7168  ;;  %v4854_v30 = vpop.f32.mrf.mxu2 }
0x325b   :  { %v4809_v23 = vmul.f32 %v7169_v14, %v4807_v58  ;;  %vm4814_vm10 = vweird.f32 %v7169_v14 }
0x325c   :  { %vm4815_vm12 = vmor %vm4813_vm11, %vm4814_vm10 }
0x325d   :  { %v4810_v5 = vsub.f32 1.0, %v4809_v23 }
0x325f   :  { %v4811_v0 = vmul.f32 %v7169_v14, %v4810_v5 }
0x3261   :  { %v4812_v48 = vadd.f32 %v7169_v14, %v4811_v0 }
0x3263   :  { %v4816_v20 = vsel %vm4815_vm12, %v7169_v14, %v4812_v48 }
0x3264   :  { %v4821_v36 = vsel %vm4818_vm13, %v4820_v25, %v4816_v20 }
0x3265   :  { %v4827_v55 = vmul.f32 %v4825_v16, %v4821_v36  ;;  %v4834_v4 = vsub.f32 1.0, %v4821_v36  ;;  %v4840_v46 = vmul.f32 %v4821_v36, %v8677_v45 }
0x3267   :  { %4829 = vrot.lane.b32.xlu2 %v4827_v55, %s7552_s5 }
0x32c1   :  { %v4830_v39 = vpop.permute.xlu2 %4829 }
0x32c2   :  { %v4832_v62 = vadd.f32 %v4830_v39, %v4789_v57 }
0x32c4   :  { %7170 = vtanh.f32 %v4832_v62 }
0x32ca   :  { %v7171_v50 = vpop.eup %7170 }
0x32cb   :  { %4836 = vrot.lane.b32.xlu0 %v7171_v50, %s7565_s8 }
0x333d   :  { %v4837_v44 = vpop.permute.xlu0 %4836 }
0x333e   :  { %v4839_v2 = vmul.f32 %v4837_v44, %v4834_v4 }
0x3340   :  { %v8843_v19 = vadd.f32 %v4840_v46, %v4839_v2 }
0x3342   :  { %v4842_v43 = vpack.c.bf16 %v8843_v19, %v8843_v19 }
0x3344   :  { %4857 = vrot.lane.b32.xlu1 %v4842_v43, %s7565_s8 }
0x33b6   :  { %v8848_v47 = vpop.permute.xlu1 %4857 }
0x33b7   :  { %6760 = vmatmul.msk.bf16.vlgmr.msra.gmra.mxu3 %vm399_vm0, %v8848_v47 }
0x343a   :  { %v4871_v57 = vpop.f32.mrf.mxu3 }
0x343b   :  { %v4872_v15 = vadd.f32 %v4871_v57, %v4852_v21 }
0x343d   :  { %v4888_v10 = vadd.f32 %v4884_v17, %v4872_v15 }
0x343e   :  { %4894 = sbr.rel (%p6763_p10) target bundleno = 13381 (0x3445), region = 161 }
0x343f   :  { %v8853_v45 = vadd.f32 %v8020_v40, %v4888_v10 }
0x3441   :  { %9311 = vst [vmem:[#allocation44_spill] sm:$0xff] %v8853_v45 }
0x3442   :  { %v4873_v24 = vpop.f32.mrf.mxu3 }
0x3443   :  { %v6764_v58 = vld [vmem:[%s9312_s24 + $0x30] sm:$0xff] }
0x3444   :  { %4897 = vst.msk [vmem:[#allocation2] sm:$0xff] %vm399_vm0, %v6764_v58 }
0x3445 PF:  { %p6765_p11 = scmp.ne.s32.totalorder %s6762_s12, 0 }
0x3446   :  { %s9313_s11 = sld [smem:[#allocation47_spill]] (!%p6765_p11) }
0x3447   :  { %4901 = sbr.rel (%p6765_p11) target bundleno = 13888 (0x3640), region = 165 }
0x344c   :  { %v4902_v14 = vsel %vm399_vm0, %v8853_v45, -inf  ;;  %v6883_v25 = vld [vmem:[%s9313_s11 + $0x8] sm:$0xff]  ;;  %v6882_v20 = vld [vmem:[%s9313_s11] sm:$0xff]  ;;  %v7571_v4 = vmov 0.0  }
0x344d   :  { %4903 = vmax.xlane.f32.xlu0 %v4902_v14  ;;  %4950 = vmatpush.bf16.msra.mxu0 %v6883_v25 }
0x3451   :  { %4951 = vmatpush.bf16.msra.mxu0 %v6882_v20 }
0x34c0   :  { %v4904_v21 = vpop.xlane.xlu0 %4903 }
0x34c1   :  { %vm4905_vm14 = vcmp.eq.f32.partialorder %v8853_v45, %v4904_v21 }
0x34c2   :  { %v4906_v30 = vsel %vm4905_vm14, %v7811_v26, 32 }
0x34c3   :  { %v4907_v23 = vsel %vm399_vm0, %v4906_v30, 2147483647 }
0x34c4   :  { %v4909_v5 = vshra.s32 %v4907_v23, 16  ;;  %v4908_v0 = vand.u32 65535, %v4907_v23 }
0x34c6   :  { %v4911_v38 = vcvt.s32.f32 %v4909_v5  ;;  %v4910_v48 = vcvt.s32.f32 %v4908_v0 }
0x34c8   :  { %4912 = vmin.xlane.f32.xlu0 %v4911_v38 }
0x353b   :  { %v4913_v54 = vpop.xlane.xlu0 %4912 }
0x353c   :  { %vm4914_vm15 = vcmp.eq.f32.partialorder %v4911_v38, %v4913_v54  ;;  %v4919_v36 = vcvt.f32.s32 %v4913_v54 }
0x353d   :  { %v4915_v16 = vsel %vm4914_vm15, %v4910_v48, inf }
0x353e   :  { %4916 = vmin.xlane.f32.xlu1 %v4915_v16  ;;  %v4920_v39 = vshll.u32 %v4919_v36, 16 }
0x35b1   :  { %v4917_v55 = vpop.xlane.xlu1 %4916 }
0x35b2   :  { %v4918_v62 = vcvt.f32.s32 %v4917_v55 }
0x35b4   :  { %v4921_v50 = vadd.s32 %v4920_v39, %v4918_v62 }
0x35b6   :  { %vm4922_vm10 = vcmp.eq.s32.totalorder %v7811_v26, %v4921_v50 }
0x35b7   :  { %v4923_v44 = vsel %vm4922_vm10, 1.0, %v7571_v4 }
0x35b8   :  { %v4924_v2 = vpack.c.bf16 %v4923_v44, %v4923_v44 }
0x35ba   :  { %6774 = vmatmul.msk.bf16.vlgmr.msra.gmra.mxu0 %vm399_vm0, %v4924_v2 }
0x3637   :  { %v4953_v46 = vpop.f32.mrf.mxu0 }
0x3638   :  { %v4957_v43 = vmul.f32 5.656854, %v4953_v46 }
0x363a   :  { %4958 = vst.msk [vmem:[#allocation2] sm:$0xff] %vm399_vm0, %v4957_v43 }
0x363f   :  { %v4955_v17 = vpop.f32.mrf.mxu0 }
0x3640 PF:  { %4967 = vmatpush.bf16.msra.mxu0 %v7726_v1  ;;  %5036 = vmatpush.bf16.msra.mxu1 %v7759_v12  ;;  %v9314_v63 = vmov 0   ;;  %v9315_v58 = vld [vmem:[#allocation31_spill] sm:$0xff]  ;;  %v9316_v21 = vld [vmem:[#allocation32_spill] sm:$0xff]  ;;  %v9317_v20 = vld [vmem:[#allocation33_spill] sm:$0xff]  ;;  %s6803_s16 = sld [smem:[#allocation3 + $0x6]] }
0x3641   :  { %7172 = vset.pattern.permute.xlu0 %v9314_v63  ;;  %7173 = vset.pattern.permute.xlu1 %v9314_v63  ;;  %v9318_v55 = vld [vmem:[#allocation34_spill] sm:$0xff]  ;;  %v9319_v17 = vld [vmem:[#allocation35_spill] sm:$0xff] }
0x3642   :  { %7174 = vset.pattern.permute.xlu2 %v9314_v63  ;;  %5288 = vmatpush.bf16.msra.mxu3 %v7874_v60 }
0x3643   :  { %5263 = vmatpush.bf16.msra.mxu2 %v7870_v59 }
0x3644   :  { %4968 = vmatpush.bf16.msra.mxu0 %v7732_v3  ;;  %5037 = vmatpush.bf16.msra.mxu1 %v7765_v13 }
0x3646   :  { %5338 = vmatpush.bf16.msrb.mxu3 %v7883_v7  ;;  %p6804_p12 = scmp.eq.s32.totalorder %s6803_s16, 0 }
0x3647   :  { %5313 = vmatpush.bf16.msrb.mxu2 %v7878_v61  ;;  %6775 = vmatmul.msk.bf16.vlgmr.msra.gmra.mxu0 %vm399_vm0, %v8848_v47  ;;  %s9323_s30 = sld [smem:[#allocation46_spill]] (!%p6804_p12) }
0x3648   :  { %5363 = vmatpush.bf16.msrb.mxu0 %v7886_v9 }
0x364c   :  { %5438 = vmatpush.bf16.msra.mxu0 %v7909_v41 }
0x36c4   :  { %v4970_v57 = vpop.f32.mrf.mxu0 }
0x36c5   :  { %v4975_v15 = vrot.slane %v4970_v57, 1  ;;  %v4982_v10 = vperm.slane %v4970_v57, 0  ;;  %v4976_v5 = vrot.slane %v4970_v57, 2  ;;  %v4977_v38 = vrot.slane %v4970_v57, 3 }
0x36c6   :  { %v4978_v62 = vrot.slane %v4970_v57, 4  ;;  %v4979_v50 = vrot.slane %v4970_v57, 5 }
0x36c7   :  { %v4983_v24 = vperm.slane %v4975_v15, 0  ;;  %v4998_v14 = vadd.f32 %v4982_v10, %v9315_v58  ;;  %v4984_v54 = vperm.slane %v4976_v5, 0  ;;  %v4985_v16 = vperm.slane %v4977_v38, 0  ;;  %v9320_v15 = vld [vmem:[#allocation36_spill] sm:$0xff]  ;;  %v9321_v38 = vld [vmem:[#allocation37_spill] sm:$0xff] }
0x36c8   :  { %v4986_v2 = vperm.slane %v4978_v62, 0  ;;  %v4987_v46 = vperm.slane %v4979_v50, 0  ;;  %v4981_v58 = vrot.slane %v4970_v57, 7 }
0x36c9   :  { %v4999_v30 = vadd.f32 %v4983_v24, %v9316_v21  ;;  %7175 = vtanh.f32 %v4998_v14  ;;  %v5000_v36 = vadd.f32 %v4984_v54, %v9317_v20  ;;  %v5001_v39 = vadd.f32 %v4985_v16, %v9318_v55  ;;  %v9322_v54 = vld [vmem:[#allocation38_spill] sm:$0xff] }
0x36ca   :  { %v5002_v63 = vadd.f32 %v4986_v2, %v9319_v17  ;;  %v5003_v10 = vadd.f32 %v4987_v46, %v9320_v15  ;;  %v4980_v24 = vrot.slane %v4970_v57, 6 }
0x36cb   :  { %7177 = vtanh.f32 %v4999_v30 }
0x36cc   :  { %v4972_v23 = vpop.f32.mrf.mxu0  ;;  %7179 = vtanh.f32 %v5000_v36  ;;  %v4988_v30 = vperm.slane %v4980_v24, 0 }
0x36cd   :  { %7181 = vtanh.f32 %v5001_v39  ;;  %v4989_v23 = vperm.slane %v4981_v58, 0 }
0x36ce   :  { %7183 = vtanh.f32 %v5002_v63 }
0x36cf   :  { %v7176_v0 = vpop.eup %7175  ;;  %7185 = vtanh.f32 %v5003_v10 }
0x36d1   :  { %v7178_v48 = vpop.eup %7177 }
0x36d2   :  { %v5014_v25 = vpack.c.bf16 %v7178_v48, %v7176_v0  ;;  %v7180_v4 = vpop.eup %7179  ;;  %v5004_v0 = vadd.f32 %v4988_v30, %v9321_v38  ;;  %v5005_v48 = vadd.f32 %v4989_v23, %v9322_v54 }
0x36d3   :  { %v7182_v44 = vpop.eup %7181 }
0x36d4   :  { %6776 = vmatmul.msk.bf16.vlgmr.msra.gmra.mxu1 %vm399_vm0, %v5014_v25  ;;  %v5015_v43 = vpack.c.bf16 %v7182_v44, %v7180_v4  ;;  %v7184_v14 = vpop.eup %7183  ;;  %7187 = vtanh.f32 %v5004_v0 }
0x36d5   :  { %v7186_v21 = vpop.eup %7185  ;;  %7189 = vtanh.f32 %v5005_v48 }
0x36d6   :  { %v5016_v5 = vpack.c.bf16 %v7186_v21, %v7184_v14 }
0x36da   :  { %v7188_v16 = vpop.eup %7187 }
0x36db   :  { %v7190_v25 = vpop.eup %7189 }
0x36dc   :  { %v5017_v20 = vpack.c.bf16 %v7190_v25, %v7188_v16 }
0x36e4   :  { %6777 = vmatmul.msk.bf16.gmra.mxu1 %vm399_vm0, %v5015_v43 }
0x36f4   :  { %6778 = vmatmul.msk.bf16.gmra.mxu1 %vm399_vm0, %v5016_v5 }
0x3704   :  { %6779 = vmatmul.msk.bf16.gmra.mxu1 %vm399_vm0, %v5017_v20 }
0x3751   :  { %v5039_v36 = vpop.f32.mrf.mxu1 }
0x3752   :  { %5076 = vperm.xlu0 %7172, %v5039_v36  }
0x3759   :  { %v5041_v57 = vpop.f32.mrf.mxu1 }
0x375a   :  { %5079 = vperm.xlu0 %7172, %v5041_v57  }
0x3761   :  { %v5044_v55 = vpop.f32.mrf.mxu1 }
0x3762   :  { %5082 = vperm.xlu1 %7173, %v5044_v55  }
0x3769   :  { %v5046_v39 = vpop.f32.mrf.mxu1 }
0x376a   :  { %5085 = vperm.xlu1 %7173, %v5046_v39  }
0x3771   :  { %v5049_v62 = vpop.f32.mrf.mxu1 }
0x3772   :  { %5088 = vperm.xlu2 %7174, %v5049_v62  }
0x3779   :  { %v5051_v50 = vpop.f32.mrf.mxu1 }
0x377a   :  { %5091 = vperm.xlu2 %7174, %v5051_v50  }
0x3781   :  { %v8900_v4 = vpop.f32.mrf.mxu1 }
0x3782   :  { %5094 = vperm.xlu0 %7172, %v8900_v4  }
0x3789   :  { %v5056_v44 = vpop.f32.mrf.mxu1 }
0x378a   :  { %5097 = vperm.xlu1 %7173, %v5056_v44  }
0x37c4   :  { %v5077_v2 = vpop.permute.xlu0 %5076 }
0x37c5   :  { %v5099_v24 = vperm.slane %v5077_v2, %v7811_v26 }
0x37cc   :  { %v5080_v43 = vpop.permute.xlu0 %5079  ;;  %v5089_v17 = vpop.permute.xlu2 %5088 }
0x37cd   :  { %v5100_v15 = vperm.slane %v5080_v43, %v7811_v26  ;;  %v5103_v5 = vperm.slane %v5089_v17, %v7811_v26 }
0x37cf   :  { %v5107_v14 = vsel %vm561_vm2, %v5100_v15, %v5099_v24 }
0x37d4   :  { %v5083_v46 = vpop.permute.xlu1 %5082  ;;  %v5092_v38 = vpop.permute.xlu2 %5091 }
0x37d5   :  { %v5101_v10 = vperm.slane %v5083_v46, %v7811_v26  ;;  %v5104_v48 = vperm.slane %v5092_v38, %v7811_v26 }
0x37d7   :  { %v5108_v21 = vsel %vm563_vm3, %v5101_v10, %v5107_v14 }
0x37dc   :  { %v5086_v63 = vpop.permute.xlu1 %5085 }
0x37dd   :  { %v5102_v58 = vperm.slane %v5086_v63, %v7811_v26 }
0x37df   :  { %v5109_v30 = vsel %vm565_vm4, %v5102_v58, %v5108_v21 }
0x37e0   :  { %v5110_v0 = vsel %vm567_vm5, %v5103_v5, %v5109_v30 }
0x37e1   :  { %v5111_v20 = vsel %vm569_vm6, %v5104_v48, %v5110_v0 }
0x37f4   :  { %v5095_v23 = vpop.permute.xlu0 %5094 }
0x37f5   :  { %v5105_v54 = vperm.slane %v5095_v23, %v7811_v26 }
0x37f7   :  { %v5112_v2 = vsel %vm571_vm7, %v5105_v54, %v5111_v20 }
0x37fc   :  { %v5098_v16 = vpop.permute.xlu1 %5097 }
0x37fd   :  { %v5106_v25 = vperm.slane %v5098_v16, %v7811_v26 }
0x37ff   :  { %v5113_v46 = vsel %vm573_vm8, %v5106_v25, %v5112_v2 }
0x3800   :  { %v5115_v43 = vsel %vm576_vm9, %v5113_v46, -inf }
0x3801   :  { %5116 = vmax.xlane.f32.xlu2 %v5115_v43 }
0x3874   :  { %v5117_v17 = vpop.xlane.xlu2 %5116 }
0x3875   :  { %v5120_v63 = vperm.slane %v5117_v17, 1  ;;  %v5119_v15 = vperm.slane %v5117_v17, 0  ;;  %v5122_v58 = vperm.slane %v5117_v17, 3  ;;  %v5121_v14 = vperm.slane %v5117_v17, 2 }
0x3876   :  { %v5124_v0 = vperm.slane %v5117_v17, 5  ;;  %v5123_v48 = vperm.slane %v5117_v17, 4 }
0x3877   :  { %v5136_v10 = vsub.f32 %v5041_v57, %v5120_v63  ;;  %v5135_v24 = vsub.f32 %v5039_v36, %v5119_v15  ;;  %v5138_v23 = vsub.f32 %v5046_v39, %v5122_v58  ;;  %v5137_v5 = vsub.f32 %v5044_v55, %v5121_v14 }
0x3878   :  { %v5140_v36 = vsub.f32 %v5051_v50, %v5124_v0  ;;  %v5139_v57 = vsub.f32 %v5049_v62, %v5123_v48  ;;  %v5126_v39 = vperm.slane %v5117_v17, 7  ;;  %v5125_v55 = vperm.slane %v5117_v17, 6 }
0x3879   :  { %v5145_v21 = vmul.f32 1.442695, %v5136_v10  ;;  %v5143_v30 = vmul.f32 1.442695, %v5135_v24  ;;  %v5149_v38 = vmul.f32 1.442695, %v5138_v23 }
0x387a   :  { %v5147_v54 = vmul.f32 1.442695, %v5137_v5  ;;  %v5153_v20 = vmul.f32 1.442695, %v5140_v36  ;;  %v5151_v2 = vmul.f32 1.442695, %v5139_v57  ;;  %v5142_v63 = vsub.f32 %v5056_v44, %v5126_v39 }
0x387b   :  { %7191 = vpow2.f32 %v5145_v21  ;;  %v5141_v15 = vsub.f32 %v8900_v4, %v5125_v55 }
0x387c   :  { %7193 = vpow2.f32 %v5143_v30  ;;  %v5157_v10 = vmul.f32 1.442695, %v5142_v63 }
0x387d   :  { %7195 = vpow2.f32 %v5149_v38  ;;  %v5155_v24 = vmul.f32 1.442695, %v5141_v15 }
0x387e   :  { %7197 = vpow2.f32 %v5147_v54 }
0x387f   :  { %7199 = vpow2.f32 %v5153_v20 }
0x3880   :  { %7201 = vpow2.f32 %v5151_v2 }
0x3881   :  { %v8919_v16 = vpop.eup %7191  ;;  %7203 = vpow2.f32 %v5157_v10 }
0x3882   :  { %v8921_v25 = vpop.eup %7193  ;;  %5171 = vperm.xlu1 %7173, %v8919_v16   ;;  %7205 = vpow2.f32 %v5155_v24 }
0x3883   :  { %5168 = vperm.xlu0 %7172, %v8921_v25   ;;  %v8925_v46 = vpop.eup %7195 }
0x3884   :  { %v7198_v43 = vpop.eup %7197 }
0x3885   :  { %v7200_v50 = vpop.eup %7199 }
0x3886   :  { %v8929_v58 = vpop.eup %7201 }
0x3887   :  { %v7204_v62 = vpop.eup %7203 }
0x3888   :  { %v8932_v17 = vpop.eup %7205 }
0x388a   :  { %5177 = vperm.xlu1 %7173, %v8925_v46  }
0x388b   :  { %5174 = vperm.xlu0 %7172, %v7198_v43  }
0x3892   :  { %5183 = vperm.xlu1 %7173, %v7200_v50  }
0x3893   :  { %5180 = vperm.xlu0 %7172, %v8929_v58  }
0x389a   :  { %5189 = vperm.xlu1 %7173, %v7204_v62  }
0x389b   :  { %5186 = vperm.xlu0 %7172, %v8932_v17  }
0x38f4   :  { %v5172_v44 = vpop.permute.xlu1 %5171 }
0x38f5   :  { %v5169_v14 = vpop.permute.xlu0 %5168  ;;  %v5192_v30 = vperm.slane %v5172_v44, %v7811_v26 }
0x38f6   :  { %v5191_v23 = vperm.slane %v5169_v14, %v7811_v26 }
0x38f8   :  { %v5199_v54 = vsel %vm561_vm2, %v5192_v30, %v5191_v23 }
0x38fc   :  { %v5178_v21 = vpop.permute.xlu1 %5177 }
0x38fd   :  { %v5175_v4 = vpop.permute.xlu0 %5174  ;;  %v5194_v48 = vperm.slane %v5178_v21, %v7811_v26 }
0x38fe   :  { %v5193_v5 = vperm.slane %v5175_v4, %v7811_v26 }
0x3900   :  { %v5200_v36 = vsel %vm563_vm3, %v5193_v5, %v5199_v54 }
0x3901   :  { %v5201_v39 = vsel %vm565_vm4, %v5194_v48, %v5200_v36 }
0x3904   :  { %v5184_v38 = vpop.permute.xlu1 %5183 }
0x3905   :  { %v5181_v0 = vpop.permute.xlu0 %5180  ;;  %v5196_v20 = vperm.slane %v5184_v38, %v7811_v26 }
0x3906   :  { %v5195_v57 = vperm.slane %v5181_v0, %v7811_v26 }
0x3908   :  { %v5202_v2 = vsel %vm567_vm5, %v5195_v57, %v5201_v39 }
0x3909   :  { %v5203_v24 = vsel %vm569_vm6, %v5196_v20, %v5202_v2 }
0x390c   :  { %v5190_v55 = vpop.permute.xlu1 %5189 }
0x390d   :  { %v5198_v63 = vperm.slane %v5190_v55, %v7811_v26  ;;  %v5187_v15 = vpop.permute.xlu0 %5186 }
0x390e   :  { %v5197_v10 = vperm.slane %v5187_v15, %v7811_v26 }
0x3910   :  { %v5204_v44 = vsel %vm571_vm7, %v5197_v10, %v5203_v24 }
0x3911   :  { %v5205_v14 = vsel %vm573_vm8, %v5198_v63, %v5204_v44 }
0x3912   :  { %v5207_v21 = vsel %vm576_vm9, %v5205_v14, 0.0 }
0x3913   :  { %5208 = vadd.xlane.f32.xlu0 %v5207_v21 }
0x3986   :  { %v5209_v4 = vpop.xlane.xlu0 %5208 }
0x3987   :  { %7207 = vrcp.f32 %v5209_v4 }
0x398d   :  { %v7208_v30 = vpop.eup %7207 }
0x398e   :  { %v5213_v23 = vperm.slane %v7208_v30, 1  ;;  %v5212_v5 = vperm.slane %v7208_v30, 0  ;;  %v5217_v38 = vperm.slane %v7208_v30, 5  ;;  %v5214_v0 = vperm.slane %v7208_v30, 2 }
0x398f   :  { %v5219_v63 = vperm.slane %v7208_v30, 7  ;;  %v5215_v15 = vperm.slane %v7208_v30, 3 }
0x3990   :  { %v5229_v54 = vmul.f32 %v8919_v16, %v5213_v23  ;;  %v5228_v48 = vmul.f32 %v8921_v25, %v5212_v5  ;;  %v5233_v20 = vmul.f32 %v7200_v50, %v5217_v38  ;;  %v5230_v39 = vmul.f32 %v7198_v43, %v5214_v0 }
0x3991   :  { %v5235_v45 = vmul.f32 %v7204_v62, %v5219_v63  ;;  %v5231_v16 = vmul.f32 %v8925_v46, %v5215_v15  ;;  %v5216_v25 = vperm.slane %v7208_v30, 4 }
0x3992   :  { %v5237_v36 = vpack.c.bf16 %v5229_v54, %v5229_v54  ;;  %v5236_v57 = vpack.c.bf16 %v5228_v48, %v5228_v48  ;;  %v5241_v44 = vpack.c.bf16 %v5233_v20, %v5233_v20  ;;  %v5238_v14 = vpack.c.bf16 %v5230_v39, %v5230_v39 }
0x3993   :  { %v5243_v50 = vpack.c.bf16 %v5235_v45, %v5235_v45  ;;  %v5239_v43 = vpack.c.bf16 %v5231_v16, %v5231_v16  ;;  %v5232_v54 = vmul.f32 %v8929_v58, %v5216_v25  ;;  %v5218_v20 = vperm.slane %v7208_v30, 6 }
0x3994   :  { %v5270_v2 = vunpack.c.l.b16 %v5237_v36  ;;  %v5245_v55 = vunpack.c.l.b16 %v5236_v57  ;;  %v5370_v21 = vunpack.c.l.b16 %v5241_v44  ;;  %v5295_v4 = vunpack.c.l.b16 %v5238_v14 }
0x3995   :  { %v5420_v38 = vunpack.c.l.b16 %v5243_v50  ;;  %v5320_v0 = vunpack.c.l.b16 %v5239_v43  ;;  %v5240_v57 = vpack.c.bf16 %v5232_v54, %v5232_v54  ;;  %v5234_v46 = vmul.f32 %v8932_v17, %v5218_v20 }
0x3996   :  { %v6782_v10 = vunpack.i.l.s16 %v5270_v2  ;;  %v6780_v24 = vunpack.i.l.s16 %v5245_v55  ;;  %v6790_v23 = vunpack.i.l.s16 %v5370_v21  ;;  %v6784_v5 = vunpack.i.l.s16 %v5295_v4 }
0x3997   :  { %v6794_v48 = vunpack.i.l.s16 %v5420_v38  ;;  %v6786_v36 = vunpack.i.l.s16 %v5320_v0  ;;  %v5345_v62 = vunpack.c.l.b16 %v5240_v57  ;;  %v5242_v2 = vpack.c.bf16 %v5234_v46, %v5234_v46 }
0x3998   :  { %5274 = vperm.xlu2 %7174, %v6782_v10   ;;  %5249 = vperm.xlu1 %7173, %v6780_v24  }
0x3999   :  { %v6788_v39 = vunpack.i.l.s16 %v5345_v62  ;;  %v5395_v45 = vunpack.c.l.b16 %v5242_v2  ;;  %v4959_v2 = vld [vmem:[#allocation2] sm:$0xff] }
0x399b   :  { %v6792_v55 = vunpack.i.l.s16 %v5395_v45 }
0x39a0   :  { %5374 = vperm.xlu2 %7174, %v6790_v23   ;;  %5299 = vperm.xlu1 %7173, %v6784_v5  }
0x39a8   :  { %5424 = vperm.xlu2 %7174, %v6794_v48   ;;  %5324 = vperm.xlu1 %7173, %v6786_v36  }
0x39b0   :  { %5349 = vperm.xlu1 %7173, %v6788_v39  }
0x39b8   :  { %5399 = vperm.xlu1 %7173, %v6792_v55   ;;  %v4960_v55 = vpack.c.bf16 %v4959_v2, %v4959_v2 }
0x39f2   :  { %v5275_v63 = vpop.permute.xlu2 %5274 }
0x39f3   :  { %v5276_v15 = vperm.slane %v5275_v63, %v7811_v26 }
0x39f5   :  { %v5277_v10 = vpack.c.b16 %v5276_v15, %v5276_v15 }
0x39f7   :  { %6783 = vmatmul.msk.bf16.vlgmr.msra.gmra.mxu3 %vm576_vm9, %v5277_v10 }
0x39f8   :  { %5413 = vmatpush.bf16.msra.mxu3 %v7897_v35 }
0x39fa   :  { %v5375_v5 = vpop.permute.xlu2 %5374 }
0x39fb   :  { %v5376_v43 = vperm.slane %v5375_v5, %v7811_v26 }
0x39fd   :  { %v5377_v54 = vpack.c.b16 %v5376_v43, %v5376_v43 }
0x3a02   :  { %v5425_v36 = vpop.permute.xlu2 %5424 }
0x3a03   :  { %v5426_v57 = vperm.slane %v5425_v36, %v7811_v26 }
0x3a05   :  { %v5427_v20 = vpack.c.b16 %v5426_v57, %v5426_v57 }
0x3a0a   :  { %v5250_v58 = vpop.permute.xlu1 %5249 }
0x3a0b   :  { %v5251_v30 = vperm.slane %v5250_v58, %v7811_v26 }
0x3a0d   :  { %v5252_v24 = vpack.c.b16 %v5251_v30, %v5251_v30 }
0x3a0f   :  { %6781 = vmatmul.msk.bf16.vlgmr.msra.gmra.mxu2 %vm576_vm9, %v5252_v24 }
0x3a10   :  { %5388 = vmatpush.bf16.msra.mxu2 %v7894_v18 }
0x3a12   :  { %v5300_v17 = vpop.permute.xlu1 %5299 }
0x3a13   :  { %v5301_v44 = vperm.slane %v5300_v17, %v7811_v26 }
0x3a15   :  { %v5302_v4 = vpack.c.b16 %v5301_v44, %v5301_v44 }
0x3a1a   :  { %v5325_v14 = vpop.permute.xlu1 %5324 }
0x3a1b   :  { %v5326_v21 = vperm.slane %v5325_v14, %v7811_v26 }
0x3a1d   :  { %v5327_v16 = vpack.c.b16 %v5326_v21, %v5326_v21 }
0x3a1f   :  { %6785 = vmatmul.msk.bf16.vlgmr.msrb.gmra.mxu2 %vm576_vm9, %v5302_v4  ;;  %6787 = vmatmul.msk.bf16.vlgmr.msrb.gmra.mxu3 %vm576_vm9, %v5327_v16 }
0x3a20   :  { %5498 = vmatpush.bf16.msrb.mxu2 %v7931_v32  ;;  %5516 = vmatpush.bf16.msrb.mxu3 %v7925_v34 }
0x3a22   :  { %v5350_v25 = vpop.permute.xlu1 %5349 }
0x3a23   :  { %v5351_v23 = vperm.slane %v5350_v25, %v7811_v26 }
0x3a24   :  { %5499 = vmatpush.bf16.msrb.mxu2 %v7945_v6  ;;  %5517 = vmatpush.bf16.msrb.mxu3 %v7928_v27 }
0x3a25   :  { %v5352_v50 = vpack.c.b16 %v5351_v23, %v5351_v23 }
0x3a27   :  { %6789 = vmatmul.msk.bf16.vlgmr.msrb.gmra.mxu0 %vm576_vm9, %v5352_v50 }
0x3a28   :  { %5530 = vmatpush.bf16.msrb.mxu0 %v7901_v37  ;;  %5500 = vmatpush.bf16.msrb.mxu2 %v7956_v11 }
0x3a2a   :  { %v5400_v38 = vpop.permute.xlu1 %5399 }
0x3a2b   :  { %v5401_v0 = vperm.slane %v5400_v38, %v7811_v26 }
0x3a2c   :  { %5531 = vmatpush.bf16.msrb.mxu0 %v7913_v42  ;;  %5501 = vmatpush.bf16.msrb.mxu2 %v7965_v28 }
0x3a2d   :  { %v5402_v48 = vpack.c.b16 %v5401_v0, %v5401_v0 }
0x3a2f   :  { %6791 = vmatmul.msk.bf16.vlgmr.msra.gmra.mxu2 %vm576_vm9, %v5377_v54  ;;  %6793 = vmatmul.msk.bf16.vlgmr.msra.gmra.mxu3 %vm576_vm9, %v5402_v48 }
0x3a30   :  { %5581 = vmatpush.bf16.msra.mxu2 %v7936_v33  ;;  %5602 = vmatpush.bf16.msra.mxu3 %v7996_v51 }
0x3a34   :  { %5582 = vmatpush.bf16.msra.mxu2 %v7950_v8  ;;  %5603 = vmatpush.bf16.msra.mxu3 %v8002_v56 }
0x3a37   :  { %6795 = vmatmul.msk.bf16.vlgmr.msra.gmra.mxu0 %vm576_vm9, %v5427_v20 }
0x3a38   :  { %5583 = vmatpush.bf16.msra.mxu2 %v7961_v22  ;;  %5615 = vmatpush.bf16.msra.mxu0 %v7994_v49 }
0x3a3c   :  { %5584 = vmatpush.bf16.msra.mxu2 %v7970_v29  ;;  %5616 = vmatpush.bf16.msra.mxu0 %v7999_v53 }
0x3a3f   :  { %6797 = vmatmul.msk.bf16.vlgmr.msrb.gmra.mxu3 %vm399_vm0, %v4960_v55 }
0x3a47   :  { %6798 = vmatmul.msk.bf16.vlgmr.msrb.gmra.mxu0 %vm399_vm0, %v8848_v47 }
0x3a57   :  { %6802 = vmatmul.msk.bf16.vlgmr.msra.gmra.mxu0 %vm399_vm0, %v4960_v55 }
0x3a7a   :  { %v5290_v62 = vpop.f32.mrf.mxu3 }
0x3a7b   :  { %v5453_v30 = vpack.c.bf16 %v5290_v62, %v5290_v62 }
0x3a7d   :  { %v5469_v21 = vunpack.c.l.b16 %v5453_v30 }
0x3a7f   :  { %v5476_v50 = vrot.slane %v5469_v21, 7 }
0x3a82   :  { %v5292_v46 = vpop.f32.mrf.mxu3 }
0x3a92   :  { %v5265_v39 = vpop.f32.mrf.mxu2 }
0x3a93   :  { %v5452_v24 = vpack.c.bf16 %v5265_v39, %v5265_v39 }
0x3a95   :  { %v5468_v25 = vunpack.c.l.b16 %v5452_v24 }
0x3a97   :  { %v5477_v38 = vsel %vm561_vm2, %v5476_v50, %v5468_v25 }
0x3a9a   :  { %v5267_v45 = vpop.f32.mrf.mxu2 }
0x3aa2   :  { %v5315_v63 = vpop.f32.mrf.mxu2  ;;  %v5340_v15 = vpop.f32.mrf.mxu3 }
0x3aa3   :  { %v5454_v58 = vpack.c.bf16 %v5315_v63, %v5315_v63  ;;  %v5455_v17 = vpack.c.bf16 %v5340_v15, %v5340_v15 }
0x3aa4   :  { %v5365_v10 = vpop.f32.mrf.mxu0 }
0x3aa5   :  { %v5470_v44 = vunpack.c.l.b16 %v5454_v58  ;;  %v5456_v4 = vpack.c.bf16 %v5365_v10, %v5365_v10  ;;  %v5471_v23 = vunpack.c.l.b16 %v5455_v17 }
0x3aa7   :  { %v5478_v5 = vrot.slane %v5470_v44, 6  ;;  %v5472_v43 = vunpack.c.l.b16 %v5456_v4  ;;  %v5480_v0 = vrot.slane %v5471_v23, 5 }
0x3aa9   :  { %v5479_v54 = vsel %vm563_vm3, %v5478_v5, %v5477_v38  ;;  %v5482_v62 = vrot.slane %v5472_v43, 4 }
0x3aaa   :  { %v5317_v14 = vpop.f32.mrf.mxu2  ;;  %v5342_v47 = vpop.f32.mrf.mxu3  ;;  %v5481_v39 = vsel %vm565_vm4, %v5480_v0, %v5479_v54 }
0x3aab   :  { %v5483_v58 = vsel %vm567_vm5, %v5482_v62, %v5481_v39 }
0x3aac   :  { %v5367_v16 = vpop.f32.mrf.mxu0 }
0x3ab2   :  { %v5390_v48 = vpop.f32.mrf.mxu2  ;;  %v5415_v36 = vpop.f32.mrf.mxu3 }
0x3ab3   :  { %v5457_v57 = vpack.c.bf16 %v5390_v48, %v5390_v48  ;;  %v5458_v20 = vpack.c.bf16 %v5415_v36, %v5415_v36 }
0x3ab4   :  { %v5440_v46 = vpop.f32.mrf.mxu0 }
0x3ab5   :  { %v5473_v2 = vunpack.c.l.b16 %v5457_v57  ;;  %v5474_v45 = vunpack.c.l.b16 %v5458_v20  ;;  %v5459_v55 = vpack.c.bf16 %v5440_v46, %v5440_v46 }
0x3ab7   :  { %v5484_v63 = vrot.slane %v5473_v2, 3  ;;  %v5486_v15 = vrot.slane %v5474_v45, 2  ;;  %v5475_v10 = vunpack.c.l.b16 %v5459_v55 }
0x3ab9   :  { %v5485_v30 = vsel %vm569_vm6, %v5484_v63, %v5483_v58  ;;  %v5488_v24 = vrot.slane %v5475_v10, 1 }
0x3aba   :  { %v5487_v17 = vsel %vm571_vm7, %v5486_v15, %v5485_v30  ;;  %v5392_v44 = vpop.f32.mrf.mxu2  ;;  %v5417_v14 = vpop.f32.mrf.mxu3 }
0x3abb   :  { %v5489_v47 = vsel %vm573_vm8, %v5488_v24, %v5487_v17 }
0x3abc   :  { %v5490_v21 = vpack.c.b16 %v5489_v47, %v5489_v47  ;;  %v5442_v4 = vpop.f32.mrf.mxu0 }
0x3abe   :  { %6796 = vmatmul.msk.bf16.vlgmr.msrb.gmra.mxu2 %vm327_vm1, %v5490_v21 }
0x3ac2   :  { %v5519_v5 = vpop.f32.mrf.mxu3 }
0x3ac4   :  { %v5533_v16 = vpop.f32.mrf.mxu0 }
0x3ac5   :  { %v5534_v25 = vadd.f32 %v7972_v31, %v5533_v16 }
0x3ac7   :  { %5558 = vrot.lane.b32.xlu1 %v5534_v25, %s7552_s5 }
0x3aca   :  { %v5521_v50 = vpop.f32.mrf.mxu3 }
0x3acc   :  { %v5535_v23 = vpop.f32.mrf.mxu0 }
0x3ace   :  { %6800 = vmatmul.msk.bf16.vlgmr.msra.gmra.mxu2 %vm327_vm1, %v5490_v21 }
0x3b39   :  { %v5559_v58 = vpop.permute.xlu1 %5558 }
0x3b41   :  { %v5503_v43 = vpop.f32.mrf.mxu2 }
0x3b42   :  { %v5520_v38 = vadd.f32 %v5519_v5, %v5503_v43  ;;  %v5618_v43 = vpop.f32.mrf.mxu0 }
0x3b44   :  { %v5523_v0 = vadd.f32 %v7989_v52, %v5520_v38 }
0x3b46   :  { %v5537_v54 = vadd.f32 %v5534_v25, %v5523_v0 }
0x3b48   :  { %v6799_v48 = vmul.f32 -1.442695, %v5537_v54 }
0x3b49   :  { %v5505_v36 = vpop.f32.mrf.mxu2 }
0x3b4a   :  { %7209 = vpow2.f32 %v6799_v48  ;;  %v5620_v38 = vpop.f32.mrf.mxu0 }
0x3b50   :  { %v7210_v57 = vpop.eup %7209 }
0x3b51   :  { %v5541_v20 = vadd.f32 1.0, %v7210_v57  ;;  %v5586_v62 = vpop.f32.mrf.mxu2 }
0x3b53   :  { %7211 = vrcp.f32 %v5541_v20  ;;  %v5553_v55 = vand.u32 2147483648, %v5541_v20  ;;  %v5551_v15 = vand.u32 2147483647, %v5541_v20  ;;  %vm5547_vm12 = vweird.f32 %v5541_v20 }
0x3b55   :  { %v5554_v30 = vor.u32 1.1754944e-38, %v5553_v55  ;;  %vm5552_vm14 = vcmp.eq.f32.partialorder %v5551_v15, 8.507059e+37 }
0x3b59   :  { %v7212_v46 = vpop.eup %7211  ;;  %v5588_v39 = vpop.f32.mrf.mxu2 }
0x3b5a   :  { %v5543_v2 = vmul.f32 %v7212_v46, %v5541_v20  ;;  %vm5548_vm11 = vweird.f32 %v7212_v46 }
0x3b5b   :  { %vm5549_vm13 = vmor %vm5547_vm12, %vm5548_vm11 }
0x3b5c   :  { %v5544_v45 = vsub.f32 1.0, %v5543_v2 }
0x3b5e   :  { %v5545_v63 = vmul.f32 %v7212_v46, %v5544_v45 }
0x3b60   :  { %v5546_v10 = vadd.f32 %v7212_v46, %v5545_v63 }
0x3b62   :  { %v5550_v24 = vsel %vm5549_vm13, %v7212_v46, %v5546_v10 }
0x3b63   :  { %v5555_v17 = vsel %vm5552_vm14, %v5554_v30, %v5550_v24 }
0x3b64   :  { %v5561_v44 = vmul.f32 %v5559_v58, %v5555_v17  ;;  %v5568_v4 = vsub.f32 1.0, %v5555_v17  ;;  %v5574_v23 = vmul.f32 %v5555_v17, %v8843_v19 }
0x3b66   :  { %5563 = vrot.lane.b32.xlu2 %v5561_v44, %s7552_s5 }
0x3bc0   :  { %v5564_v14 = vpop.permute.xlu2 %5563 }
0x3bc1   :  { %v5566_v47 = vadd.f32 %v5564_v14, %v5523_v0 }
0x3bc3   :  { %7213 = vtanh.f32 %v5566_v47 }
0x3bc9   :  { %v7214_v21 = vpop.eup %7213 }
0x3bca   :  { %5570 = vrot.lane.b32.xlu0 %v7214_v21, %s7565_s8 }
0x3c3c   :  { %v5571_v16 = vpop.permute.xlu0 %5570 }
0x3c3d   :  { %v5573_v25 = vmul.f32 %v5571_v16, %v5568_v4 }
0x3c3f   :  { %v9009_v5 = vadd.f32 %v5574_v23, %v5573_v25 }
0x3c41   :  { %v5576_v50 = vpack.c.bf16 %v9009_v5, %v9009_v5 }
0x3c43   :  { %5591 = vrot.lane.b32.xlu1 %v5576_v50, %s7565_s8 }
0x3cb5   :  { %v9014_v54 = vpop.permute.xlu1 %5591 }
0x3cb6   :  { %6801 = vmatmul.msk.bf16.vlgmr.msra.gmra.mxu3 %vm399_vm0, %v9014_v54 }
0x3d39   :  { %v5605_v0 = vpop.f32.mrf.mxu3 }
0x3d3a   :  { %v5606_v48 = vadd.f32 %v5605_v0, %v5586_v62 }
0x3d3c   :  { %v5622_v36 = vadd.f32 %v5618_v43, %v5606_v48 }
0x3d3d   :  { %5628 = sbr.rel (%p6804_p12) target bundleno = 15684 (0x3d44), region = 169 }
0x3d3e   :  { %v9019_v19 = vadd.f32 %v8020_v40, %v5622_v36 }
0x3d41   :  { %v5607_v57 = vpop.f32.mrf.mxu3 }
0x3d42   :  { %v6805_v20 = vld [vmem:[%s9323_s30 + $0x38] sm:$0xff] }
0x3d43   :  { %5631 = vst.msk [vmem:[#allocation2] sm:$0xff] %vm399_vm0, %v6805_v20 }
0x3d44 PF:  { %p6806_p13 = scmp.ne.s32.totalorder %s6803_s16, 0 }
0x3d45   :  { %s9324_s0 = sld [smem:[#allocation47_spill]] (!%p6806_p13) }
0x3d46   :  { %5635 = sbr.rel (%p6806_p13) target bundleno = 16191 (0x3f3f), region = 173 }
0x3d4b   :  { %v5636_v46 = vsel %vm399_vm0, %v9019_v19, -inf  ;;  %v6885_v30 = vld [vmem:[%s9324_s0 + $0x8] sm:$0xff]  ;;  %v6884_v24 = vld [vmem:[%s9324_s0] sm:$0xff]  ;;  %v7572_v4 = vmov 0.0  }
0x3d4c   :  { %5637 = vmax.xlane.f32.xlu0 %v5636_v46  ;;  %5684 = vmatpush.bf16.msra.mxu0 %v6885_v30 }
0x3d50   :  { %5685 = vmatpush.bf16.msra.mxu0 %v6884_v24 }
0x3dbf   :  { %v5638_v62 = vpop.xlane.xlu0 %5637 }
0x3dc0   :  { %vm5639_vm15 = vcmp.eq.f32.partialorder %v9019_v19, %v5638_v62 }
0x3dc1   :  { %v5640_v39 = vsel %vm5639_vm15, %v7811_v26, 32 }
0x3dc2   :  { %v5641_v2 = vsel %vm399_vm0, %v5640_v39, 2147483647 }
0x3dc3   :  { %v5643_v45 = vshra.s32 %v5641_v2, 16  ;;  %v5642_v63 = vand.u32 65535, %v5641_v2 }
0x3dc5   :  { %v5645_v55 = vcvt.s32.f32 %v5643_v45  ;;  %v5644_v10 = vcvt.s32.f32 %v5642_v63 }
0x3dc7   :  { %5646 = vmin.xlane.f32.xlu0 %v5645_v55 }
0x3e3a   :  { %v5647_v15 = vpop.xlane.xlu0 %5646 }
0x3e3b   :  { %vm5648_vm10 = vcmp.eq.f32.partialorder %v5645_v55, %v5647_v15  ;;  %v5653_v17 = vcvt.f32.s32 %v5647_v15 }
0x3e3c   :  { %v5649_v58 = vsel %vm5648_vm10, %v5644_v10, inf }
0x3e3d   :  { %5650 = vmin.xlane.f32.xlu1 %v5649_v58  ;;  %v5654_v14 = vshll.u32 %v5653_v17, 16 }
0x3eb0   :  { %v5651_v44 = vpop.xlane.xlu1 %5650 }
0x3eb1   :  { %v5652_v47 = vcvt.f32.s32 %v5651_v44 }
0x3eb3   :  { %v5655_v21 = vadd.s32 %v5654_v14, %v5652_v47 }
0x3eb5   :  { %vm5656_vm11 = vcmp.eq.s32.totalorder %v7811_v26, %v5655_v21 }
0x3eb6   :  { %v5657_v16 = vsel %vm5656_vm11, 1.0, %v7572_v4 }
0x3eb7   :  { %v5658_v25 = vpack.c.bf16 %v5657_v16, %v5657_v16 }
0x3eb9   :  { %6815 = vmatmul.msk.bf16.vlgmr.msra.gmra.mxu0 %vm399_vm0, %v5658_v25 }
0x3f36   :  { %v5687_v23 = vpop.f32.mrf.mxu0 }
0x3f37   :  { %v5691_v50 = vmul.f32 5.656854, %v5687_v23 }
0x3f39   :  { %5692 = vst.msk [vmem:[#allocation2] sm:$0xff] %vm399_vm0, %v5691_v50 }
0x3f3e   :  { %v5689_v43 = vpop.f32.mrf.mxu0 }
0x3f3f PF:  { %5701 = vmatpush.bf16.msra.mxu0 %v7726_v1  ;;  %5770 = vmatpush.bf16.msra.mxu1 %v7759_v12  ;;  %v9325_v38 = vmov 0   ;;  %v9329_v2 = vld [vmem:[#allocation34_spill] sm:$0xff]  ;;  %v9330_v17 = vld [vmem:[#allocation35_spill] sm:$0xff]  ;;  %v9331_v14 = vld [vmem:[#allocation36_spill] sm:$0xff]  ;;  %s6398_s1 = sshll.u32 %s9218_s18, 4  ;;  %s6399_s1 = int_to_ptr.hbm [resolvable:$true] %s6398_s1 }
0x3f40   :  { %7215 = vset.pattern.permute.xlu0 %v9325_v38  ;;  %7216 = vset.pattern.permute.xlu1 %v9325_v38 }
0x3f41   :  { %7217 = vset.pattern.permute.xlu2 %v9325_v38  ;;  %6022 = vmatpush.bf16.msra.mxu3 %v7874_v60  ;;  %v9332_v38 = vld [vmem:[#allocation37_spill] sm:$0xff] }
0x3f42   :  { %5997 = vmatpush.bf16.msra.mxu2 %v7870_v59  ;;  %v9326_v59 = vld [vmem:[#allocation31_spill] sm:$0xff] }
0x3f43   :  { %5702 = vmatpush.bf16.msra.mxu0 %v7732_v3  ;;  %5771 = vmatpush.bf16.msra.mxu1 %v7765_v13 }
0x3f45   :  { %6072 = vmatpush.bf16.msrb.mxu3 %v7883_v7  ;;  %v9327_v7 = vld [vmem:[#allocation32_spill] sm:$0xff] }
0x3f46   :  { %6047 = vmatpush.bf16.msrb.mxu2 %v7878_v61  ;;  %6816 = vmatmul.msk.bf16.vlgmr.msra.gmra.mxu0 %vm399_vm0, %v9014_v54 }
0x3f47   :  { %6097 = vmatpush.bf16.msrb.mxu0 %v7886_v9 }
0x3f4b   :  { %6172 = vmatpush.bf16.msra.mxu0 %v7909_v41  ;;  %v9328_v41 = vld [vmem:[#allocation33_spill] sm:$0xff] }
0x3fc3   :  { %v5704_v1 = vpop.f32.mrf.mxu0 }
0x3fc4   :  { %v5709_v12 = vrot.slane %v5704_v1, 1  ;;  %v5716_v60 = vperm.slane %v5704_v1, 0  ;;  %v5710_v13 = vrot.slane %v5704_v1, 2  ;;  %v5711_v61 = vrot.slane %v5704_v1, 3 }
0x3fc5   :  { %v5712_v55 = vrot.slane %v5704_v1, 4  ;;  %v5713_v63 = vrot.slane %v5704_v1, 5  ;;  %v5714_v21 = vrot.slane %v5704_v1, 6  ;;  %v5715_v4 = vrot.slane %v5704_v1, 7 }
0x3fc6   :  { %v5717_v0 = vperm.slane %v5709_v12, 0  ;;  %v5732_v48 = vadd.f32 %v5716_v60, %v9326_v59  ;;  %v5718_v9 = vperm.slane %v5710_v13, 0  ;;  %v5719_v46 = vperm.slane %v5711_v61, 0  ;;  %v9333_v60 = vld [vmem:[#allocation38_spill] sm:$0xff] }
0x3fc7   :  { %v5720_v58 = vperm.slane %v5712_v55, 0  ;;  %v5721_v30 = vperm.slane %v5713_v63, 0  ;;  %v5722_v23 = vperm.slane %v5714_v21, 0  ;;  %v5723_v50 = vperm.slane %v5715_v4, 0 }
0x3fc8   :  { %v5733_v36 = vadd.f32 %v5717_v0, %v9327_v7  ;;  %7218 = vtanh.f32 %v5732_v48  ;;  %v5734_v39 = vadd.f32 %v5718_v9, %v9328_v41  ;;  %v5735_v45 = vadd.f32 %v5719_v46, %v9329_v2 }
0x3fc9   :  { %v5736_v44 = vadd.f32 %v5720_v58, %v9330_v17  ;;  %v5737_v47 = vadd.f32 %v5721_v30, %v9331_v14  ;;  %v5738_v12 = vadd.f32 %v5722_v23, %v9332_v38  ;;  %v5739_v0 = vadd.f32 %v5723_v50, %v9333_v60 }
0x3fca   :  { %7220 = vtanh.f32 %v5733_v36 }
0x3fcb   :  { %v5706_v3 = vpop.f32.mrf.mxu0  ;;  %7222 = vtanh.f32 %v5734_v39 }
0x3fcc   :  { %7224 = vtanh.f32 %v5735_v45 }
0x3fcd   :  { %7226 = vtanh.f32 %v5736_v44 }
0x3fce   :  { %v7219_v57 = vpop.eup %7218  ;;  %7228 = vtanh.f32 %v5737_v47 }
0x3fcf   :  { %7230 = vtanh.f32 %v5738_v12 }
0x3fd0   :  { %v7221_v20 = vpop.eup %7220  ;;  %7232 = vtanh.f32 %v5739_v0 }
0x3fd1   :  { %v5748_v62 = vpack.c.bf16 %v7221_v20, %v7219_v57  ;;  %v7223_v15 = vpop.eup %7222 }
0x3fd2   :  { %v7225_v10 = vpop.eup %7224 }
0x3fd3   :  { %6817 = vmatmul.msk.bf16.vlgmr.msra.gmra.mxu1 %vm399_vm0, %v5748_v62  ;;  %v5749_v24 = vpack.c.bf16 %v7225_v10, %v7223_v15  ;;  %v7227_v16 = vpop.eup %7226 }
0x3fd4   :  { %v7229_v25 = vpop.eup %7228 }
0x3fd5   :  { %v5750_v43 = vpack.c.bf16 %v7229_v25, %v7227_v16  ;;  %v7231_v59 = vpop.eup %7230 }
0x3fd6   :  { %v7233_v48 = vpop.eup %7232 }
0x3fd7   :  { %v5751_v7 = vpack.c.bf16 %v7233_v48, %v7231_v59 }
0x3fe3   :  { %6818 = vmatmul.msk.bf16.gmra.mxu1 %vm399_vm0, %v5749_v24 }
0x3ff3   :  { %6819 = vmatmul.msk.bf16.gmra.mxu1 %vm399_vm0, %v5750_v43 }
0x4003   :  { %6820 = vmatmul.msk.bf16.gmra.mxu1 %vm399_vm0, %v5751_v7 }
0x4050   :  { %v5773_v36 = vpop.f32.mrf.mxu1 }
0x4051   :  { %5810 = vperm.xlu0 %7215, %v5773_v36  }
0x4058   :  { %v5775_v1 = vpop.f32.mrf.mxu1 }
0x4059   :  { %5813 = vperm.xlu0 %7215, %v5775_v1  }
0x4060   :  { %v5778_v3 = vpop.f32.mrf.mxu1 }
0x4061   :  { %5816 = vperm.xlu1 %7216, %v5778_v3  }
0x4068   :  { %v5780_v13 = vpop.f32.mrf.mxu1 }
0x4069   :  { %5819 = vperm.xlu1 %7216, %v5780_v13  }
0x4070   :  { %v5783_v61 = vpop.f32.mrf.mxu1 }
0x4071   :  { %5822 = vperm.xlu2 %7217, %v5783_v61  }
0x4078   :  { %v5785_v57 = vpop.f32.mrf.mxu1 }
0x4079   :  { %5825 = vperm.xlu2 %7217, %v5785_v57  }
0x4080   :  { %v9066_v9 = vpop.f32.mrf.mxu1 }
0x4081   :  { %5828 = vperm.xlu0 %7215, %v9066_v9  }
0x4088   :  { %v5790_v20 = vpop.f32.mrf.mxu1 }
0x4089   :  { %5831 = vperm.xlu1 %7216, %v5790_v20  }
0x40c3   :  { %v5811_v46 = vpop.permute.xlu0 %5810 }
0x40c4   :  { %v5833_v63 = vperm.slane %v5811_v46, %v7811_v26 }
0x40cb   :  { %v5814_v41 = vpop.permute.xlu0 %5813  ;;  %v5823_v39 = vpop.permute.xlu2 %5822 }
0x40cc   :  { %v5834_v45 = vperm.slane %v5814_v41, %v7811_v26  ;;  %v5837_v17 = vperm.slane %v5823_v39, %v7811_v26 }
0x40ce   :  { %v5841_v10 = vsel %vm561_vm2, %v5834_v45, %v5833_v63 }
0x40d3   :  { %v5817_v62 = vpop.permute.xlu1 %5816  ;;  %v5826_v44 = vpop.permute.xlu2 %5825 }
0x40d4   :  { %v5835_v55 = vperm.slane %v5817_v62, %v7811_v26  ;;  %v5838_v21 = vperm.slane %v5826_v44, %v7811_v26 }
0x40d6   :  { %v5842_v58 = vsel %vm563_vm3, %v5835_v55, %v5841_v10 }
0x40db   :  { %v5820_v2 = vpop.permute.xlu1 %5819 }
0x40dc   :  { %v5836_v15 = vperm.slane %v5820_v2, %v7811_v26 }
0x40de   :  { %v5843_v30 = vsel %vm565_vm4, %v5836_v15, %v5842_v58 }
0x40df   :  { %v5844_v14 = vsel %vm567_vm5, %v5837_v17, %v5843_v30 }
0x40e0   :  { %v5845_v25 = vsel %vm569_vm6, %v5838_v21, %v5844_v14 }
0x40f3   :  { %v5829_v24 = vpop.permute.xlu0 %5828 }
0x40f4   :  { %v5839_v47 = vperm.slane %v5829_v24, %v7811_v26 }
0x40f6   :  { %v5846_v23 = vsel %vm571_vm7, %v5839_v47, %v5845_v25 }
0x40fb   :  { %v5832_v4 = vpop.permute.xlu1 %5831 }
0x40fc   :  { %v5840_v16 = vperm.slane %v5832_v4, %v7811_v26 }
0x40fe   :  { %v5847_v50 = vsel %vm573_vm8, %v5840_v16, %v5846_v23 }
0x40ff   :  { %v5849_v43 = vsel %vm576_vm9, %v5847_v50, -inf }
0x4100   :  { %5850 = vmax.xlane.f32.xlu2 %v5849_v43 }
0x4173   :  { %v5851_v38 = vpop.xlane.xlu2 %5850 }
0x4174   :  { %v5854_v12 = vperm.slane %v5851_v38, 1  ;;  %v5853_v60 = vperm.slane %v5851_v38, 0  ;;  %v5856_v48 = vperm.slane %v5851_v38, 3  ;;  %v5855_v7 = vperm.slane %v5851_v38, 2 }
0x4175   :  { %v5858_v45 = vperm.slane %v5851_v38, 5  ;;  %v5857_v63 = vperm.slane %v5851_v38, 4 }
0x4176   :  { %v5870_v0 = vsub.f32 %v5775_v1, %v5854_v12  ;;  %v5869_v59 = vsub.f32 %v5773_v36, %v5853_v60  ;;  %v5872_v41 = vsub.f32 %v5780_v13, %v5856_v48  ;;  %v5871_v39 = vsub.f32 %v5778_v3, %v5855_v7 }
0x4177   :  { %v5874_v36 = vsub.f32 %v5785_v57, %v5858_v45  ;;  %v5873_v1 = vsub.f32 %v5783_v61, %v5857_v63  ;;  %v5860_v13 = vperm.slane %v5851_v38, 7  ;;  %v5859_v3 = vperm.slane %v5851_v38, 6 }
0x4178   :  { %v5879_v46 = vmul.f32 1.442695, %v5870_v0  ;;  %v5877_v62 = vmul.f32 1.442695, %v5869_v59  ;;  %v5883_v2 = vmul.f32 1.442695, %v5872_v41 }
0x4179   :  { %v5881_v55 = vmul.f32 1.442695, %v5871_v39  ;;  %v5887_v58 = vmul.f32 1.442695, %v5874_v36  ;;  %v5885_v30 = vmul.f32 1.442695, %v5873_v1  ;;  %v5876_v44 = vsub.f32 %v5790_v20, %v5860_v13 }
0x417a   :  { %7234 = vpow2.f32 %v5879_v46  ;;  %v5875_v14 = vsub.f32 %v9066_v9, %v5859_v3 }
0x417b   :  { %7236 = vpow2.f32 %v5877_v62  ;;  %v5891_v47 = vmul.f32 1.442695, %v5876_v44 }
0x417c   :  { %7238 = vpow2.f32 %v5883_v2  ;;  %v5889_v21 = vmul.f32 1.442695, %v5875_v14 }
0x417d   :  { %7240 = vpow2.f32 %v5881_v55 }
0x417e   :  { %7242 = vpow2.f32 %v5887_v58 }
0x417f   :  { %7244 = vpow2.f32 %v5885_v30 }
0x4180   :  { %v9085_v15 = vpop.eup %7234  ;;  %7246 = vpow2.f32 %v5891_v47 }
0x4181   :  { %v9087_v10 = vpop.eup %7236  ;;  %5905 = vperm.xlu1 %7216, %v9085_v15   ;;  %7248 = vpow2.f32 %v5889_v21 }
0x4182   :  { %5902 = vperm.xlu0 %7215, %v9087_v10   ;;  %v9091_v24 = vpop.eup %7238 }
0x4183   :  { %v7241_v17 = vpop.eup %7240 }
0x4184   :  { %v7243_v57 = vpop.eup %7242 }
0x4185   :  { %v9095_v4 = vpop.eup %7244 }
0x4186   :  { %v7247_v61 = vpop.eup %7246 }
0x4187   :  { %v9098_v16 = vpop.eup %7248 }
0x4189   :  { %5911 = vperm.xlu1 %7216, %v9091_v24  }
0x418a   :  { %5908 = vperm.xlu0 %7215, %v7241_v17  }
0x4191   :  { %5917 = vperm.xlu1 %7216, %v7243_v57  }
0x4192   :  { %5914 = vperm.xlu0 %7215, %v9095_v4  }
0x4199   :  { %5923 = vperm.xlu1 %7216, %v7247_v61  }
0x419a   :  { %5920 = vperm.xlu0 %7215, %v9098_v16  }
0x41f3   :  { %v5906_v20 = vpop.permute.xlu1 %5905 }
0x41f4   :  { %v5903_v25 = vpop.permute.xlu0 %5902  ;;  %v5926_v50 = vperm.slane %v5906_v20, %v7811_v26 }
0x41f5   :  { %v5925_v43 = vperm.slane %v5903_v25, %v7811_v26 }
0x41f7   :  { %v5933_v0 = vsel %vm561_vm2, %v5926_v50, %v5925_v43 }
0x41fb   :  { %v5912_v23 = vpop.permute.xlu1 %5911 }
0x41fc   :  { %v5909_v9 = vpop.permute.xlu0 %5908  ;;  %v5928_v59 = vperm.slane %v5912_v23, %v7811_v26 }
0x41fd   :  { %v5927_v38 = vperm.slane %v5909_v9, %v7811_v26 }
0x41ff   :  { %v5934_v48 = vsel %vm563_vm3, %v5927_v38, %v5933_v0 }
0x4200   :  { %v5935_v62 = vsel %vm565_vm4, %v5928_v59, %v5934_v48 }
0x4203   :  { %v5918_v12 = vpop.permute.xlu1 %5917 }
0x4204   :  { %v5915_v60 = vpop.permute.xlu0 %5914  ;;  %v5930_v46 = vperm.slane %v5918_v12, %v7811_v26 }
0x4205   :  { %v5929_v7 = vperm.slane %v5915_v60, %v7811_v26 }
0x4207   :  { %v5936_v41 = vsel %vm567_vm5, %v5929_v7, %v5935_v62 }
0x4208   :  { %v5937_v63 = vsel %vm569_vm6, %v5930_v46, %v5936_v41 }
0x420b   :  { %v5924_v39 = vpop.permute.xlu1 %5923 }
0x420c   :  { %v5932_v2 = vperm.slane %v5924_v39, %v7811_v26  ;;  %v5921_v45 = vpop.permute.xlu0 %5920 }
0x420d   :  { %v5931_v55 = vperm.slane %v5921_v45, %v7811_v26 }
0x420f   :  { %v5938_v36 = vsel %vm571_vm7, %v5931_v55, %v5937_v63 }
0x4210   :  { %v5939_v1 = vsel %vm573_vm8, %v5932_v2, %v5938_v36 }
0x4211   :  { %v5941_v58 = vsel %vm576_vm9, %v5939_v1, 0.0 }
0x4212   :  { %5942 = vadd.xlane.f32.xlu0 %v5941_v58 }
0x4285   :  { %v5943_v13 = vpop.xlane.xlu0 %5942 }
0x4286   :  { %7250 = vrcp.f32 %v5943_v13 }
0x428c   :  { %v7251_v30 = vpop.eup %7250 }
0x428d   :  { %v5947_v3 = vperm.slane %v7251_v30, 1  ;;  %v5946_v44 = vperm.slane %v7251_v30, 0  ;;  %v5951_v14 = vperm.slane %v7251_v30, 5  ;;  %v5948_v47 = vperm.slane %v7251_v30, 2 }
0x428e   :  { %v5953_v12 = vperm.slane %v7251_v30, 7  ;;  %v5949_v60 = vperm.slane %v7251_v30, 3  ;;  %v5952_v13 = vperm.slane %v7251_v30, 6 }
0x428f   :  { %v5963_v21 = vmul.f32 %v9085_v15, %v5947_v3  ;;  %v5962_v20 = vmul.f32 %v9087_v10, %v5946_v44  ;;  %v5967_v9 = vmul.f32 %v7243_v57, %v5951_v14  ;;  %v5964_v50 = vmul.f32 %v7241_v17, %v5948_v47 }
0x4290   :  { %v5969_v41 = vmul.f32 %v7247_v61, %v5953_v12  ;;  %v5965_v15 = vmul.f32 %v9091_v24, %v5949_v60  ;;  %v5950_v10 = vperm.slane %v7251_v30, 4  ;;  %v5968_v24 = vmul.f32 %v9098_v16, %v5952_v13 }
0x4291   :  { %v5971_v25 = vpack.c.bf16 %v5963_v21, %v5963_v21  ;;  %v5970_v23 = vpack.c.bf16 %v5962_v20, %v5962_v20  ;;  %v5975_v48 = vpack.c.bf16 %v5967_v9, %v5967_v9  ;;  %v5972_v7 = vpack.c.bf16 %v5964_v50, %v5964_v50 }
0x4292   :  { %v5977_v57 = vpack.c.bf16 %v5969_v41, %v5969_v41  ;;  %v5973_v17 = vpack.c.bf16 %v5965_v15, %v5965_v15  ;;  %v5966_v63 = vmul.f32 %v9095_v4, %v5950_v10  ;;  %v5976_v44 = vpack.c.bf16 %v5968_v24, %v5968_v24 }
0x4293   :  { %v6004_v43 = vunpack.c.l.b16 %v5971_v25  ;;  %v5979_v38 = vunpack.c.l.b16 %v5970_v23  ;;  %v6104_v46 = vunpack.c.l.b16 %v5975_v48  ;;  %v6029_v62 = vunpack.c.l.b16 %v5972_v7 }
0x4294   :  { %v6154_v45 = vunpack.c.l.b16 %v5977_v57  ;;  %v6054_v55 = vunpack.c.l.b16 %v5973_v17  ;;  %v5974_v58 = vpack.c.bf16 %v5966_v63, %v5966_v63  ;;  %v6129_v14 = vunpack.c.l.b16 %v5976_v44 }
0x4295   :  { %v6823_v0 = vunpack.i.l.s16 %v6004_v43  ;;  %v6821_v59 = vunpack.i.l.s16 %v5979_v38  ;;  %v6831_v39 = vunpack.i.l.s16 %v6104_v46  ;;  %v6825_v2 = vunpack.i.l.s16 %v6029_v62 }
0x4296   :  { %v6835_v36 = vunpack.i.l.s16 %v6154_v45  ;;  %v6827_v1 = vunpack.i.l.s16 %v6054_v55  ;;  %v6079_v61 = vunpack.c.l.b16 %v5974_v58  ;;  %v6833_v47 = vunpack.i.l.s16 %v6129_v14 }
0x4297   :  { %6008 = vperm.xlu2 %7217, %v6823_v0   ;;  %5983 = vperm.xlu1 %7216, %v6821_v59  }
0x4298   :  { %v6829_v3 = vunpack.i.l.s16 %v6079_v61 }
0x429f   :  { %6108 = vperm.xlu2 %7217, %v6831_v39   ;;  %6033 = vperm.xlu1 %7216, %v6825_v2  }
0x42a7   :  { %6158 = vperm.xlu2 %7217, %v6835_v36   ;;  %6058 = vperm.xlu1 %7216, %v6827_v1  }
0x42af   :  { %6083 = vperm.xlu1 %7216, %v6829_v3  }
0x42b7   :  { %6133 = vperm.xlu1 %7216, %v6833_v47  }
0x42f1   :  { %v6009_v21 = vpop.permute.xlu2 %6008 }
0x42f2   :  { %v6010_v20 = vperm.slane %v6009_v21, %v7811_v26 }
0x42f4   :  { %v6011_v25 = vpack.c.b16 %v6010_v20, %v6010_v20 }
0x42f6   :  { %6824 = vmatmul.msk.bf16.vlgmr.msra.gmra.mxu3 %vm576_vm9, %v6011_v25 }
0x42f7   :  { %6147 = vmatpush.bf16.msra.mxu3 %v7897_v35 }
0x4309   :  { %v5984_v4 = vpop.permute.xlu1 %5983 }
0x430a   :  { %v5985_v30 = vperm.slane %v5984_v4, %v7811_v26 }
0x430c   :  { %v5986_v23 = vpack.c.b16 %v5985_v30, %v5985_v30 }
0x430e   :  { %6822 = vmatmul.msk.bf16.vlgmr.msra.gmra.mxu2 %vm576_vm9, %v5986_v23 }
0x430f   :  { %6122 = vmatpush.bf16.msra.mxu2 %v7894_v18  ;;  %v6109_v18 = vpop.permute.xlu2 %6108 }
0x4310   :  { %v6110_v59 = vperm.slane %v6109_v18, %v7811_v26 }
0x4311   :  { %v6034_v16 = vpop.permute.xlu1 %6033 }
0x4312   :  { %v6035_v9 = vperm.slane %v6034_v16, %v7811_v26  ;;  %v6111_v48 = vpack.c.b16 %v6110_v59, %v6110_v59 }
0x4314   :  { %v6036_v38 = vpack.c.b16 %v6035_v9, %v6035_v9 }
0x4317   :  { %v6159_v7 = vpop.permute.xlu2 %6158 }
0x4319   :  { %v6059_v50 = vpop.permute.xlu1 %6058 }
0x431a   :  { %v6060_v43 = vperm.slane %v6059_v50, %v7811_v26 }
0x431c   :  { %v6061_v12 = vpack.c.b16 %v6060_v43, %v6060_v43 }
0x431e   :  { %6826 = vmatmul.msk.bf16.vlgmr.msrb.gmra.mxu2 %vm576_vm9, %v6036_v38  ;;  %6828 = vmatmul.msk.bf16.vlgmr.msrb.gmra.mxu3 %vm576_vm9, %v6061_v12 }
0x431f   :  { %6232 = vmatpush.bf16.msrb.mxu2 %v7931_v32  ;;  %6250 = vmatpush.bf16.msrb.mxu3 %v7925_v34 }
0x4321   :  { %v6084_v35 = vpop.permute.xlu1 %6083 }
0x4322   :  { %v6085_v60 = vperm.slane %v6084_v35, %v7811_v26 }
0x4323   :  { %6233 = vmatpush.bf16.msrb.mxu2 %v7945_v6  ;;  %6251 = vmatpush.bf16.msrb.mxu3 %v7928_v27 }
0x4324   :  { %v6086_v0 = vpack.c.b16 %v6085_v60, %v6085_v60 }
0x4326   :  { %6830 = vmatmul.msk.bf16.vlgmr.msrb.gmra.mxu0 %vm576_vm9, %v6086_v0 }
0x4327   :  { %6264 = vmatpush.bf16.msrb.mxu0 %v7901_v37  ;;  %6234 = vmatpush.bf16.msrb.mxu2 %v7956_v11  ;;  %v6160_v37 = vperm.slane %v6159_v7, %v7811_v26 }
0x4329   :  { %v6134_v32 = vpop.permute.xlu1 %6133 }
0x432a   :  { %v6135_v34 = vperm.slane %v6134_v32, %v7811_v26 }
0x432b   :  { %6265 = vmatpush.bf16.msrb.mxu0 %v7913_v42  ;;  %6235 = vmatpush.bf16.msrb.mxu2 %v7965_v28  ;;  %v6161_v42 = vpack.c.b16 %v6160_v37, %v6160_v37 }
0x432c   :  { %v6136_v6 = vpack.c.b16 %v6135_v34, %v6135_v34 }
0x432e   :  { %6832 = vmatmul.msk.bf16.vlgmr.msra.gmra.mxu2 %vm576_vm9, %v6111_v48  ;;  %6834 = vmatmul.msk.bf16.vlgmr.msra.gmra.mxu3 %vm576_vm9, %v6136_v6 }
0x432f   :  { %6315 = vmatpush.bf16.msra.mxu2 %v7936_v33  ;;  %6336 = vmatpush.bf16.msra.mxu3 %v7996_v51 }
0x4333   :  { %6316 = vmatpush.bf16.msra.mxu2 %v7950_v8  ;;  %6337 = vmatpush.bf16.msra.mxu3 %v8002_v56  ;;  %v5693_v8 = vld [vmem:[#allocation2] sm:$0xff] }
0x4334   :  { %v5694_v28 = vpack.c.bf16 %v5693_v8, %v5693_v8 }
0x4336   :  { %6836 = vmatmul.msk.bf16.vlgmr.msra.gmra.mxu0 %vm576_vm9, %v6161_v42 }
0x4337   :  { %6317 = vmatpush.bf16.msra.mxu2 %v7961_v22  ;;  %6349 = vmatpush.bf16.msra.mxu0 %v7994_v49 }
0x433b   :  { %6318 = vmatpush.bf16.msra.mxu2 %v7970_v29  ;;  %6350 = vmatpush.bf16.msra.mxu0 %v7999_v53 }
0x433e   :  { %6838 = vmatmul.msk.bf16.vlgmr.msrb.gmra.mxu3 %vm399_vm0, %v5694_v28 }
0x4346   :  { %6839 = vmatmul.msk.bf16.vlgmr.msrb.gmra.mxu0 %vm399_vm0, %v9014_v54 }
0x4356   :  { %6843 = vmatmul.msk.bf16.vlgmr.msra.gmra.mxu0 %vm399_vm0, %v5694_v28 }
0x4379   :  { %v6024_v27 = vpop.f32.mrf.mxu3 }
0x437a   :  { %v6187_v29 = vpack.c.bf16 %v6024_v27, %v6024_v27 }
0x437c   :  { %v6203_v15 = vunpack.c.l.b16 %v6187_v29 }
0x437e   :  { %v6210_v45 = vrot.slane %v6203_v15, 7  ;;  %v9335_v15 = vld [vmem:[#allocation41_spill] sm:$0xff] }
0x4381   :  { %v6026_v26 = vpop.f32.mrf.mxu3 }
0x4391   :  { %v5999_v33 = vpop.f32.mrf.mxu2 }
0x4392   :  { %v6186_v46 = vpack.c.bf16 %v5999_v33, %v5999_v33 }
0x4394   :  { %v6202_v2 = vunpack.c.l.b16 %v6186_v46 }
0x4396   :  { %v6211_v63 = vsel %vm561_vm2, %v6210_v45, %v6202_v2 }
0x4399   :  { %v6001_v11 = vpop.f32.mrf.mxu2 }
0x43a1   :  { %v6049_v22 = vpop.f32.mrf.mxu2  ;;  %v6074_v51 = vpop.f32.mrf.mxu3 }
0x43a2   :  { %v6188_v56 = vpack.c.bf16 %v6049_v22, %v6049_v22  ;;  %v6189_v53 = vpack.c.bf16 %v6074_v51, %v6074_v51 }
0x43a3   :  { %v6099_v49 = vpop.f32.mrf.mxu0 }
0x43a4   :  { %v6204_v62 = vunpack.c.l.b16 %v6188_v56  ;;  %v6190_v10 = vpack.c.bf16 %v6099_v49, %v6099_v49  ;;  %v6205_v57 = vunpack.c.l.b16 %v6189_v53 }
0x43a6   :  { %v6212_v17 = vrot.slane %v6204_v62, 6  ;;  %v6206_v55 = vunpack.c.l.b16 %v6190_v10  ;;  %v6214_v36 = vrot.slane %v6205_v57, 5 }
0x43a8   :  { %v6213_v1 = vsel %vm563_vm3, %v6212_v17, %v6211_v63  ;;  %v6216_v3 = vrot.slane %v6206_v55, 4 }
0x43a9   :  { %v6051_v41 = vpop.f32.mrf.mxu2  ;;  %v6076_v54 = vpop.f32.mrf.mxu3  ;;  %v6215_v14 = vsel %vm565_vm4, %v6214_v36, %v6213_v1  ;;  %v9336_v1 = vld [vmem:[#allocation44_spill] sm:$0xff] }
0x43aa   :  { %v6217_v23 = vsel %vm567_vm5, %v6216_v3, %v6215_v14  ;;  %v9334_v54 = vld [vmem:[#allocation40_spill] sm:$0xff] }
0x43ab   :  { %v6101_v39 = vpop.f32.mrf.mxu0 }
0x43b1   :  { %v6124_v58 = vpop.f32.mrf.mxu2  ;;  %v6149_v13 = vpop.f32.mrf.mxu3 }
0x43b2   :  { %v6191_v61 = vpack.c.bf16 %v6124_v58, %v6124_v58  ;;  %v6192_v24 = vpack.c.bf16 %v6149_v13, %v6149_v13  ;;  %v9337_v58 = vld [vmem:[#allocation42_spill] sm:$0xff] }
0x43b3   :  { %v6174_v44 = vpop.f32.mrf.mxu0 }
0x43b4   :  { %v6207_v47 = vunpack.c.l.b16 %v6191_v61  ;;  %v6208_v21 = vunpack.c.l.b16 %v6192_v24  ;;  %v6193_v20 = vpack.c.bf16 %v6174_v44, %v6174_v44  ;;  %v9338_v44 = vld [vmem:[#allocation39_spill] sm:$0xff] }
0x43b6   :  { %v6218_v25 = vrot.slane %v6207_v47, 3  ;;  %v6220_v4 = vrot.slane %v6208_v21, 2  ;;  %v6209_v30 = vunpack.c.l.b16 %v6193_v20 }
0x43b8   :  { %v6219_v16 = vsel %vm569_vm6, %v6218_v25, %v6217_v23  ;;  %v6222_v9 = vrot.slane %v6209_v30, 1  ;;  %vm6384_vm6 = vcmask 785408  }
0x43b9   :  { %v6221_v50 = vsel %vm571_vm7, %v6220_v4, %v6219_v16  ;;  %v6126_v43 = vpop.f32.mrf.mxu2  ;;  %v6151_v38 = vpop.f32.mrf.mxu3 }
0x43ba   :  { %v6223_v12 = vsel %vm573_vm8, %v6222_v9, %v6221_v50  ;;  %v9339_v9 = vld [vmem:[#allocation43_spill] sm:$0xff] }
0x43bb   :  { %v6224_v35 = vpack.c.b16 %v6223_v12, %v6223_v12  ;;  %v6176_v60 = vpop.f32.mrf.mxu0 }
0x43bd   :  { %6837 = vmatmul.msk.bf16.vlgmr.msrb.gmra.mxu2 %vm327_vm1, %v6224_v35 }
0x43c1   :  { %v6253_v32 = vpop.f32.mrf.mxu3 }
0x43c3   :  { %v6267_v18 = vpop.f32.mrf.mxu0 }
0x43c4   :  { %v6268_v0 = vadd.f32 %v7972_v31, %v6267_v18 }
0x43c6   :  { %6292 = vrot.lane.b32.xlu1 %v6268_v0, %s7552_s5 }
0x43c9   :  { %v6255_v34 = vpop.f32.mrf.mxu3 }
0x43cb   :  { %v6269_v59 = vpop.f32.mrf.mxu0 }
0x43cd   :  { %6841 = vmatmul.msk.bf16.vlgmr.msra.gmra.mxu2 %vm327_vm1, %v6224_v35 }
0x43d3   :  { %v6352_v13 = vpop.f32.mrf.mxu0 }
0x43db   :  { %v6354_v61 = vpop.f32.mrf.mxu0 }
0x4438   :  { %v6293_v46 = vpop.permute.xlu1 %6292 }
0x4440   :  { %v6237_v48 = vpop.f32.mrf.mxu2 }
0x4441   :  { %v6254_v6 = vadd.f32 %v6253_v32, %v6237_v48 }
0x4443   :  { %v6257_v7 = vadd.f32 %v7989_v52, %v6254_v6 }
0x4445   :  { %v6271_v37 = vadd.f32 %v6268_v0, %v6257_v7 }
0x4447   :  { %v6840_v42 = vmul.f32 -1.442695, %v6271_v37 }
0x4448   :  { %v6239_v27 = vpop.f32.mrf.mxu2 }
0x4449   :  { %7252 = vpow2.f32 %v6840_v42 }
0x444f   :  { %v7253_v26 = vpop.eup %7252 }
0x4450   :  { %v6275_v33 = vadd.f32 1.0, %v7253_v26  ;;  %v6320_v8 = vpop.f32.mrf.mxu2 }
0x4452   :  { %7254 = vrcp.f32 %v6275_v33  ;;  %v6287_v51 = vand.u32 2147483648, %v6275_v33  ;;  %v6285_v56 = vand.u32 2147483647, %v6275_v33  ;;  %vm6281_vm3 = vweird.f32 %v6275_v33 }
0x4454   :  { %v6288_v52 = vor.u32 1.1754944e-38, %v6287_v51  ;;  %vm6286_vm5 = vcmp.eq.f32.partialorder %v6285_v56, 8.507059e+37 }
0x4458   :  { %v7255_v31 = vpop.eup %7254  ;;  %v6322_v11 = vpop.f32.mrf.mxu2 }
0x4459   :  { %v6277_v28 = vmul.f32 %v7255_v31, %v6275_v33  ;;  %vm6282_vm2 = vweird.f32 %v7255_v31 }
0x445a   :  { %vm6283_vm4 = vmor %vm6281_vm3, %vm6282_vm2 }
0x445b   :  { %v6278_v22 = vsub.f32 1.0, %v6277_v28 }
0x445d   :  { %v6279_v49 = vmul.f32 %v7255_v31, %v6278_v22 }
0x445f   :  { %v6280_v29 = vadd.f32 %v7255_v31, %v6279_v49 }
0x4461   :  { %v6284_v53 = vsel %vm6283_vm4, %v7255_v31, %v6280_v29 }
0x4462   :  { %v6289_v62 = vsel %vm6286_vm5, %v6288_v52, %v6284_v53 }
0x4463   :  { %v6295_v41 = vmul.f32 %v6293_v46, %v6289_v62  ;;  %v6302_v57 = vsub.f32 1.0, %v6289_v62  ;;  %v6308_v55 = vmul.f32 %v6289_v62, %v9009_v5 }
0x4465   :  { %6297 = vrot.lane.b32.xlu2 %v6295_v41, %s7552_s5 }
0x446d   :  { %6359 = vrot.lane.b32.xlu2 %v9334_v54, %s7564_s13 }
0x4475   :  { %6363 = vrot.lane.b32.xlu2 %v9335_v15, %s7552_s5 }
0x44bf   :  { %v6298_v10 = vpop.permute.xlu2 %6297 }
0x44c0   :  { %v6300_v39 = vadd.f32 %v6298_v10, %v6257_v7 }
0x44c2   :  { %7256 = vtanh.f32 %v6300_v39 }
0x44c8   :  { %v7257_v2 = vpop.eup %7256 }
0x44c9   :  { %6304 = vrot.lane.b32.xlu0 %v7257_v2, %s7565_s8 }
0x44d1   :  { %6375 = vrot.lane.b32.xlu0 %v9019_v19, %s7552_s5  ;;  %v6360_v19 = vpop.permute.xlu2 %6359  ;;  %s7573_s5 = smov [#allocation22]  }
0x44d2   :  { %v6382_v5 = vsel %vm399_vm0, %v9338_v44, %v6360_v19 }
0x44d9   :  { %v6364_v14 = vpop.permute.xlu2 %6363 }
0x44da   :  { %v6383_v21 = vsel %vm327_vm1, %v6382_v5, %v6364_v14 }
0x453b   :  { %v6305_v17 = vpop.permute.xlu0 %6304 }
0x453c   :  { %v6307_v45 = vmul.f32 %v6305_v17, %v6302_v57 }
0x453e   :  { %v6309_v63 = vadd.f32 %v6308_v55, %v6307_v45 }
0x4540   :  { %v6310_v36 = vpack.c.bf16 %v6309_v63, %v6309_v63 }
0x4542   :  { %6325 = vrot.lane.b32.xlu1 %v6310_v36, %s7565_s8 }
0x4543   :  { %v6376_v43 = vpop.permute.xlu0 %6375 }
0x454a   :  { %6371 = vrot.lane.b32.xlu1 %v9336_v1, %s7564_s13  ;;  %s6396_s13 = sshll.u32 %s7573_s5, 4  ;;  %s6397_s13 = int_to_ptr.vmem [resolvable:$true] %s6396_s13 }
0x4552   :  { %6367 = vrot.lane.b32.xlu1 %v9337_v58, %s7565_s8 }
0x45b4   :  { %v6326_v24 = vpop.permute.xlu1 %6325 }
0x45b5   :  { %6842 = vmatmul.msk.bf16.vlgmr.msra.gmra.mxu3 %vm399_vm0, %v6326_v24 }
0x45bc   :  { %v6372_v3 = vpop.permute.xlu1 %6371 }
0x45bd   :  { %v6386_v50 = vsel %vm399_vm0, %v9339_v9, %v6372_v3 }
0x45be   :  { %v6387_v38 = vsel %vm327_vm1, %v6386_v50, %v6376_v43 }
0x45c4   :  { %v6368_v47 = vpop.permute.xlu1 %6367 }
0x45c5   :  { %v6385_v20 = vsel %vm6384_vm6, %v6383_v21, %v6368_v47 }
0x45c6   :  { %6389 = vst [vmem:[#allocation22] sm:$0xff] %v6385_v20 }
0x4638   :  { %v6339_v25 = vpop.f32.mrf.mxu3 }
0x4639   :  { %v6340_v4 = vadd.f32 %v6339_v25, %v6320_v8 }
0x463b   :  { %v6356_v30 = vadd.f32 %v6352_v13, %v6340_v4 }
0x463d   :  { %v6357_v23 = vadd.f32 %v8020_v40, %v6356_v30 }
0x463f   :  { %6379 = vrot.lane.b32.xlu2 %v6357_v23, %s7565_s8 }
0x4640   :  { %v6341_v16 = vpop.f32.mrf.mxu3 }
0x4699   :  { %v6380_v12 = vpop.permute.xlu2 %6379 }
0x469a   :  { %v6388_v40 = vsel %vm6384_vm6, %v6387_v38, %v6380_v12 }
0x469b   :  { %6390 = vst [vmem:[#allocation22 + $0x8] sm:$0xff] %v6388_v40 }
0x469c   :  { %6401 = dma.vmem_to_hbm [thread:$0]  %s6397_s13, 256, %s6399_s1, [#allocation5]  }
0x469d   :  { %7548 = dma.done.wait [#allocation5], 256  }
0x469e   :  { %7549 = vsyncadd [#allocation5], 4294967040 }
0x469f   :  { %6406 = vsyncpa [#allocation4], 1 }
0x46a0   :  { %6407 = vsyncpa [#allocation9], 1 }
0x46a1   :  { %6408 = vsyncpa [#allocation12], 1 }
0x46a2   :  { %6409 = vsyncpa [#allocation15], 1 }
0x46a3   :  { %6410 = vsyncpa [#allocation18], 1 }
0x46a4   :  { %6411 = vsyncpa [#allocation21], 1 }
0x46a5   :  { %6412 = vsyncpa [#allocation5], 1 }
0x46a6   :  { %6413 = vsyncpa [#allocation6], 1 }

</bundles_post_ra>
